<compile_context>
chip_gen: v6e
topology: v6e:2x2x1
jax: 0.10.0
libtpu: 0.0.40
codegen_flags: <defaults>
</compile_context>

<pallas_src>
import jax
import jax.numpy as jnp
from jax.experimental import pallas as pl
from jax.experimental.pallas import tpu as pltpu


N_CLASSES = 10
N_OUT_PAD = 128      # lane-dense padded logit width (unmasked vst)
TILE_B = 512         # MXU-friendly batch tile (multiple of 128 and 256)


def mlp_kernel(x_ref, w1_ref, b1_ref, w2_ref, b2_ref, w3_ref, b3_ref, o_ref):
    # x tile arrives already in bf16 (cast fused with the pad in the wrapper).
    x = x_ref[...]                                             # (TILE_B, 784) bf16

    # Linear(784, 512) + ReLU; f32 accumulation, bf16 activation out.
    h1 = jnp.dot(x, w1_ref[...], preferred_element_type=jnp.float32)
    h1 = jnp.maximum(h1 + b1_ref[...], 0.0).astype(jnp.bfloat16)   # (TILE_B, 512)

    # Linear(512, 512) + ReLU
    h2 = jnp.dot(h1, w2_ref[...], preferred_element_type=jnp.float32)
    h2 = jnp.maximum(h2 + b2_ref[...], 0.0).astype(jnp.bfloat16)   # (TILE_B, 512)

    # Linear(512, 10) computed on a lane-dense 128-wide tile.
    # Padded columns: w3 cols are 0 and b3 entries are -1e30, so after the
    # stable log_softmax they contribute exp(~-1e30) == 0 to the sum.
    logits = jnp.dot(h2, w3_ref[...], preferred_element_type=jnp.float32)
    logits = logits + b3_ref[...]                               # (TILE_B, 128) f32

    # Numerically stable log_softmax along the last axis.
    m = jnp.max(logits, axis=-1, keepdims=True)
    shifted = logits - m
    lse = jnp.log(jnp.sum(jnp.exp(shifted), axis=-1, keepdims=True))
    o_ref[...] = shifted - lse


def mlp_forward(x_nchw, params, *, tile_b=TILE_B, core_parallel=False):
    """x_nchw: (B, 1, 28, 28) float -> (B, 10) f32 log-probabilities."""
    w1, b1, w2, b2, w3, b3 = params
    B = x_nchw.shape[0]
    # bf16 x: the cast fuses with the reshape/pad that already rewrites x,
    # halving the dominant x-tile HBM read (v6e is read-bound on this).
    x = x_nchw.reshape(B, -1).astype(jnp.bfloat16)              # (B, 784)
    K = x.shape[1]

    # Pad the batch up to a full MXU-friendly tile.
    n_tiles = pl.cdiv(B, tile_b)
    b_pad = n_tiles * tile_b
    if b_pad != B:
        x = jnp.pad(x, ((0, b_pad - B), (0, 0)))

    # bf16 weights (f32 accumulation in-kernel); biases stay f32.
    w1b = w1.astype(jnp.bfloat16)
    w2b = w2.astype(jnp.bfloat16)
    # Lane-dense final layer: pad 10 -> 128 output columns.
    w3p = (jnp.zeros((w3.shape[0], N_OUT_PAD), jnp.float32)
           .at[:, :N_CLASSES].set(w3)).astype(jnp.bfloat16)
    b3p = (jnp.full((1, N_OUT_PAD), -1e30, jnp.float32)
           .at[:, :N_CLASSES].set(b3.reshape(1, -1)))

    h1_dim = w1.shape[1]
    h2_dim = w2.shape[1]

    # Resident (constant index_map) inputs: single-buffer them — double
    # buffering a tile that never changes only wastes VMEM.
    resident = dict(pipeline_mode=pl.Buffered(1))

    # Advisory cost estimate so XLA schedules the surrounding pad/cast/slice
    # sensibly around the custom call.
    flops = 2 * b_pad * (K * h1_dim + h1_dim * h2_dim + h2_dim * N_OUT_PAD)
    transcendentals = b_pad * (N_OUT_PAD + 1)                   # exp per lane + log per row
    bytes_accessed = (b_pad * K * 2                             # x (bf16)
                      + K * h1_dim * 2 + h1_dim * 4             # w1 (bf16) + b1 (f32)
                      + h1_dim * h2_dim * 2 + h2_dim * 4        # w2 + b2
                      + h2_dim * N_OUT_PAD * 2 + N_OUT_PAD * 4  # w3 + b3
                      + b_pad * N_OUT_PAD * 4)                  # output (f32)
    cost = pl.CostEstimate(flops=flops, transcendentals=transcendentals,
                           bytes_accessed=bytes_accessed)

    # v7x: opt into an explicit cross-TensorCore split of the batch axis when
    # the grid is large enough; default "parallel" is safe on all generations
    # (and the test grid below has a single tile, which cannot be core-split).
    dim_sem = (pltpu.CORE_PARALLEL,) if core_parallel else ("parallel",)

    out = pl.pallas_call(
        mlp_kernel,
        out_shape=jax.ShapeDtypeStruct((b_pad, N_OUT_PAD), jnp.float32),
        grid=(n_tiles,),
        in_specs=[
            pl.BlockSpec((tile_b, K), lambda i: (i, 0)),                     # x tile
            pl.BlockSpec((K, h1_dim), lambda i: (0, 0), **resident),         # w1
            pl.BlockSpec((1, h1_dim), lambda i: (0, 0), **resident),         # b1
            pl.BlockSpec((h1_dim, h2_dim), lambda i: (0, 0), **resident),    # w2
            pl.BlockSpec((1, h2_dim), lambda i: (0, 0), **resident),         # b2
            pl.BlockSpec((h2_dim, N_OUT_PAD), lambda i: (0, 0), **resident), # w3
            pl.BlockSpec((1, N_OUT_PAD), lambda i: (0, 0), **resident),      # b3
        ],
        out_specs=pl.BlockSpec((tile_b, N_OUT_PAD), lambda i: (i, 0)),
        compiler_params=pltpu.CompilerParams(dimension_semantics=dim_sem),
        cost_estimate=cost,
    )(x, w1b, b1, w2b, b2, w3p, b3p)

    return out[:B, :N_CLASSES]


def init_params(key):
    """Deterministic init mimicking PyTorch Linear default (U[-1/sqrt(fan_in), +])."""
    def linear(key, fan_in, fan_out):
        kw, kb = jax.random.split(key)
        bound = 1.0 / jnp.sqrt(fan_in)
        # stored as (in, out) so the kernel does x @ W
        w = jax.random.uniform(kw, (fan_in, fan_out), jnp.float32, -bound, bound)
        b = jax.random.uniform(kb, (1, fan_out), jnp.float32, -bound, bound)
        return w, b

    k1, k2, k3 = jax.random.split(key, 3)
    w1, b1 = linear(k1, 28 * 28, 512)
    w2, b2 = linear(k2, 512, 512)
    w3, b3 = linear(k3, 512, 10)
    return (w1, b1, w2, b2, w3, b3)


def reference_forward(x_nchw, params):
    """Pure-JAX f32 reference for a sanity check."""
    w1, b1, w2, b2, w3, b3 = params
    x = x_nchw.reshape(x_nchw.shape[0], -1).astype(jnp.float32)
    h1 = jnp.maximum(x @ w1 + b1, 0.0)
    h2 = jnp.maximum(h1 @ w2 + b2, 0.0)
    logits = h2 @ w3 + b3
    return jax.nn.log_softmax(logits, axis=-1)


if __name__ == "__main__":
    key = jax.random.PRNGKey(0)
    kx, kp = jax.random.split(key)

    batch = 2
    x = jax.random.normal(kx, (batch, 1, 28, 28), dtype=jnp.float32)
    params = init_params(kp)

    out = mlp_forward(x, params)
    out = jax.block_until_ready(out)

    ref = reference_forward(x, params)
    assert out.shape == (batch, 10)
    # bf16 MXU inputs with f32 accumulation -> relaxed tolerance vs f32 reference.
    assert jnp.allclose(out, ref, atol=3e-2, rtol=3e-2), "mismatch vs reference"

    print("KERNEL_OK")
</pallas_src>

<mosaic_0001>
module attributes {stable_mosaic.version = 11 : i64} {
  func.func @mlp_kernel(%arg0: i32, %arg1: memref<512x784xbf16, #tpu.memory_space<vmem>>, %arg2: memref<784x512xbf16, #tpu.memory_space<vmem>>, %arg3: memref<1x512xf32, #tpu.memory_space<vmem>>, %arg4: memref<512x512xbf16, #tpu.memory_space<vmem>>, %arg5: memref<1x512xf32, #tpu.memory_space<vmem>>, %arg6: memref<512x128xbf16, #tpu.memory_space<vmem>>, %arg7: memref<1x128xf32, #tpu.memory_space<vmem>>, %arg8: memref<512x128xf32, #tpu.memory_space<vmem>>) attributes {dimension_semantics = [#tpu.dimension_semantics<parallel>], iteration_bounds = array<i64: 1>, scalar_prefetch = 0 : i64, scratch_operands = 0 : i64, tpu.core_type = #tpu.core_type<tc>, window_params = [{transform_indices = @transform_0, window_bounds = array<i64: 512, 784>}, {pipeline_mode = #tpu.pipeline_mode<synchronous>, transform_indices = @transform_1, window_bounds = array<i64: 784, 512>}, {pipeline_mode = #tpu.pipeline_mode<synchronous>, transform_indices = @transform_2, window_bounds = array<i64: 1, 512>}, {pipeline_mode = #tpu.pipeline_mode<synchronous>, transform_indices = @transform_3, window_bounds = array<i64: 512, 512>}, {pipeline_mode = #tpu.pipeline_mode<synchronous>, transform_indices = @transform_4, window_bounds = array<i64: 1, 512>}, {pipeline_mode = #tpu.pipeline_mode<synchronous>, transform_indices = @transform_5, window_bounds = array<i64: 512, 128>}, {pipeline_mode = #tpu.pipeline_mode<synchronous>, transform_indices = @transform_6, window_bounds = array<i64: 1, 128>}, {transform_indices = @transform_7, window_bounds = array<i64: 512, 128>}]} {
    %c0 = arith.constant 0 : index
    %c0_0 = arith.constant 0 : index
    %0 = vector.load %arg1[%c0, %c0_0] : memref<512x784xbf16, #tpu.memory_space<vmem>>, vector<512x784xbf16>
    %c0_1 = arith.constant 0 : index
    %c0_2 = arith.constant 0 : index
    %1 = vector.load %arg2[%c0_1, %c0_2] : memref<784x512xbf16, #tpu.memory_space<vmem>>, vector<784x512xbf16>
    %cst = arith.constant dense<0.000000e+00> : vector<512x512xf32>
    %2 = tpu.matmul %0, %1, %cst {dimension_numbers = #tpu.dot_dimension_numbers<[1], [0], [0], [1], [0, 0, 1, 1], [], []>} : vector<512x784xbf16>, vector<784x512xbf16>, vector<512x512xf32> -> vector<512x512xf32>
    %c0_3 = arith.constant 0 : index
    %c0_4 = arith.constant 0 : index
    %3 = vector.load %arg3[%c0_3, %c0_4] : memref<1x512xf32, #tpu.memory_space<vmem>>, vector<1x512xf32>
    %4 = vector.broadcast %3 : vector<1x512xf32> to vector<512x512xf32>
    %5 = arith.addf %2, %4 : vector<512x512xf32>
    %cst_5 = arith.constant 0.000000e+00 : f32
    %6 = vector.broadcast %cst_5 : f32 to vector<512x512xf32>
    %7 = arith.maximumf %5, %6 : vector<512x512xf32>
    %8 = arith.truncf %7 : vector<512x512xf32> to vector<512x512xbf16>
    %c0_6 = arith.constant 0 : index
    %c0_7 = arith.constant 0 : index
    %9 = vector.load %arg4[%c0_6, %c0_7] : memref<512x512xbf16, #tpu.memory_space<vmem>>, vector<512x512xbf16>
    %cst_8 = arith.constant dense<0.000000e+00> : vector<512x512xf32>
    %10 = tpu.matmul %8, %9, %cst_8 {dimension_numbers = #tpu.dot_dimension_numbers<[1], [0], [0], [1], [0, 0, 1, 1], [], []>} : vector<512x512xbf16>, vector<512x512xbf16>, vector<512x512xf32> -> vector<512x512xf32>
    %c0_9 = arith.constant 0 : index
    %c0_10 = arith.constant 0 : index
    %11 = vector.load %arg5[%c0_9, %c0_10] : memref<1x512xf32, #tpu.memory_space<vmem>>, vector<1x512xf32>
    %12 = vector.broadcast %11 : vector<1x512xf32> to vector<512x512xf32>
    %13 = arith.addf %10, %12 : vector<512x512xf32>
    %cst_11 = arith.constant 0.000000e+00 : f32
    %14 = vector.broadcast %cst_11 : f32 to vector<512x512xf32>
    %15 = arith.maximumf %13, %14 : vector<512x512xf32>
    %16 = arith.truncf %15 : vector<512x512xf32> to vector<512x512xbf16>
    %c0_12 = arith.constant 0 : index
    %c0_13 = arith.constant 0 : index
    %17 = vector.load %arg6[%c0_12, %c0_13] : memref<512x128xbf16, #tpu.memory_space<vmem>>, vector<512x128xbf16>
    %cst_14 = arith.constant dense<0.000000e+00> : vector<512x128xf32>
    %18 = tpu.matmul %16, %17, %cst_14 {dimension_numbers = #tpu.dot_dimension_numbers<[1], [0], [0], [1], [0, 0, 1, 1], [], []>} : vector<512x512xbf16>, vector<512x128xbf16>, vector<512x128xf32> -> vector<512x128xf32>
    %c0_15 = arith.constant 0 : index
    %c0_16 = arith.constant 0 : index
    %19 = vector.load %arg7[%c0_15, %c0_16] : memref<1x128xf32, #tpu.memory_space<vmem>>, vector<1x128xf32>
    %20 = vector.broadcast %19 : vector<1x128xf32> to vector<512x128xf32>
    %21 = arith.addf %18, %20 : vector<512x128xf32>
    %cst_17 = arith.constant dense<0xFF800000> : vector<512xf32>
    %22 = vector.multi_reduction <maximumf>, %21, %cst_17 [1] : vector<512x128xf32> to vector<512xf32>
    %23 = vector.shape_cast %22 : vector<512xf32> to vector<512x1xf32>
    %24 = vector.broadcast %23 : vector<512x1xf32> to vector<512x128xf32>
    %25 = arith.subf %21, %24 : vector<512x128xf32>
    %26 = math.exp %25 : vector<512x128xf32>
    %cst_18 = arith.constant dense<0.000000e+00> : vector<512xf32>
    %27 = vector.multi_reduction <add>, %26, %cst_18 [1] : vector<512x128xf32> to vector<512xf32>
    %28 = vector.shape_cast %27 : vector<512xf32> to vector<512x1xf32>
    %29 = math.log %28 : vector<512x1xf32>
    %30 = vector.broadcast %29 : vector<512x1xf32> to vector<512x128xf32>
    %31 = arith.subf %25, %30 : vector<512x128xf32>
    %c0_19 = arith.constant 0 : index
    %c0_20 = arith.constant 0 : index
    %32 = vector.load %arg8[%c0_19, %c0_20] : memref<512x128xf32, #tpu.memory_space<vmem>>, vector<512x128xf32>
    tpu.vector_store %arg8[%c0_19, %c0_20], %31 {strides = array<i32>} : memref<512x128xf32, #tpu.memory_space<vmem>>, vector<512x128xf32>,
    return
  }
  func.func @transform_0(%arg0: i32) -> (i32, i32) {
    %c0_i32 = arith.constant 0 : i32
    %c0_i32_0 = arith.constant 0 : i32
    return %arg0, %c0_i32 : i32, i32
  }
  func.func @transform_1(%arg0: i32) -> (i32, i32) {
    %c0_i32 = arith.constant 0 : i32
    %c0_i32_0 = arith.constant 0 : i32
    %c0_i32_1 = arith.constant 0 : i32
    return %c0_i32, %c0_i32_0 : i32, i32
  }
  func.func @transform_2(%arg0: i32) -> (i32, i32) {
    %c0_i32 = arith.constant 0 : i32
    %c0_i32_0 = arith.constant 0 : i32
    %c0_i32_1 = arith.constant 0 : i32
    return %c0_i32, %c0_i32_0 : i32, i32
  }
  func.func @transform_3(%arg0: i32) -> (i32, i32) {
    %c0_i32 = arith.constant 0 : i32
    %c0_i32_0 = arith.constant 0 : i32
    %c0_i32_1 = arith.constant 0 : i32
    return %c0_i32, %c0_i32_0 : i32, i32
  }
  func.func @transform_4(%arg0: i32) -> (i32, i32) {
    %c0_i32 = arith.constant 0 : i32
    %c0_i32_0 = arith.constant 0 : i32
    %c0_i32_1 = arith.constant 0 : i32
    return %c0_i32, %c0_i32_0 : i32, i32
  }
  func.func @transform_5(%arg0: i32) -> (i32, i32) {
    %c0_i32 = arith.constant 0 : i32
    %c0_i32_0 = arith.constant 0 : i32
    %c0_i32_1 = arith.constant 0 : i32
    return %c0_i32, %c0_i32_0 : i32, i32
  }
  func.func @transform_6(%arg0: i32) -> (i32, i32) {
    %c0_i32 = arith.constant 0 : i32
    %c0_i32_0 = arith.constant 0 : i32
    %c0_i32_1 = arith.constant 0 : i32
    return %c0_i32, %c0_i32_0 : i32, i32
  }
  func.func @transform_7(%arg0: i32) -> (i32, i32) {
    %c0_i32 = arith.constant 0 : i32
    %c0_i32_0 = arith.constant 0 : i32
    return %arg0, %c0_i32 : i32, i32
  }
}

</mosaic_0001>

<bundles_post_ra>
// kernel: tpu_custom_call.1
= control target key start
LH: loop header
LB: loop body
LE: loop exit
PB: predicated region body
PF: predicated region fallthrough
CT: control target
= control target key end

     0   :  { %s18050_s0 = inlined_call_operand.vmem [shape: bf16[512,784], index: 0, kind: input, shape index: {}]   ;;  %s18051_s1 = inlined_call_operand.vmem [shape: bf16[784,512], index: 1, kind: input, shape index: {}]   ;;  %s18052_s2 = inlined_call_operand.vmem [shape: f32[1,512], index: 2, kind: input, shape index: {}]   ;;  %s18053_s3 = inlined_call_operand.vmem [shape: bf16[512,512], index: 3, kind: input, shape index: {}]   ;;  %s18054_s4 = inlined_call_operand.vmem [shape: f32[1,512], index: 4, kind: input, shape index: {}]   ;;  %s18055_s5 = inlined_call_operand.vmem [shape: bf16[512,128], index: 5, kind: input, shape index: {}]   ;;  %s18056_s6 = inlined_call_operand.vmem [shape: f32[1,128], index: 6, kind: input, shape index: {}]   ;;  %s18057_s7 = inlined_call_operand.hbm [shape: f32[512,128], index: 7, kind: output, shape index: {}]  }
   0x1   :  { %v10703_v0 = vld [vmem:[%s18051_s1 + $0xe4] ss:$16 sps:$4 sm:$0xff]   ;;  %v10707_v2 = vld [vmem:[%s18051_s1 + $0xe0] ss:$16 sps:$4 sm:$0xff]   ;;  %v10804_v51 = vld [vmem:[%s18050_s0 + $0xc] ss:$28 sps:$4 sm:$0xff]  }
   0x2   :  { %v10705_v1 = vld [vmem:[%s18051_s1 + $0x2e4] ss:$16 sps:$4 sm:$0xff]   ;;  %2699 = vmatprep.subr.bf16.mxu0 %v10703_v0  ;;  %v10708_v3 = vld [vmem:[%s18051_s1 + $0x2e0] ss:$16 sps:$4 sm:$0xff]   ;;  %3084 = vmatprep.mubr.bf16.mxu1 %v10804_v51 }
   0x3   :  { %3052 = vmatprep.subr.bf16.mxu1 %v10705_v1  ;;  %v10709_v4 = vld [vmem:[%s18051_s1 + $0xc4] ss:$16 sps:$4 sm:$0xff]   ;;  %2700 = vmatpush1.bf16.msra.mxu0 %v10707_v2  ;;  %v10713_v6 = vld [vmem:[%s18051_s1 + $0xc0] ss:$16 sps:$4 sm:$0xff]  }
   0x4   :  { %3053 = vmatpush1.bf16.msra.mxu1 %v10708_v3  ;;  %v10711_v5 = vld [vmem:[%s18051_s1 + $0x2c4] ss:$16 sps:$4 sm:$0xff]   ;;  %2701 = vmatprep.subr.bf16.mxu0 %v10709_v4  ;;  %v10714_v7 = vld [vmem:[%s18051_s1 + $0x2c0] ss:$16 sps:$4 sm:$0xff]  }
   0x5   :  { %3054 = vmatprep.subr.bf16.mxu1 %v10711_v5  ;;  %v10715_v8 = vld [vmem:[%s18051_s1 + $0xa4] ss:$16 sps:$4 sm:$0xff]   ;;  %v10719_v10 = vld [vmem:[%s18051_s1 + $0xa0] ss:$16 sps:$4 sm:$0xff]  }
   0x6   :  { %v10717_v9 = vld [vmem:[%s18051_s1 + $0x2a4] ss:$16 sps:$4 sm:$0xff]   ;;  %v10720_v11 = vld [vmem:[%s18051_s1 + $0x2a0] ss:$16 sps:$4 sm:$0xff]  }
   0x7   :  { %2702 = vmatpush1.bf16.msra.mxu0 %v10713_v6  ;;  %v10721_v12 = vld [vmem:[%s18051_s1 + $0x84] ss:$16 sps:$4 sm:$0xff]   ;;  %v10725_v14 = vld [vmem:[%s18051_s1 + $0x80] ss:$16 sps:$4 sm:$0xff]  }
   0x8   :  { %3055 = vmatpush1.bf16.msra.mxu1 %v10714_v7  ;;  %2703 = vmatprep.subr.bf16.mxu0 %v10715_v8  ;;  %v10723_v13 = vld [vmem:[%s18051_s1 + $0x284] ss:$16 sps:$4 sm:$0xff]   ;;  %v10726_v15 = vld [vmem:[%s18051_s1 + $0x280] ss:$16 sps:$4 sm:$0xff]   ;;  %v10811_v8 = vld [vmem:[%s18050_s0 + $0x3c] ss:$28 sps:$4 sm:$0xff]  }
   0x9   :  { %3056 = vmatprep.subr.bf16.mxu1 %v10717_v9  ;;  %v10727_v16 = vld [vmem:[%s18051_s1 + $0x64] ss:$16 sps:$4 sm:$0xff]   ;;  %v10731_v18 = vld [vmem:[%s18051_s1 + $0x60] ss:$16 sps:$4 sm:$0xff]  }
   0xa   :  { %v10729_v17 = vld [vmem:[%s18051_s1 + $0x264] ss:$16 sps:$4 sm:$0xff]   ;;  %v10732_v19 = vld [vmem:[%s18051_s1 + $0x260] ss:$16 sps:$4 sm:$0xff]  }
   0xb   :  { %2704 = vmatpush1.bf16.msra.mxu0 %v10719_v10  ;;  %v10733_v20 = vld [vmem:[%s18051_s1 + $0x44] ss:$16 sps:$4 sm:$0xff]   ;;  %v10737_v22 = vld [vmem:[%s18051_s1 + $0x40] ss:$16 sps:$4 sm:$0xff]  }
   0xc   :  { %3057 = vmatpush1.bf16.msra.mxu1 %v10720_v11  ;;  %2705 = vmatprep.subr.bf16.mxu0 %v10721_v12  ;;  %v10735_v21 = vld [vmem:[%s18051_s1 + $0x244] ss:$16 sps:$4 sm:$0xff]   ;;  %v10738_v23 = vld [vmem:[%s18051_s1 + $0x240] ss:$16 sps:$4 sm:$0xff]  }
   0xd   :  { %3058 = vmatprep.subr.bf16.mxu1 %v10723_v13  ;;  %v10739_v24 = vld [vmem:[%s18051_s1 + $0x24] ss:$16 sps:$4 sm:$0xff]   ;;  %v10743_v26 = vld [vmem:[%s18051_s1 + $0x20] ss:$16 sps:$4 sm:$0xff]  }
   0xe   :  { %v10741_v25 = vld [vmem:[%s18051_s1 + $0x224] ss:$16 sps:$4 sm:$0xff]   ;;  %v10744_v27 = vld [vmem:[%s18051_s1 + $0x220] ss:$16 sps:$4 sm:$0xff]  }
   0xf   :  { %2706 = vmatpush1.bf16.msra.mxu0 %v10725_v14  ;;  %v10745_v28 = vld [vmem:[%s18051_s1 + $0x4] ss:$16 sps:$4 sm:$0xff]   ;;  %v10749_v30 = vld [vmem:[%s18051_s1] ss:$16 sps:$4 sm:$0xff]  }
  0x10   :  { %3059 = vmatpush1.bf16.msra.mxu1 %v10726_v15  ;;  %2707 = vmatprep.subr.bf16.mxu0 %v10727_v16  ;;  %v10747_v29 = vld [vmem:[%s18051_s1 + $0x204] ss:$16 sps:$4 sm:$0xff]   ;;  %v10750_v31 = vld [vmem:[%s18051_s1 + $0x200] ss:$16 sps:$4 sm:$0xff]   ;;  %v10819_v16 = vld [vmem:[%s18050_s0 + $0x7c] ss:$28 sps:$4 sm:$0xff]  }
  0x11   :  { %3060 = vmatprep.subr.bf16.mxu1 %v10729_v17  ;;  %v10751_v32 = vld [vmem:[%s18051_s1 + $0x1e4] ss:$16 sps:$4 sm:$0xff]   ;;  %v10755_v34 = vld [vmem:[%s18051_s1 + $0x1e0] ss:$16 sps:$4 sm:$0xff]  }
  0x12   :  { %v10753_v33 = vld [vmem:[%s18051_s1 + $0x3e4] ss:$16 sps:$4 sm:$0xff]   ;;  %v10756_v35 = vld [vmem:[%s18051_s1 + $0x3e0] ss:$16 sps:$4 sm:$0xff]  }
  0x13   :  { %2708 = vmatpush1.bf16.msra.mxu0 %v10731_v18  ;;  %v10757_v36 = vld [vmem:[%s18051_s1 + $0x1c4] ss:$16 sps:$4 sm:$0xff]   ;;  %v10761_v38 = vld [vmem:[%s18051_s1 + $0x1c0] ss:$16 sps:$4 sm:$0xff]  }
  0x14   :  { %3061 = vmatpush1.bf16.msra.mxu1 %v10732_v19  ;;  %2709 = vmatprep.subr.bf16.mxu0 %v10733_v20  ;;  %v10759_v37 = vld [vmem:[%s18051_s1 + $0x3c4] ss:$16 sps:$4 sm:$0xff]   ;;  %v10762_v39 = vld [vmem:[%s18051_s1 + $0x3c0] ss:$16 sps:$4 sm:$0xff]  }
  0x15   :  { %3062 = vmatprep.subr.bf16.mxu1 %v10735_v21  ;;  %v10763_v40 = vld [vmem:[%s18051_s1 + $0x1a4] ss:$16 sps:$4 sm:$0xff]   ;;  %v10767_v42 = vld [vmem:[%s18051_s1 + $0x1a0] ss:$16 sps:$4 sm:$0xff]  }
  0x16   :  { %v10765_v41 = vld [vmem:[%s18051_s1 + $0x3a4] ss:$16 sps:$4 sm:$0xff]   ;;  %v10768_v43 = vld [vmem:[%s18051_s1 + $0x3a0] ss:$16 sps:$4 sm:$0xff]  }
  0x17   :  { %2710 = vmatpush1.bf16.msra.mxu0 %v10737_v22  ;;  %v10769_v44 = vld [vmem:[%s18051_s1 + $0x184] ss:$16 sps:$4 sm:$0xff]   ;;  %v10773_v46 = vld [vmem:[%s18051_s1 + $0x180] ss:$16 sps:$4 sm:$0xff]  }
  0x18   :  { %3063 = vmatpush1.bf16.msra.mxu1 %v10738_v23  ;;  %2711 = vmatprep.subr.bf16.mxu0 %v10739_v24  ;;  %v10771_v45 = vld [vmem:[%s18051_s1 + $0x384] ss:$16 sps:$4 sm:$0xff]   ;;  %v10774_v47 = vld [vmem:[%s18051_s1 + $0x380] ss:$16 sps:$4 sm:$0xff]   ;;  %v10826_v23 = vld [vmem:[%s18050_s0 + $0xac] ss:$28 sps:$4 sm:$0xff]  }
  0x19   :  { %3064 = vmatprep.subr.bf16.mxu1 %v10741_v25  ;;  %v10775_v48 = vld [vmem:[%s18051_s1 + $0x164] ss:$16 sps:$4 sm:$0xff]   ;;  %v10779_v52 = vld [vmem:[%s18051_s1 + $0x160] ss:$16 sps:$4 sm:$0xff]  }
  0x1a   :  { %v10801_v49 = vld [vmem:[%s18050_s0 + $0x4] ss:$28 sps:$4 sm:$0xff]   ;;  %v10815_v13 = vld [vmem:[%s18050_s0 + $0x38] ss:$28 sps:$4 sm:$0xff]   ;;  %v10821_v21 = vld [vmem:[%s18050_s0 + $0x70] ss:$28 sps:$4 sm:$0xff]  }
  0x1b   :  { %2712 = vmatpush1.bf16.msra.mxu0 %v10743_v26  ;;  %v10777_v50 = vld [vmem:[%s18051_s1 + $0x364] ss:$16 sps:$4 sm:$0xff]   ;;  %2731 = vmatprep.mubr.bf16.mxu0 %v10801_v49  ;;  %v10780_v53 = vld [vmem:[%s18051_s1 + $0x360] ss:$16 sps:$4 sm:$0xff]  }
  0x1c   :  { %3065 = vmatpush1.bf16.msra.mxu1 %v10744_v27  ;;  %2713 = vmatprep.subr.bf16.mxu0 %v10745_v28  ;;  %v10781_v54 = vld [vmem:[%s18051_s1 + $0x144] ss:$16 sps:$4 sm:$0xff]   ;;  %v10785_v56 = vld [vmem:[%s18051_s1 + $0x140] ss:$16 sps:$4 sm:$0xff]  }
  0x1d   :  { %3066 = vmatprep.subr.bf16.mxu1 %v10747_v29  ;;  %v10783_v55 = vld [vmem:[%s18051_s1 + $0x344] ss:$16 sps:$4 sm:$0xff]   ;;  %v10786_v57 = vld [vmem:[%s18051_s1 + $0x340] ss:$16 sps:$4 sm:$0xff]  }
  0x1e   :  { %v10787_v58 = vld [vmem:[%s18051_s1 + $0x124] ss:$16 sps:$4 sm:$0xff]   ;;  %v10791_v60 = vld [vmem:[%s18051_s1 + $0x120] ss:$16 sps:$4 sm:$0xff]  }
  0x1f   :  { %2714 = vmatpush1.bf16.msra.mxu0 %v10749_v30  ;;  %v10789_v59 = vld [vmem:[%s18051_s1 + $0x324] ss:$16 sps:$4 sm:$0xff]   ;;  %v10792_v61 = vld [vmem:[%s18051_s1 + $0x320] ss:$16 sps:$4 sm:$0xff]  }
  0x20   :  { %3067 = vmatpush1.bf16.msra.mxu1 %v10750_v31  ;;  %2715 = vmatprep.subr.bf16.mxu0 %v10751_v32  ;;  %v10793_v62 = vld [vmem:[%s18051_s1 + $0x104] ss:$16 sps:$4 sm:$0xff]   ;;  %v10797_v0 = vld [vmem:[%s18051_s1 + $0x100] ss:$16 sps:$4 sm:$0xff]   ;;  %v10834_v32 = vld [vmem:[%s18050_s0 + $0xec] ss:$28 sps:$4 sm:$0xff]  }
  0x21   :  { %3068 = vmatprep.subr.bf16.mxu1 %v10753_v33  ;;  %v10795_v63 = vld [vmem:[%s18051_s1 + $0x304] ss:$16 sps:$4 sm:$0xff]   ;;  %v10798_v1 = vld [vmem:[%s18051_s1 + $0x300] ss:$16 sps:$4 sm:$0xff]  }
  0x22   :  { %v10807_v2 = vld [vmem:[%s18051_s1 + $0x4e4] ss:$16 sps:$4 sm:$0xff]   ;;  %v10799_v4 = vld [vmem:[%s18050_s0] ss:$28 sps:$4 sm:$0xff]   ;;  %v10831_v29 = vld [vmem:[%s18050_s0 + $0xb0] ss:$28 sps:$4 sm:$0xff]  }
  0x23   :  { %2716 = vmatpush2.bf16.msra.mxu0 %v10755_v34  ;;  %v10810_v3 = vld [vmem:[%s18051_s1 + $0x604] ss:$16 sps:$4 sm:$0xff]   ;;  %v10805_v6 = vld [vmem:[%s18051_s1 + $0x4e0] ss:$16 sps:$4 sm:$0xff]  }
  0x24   :  { %3069 = vmatpush2.bf16.msra.mxu1 %v10756_v35  ;;  %2717 = vmatprep.subr.bf16.mxu0 %v10757_v36  ;;  %v10802_v5 = vld [vmem:[%s18050_s0 + $0x8] ss:$28 sps:$4 sm:$0xff]   ;;  %v10808_v7 = vld [vmem:[%s18051_s1 + $0x600] ss:$16 sps:$4 sm:$0xff]   ;;  %v10822_v22 = vld [vmem:[%s18050_s0 + $0x78] ss:$28 sps:$4 sm:$0xff]  }
  0x25   :  { %3070 = vmatprep.subr.bf16.mxu1 %v10759_v37  ;;  %v10813_v9 = vld [vmem:[%s18050_s0 + $0x44] ss:$28 sps:$4 sm:$0xff]   ;;  %v10817_v15 = vld [vmem:[%s18050_s0 + $0x74] ss:$28 sps:$4 sm:$0xff]  }
  0x26   :  { %v10825_v10 = vld [vmem:[%s18051_s1 + $0x4c4] ss:$16 sps:$4 sm:$0xff]   ;;  %v10823_v11 = vld [vmem:[%s18051_s1 + $0x4c0] ss:$16 sps:$4 sm:$0xff]  }
  0x27   :  { %2718 = vmatpush2.bf16.msra.mxu0 %v10761_v38  ;;  %v10840_v12 = vld [vmem:[%s18051_s1 + $0x4a4] ss:$16 sps:$4 sm:$0xff]   ;;  %v10816_v14 = vld [vmem:[%s18050_s0 + $0x40] ss:$28 sps:$4 sm:$0xff]  }
  0x28   :  { %3071 = vmatpush2.bf16.msra.mxu1 %v10762_v39  ;;  %2719 = vmatprep.subr.bf16.mxu0 %v10763_v40  ;;  %v10838_v17 = vld [vmem:[%s18051_s1 + $0x4a0] ss:$16 sps:$4 sm:$0xff]   ;;  %v10855_v18 = vld [vmem:[%s18051_s1 + $0x484] ss:$16 sps:$4 sm:$0xff]   ;;  %v10841_v38 = vld [vmem:[%s18050_s0 + $0x11c] ss:$28 sps:$4 sm:$0xff]  }
  0x29   :  { %3072 = vmatprep.subr.bf16.mxu1 %v10765_v41  ;;  %v10853_v19 = vld [vmem:[%s18051_s1 + $0x480] ss:$16 sps:$4 sm:$0xff]   ;;  %v10870_v20 = vld [vmem:[%s18051_s1 + $0x464] ss:$16 sps:$4 sm:$0xff]  }
  0x2a   :  { %v10828_v24 = vld [vmem:[%s18050_s0 + $0xb4] ss:$28 sps:$4 sm:$0xff]   ;;  %v10830_v28 = vld [vmem:[%s18050_s0 + $0xa8] ss:$28 sps:$4 sm:$0xff]   ;;  %v10836_v34 = vld [vmem:[%s18050_s0 + $0xe0] ss:$28 sps:$4 sm:$0xff]  }
  0x2b   :  { %2720 = vmatpush2.bf16.msra.mxu0 %v10767_v42  ;;  %v10868_v25 = vld [vmem:[%s18051_s1 + $0x460] ss:$16 sps:$4 sm:$0xff]   ;;  %v10885_v26 = vld [vmem:[%s18051_s1 + $0x444] ss:$16 sps:$4 sm:$0xff]  }
  0x2c   :  { %3073 = vmatpush2.bf16.msra.mxu1 %v10768_v43  ;;  %2721 = vmatprep.subr.bf16.mxu0 %v10769_v44  ;;  %v10883_v27 = vld [vmem:[%s18051_s1 + $0x440] ss:$16 sps:$4 sm:$0xff]   ;;  %v10900_v31 = vld [vmem:[%s18051_s1 + $0x424] ss:$16 sps:$4 sm:$0xff]  }
  0x2d   :  { %3074 = vmatprep.subr.bf16.mxu1 %v10771_v45  ;;  %v10832_v30 = vld [vmem:[%s18050_s0 + $0xe4] ss:$28 sps:$4 sm:$0xff]   ;;  %v10845_v42 = vld [vmem:[%s18050_s0 + $0x118] ss:$28 sps:$4 sm:$0xff]  }
  0x2e   :  { %v10898_v33 = vld [vmem:[%s18051_s1 + $0x420] ss:$16 sps:$4 sm:$0xff]   ;;  %v10915_v36 = vld [vmem:[%s18051_s1 + $0x404] ss:$16 sps:$4 sm:$0xff]   ;;  %v10849_v45 = vld [vmem:[%s18050_s0 + $0x15c] ss:$28 sps:$4 sm:$0xff]  }
  0x2f   :  { %2722 = vmatpush2.bf16.msra.mxu0 %v10773_v46  ;;  %v10913_v35 = vld [vmem:[%s18051_s1 + $0x400] ss:$16 sps:$4 sm:$0xff]   ;;  %v10837_v37 = vld [vmem:[%s18050_s0 + $0xe8] ss:$28 sps:$4 sm:$0xff]   ;;  %v10852_v49 = vld [vmem:[%s18050_s0 + $0x158] ss:$28 sps:$4 sm:$0xff]  }
  0x30   :  { %3075 = vmatpush2.bf16.msra.mxu1 %v10774_v47  ;;  %2723 = vmatprep.subr.bf16.mxu0 %v10775_v48  ;;  %v10843_v39 = vld [vmem:[%s18050_s0 + $0x124] ss:$28 sps:$4 sm:$0xff]   ;;  %v10847_v44 = vld [vmem:[%s18050_s0 + $0x154] ss:$28 sps:$4 sm:$0xff]  }
  0x31   :  { %3076 = vmatprep.subr.bf16.mxu1 %v10777_v50  ;;  %v10928_v40 = vld [vmem:[%s18051_s1 + $0x5e0] ss:$16 sps:$4 sm:$0xff]   ;;  %v10930_v41 = vld [vmem:[%s18051_s1 + $0x5e4] ss:$16 sps:$4 sm:$0xff]   ;;  %v10856_v50 = vld [vmem:[%s18050_s0 + $0x18c] ss:$28 sps:$4 sm:$0xff]  }
  0x32   :  { %v10846_v43 = vld [vmem:[%s18050_s0 + $0x120] ss:$28 sps:$4 sm:$0xff]   ;;  %v10945_v47 = vld [vmem:[%s18051_s1 + $0x5c4] ss:$16 sps:$4 sm:$0xff]   ;;  %v10851_v48 = vld [vmem:[%s18050_s0 + $0x150] ss:$28 sps:$4 sm:$0xff]  }
  0x33   :  { %2724 = vmatpush2.bf16.msra.mxu0 %v10779_v52  ;;  %v10943_v46 = vld [vmem:[%s18051_s1 + $0x5c0] ss:$16 sps:$4 sm:$0xff]  }
  0x34   :  { %3077 = vmatpush2.bf16.msra.mxu1 %v10780_v53  ;;  %2725 = vmatprep.subr.bf16.mxu0 %v10781_v54  ;;  %v10858_v51 = vld [vmem:[%s18050_s0 + $0x194] ss:$28 sps:$4 sm:$0xff]   ;;  %v10860_v54 = vld [vmem:[%s18050_s0 + $0x188] ss:$28 sps:$4 sm:$0xff]  }
  0x35   :  { %3078 = vmatprep.subr.bf16.mxu1 %v10783_v55  ;;  %v10958_v52 = vld [vmem:[%s18051_s1 + $0x5a0] ss:$16 sps:$4 sm:$0xff]   ;;  %v10960_v53 = vld [vmem:[%s18051_s1 + $0x5a4] ss:$16 sps:$4 sm:$0xff]  }
  0x36   :  { %v10861_v55 = vld [vmem:[%s18050_s0 + $0x190] ss:$28 sps:$4 sm:$0xff]  }
  0x37   :  { %2726 = vmatpush2.bf16.msra.mxu0 %v10785_v56  ;;  %v10862_v56 = vld [vmem:[%s18050_s0 + $0x1c4] ss:$28 sps:$4 sm:$0xff]  }
  0x38   :  { %3079 = vmatpush2.bf16.msra.mxu1 %v10786_v57  ;;  %2727 = vmatprep.subr.bf16.mxu0 %v10787_v58  ;;  %v10864_v57 = vld [vmem:[%s18050_s0 + $0x1cc] ss:$28 sps:$4 sm:$0xff]   ;;  %v10975_v58 = vld [vmem:[%s18051_s1 + $0x584] ss:$16 sps:$4 sm:$0xff]  }
  0x39   :  { %3080 = vmatprep.subr.bf16.mxu1 %v10789_v59  ;;  %v10973_v59 = vld [vmem:[%s18051_s1 + $0x580] ss:$16 sps:$4 sm:$0xff]  }
  0x3b   :  { %2728 = vmatpush2.bf16.msra.mxu0 %v10791_v60  ;;  %v10866_v60 = vld [vmem:[%s18050_s0 + $0x1c0] ss:$28 sps:$4 sm:$0xff]  }
  0x3c   :  { %3081 = vmatpush2.bf16.msra.mxu1 %v10792_v61  ;;  %2729 = vmatprep.subr.bf16.mxu0 %v10793_v62  ;;  %v10867_v61 = vld [vmem:[%s18050_s0 + $0x1c8] ss:$28 sps:$4 sm:$0xff]   ;;  %v10871_v62 = vld [vmem:[%s18050_s0 + $0x1fc] ss:$28 sps:$4 sm:$0xff]  }
  0x3d   :  { %3082 = vmatprep.subr.bf16.mxu1 %v10795_v63  ;;  %v10873_v63 = vld [vmem:[%s18050_s0 + $0x204] ss:$28 sps:$4 sm:$0xff]  }
  0x3f   :  { %2730 = vmatpush2.bf16.msra.mxu0 %v10797_v0  ;;  %v10875_v0 = vld [vmem:[%s18050_s0 + $0x1f8] ss:$28 sps:$4 sm:$0xff]  }
  0x40   :  { %3083 = vmatpush2.bf16.msra.mxu1 %v10798_v1  ;;  %3405 = vmatprep.subr.bf16.mxu0 %v10807_v2  ;;  %v10876_v1 = vld [vmem:[%s18050_s0 + $0x200] ss:$28 sps:$4 sm:$0xff]  }
  0x41   :  { %3772 = vmatprep.subr.bf16.mxu1 %v10810_v3  ;;  %v10988_v2 = vld [vmem:[%s18051_s1 + $0x560] ss:$16 sps:$4 sm:$0xff]   ;;  %v10990_v3 = vld [vmem:[%s18051_s1 + $0x564] ss:$16 sps:$4 sm:$0xff]  }
  0x42   :  { %2732 = vmatmul.mubr.bf16.vlgmr.msra.gmra.mxu0 %v10799_v4  ;;  %v10877_v4 = vld [vmem:[%s18050_s0 + $0x234] ss:$28 sps:$4 sm:$0xff]  }
  0x43   :  { %3085 = vmatmul.mubr.bf16.vlgmr.msra.gmra.mxu1 %v10802_v5  ;;  %3406 = vmatpush1.bf16.msra.mxu0 %v10805_v6  ;;  %v10879_v5 = vld [vmem:[%s18050_s0 + $0x23c] ss:$28 sps:$4 sm:$0xff]   ;;  %v10881_v6 = vld [vmem:[%s18050_s0 + $0x230] ss:$28 sps:$4 sm:$0xff]  }
  0x44   :  { %3773 = vmatpush1.bf16.msra.mxu1 %v10808_v7  ;;  %2741 = vmatprep.mubr.bf16.mxu0 %v10811_v8  ;;  %v10882_v7 = vld [vmem:[%s18050_s0 + $0x238] ss:$28 sps:$4 sm:$0xff]   ;;  %v10886_v8 = vld [vmem:[%s18050_s0 + $0x26c] ss:$28 sps:$4 sm:$0xff]  }
  0x45   :  { %3094 = vmatprep.mubr.bf16.mxu1 %v10813_v9  ;;  %3407 = vmatprep.subr.bf16.mxu0 %v10825_v10  ;;  %v10888_v9 = vld [vmem:[%s18050_s0 + $0x274] ss:$28 sps:$4 sm:$0xff]   ;;  %v10890_v10 = vld [vmem:[%s18050_s0 + $0x268] ss:$28 sps:$4 sm:$0xff]  }
  0x47   :  { %3408 = vmatpush1.bf16.msra.mxu0 %v10823_v11  ;;  %v10891_v11 = vld [vmem:[%s18050_s0 + $0x270] ss:$28 sps:$4 sm:$0xff]  }
  0x48   :  { %3409 = vmatprep.subr.bf16.mxu0 %v10840_v12  ;;  %v11003_v12 = vld [vmem:[%s18051_s1 + $0x540] ss:$16 sps:$4 sm:$0xff]  }
  0x4a   :  { %2742 = vmatmul.mubr.bf16.gmra.mxu0 %v10815_v13  ;;  %v11005_v13 = vld [vmem:[%s18051_s1 + $0x544] ss:$16 sps:$4 sm:$0xff]  }
  0x4b   :  { %3095 = vmatmul.mubr.bf16.gmra.mxu1 %v10816_v14  ;;  %2751 = vmatprep.mubr.bf16.mxu0 %v10817_v15  ;;  %v10892_v14 = vld [vmem:[%s18050_s0 + $0x2a4] ss:$28 sps:$4 sm:$0xff]   ;;  %v10894_v15 = vld [vmem:[%s18050_s0 + $0x2ac] ss:$28 sps:$4 sm:$0xff]  }
  0x4c   :  { %3104 = vmatprep.mubr.bf16.mxu1 %v10819_v16  ;;  %3410 = vmatpush1.bf16.msra.mxu0 %v10838_v17  ;;  %v10896_v16 = vld [vmem:[%s18050_s0 + $0x2a0] ss:$28 sps:$4 sm:$0xff]   ;;  %v10897_v17 = vld [vmem:[%s18050_s0 + $0x2a8] ss:$28 sps:$4 sm:$0xff]  }
  0x4d   :  { %3411 = vmatprep.subr.bf16.mxu0 %v10855_v18  ;;  %v10901_v18 = vld [vmem:[%s18050_s0 + $0x2dc] ss:$28 sps:$4 sm:$0xff]  }
  0x50   :  { %3412 = vmatpush1.bf16.msra.mxu0 %v10853_v19  ;;  %v10903_v19 = vld [vmem:[%s18050_s0 + $0x2e4] ss:$28 sps:$4 sm:$0xff]  }
  0x51   :  { %3413 = vmatprep.subr.bf16.mxu0 %v10870_v20  ;;  %v10905_v20 = vld [vmem:[%s18050_s0 + $0x2d8] ss:$28 sps:$4 sm:$0xff]  }
  0x52   :  { %2752 = vmatmul.mubr.bf16.gmra.mxu0 %v10821_v21  ;;  %v10906_v21 = vld [vmem:[%s18050_s0 + $0x2e0] ss:$28 sps:$4 sm:$0xff]  }
  0x53   :  { %3105 = vmatmul.mubr.bf16.gmra.mxu1 %v10822_v22  ;;  %2761 = vmatprep.mubr.bf16.mxu0 %v10826_v23  ;;  %v11018_v22 = vld [vmem:[%s18051_s1 + $0x520] ss:$16 sps:$4 sm:$0xff]   ;;  %v11020_v23 = vld [vmem:[%s18051_s1 + $0x524] ss:$16 sps:$4 sm:$0xff]  }
  0x54   :  { %3114 = vmatprep.mubr.bf16.mxu1 %v10828_v24  ;;  %3414 = vmatpush1.bf16.msra.mxu0 %v10868_v25  ;;  %v10907_v24 = vld [vmem:[%s18050_s0 + $0x314] ss:$28 sps:$4 sm:$0xff]   ;;  %v10909_v25 = vld [vmem:[%s18050_s0 + $0x31c] ss:$28 sps:$4 sm:$0xff]  }
  0x55   :  { %3415 = vmatprep.subr.bf16.mxu0 %v10885_v26  ;;  %v10911_v26 = vld [vmem:[%s18050_s0 + $0x310] ss:$28 sps:$4 sm:$0xff]  }
  0x58   :  { %3416 = vmatpush1.bf16.msra.mxu0 %v10883_v27  ;;  %v10912_v27 = vld [vmem:[%s18050_s0 + $0x318] ss:$28 sps:$4 sm:$0xff]  }
  0x59   :  { %3417 = vmatprep.subr.bf16.mxu0 %v10900_v31  ;;  %v10921_v31 = vld [vmem:[%s18050_s0 + $0x350] ss:$28 sps:$4 sm:$0xff]  }
  0x5a   :  { %2762 = vmatmul.mubr.bf16.gmra.mxu0 %v10830_v28  ;;  %v10916_v28 = vld [vmem:[%s18050_s0 + $0x34c] ss:$28 sps:$4 sm:$0xff]  }
  0x5b   :  { %3115 = vmatmul.mubr.bf16.gmra.mxu1 %v10831_v29  ;;  %2771 = vmatprep.mubr.bf16.mxu0 %v10832_v30  ;;  %v10918_v29 = vld [vmem:[%s18050_s0 + $0x354] ss:$28 sps:$4 sm:$0xff]   ;;  %v10920_v30 = vld [vmem:[%s18050_s0 + $0x348] ss:$28 sps:$4 sm:$0xff]  }
  0x5c   :  { %3124 = vmatprep.mubr.bf16.mxu1 %v10834_v32  ;;  %3418 = vmatpush1.bf16.msra.mxu0 %v10898_v33  ;;  %v11033_v32 = vld [vmem:[%s18051_s1 + $0x500] ss:$16 sps:$4 sm:$0xff]   ;;  %v11035_v33 = vld [vmem:[%s18051_s1 + $0x504] ss:$16 sps:$4 sm:$0xff]  }
  0x5d   :  { %3419 = vmatprep.subr.bf16.mxu0 %v10915_v36  ;;  %v10926_v36 = vld [vmem:[%s18050_s0 + $0x380] ss:$28 sps:$4 sm:$0xff]  }
  0x60   :  { %3420 = vmatpush1.bf16.msra.mxu0 %v10913_v35  ;;  %v10924_v35 = vld [vmem:[%s18050_s0 + $0x38c] ss:$28 sps:$4 sm:$0xff]  }
  0x61   :  { %3421 = vmatprep.subr.bf16.mxu0 %v10930_v41  ;;  %v10936_v41 = vld [vmem:[%s18050_s0 + $0x3c0] ss:$28 sps:$4 sm:$0xff]  }
  0x62   :  { %2772 = vmatmul.mubr.bf16.gmra.mxu0 %v10836_v34  ;;  %v10922_v34 = vld [vmem:[%s18050_s0 + $0x384] ss:$28 sps:$4 sm:$0xff]  }
  0x63   :  { %3125 = vmatmul.mubr.bf16.gmra.mxu1 %v10837_v37  ;;  %2781 = vmatprep.mubr.bf16.mxu0 %v10841_v38  ;;  %v10927_v37 = vld [vmem:[%s18050_s0 + $0x388] ss:$28 sps:$4 sm:$0xff]   ;;  %v10931_v38 = vld [vmem:[%s18050_s0 + $0x3bc] ss:$28 sps:$4 sm:$0xff]  }
  0x64   :  { %3134 = vmatprep.mubr.bf16.mxu1 %v10843_v39  ;;  %3422 = vmatpush2.bf16.msra.mxu0 %v10928_v40  ;;  %v10933_v39 = vld [vmem:[%s18050_s0 + $0x3c4] ss:$28 sps:$4 sm:$0xff]   ;;  %v10935_v40 = vld [vmem:[%s18050_s0 + $0x3b8] ss:$28 sps:$4 sm:$0xff]  }
  0x65   :  { %3423 = vmatprep.subr.bf16.mxu0 %v10945_v47  ;;  %v10942_v47 = vld [vmem:[%s18050_s0 + $0x3f8] ss:$28 sps:$4 sm:$0xff]  }
  0x68   :  { %3424 = vmatpush2.bf16.msra.mxu0 %v10943_v46  ;;  %v10941_v46 = vld [vmem:[%s18050_s0 + $0x3f0] ss:$28 sps:$4 sm:$0xff]  }
  0x69   :  { %3425 = vmatprep.subr.bf16.mxu0 %v10960_v53  ;;  %v10954_v53 = vld [vmem:[%s18050_s0 + $0x46c] ss:$28 sps:$4 sm:$0xff]  }
  0x6a   :  { %2782 = vmatmul.mubr.bf16.gmra.mxu0 %v10845_v42  ;;  %v11048_v42 = vld [vmem:[%s18051_s1 + $0xec] ss:$16 sps:$4 sm:$0xff]  }
  0x6b   :  { %3135 = vmatmul.mubr.bf16.gmra.mxu1 %v10846_v43  ;;  %2791 = vmatprep.mubr.bf16.mxu0 %v10847_v44  ;;  %v10937_v43 = vld [vmem:[%s18050_s0 + $0x3f4] ss:$28 sps:$4 sm:$0xff]   ;;  %v10939_v44 = vld [vmem:[%s18050_s0 + $0x3fc] ss:$28 sps:$4 sm:$0xff]  }
  0x6c   :  { %3144 = vmatprep.mubr.bf16.mxu1 %v10849_v45  ;;  %3426 = vmatpush2.bf16.msra.mxu0 %v10958_v52  ;;  %v11051_v45 = vld [vmem:[%s18051_s1 + $0x2ec] ss:$16 sps:$4 sm:$0xff]   ;;  %v10952_v52 = vld [vmem:[%s18050_s0 + $0x464] ss:$28 sps:$4 sm:$0xff]  }
  0x6d   :  { %3427 = vmatprep.subr.bf16.mxu0 %v10975_v58  ;;  %4464 = vmatprep.subr.bf16.mxu1 %v11051_v45  ;;  %v10965_v58 = vld [vmem:[%s18050_s0 + $0x498] ss:$28 sps:$4 sm:$0xff]  }
  0x70   :  { %3428 = vmatpush2.bf16.msra.mxu0 %v10973_v59  ;;  %v10966_v59 = vld [vmem:[%s18050_s0 + $0x4a0] ss:$28 sps:$4 sm:$0xff]  }
  0x71   :  { %3429 = vmatprep.subr.bf16.mxu0 %v10990_v3  ;;  %v10980_v3 = vld [vmem:[%s18050_s0 + $0x508] ss:$28 sps:$4 sm:$0xff]  }
  0x72   :  { %2792 = vmatmul.mubr.bf16.gmra.mxu0 %v10851_v48  ;;  %v10946_v48 = vld [vmem:[%s18050_s0 + $0x42c] ss:$28 sps:$4 sm:$0xff]  }
  0x73   :  { %3145 = vmatmul.mubr.bf16.gmra.mxu1 %v10852_v49  ;;  %2801 = vmatprep.mubr.bf16.mxu0 %v10856_v50  ;;  %v10948_v49 = vld [vmem:[%s18050_s0 + $0x434] ss:$28 sps:$4 sm:$0xff]   ;;  %v10950_v50 = vld [vmem:[%s18050_s0 + $0x428] ss:$28 sps:$4 sm:$0xff]  }
  0x74   :  { %3154 = vmatprep.mubr.bf16.mxu1 %v10858_v51  ;;  %3430 = vmatpush2.bf16.msra.mxu0 %v10988_v2  ;;  %v10951_v51 = vld [vmem:[%s18050_s0 + $0x430] ss:$28 sps:$4 sm:$0xff]   ;;  %v482_v2 = vlaneseq }
  0x75   :  { %3431 = vmatprep.subr.bf16.mxu0 %v11005_v13  ;;  %v10991_v13 = vld [vmem:[%s18050_s0 + $0x57c] ss:$28 sps:$4 sm:$0xff]  }
  0x78   :  { %3432 = vmatpush2.bf16.msra.mxu0 %v11003_v12 }
  0x79   :  { %3433 = vmatprep.subr.bf16.mxu0 %v11020_v23 }
  0x7a   :  { %2802 = vmatmul.mubr.bf16.gmra.mxu0 %v10860_v54  ;;  %v10956_v54 = vld [vmem:[%s18050_s0 + $0x460] ss:$28 sps:$4 sm:$0xff]  }
  0x7b   :  { %3155 = vmatmul.mubr.bf16.gmra.mxu1 %v10861_v55  ;;  %2811 = vmatprep.mubr.bf16.mxu0 %v10862_v56  ;;  %v10957_v55 = vld [vmem:[%s18050_s0 + $0x468] ss:$28 sps:$4 sm:$0xff]   ;;  %v10961_v56 = vld [vmem:[%s18050_s0 + $0x49c] ss:$28 sps:$4 sm:$0xff]  }
  0x7c   :  { %3164 = vmatprep.mubr.bf16.mxu1 %v10864_v57  ;;  %3434 = vmatpush2.bf16.msra.mxu0 %v11018_v22  ;;  %v10963_v57 = vld [vmem:[%s18050_s0 + $0x4a4] ss:$28 sps:$4 sm:$0xff]  }
  0x7d   :  { %3435 = vmatprep.subr.bf16.mxu0 %v11035_v33 }
  0x80   :  { %3436 = vmatpush2.bf16.msra.mxu0 %v11033_v32 }
  0x81   :  { %4111 = vmatprep.subr.bf16.mxu0 %v11048_v42  ;;  %v11001_v42 = vld [vmem:[%s18050_s0 + $0x5b0] ss:$28 sps:$4 sm:$0xff]  }
  0x82   :  { %2812 = vmatmul.mubr.bf16.gmra.mxu0 %v10866_v60  ;;  %v10967_v60 = vld [vmem:[%s18050_s0 + $0x4d4] ss:$28 sps:$4 sm:$0xff]  }
  0x83   :  { %3165 = vmatmul.mubr.bf16.gmra.mxu1 %v10867_v61  ;;  %2821 = vmatprep.mubr.bf16.mxu0 %v10871_v62  ;;  %v10969_v61 = vld [vmem:[%s18050_s0 + $0x4dc] ss:$28 sps:$4 sm:$0xff]   ;;  %v10971_v62 = vld [vmem:[%s18050_s0 + $0x4d0] ss:$28 sps:$4 sm:$0xff]  }
  0x84   :  { %3174 = vmatprep.mubr.bf16.mxu1 %v10873_v63  ;;  %v10972_v63 = vld [vmem:[%s18050_s0 + $0x4d8] ss:$28 sps:$4 sm:$0xff]  }
  0x8a   :  { %2822 = vmatmul.mubr.bf16.gmra.mxu0 %v10875_v0  ;;  %v10976_v0 = vld [vmem:[%s18050_s0 + $0x50c] ss:$28 sps:$4 sm:$0xff]  }
  0x8b   :  { %3175 = vmatmul.mubr.bf16.gmra.mxu1 %v10876_v1  ;;  %2831 = vmatprep.mubr.bf16.mxu0 %v10877_v4  ;;  %v10978_v1 = vld [vmem:[%s18050_s0 + $0x514] ss:$28 sps:$4 sm:$0xff]  }
  0x8c   :  { %3184 = vmatprep.mubr.bf16.mxu1 %v10879_v5  ;;  %v10981_v4 = vld [vmem:[%s18050_s0 + $0x510] ss:$28 sps:$4 sm:$0xff]   ;;  %v10982_v5 = vld [vmem:[%s18050_s0 + $0x544] ss:$28 sps:$4 sm:$0xff]  }
  0x92   :  { %2832 = vmatmul.mubr.bf16.gmra.mxu0 %v10881_v6  ;;  %v10984_v6 = vld [vmem:[%s18050_s0 + $0x54c] ss:$28 sps:$4 sm:$0xff]  }
  0x93   :  { %3185 = vmatmul.mubr.bf16.gmra.mxu1 %v10882_v7  ;;  %2841 = vmatprep.mubr.bf16.mxu0 %v10886_v8  ;;  %v12684_v7 = vshrl.u32 %v482_v2, 7  ;;  %v480_v8 = vld [vmem:[%s18052_s2] sm:$0xf] }
  0x94   :  { %3194 = vmatprep.mubr.bf16.mxu1 %v10888_v9 }
  0x95   :  { %18187 = vst [vmem:[#allocation5_spill] sm:$0xff] %v12684_v7  ;;  %v18059_v9 = vsub.s32 0, %v12684_v7  ;;  %v18058_v12 = vsub.s32 1, %v12684_v7 }
  0x9a   :  { %2842 = vmatmul.mubr.bf16.gmra.mxu0 %v10890_v10  ;;  %v10986_v10 = vld [vmem:[%s18050_s0 + $0x540] ss:$28 sps:$4 sm:$0xff]  }
  0x9b   :  { %3195 = vmatmul.mubr.bf16.gmra.mxu1 %v10891_v11  ;;  %2851 = vmatprep.mubr.bf16.mxu0 %v10892_v14  ;;  %v10987_v11 = vld [vmem:[%s18050_s0 + $0x548] ss:$28 sps:$4 sm:$0xff]   ;;  %v12702_v14 = vrot.slane %v480_v8, %v18059_v9 }
  0x9c   :  { %3204 = vmatprep.mubr.bf16.mxu1 %v10894_v15  ;;  %v10993_v15 = vld [vmem:[%s18050_s0 + $0x584] ss:$28 sps:$4 sm:$0xff]  }
  0xa2   :  { %2852 = vmatmul.mubr.bf16.gmra.mxu0 %v10896_v16  ;;  %v12709_v16 = vrot.slane %v480_v8, %v18058_v12  ;;  %v11017_v8 = vld [vmem:[%s18050_s0 + $0x62c] ss:$28 sps:$4 sm:$0xff]  }
  0xa3   :  { %3205 = vmatmul.mubr.bf16.gmra.mxu1 %v10897_v17  ;;  %2861 = vmatprep.mubr.bf16.mxu0 %v10901_v18 }
  0xa4   :  { %3214 = vmatprep.mubr.bf16.mxu1 %v10903_v19 }
  0xaa   :  { %2862 = vmatmul.mubr.bf16.gmra.mxu0 %v10905_v20 }
  0xab   :  { %3215 = vmatmul.mubr.bf16.gmra.mxu1 %v10906_v21  ;;  %2871 = vmatprep.mubr.bf16.mxu0 %v10907_v24  ;;  %v10995_v24 = vld [vmem:[%s18050_s0 + $0x578] ss:$28 sps:$4 sm:$0xff]  }
  0xac   :  { %3224 = vmatprep.mubr.bf16.mxu1 %v10909_v25  ;;  %v10996_v25 = vld [vmem:[%s18050_s0 + $0x580] ss:$28 sps:$4 sm:$0xff]  }
  0xb2   :  { %2872 = vmatmul.mubr.bf16.gmra.mxu0 %v10911_v26 }
  0xb3   :  { %3225 = vmatmul.mubr.bf16.gmra.mxu1 %v10912_v27  ;;  %2881 = vmatprep.mubr.bf16.mxu0 %v10916_v28 }
  0xb4   :  { %3234 = vmatprep.mubr.bf16.mxu1 %v10918_v29 }
  0xba   :  { %2882 = vmatmul.mubr.bf16.gmra.mxu0 %v10920_v30  ;;  %v10997_v30 = vld [vmem:[%s18050_s0 + $0x5b4] ss:$28 sps:$4 sm:$0xff]  }
  0xbb   :  { %3235 = vmatmul.mubr.bf16.gmra.mxu1 %v10921_v31  ;;  %2891 = vmatprep.mubr.bf16.mxu0 %v10922_v34  ;;  %v10999_v31 = vld [vmem:[%s18050_s0 + $0x5bc] ss:$28 sps:$4 sm:$0xff]  }
  0xbc   :  { %3244 = vmatprep.mubr.bf16.mxu1 %v10924_v35 }
  0xc2   :  { %2892 = vmatmul.mubr.bf16.gmra.mxu0 %v10926_v36 }
  0xc3   :  { %3245 = vmatmul.mubr.bf16.gmra.mxu1 %v10927_v37  ;;  %2901 = vmatprep.mubr.bf16.mxu0 %v10931_v38 }
  0xc4   :  { %3254 = vmatprep.mubr.bf16.mxu1 %v10933_v39 }
  0xca   :  { %2902 = vmatmul.mubr.bf16.gmra.mxu0 %v10935_v40 }
  0xcb   :  { %3255 = vmatmul.mubr.bf16.gmra.mxu1 %v10936_v41  ;;  %2911 = vmatprep.mubr.bf16.mxu0 %v10937_v43  ;;  %v11002_v43 = vld [vmem:[%s18050_s0 + $0x5b8] ss:$28 sps:$4 sm:$0xff]  }
  0xcc   :  { %3264 = vmatprep.mubr.bf16.mxu1 %v10939_v44 }
  0xd2   :  { %2912 = vmatmul.mubr.bf16.gmra.mxu0 %v10941_v46  ;;  %v11006_v46 = vld [vmem:[%s18050_s0 + $0x5ec] ss:$28 sps:$4 sm:$0xff]  }
  0xd3   :  { %3265 = vmatmul.mubr.bf16.gmra.mxu1 %v10942_v47  ;;  %2921 = vmatprep.mubr.bf16.mxu0 %v10946_v48 }
  0xd4   :  { %3274 = vmatprep.mubr.bf16.mxu1 %v10948_v49 }
  0xda   :  { %2922 = vmatmul.mubr.bf16.gmra.mxu0 %v10950_v50 }
  0xdb   :  { %3275 = vmatmul.mubr.bf16.gmra.mxu1 %v10951_v51  ;;  %2931 = vmatprep.mubr.bf16.mxu0 %v10952_v52  ;;  %v11008_v51 = vld [vmem:[%s18050_s0 + $0x5f4] ss:$28 sps:$4 sm:$0xff]  }
  0xdc   :  { %3284 = vmatprep.mubr.bf16.mxu1 %v10954_v53 }
  0xe2   :  { %2932 = vmatmul.mubr.bf16.gmra.mxu0 %v10956_v54 }
  0xe3   :  { %3285 = vmatmul.mubr.bf16.gmra.mxu1 %v10957_v55  ;;  %2941 = vmatprep.mubr.bf16.mxu0 %v10961_v56 }
  0xe4   :  { %3294 = vmatprep.mubr.bf16.mxu1 %v10963_v57 }
  0xea   :  { %2942 = vmatmul.mubr.bf16.gmra.mxu0 %v10965_v58 }
  0xeb   :  { %3295 = vmatmul.mubr.bf16.gmra.mxu1 %v10966_v59  ;;  %2951 = vmatprep.mubr.bf16.mxu0 %v10967_v60 }
  0xec   :  { %3304 = vmatprep.mubr.bf16.mxu1 %v10969_v61 }
  0xf2   :  { %2952 = vmatmul.mubr.bf16.gmra.mxu0 %v10971_v62 }
  0xf3   :  { %3305 = vmatmul.mubr.bf16.gmra.mxu1 %v10972_v63  ;;  %2961 = vmatprep.mubr.bf16.mxu0 %v10976_v0  ;;  %v11010_v0 = vld [vmem:[%s18050_s0 + $0x5e8] ss:$28 sps:$4 sm:$0xff]  }
  0xf4   :  { %3314 = vmatprep.mubr.bf16.mxu1 %v10978_v1  ;;  %v11011_v1 = vld [vmem:[%s18050_s0 + $0x5f0] ss:$28 sps:$4 sm:$0xff]  }
  0xfa   :  { %2962 = vmatmul.mubr.bf16.gmra.mxu0 %v10980_v3 }
  0xfb   :  { %3315 = vmatmul.mubr.bf16.gmra.mxu1 %v10981_v4  ;;  %2971 = vmatprep.mubr.bf16.mxu0 %v10982_v5 }
  0xfc   :  { %3324 = vmatprep.mubr.bf16.mxu1 %v10984_v6  ;;  %v11014_v6 = vld [vmem:[%s18050_s0 + $0x624] ss:$28 sps:$4 sm:$0xff]  }
 0x102   :  { %v2733_v17 = vpop.f32.mrf.mxu0  ;;  %2972 = vmatmul.mubr.bf16.gmra.mxu0 %v10986_v10 }
 0x103   :  { %v3086_v18 = vpop.f32.mrf.mxu1  ;;  %3325 = vmatmul.mubr.bf16.gmra.mxu1 %v10987_v11  ;;  %v2734_v19 = vadd.f32 %v2733_v17, %v12702_v14  ;;  %2981 = vmatprep.mubr.bf16.mxu0 %v10991_v13 }
 0x104   :  { %3334 = vmatprep.mubr.bf16.mxu1 %v10993_v15  ;;  %v2735_v20 = vpop.f32.mrf.mxu0 }
 0x105   :  { %v3088_v21 = vpop.f32.mrf.mxu1  ;;  %v12712_v22 = vadd.f32 %v3086_v18, %v2734_v19  ;;  %v2736_v23 = vadd.f32 %v2735_v20, %v12709_v16 }
 0x106   :  { %v2737_v26 = vpop.f32.mrf.mxu0 }
 0x107   :  { %v3090_v27 = vpop.f32.mrf.mxu1  ;;  %v12721_v28 = vadd.f32 %v3088_v21, %v2736_v23  ;;  %v2738_v29 = vadd.f32 %v2737_v26, %v12702_v14 }
 0x108   :  { %v2739_v32 = vpop.f32.mrf.mxu0 }
 0x109   :  { %v3092_v33 = vpop.f32.mrf.mxu1  ;;  %v12730_v34 = vadd.f32 %v3090_v27, %v2738_v29  ;;  %v2740_v35 = vadd.f32 %v2739_v32, %v12709_v16  ;;  %v11023_v29 = vld [vmem:[%s18050_s0 + $0x65c] ss:$28 sps:$4 sm:$0xff]  }
 0x10a   :  { %v2743_v36 = vpop.f32.mrf.mxu0  ;;  %2982 = vmatmul.mubr.bf16.gmra.mxu0 %v10995_v24  ;;  %v11012_v24 = vld [vmem:[%s18050_s0 + $0x620] ss:$28 sps:$4 sm:$0xff]  }
 0x10b   :  { %v3096_v37 = vpop.f32.mrf.mxu1  ;;  %3335 = vmatmul.mubr.bf16.gmra.mxu1 %v10996_v25  ;;  %v12733_v38 = vadd.f32 %v3092_v33, %v2740_v35  ;;  %v2744_v39 = vadd.f32 %v2743_v36, %v12702_v14  ;;  %2991 = vmatprep.mubr.bf16.mxu0 %v10997_v30  ;;  %v11015_v25 = vld [vmem:[%s18050_s0 + $0x628] ss:$28 sps:$4 sm:$0xff]  }
 0x10c   :  { %3344 = vmatprep.mubr.bf16.mxu1 %v10999_v31  ;;  %v2745_v40 = vpop.f32.mrf.mxu0  ;;  %v11026_v35 = vld [vmem:[%s18050_s0 + $0x664] ss:$28 sps:$4 sm:$0xff]  }
 0x10d   :  { %v3098_v41 = vpop.f32.mrf.mxu1  ;;  %v12742_v44 = vadd.f32 %v3096_v37, %v2744_v39  ;;  %v2746_v45 = vadd.f32 %v2745_v40, %v12709_v16 }
 0x10e   :  { %v2747_v47 = vpop.f32.mrf.mxu0 }
 0x10f   :  { %v3100_v48 = vpop.f32.mrf.mxu1  ;;  %v12748_v49 = vadd.f32 %v3098_v41, %v2746_v45  ;;  %v2748_v50 = vadd.f32 %v2747_v47, %v12702_v14 }
 0x110   :  { %v2749_v52 = vpop.f32.mrf.mxu0 }
 0x111   :  { %v3102_v53 = vpop.f32.mrf.mxu1  ;;  %v12754_v54 = vadd.f32 %v3100_v48, %v2748_v50  ;;  %v2750_v55 = vadd.f32 %v2749_v52, %v12709_v16  ;;  %v11024_v52 = vld [vmem:[%s18050_s0 + $0x660] ss:$28 sps:$4 sm:$0xff]  }
 0x112   :  { %v2753_v56 = vpop.f32.mrf.mxu0  ;;  %2992 = vmatmul.mubr.bf16.gmra.mxu0 %v11001_v42 }
 0x113   :  { %v3106_v57 = vpop.f32.mrf.mxu1  ;;  %3345 = vmatmul.mubr.bf16.gmra.mxu1 %v11002_v43  ;;  %v12757_v58 = vadd.f32 %v3102_v53, %v2750_v55  ;;  %v2754_v59 = vadd.f32 %v2753_v56, %v12702_v14  ;;  %3001 = vmatprep.mubr.bf16.mxu0 %v11006_v46 }
 0x114   :  { %3354 = vmatprep.mubr.bf16.mxu1 %v11008_v51  ;;  %v2755_v60 = vpop.f32.mrf.mxu0  ;;  %v11021_v51 = vld [vmem:[%s18050_s0 + $0x658] ss:$28 sps:$4 sm:$0xff]  }
 0x115   :  { %v3108_v61 = vpop.f32.mrf.mxu1  ;;  %v12760_v62 = vadd.f32 %v3106_v57, %v2754_v59  ;;  %v2756_v63 = vadd.f32 %v2755_v60, %v12709_v16  ;;  %v11029_v59 = vld [vmem:[%s18050_s0 + $0x694] ss:$28 sps:$4 sm:$0xff]   ;;  %v11032_v60 = vld [vmem:[%s18050_s0 + $0x69c] ss:$28 sps:$4 sm:$0xff]  }
 0x116   :  { %v2757_v2 = vpop.f32.mrf.mxu0 }
 0x117   :  { %v3110_v3 = vpop.f32.mrf.mxu1  ;;  %v12769_v4 = vadd.f32 %v3108_v61, %v2756_v63  ;;  %v2758_v5 = vadd.f32 %v2757_v2, %v12702_v14 }
 0x118   :  { %v2759_v10 = vpop.f32.mrf.mxu0 }
 0x119   :  { %v3112_v11 = vpop.f32.mrf.mxu1  ;;  %v12778_v13 = vadd.f32 %v3110_v3, %v2758_v5  ;;  %v2760_v15 = vadd.f32 %v2759_v10, %v12709_v16 }
 0x11a   :  { %v2763_v17 = vpop.f32.mrf.mxu0  ;;  %3002 = vmatmul.mubr.bf16.gmra.mxu0 %v11010_v0 }
 0x11b   :  { %v3116_v18 = vpop.f32.mrf.mxu1  ;;  %3355 = vmatmul.mubr.bf16.gmra.mxu1 %v11011_v1  ;;  %v12781_v19 = vadd.f32 %v3112_v11, %v2760_v15  ;;  %v2764_v20 = vadd.f32 %v2763_v17, %v12702_v14  ;;  %3011 = vmatprep.mubr.bf16.mxu0 %v11014_v6  ;;  %v11027_v11 = vld [vmem:[%s18050_s0 + $0x690] ss:$28 sps:$4 sm:$0xff]   ;;  %v11030_v15 = vld [vmem:[%s18050_s0 + $0x698] ss:$28 sps:$4 sm:$0xff]  }
 0x11c   :  { %3364 = vmatprep.mubr.bf16.mxu1 %v11017_v8  ;;  %v2765_v21 = vpop.f32.mrf.mxu0 }
 0x11d   :  { %v3118_v23 = vpop.f32.mrf.mxu1  ;;  %v12790_v26 = vadd.f32 %v3116_v18, %v2764_v20  ;;  %v2766_v27 = vadd.f32 %v2765_v21, %v12709_v16  ;;  %v11038_v20 = vld [vmem:[%s18050_s0 + $0x6cc] ss:$28 sps:$4 sm:$0xff]  }
 0x11e   :  { %v2767_v30 = vpop.f32.mrf.mxu0 }
 0x11f   :  { %v3120_v31 = vpop.f32.mrf.mxu1  ;;  %v12796_v32 = vadd.f32 %v3118_v23, %v2766_v27  ;;  %v2768_v33 = vadd.f32 %v2767_v30, %v12702_v14  ;;  %v11041_v27 = vld [vmem:[%s18050_s0 + $0x6d4] ss:$28 sps:$4 sm:$0xff]  }
 0x120   :  { %v2769_v36 = vpop.f32.mrf.mxu0 }
 0x121   :  { %v3122_v37 = vpop.f32.mrf.mxu1  ;;  %v12802_v39 = vadd.f32 %v3120_v31, %v2768_v33  ;;  %v2770_v40 = vadd.f32 %v2769_v36, %v12709_v16 }
 0x122   :  { %v2773_v41 = vpop.f32.mrf.mxu0  ;;  %3012 = vmatmul.mubr.bf16.gmra.mxu0 %v11012_v24 }
 0x123   :  { %v3126_v42 = vpop.f32.mrf.mxu1  ;;  %3365 = vmatmul.mubr.bf16.gmra.mxu1 %v11015_v25  ;;  %v12805_v43 = vadd.f32 %v3122_v37, %v2770_v40  ;;  %v2774_v45 = vadd.f32 %v2773_v41, %v12702_v14  ;;  %3021 = vmatprep.mubr.bf16.mxu0 %v11023_v29 }
 0x124   :  { %3374 = vmatprep.mubr.bf16.mxu1 %v11026_v35  ;;  %v2775_v46 = vpop.f32.mrf.mxu0 }
 0x125   :  { %v3128_v47 = vpop.f32.mrf.mxu1  ;;  %v12808_v48 = vadd.f32 %v3126_v42, %v2774_v45  ;;  %v2776_v50 = vadd.f32 %v2775_v46, %v12709_v16 }
 0x126   :  { %v2777_v53 = vpop.f32.mrf.mxu0 }
 0x127   :  { %v3130_v55 = vpop.f32.mrf.mxu1  ;;  %v12817_v56 = vadd.f32 %v3128_v47, %v2776_v50  ;;  %v2778_v57 = vadd.f32 %v2777_v53, %v12702_v14  ;;  %v11036_v47 = vld [vmem:[%s18050_s0 + $0x6c8] ss:$28 sps:$4 sm:$0xff]   ;;  %v11039_v50 = vld [vmem:[%s18050_s0 + $0x6d0] ss:$28 sps:$4 sm:$0xff]  }
 0x128   :  { %v2779_v61 = vpop.f32.mrf.mxu0 }
 0x129   :  { %v3132_v63 = vpop.f32.mrf.mxu1  ;;  %v12826_v0 = vadd.f32 %v3130_v55, %v2778_v57  ;;  %v2780_v1 = vadd.f32 %v2779_v61, %v12709_v16  ;;  %v11044_v57 = vld [vmem:[%s18050_s0 + $0x14] ss:$28 sps:$4 sm:$0xff]  }
 0x12a   :  { %v2783_v2 = vpop.f32.mrf.mxu0  ;;  %3022 = vmatmul.mubr.bf16.gmra.mxu0 %v11021_v51 }
 0x12b   :  { %v3136_v3 = vpop.f32.mrf.mxu1  ;;  %3375 = vmatmul.mubr.bf16.gmra.mxu1 %v11024_v52  ;;  %v12829_v5 = vadd.f32 %v3132_v63, %v2780_v1  ;;  %v2784_v6 = vadd.f32 %v2783_v2, %v12702_v14  ;;  %3031 = vmatprep.mubr.bf16.mxu0 %v11029_v59 }
 0x12c   :  { %3384 = vmatprep.mubr.bf16.mxu1 %v11032_v60  ;;  %v2785_v8 = vpop.f32.mrf.mxu0 }
 0x12d   :  { %v3138_v10 = vpop.f32.mrf.mxu1  ;;  %v12838_v17 = vadd.f32 %v3136_v3, %v2784_v6  ;;  %v2786_v18 = vadd.f32 %v2785_v8, %v12709_v16  ;;  %v18060_v8 = vmov 0  }
 0x12e   :  { %v2787_v21 = vpop.f32.mrf.mxu0 }
 0x12f   :  { %v3140_v23 = vpop.f32.mrf.mxu1  ;;  %v12844_v24 = vadd.f32 %v3138_v10, %v2786_v18  ;;  %v2788_v25 = vadd.f32 %v2787_v21, %v12702_v14 }
 0x130   :  { %v2789_v29 = vpop.f32.mrf.mxu0 }
 0x131   :  { %v3142_v30 = vpop.f32.mrf.mxu1  ;;  %v12850_v31 = vadd.f32 %v3140_v23, %v2788_v25  ;;  %v2790_v33 = vadd.f32 %v2789_v29, %v12709_v16 }
 0x132   :  { %v2793_v35 = vpop.f32.mrf.mxu0  ;;  %3032 = vmatmul.mubr.bf16.gmra.mxu0 %v11027_v11 }
 0x133   :  { %v3146_v36 = vpop.f32.mrf.mxu1  ;;  %3385 = vmatmul.mubr.bf16.gmra.mxu1 %v11030_v15  ;;  %v12853_v37 = vadd.f32 %v3142_v30, %v2790_v33  ;;  %v2794_v40 = vadd.f32 %v2793_v35, %v12702_v14  ;;  %3041 = vmatprep.mubr.bf16.mxu0 %v11038_v20 }
 0x134   :  { %3394 = vmatprep.mubr.bf16.mxu1 %v11041_v27  ;;  %v2795_v41 = vpop.f32.mrf.mxu0 }
 0x135   :  { %v3148_v42 = vpop.f32.mrf.mxu1  ;;  %v12856_v45 = vadd.f32 %v3146_v36, %v2794_v40  ;;  %v2796_v46 = vadd.f32 %v2795_v41, %v12709_v16 }
 0x136   :  { %v2797_v51 = vpop.f32.mrf.mxu0 }
 0x137   :  { %v3150_v52 = vpop.f32.mrf.mxu1  ;;  %v12865_v53 = vadd.f32 %v3148_v42, %v2796_v46  ;;  %v2798_v55 = vadd.f32 %v2797_v51, %v12702_v14 }
 0x138   :  { %v2799_v59 = vpop.f32.mrf.mxu0 }
 0x139   :  { %v3152_v60 = vpop.f32.mrf.mxu1  ;;  %v12871_v61 = vadd.f32 %v3150_v52, %v2798_v55  ;;  %v2800_v63 = vadd.f32 %v2799_v59, %v12709_v16 }
 0x13a   :  { %v2803_v1 = vpop.f32.mrf.mxu0  ;;  %3042 = vmatmul.mubr.bf16.gmra.mxu0 %v11036_v47 }
 0x13b   :  { %v3156_v2 = vpop.f32.mrf.mxu1  ;;  %3395 = vmatmul.mubr.bf16.gmra.mxu1 %v11039_v50  ;;  %v12874_v3 = vadd.f32 %v3152_v60, %v2800_v63  ;;  %v2804_v6 = vadd.f32 %v2803_v1, %v12702_v14  ;;  %3437 = vmatprep.mubr.bf16.mxu0 %v11044_v57 }
 0x13c   :  { %3790 = vmatprep.mubr.bf16.mxu1 %v18060_v8  ;;  %v2805_v10 = vpop.f32.mrf.mxu0 }
 0x13d   :  { %v3158_v11 = vpop.f32.mrf.mxu1 }
 0x13e   :  { %12 = vsyncpa [#allocation3], 0  ;;  %v12878_v15 = vadd.f32 %v3156_v2, %v2804_v6  ;;  %v2806_v18 = vadd.f32 %v2805_v10, %v12709_v16  ;;  %v2807_v20 = vpop.f32.mrf.mxu0  ;;  %v11042_v23 = vld [vmem:[%s18050_s0 + $0x10] ss:$28 sps:$4 sm:$0xff]   ;;  %v11045_v25 = vld [vmem:[%s18050_s0 + $0x18] ss:$28 sps:$4 sm:$0xff]  }
 0x13f   :  { %v3160_v21 = vpop.f32.mrf.mxu1  ;;  %v2808_v29 = vadd.f32 %v2807_v20, %v12702_v14  ;;  %vm2602_vm0 = vcmask 130048   ;;  %v11046_v30 = vld [vmem:[%s18051_s1 + $0xe8] ss:$16 sps:$4 sm:$0xff]   ;;  %v11062_v46 = vld [vmem:[%s18051_s1 + $0xcc] ss:$16 sps:$4 sm:$0xff]  }
 0x140   :  { %v12887_v27 = vadd.f32 %v3158_v11, %v2806_v18  ;;  %v11049_v33 = vld [vmem:[%s18051_s1 + $0x2e8] ss:$16 sps:$4 sm:$0xff]   ;;  %v2809_v35 = vpop.f32.mrf.mxu0  ;;  %v11065_v47 = vld [vmem:[%s18051_s1 + $0x2cc] ss:$16 sps:$4 sm:$0xff]  }
 0x141   :  { %v3162_v36 = vpop.f32.mrf.mxu1  ;;  %v11054_v40 = vld [vmem:[%s18050_s0 + $0x4c] ss:$28 sps:$4 sm:$0xff]   ;;  %v12899_v41 = vadd.f32 %v3160_v21, %v2808_v29  ;;  %v2810_v42 = vadd.f32 %v2809_v35, %v12709_v16  ;;  %v11058_v29 = vld [vmem:[%s18050_s0 + $0x84] ss:$28 sps:$4 sm:$0xff]  }
 0x142   :  { %v2813_v50 = vpop.f32.mrf.mxu0  ;;  %3438 = vmatmul.mubr.bf16.vlgmr.msra.gmra.mxu0 %v11042_v23  ;;  %v11060_v57 = vld [vmem:[%s18051_s1 + $0xc8] ss:$16 sps:$4 sm:$0xff]   ;;  %v11076_v1 = vld [vmem:[%s18051_s1 + $0xac] ss:$16 sps:$4 sm:$0xff]  }
 0x143   :  { %v3166_v51 = vpop.f32.mrf.mxu1  ;;  %10474 = vmatmul.mubr.msk.bf16.vlgmr.msra.gmra.mxu1 %vm2602_vm0, %v11045_v25  ;;  %v12909_v52 = vadd.f32 %v3162_v36, %v2810_v42  ;;  %v2814_v55 = vadd.f32 %v2813_v50, %v12702_v14  ;;  %4112 = vmatpush1.bf16.msra.mxu0 %v11046_v30  ;;  %v11063_v59 = vld [vmem:[%s18051_s1 + $0x2c8] ss:$16 sps:$4 sm:$0xff]   ;;  %v11079_v2 = vld [vmem:[%s18051_s1 + $0x2ac] ss:$16 sps:$4 sm:$0xff]  }
 0x144   :  { %4465 = vmatpush1.bf16.msra.mxu1 %v11049_v33  ;;  %v2815_v60 = vpop.f32.mrf.mxu0  ;;  %3447 = vmatprep.mubr.bf16.mxu0 %v11054_v40  ;;  %v11052_v20 = vld [vmem:[%s18050_s0 + $0x48] ss:$28 sps:$4 sm:$0xff]   ;;  %v11055_v21 = vld [vmem:[%s18050_s0 + $0x50] ss:$28 sps:$4 sm:$0xff]  }
 0x145   :  { %v3168_v63 = vpop.f32.mrf.mxu1  ;;  %3800 = vmatprep.mubr.bf16.mxu1 %v18060_v8  ;;  %v12925_v6 = vadd.f32 %v3166_v51, %v2814_v55  ;;  %v2816_v10 = vadd.f32 %v2815_v60, %v12709_v16  ;;  %4113 = vmatprep.subr.bf16.mxu0 %v11062_v46  ;;  %v11074_v35 = vld [vmem:[%s18051_s1 + $0xa8] ss:$16 sps:$4 sm:$0xff]   ;;  %v11090_v46 = vld [vmem:[%s18051_s1 + $0x8c] ss:$16 sps:$4 sm:$0xff]  }
 0x146   :  { %4466 = vmatprep.subr.bf16.mxu1 %v11065_v47  ;;  %v2817_v11 = vpop.f32.mrf.mxu0  ;;  %v11077_v36 = vld [vmem:[%s18051_s1 + $0x2a8] ss:$16 sps:$4 sm:$0xff]   ;;  %v11093_v47 = vld [vmem:[%s18051_s1 + $0x28c] ss:$16 sps:$4 sm:$0xff]  }
 0x147   :  { %v3170_v18 = vpop.f32.mrf.mxu1  ;;  %v12934_v23 = vadd.f32 %v3168_v63, %v2816_v10  ;;  %v2818_v25 = vadd.f32 %v2817_v11, %v12702_v14  ;;  %4114 = vmatpush1.bf16.msra.mxu0 %v11060_v57  ;;  %v11088_v63 = vld [vmem:[%s18051_s1 + $0x88] ss:$16 sps:$4 sm:$0xff]   ;;  %v11104_v11 = vld [vmem:[%s18051_s1 + $0x6c] ss:$16 sps:$4 sm:$0xff]  }
 0x148   :  { %4467 = vmatpush1.bf16.msra.mxu1 %v11063_v59  ;;  %v2819_v30 = vpop.f32.mrf.mxu0  ;;  %4115 = vmatprep.subr.bf16.mxu0 %v11076_v1  ;;  %v11091_v1 = vld [vmem:[%s18051_s1 + $0x288] ss:$16 sps:$4 sm:$0xff]  }
 0x149   :  { %v3172_v33 = vpop.f32.mrf.mxu1  ;;  %4468 = vmatprep.subr.bf16.mxu1 %v11079_v2  ;;  %v12946_v40 = vadd.f32 %v3170_v18, %v2818_v25  ;;  %v2820_v42 = vadd.f32 %v2819_v30, %v12709_v16  ;;  %v11107_v18 = vld [vmem:[%s18051_s1 + $0x26c] ss:$16 sps:$4 sm:$0xff]   ;;  %v11161_v7 = vld [vmem:[%s18051_s1 + $0x3e8] ss:$16 sps:$4 sm:$0xff]  }
 0x14a   :  { %v2823_v50 = vpop.f32.mrf.mxu0  ;;  %3448 = vmatmul.mubr.bf16.gmra.mxu0 %v11052_v20  ;;  %v11056_v25 = vld [vmem:[%s18050_s0 + $0x80] ss:$28 sps:$4 sm:$0xff]  }
 0x14b   :  { %v3176_v51 = vpop.f32.mrf.mxu1  ;;  %10475 = vmatmul.mubr.msk.bf16.gmra.mxu1 %vm2602_vm0, %v11055_v21  ;;  %v12956_v55 = vadd.f32 %v3172_v33, %v2820_v42  ;;  %v2824_v57 = vadd.f32 %v2823_v50, %v12702_v14  ;;  %3457 = vmatprep.mubr.bf16.mxu0 %v11058_v29  ;;  %v11059_v29 = vld [vmem:[%s18050_s0 + $0x88] ss:$28 sps:$4 sm:$0xff]  }
 0x14c   :  { %3810 = vmatprep.mubr.bf16.mxu1 %v18060_v8  ;;  %v2825_v59 = vpop.f32.mrf.mxu0  ;;  %4116 = vmatpush1.bf16.msra.mxu0 %v11074_v35  ;;  %v11068_v35 = vld [vmem:[%s18050_s0 + $0xbc] ss:$28 sps:$4 sm:$0xff]  }
 0x14d   :  { %v3178_v60 = vpop.f32.mrf.mxu1  ;;  %4469 = vmatpush1.bf16.msra.mxu1 %v11077_v36  ;;  %v12966_v2 = vadd.f32 %v3176_v51, %v2824_v57  ;;  %v2826_v10 = vadd.f32 %v2825_v59, %v12709_v16  ;;  %4117 = vmatprep.subr.bf16.mxu0 %v11090_v46  ;;  %v11102_v46 = vld [vmem:[%s18051_s1 + $0x68] ss:$16 sps:$4 sm:$0xff]   ;;  %v11118_v57 = vld [vmem:[%s18051_s1 + $0x4c] ss:$16 sps:$4 sm:$0xff]  }
 0x14e   :  { %4470 = vmatprep.subr.bf16.mxu1 %v11093_v47  ;;  %v2827_v20 = vpop.f32.mrf.mxu0  ;;  %v11105_v47 = vld [vmem:[%s18051_s1 + $0x268] ss:$16 sps:$4 sm:$0xff]   ;;  %v11121_v59 = vld [vmem:[%s18051_s1 + $0x24c] ss:$16 sps:$4 sm:$0xff]  }
 0x14f   :  { %v3180_v21 = vpop.f32.mrf.mxu1  ;;  %v12981_v30 = vadd.f32 %v3178_v60, %v2826_v10  ;;  %v2828_v33 = vadd.f32 %v2827_v20, %v12702_v14  ;;  %v11116_v20 = vld [vmem:[%s18051_s1 + $0x48] ss:$16 sps:$4 sm:$0xff]  }
 0x150   :  { %v2829_v36 = vpop.f32.mrf.mxu0  ;;  %4118 = vmatpush1.bf16.msra.mxu0 %v11088_v63 }
 0x151   :  { %v3182_v42 = vpop.f32.mrf.mxu1  ;;  %4471 = vmatpush1.bf16.msra.mxu1 %v11091_v1  ;;  %v12993_v50 = vadd.f32 %v3180_v21, %v2828_v33  ;;  %v2830_v51 = vadd.f32 %v2829_v36, %v12709_v16  ;;  %4119 = vmatprep.subr.bf16.mxu0 %v11104_v11  ;;  %v11119_v21 = vld [vmem:[%s18051_s1 + $0x248] ss:$16 sps:$4 sm:$0xff]   ;;  %v11132_v33 = vld [vmem:[%s18051_s1 + $0x2c] ss:$16 sps:$4 sm:$0xff]  }
 0x152   :  { %4472 = vmatprep.subr.bf16.mxu1 %v11107_v18  ;;  %v2833_v60 = vpop.f32.mrf.mxu0  ;;  %3458 = vmatmul.mubr.bf16.gmra.mxu0 %v11056_v25 }
 0x153   :  { %v3186_v63 = vpop.f32.mrf.mxu1  ;;  %10476 = vmatmul.mubr.msk.bf16.gmra.mxu1 %vm2602_vm0, %v11059_v29  ;;  %v13003_v1 = vadd.f32 %v3182_v42, %v2830_v51  ;;  %v2834_v10 = vadd.f32 %v2833_v60, %v12702_v14  ;;  %3467 = vmatprep.mubr.bf16.mxu0 %v11068_v35  ;;  %v11135_v35 = vld [vmem:[%s18051_s1 + $0x22c] ss:$16 sps:$4 sm:$0xff]  }
 0x154   :  { %3820 = vmatprep.mubr.bf16.mxu1 %v18060_v8  ;;  %v2835_v11 = vpop.f32.mrf.mxu0  ;;  %4120 = vmatpush1.bf16.msra.mxu0 %v11102_v46  ;;  %v11066_v46 = vld [vmem:[%s18050_s0 + $0xb8] ss:$28 sps:$4 sm:$0xff]  }
 0x155   :  { %v3188_v18 = vpop.f32.mrf.mxu1  ;;  %4473 = vmatpush1.bf16.msra.mxu1 %v11105_v47  ;;  %v13013_v25 = vadd.f32 %v3186_v63, %v2834_v10  ;;  %v2836_v29 = vadd.f32 %v2835_v11, %v12709_v16  ;;  %4121 = vmatprep.subr.bf16.mxu0 %v11118_v57  ;;  %v11069_v47 = vld [vmem:[%s18050_s0 + $0xc0] ss:$28 sps:$4 sm:$0xff]   ;;  %v11130_v10 = vld [vmem:[%s18051_s1 + $0x28] ss:$16 sps:$4 sm:$0xff]  }
 0x156   :  { %4474 = vmatprep.subr.bf16.mxu1 %v11121_v59  ;;  %v2837_v36 = vpop.f32.mrf.mxu0  ;;  %v11072_v59 = vld [vmem:[%s18050_s0 + $0xf4] ss:$28 sps:$4 sm:$0xff]   ;;  %v11133_v11 = vld [vmem:[%s18051_s1 + $0x228] ss:$16 sps:$4 sm:$0xff]  }
 0x157   :  { %v3190_v42 = vpop.f32.mrf.mxu1  ;;  %v13028_v51 = vadd.f32 %v3188_v18, %v2836_v29  ;;  %v2838_v57 = vadd.f32 %v2837_v36, %v12702_v14  ;;  %v11146_v36 = vld [vmem:[%s18051_s1 + $0xc] ss:$16 sps:$4 sm:$0xff]  }
 0x158   :  { %v2839_v60 = vpop.f32.mrf.mxu0  ;;  %4122 = vmatpush1.bf16.msra.mxu0 %v11116_v20  ;;  %v11149_v20 = vld [vmem:[%s18051_s1 + $0x20c] ss:$16 sps:$4 sm:$0xff]  }
 0x159   :  { %v3192_v63 = vpop.f32.mrf.mxu1  ;;  %4475 = vmatpush1.bf16.msra.mxu1 %v11119_v21  ;;  %v13040_v18 = vadd.f32 %v3190_v42, %v2838_v57  ;;  %v2840_v29 = vadd.f32 %v2839_v60, %v12709_v16  ;;  %4123 = vmatprep.subr.bf16.mxu0 %v11132_v33  ;;  %v11144_v57 = vld [vmem:[%s18051_s1 + $0x8] ss:$16 sps:$4 sm:$0xff]  }
 0x15a   :  { %4476 = vmatprep.subr.bf16.mxu1 %v11135_v35  ;;  %v2843_v21 = vpop.f32.mrf.mxu0  ;;  %3468 = vmatmul.mubr.bf16.gmra.mxu0 %v11066_v46  ;;  %v11147_v46 = vld [vmem:[%s18051_s1 + $0x208] ss:$16 sps:$4 sm:$0xff]  }
 0x15b   :  { %18188 = vst [vmem:[#allocation6_spill] sm:$0xff] %v13040_v18  ;;  %v3196_v12 = vpop.f32.mrf.mxu1  ;;  %10477 = vmatmul.mubr.msk.bf16.gmra.mxu1 %vm2602_vm0, %v11069_v47  ;;  %v13050_v9 = vadd.f32 %v3192_v63, %v2840_v29  ;;  %v2844_v42 = vadd.f32 %v2843_v21, %v12702_v14  ;;  %3477 = vmatprep.mubr.bf16.mxu0 %v11072_v59  ;;  %v11160_v59 = vld [vmem:[%s18051_s1 + $0x1ec] ss:$16 sps:$4 sm:$0xff]  }
 0x15c   :  { %3830 = vmatprep.mubr.bf16.mxu1 %v18060_v8  ;;  %v2845_v33 = vpop.f32.mrf.mxu0  ;;  %4124 = vmatpush1.bf16.msra.mxu0 %v11130_v10  ;;  %v11163_v63 = vld [vmem:[%s18051_s1 + $0x3ec] ss:$16 sps:$4 sm:$0xff]   ;;  %v11158_v8 = vld [vmem:[%s18051_s1 + $0x1e8] ss:$16 sps:$4 sm:$0xff]  }
 0x15d   :  { %18189 = vst [vmem:[#allocation7_spill] sm:$0xff] %v13050_v9  ;;  %v3198_v35 = vpop.f32.mrf.mxu1  ;;  %4477 = vmatpush1.bf16.msra.mxu1 %v11133_v11  ;;  %v13060_v47 = vadd.f32 %v3196_v12, %v2844_v42  ;;  %v2846_v60 = vadd.f32 %v2845_v33, %v12709_v16  ;;  %4125 = vmatprep.subr.bf16.mxu0 %v11146_v36  ;;  %v11070_v29 = vld [vmem:[%s18050_s0 + $0xf0] ss:$28 sps:$4 sm:$0xff]   ;;  %v11073_v12 = vld [vmem:[%s18050_s0 + $0xf8] ss:$28 sps:$4 sm:$0xff]  }
 0x15e   :  { %4478 = vmatprep.subr.bf16.mxu1 %v11149_v20  ;;  %v2847_v10 = vpop.f32.mrf.mxu0  ;;  %v11082_v21 = vld [vmem:[%s18050_s0 + $0x12c] ss:$28 sps:$4 sm:$0xff]  }
 0x15f   :  { %18190 = vst [vmem:[#allocation8_spill] sm:$0xff] %v13060_v47  ;;  %v3200_v11 = vpop.f32.mrf.mxu1  ;;  %v13075_v36 = vadd.f32 %v3198_v35, %v2846_v60  ;;  %v2848_v20 = vadd.f32 %v2847_v10, %v12702_v14  ;;  %v11174_v10 = vld [vmem:[%s18051_s1 + $0x1cc] ss:$16 sps:$4 sm:$0xff]  }
 0x160   :  { %v2849_v42 = vpop.f32.mrf.mxu0  ;;  %4126 = vmatpush1.bf16.msra.mxu0 %v11144_v57  ;;  %v11177_v57 = vld [vmem:[%s18051_s1 + $0x3cc] ss:$16 sps:$4 sm:$0xff]  }
 0x161   :  { %18191 = vst [vmem:[#allocation9_spill] sm:$0xff] %v13075_v36  ;;  %v3202_v33 = vpop.f32.mrf.mxu1  ;;  %4479 = vmatpush1.bf16.msra.mxu1 %v11147_v46  ;;  %v13087_v35 = vadd.f32 %v3200_v11, %v2848_v20  ;;  %v2850_v60 = vadd.f32 %v2849_v42, %v12709_v16  ;;  %4127 = vmatprep.subr.bf16.mxu0 %v11160_v59  ;;  %v18194_v59 = vmov 0   ;;  %v11172_v42 = vld [vmem:[%s18051_s1 + $0x1c8] ss:$16 sps:$4 sm:$0xff]  }
 0x162   :  { %4480 = vmatprep.subr.bf16.mxu1 %v11163_v63  ;;  %v2853_v46 = vpop.f32.mrf.mxu0  ;;  %3478 = vmatmul.mubr.bf16.gmra.mxu0 %v11070_v29  ;;  %v11175_v29 = vld [vmem:[%s18051_s1 + $0x3c8] ss:$16 sps:$4 sm:$0xff]  }
 0x163   :  { %18192 = vst [vmem:[#allocation10_spill] sm:$0xff] %v13087_v35  ;;  %v3206_v36 = vpop.f32.mrf.mxu1  ;;  %10478 = vmatmul.mubr.msk.bf16.gmra.mxu1 %vm2602_vm0, %v11073_v12  ;;  %v13097_v47 = vadd.f32 %v3202_v33, %v2850_v60  ;;  %v2854_v11 = vadd.f32 %v2853_v46, %v12702_v14  ;;  %3487 = vmatprep.mubr.bf16.mxu0 %v11082_v21  ;;  %v11188_v21 = vld [vmem:[%s18051_s1 + $0x1ac] ss:$16 sps:$4 sm:$0xff]   ;;  %v11080_v60 = vld [vmem:[%s18050_s0 + $0x128] ss:$28 sps:$4 sm:$0xff]  }
 0x164   :  { %3840 = vmatprep.mubr.bf16.mxu1 %v18194_v59  ;;  %v2855_v63 = vpop.f32.mrf.mxu0  ;;  %4128 = vmatpush2.bf16.msra.mxu0 %v11158_v8  ;;  %v11083_v46 = vld [vmem:[%s18050_s0 + $0x130] ss:$28 sps:$4 sm:$0xff]  }
 0x165   :  { %18193 = vst [vmem:[#allocation11_spill] sm:$0xff] %v13097_v47  ;;  %v3208_v20 = vpop.f32.mrf.mxu1  ;;  %4481 = vmatpush2.bf16.msra.mxu1 %v11161_v7  ;;  %v13107_v12 = vadd.f32 %v3206_v36, %v2854_v11  ;;  %v2856_v33 = vadd.f32 %v2855_v63, %v12709_v16  ;;  %4129 = vmatprep.subr.bf16.mxu0 %v11174_v10  ;;  %v11086_v10 = vld [vmem:[%s18050_s0 + $0x164] ss:$28 sps:$4 sm:$0xff]   ;;  %v11186_v47 = vld [vmem:[%s18051_s1 + $0x1a8] ss:$16 sps:$4 sm:$0xff]  }
 0x166   :  { %4482 = vmatprep.subr.bf16.mxu1 %v11177_v57  ;;  %v2857_v8 = vpop.f32.mrf.mxu0  ;;  %v11191_v57 = vld [vmem:[%s18051_s1 + $0x3ac] ss:$16 sps:$4 sm:$0xff]  }
 0x167   :  { %18195 = vst [vmem:[#allocation12_spill] sm:$0xff] %v13107_v12  ;;  %v3210_v7 = vpop.f32.mrf.mxu1  ;;  %v13119_v36 = vadd.f32 %v3208_v20, %v2856_v33  ;;  %v2858_v11 = vadd.f32 %v2857_v8, %v12702_v14  ;;  %v11189_v20 = vld [vmem:[%s18051_s1 + $0x3a8] ss:$16 sps:$4 sm:$0xff]  }
 0x168   :  { %v2859_v63 = vpop.f32.mrf.mxu0  ;;  %4130 = vmatpush2.bf16.msra.mxu0 %v11172_v42 }
 0x169   :  { %18196 = vst [vmem:[#allocation13_spill] sm:$0xff] %v13119_v36  ;;  %v3212_v12 = vpop.f32.mrf.mxu1  ;;  %4483 = vmatpush2.bf16.msra.mxu1 %v11175_v29  ;;  %v13134_v33 = vadd.f32 %v3210_v7, %v2858_v11  ;;  %v2860_v8 = vadd.f32 %v2859_v63, %v12709_v16  ;;  %4131 = vmatprep.subr.bf16.mxu0 %v11188_v21 }
 0x16a   :  { %4484 = vmatprep.subr.bf16.mxu1 %v11191_v57  ;;  %v2863_v36 = vpop.f32.mrf.mxu0  ;;  %3488 = vmatmul.mubr.bf16.gmra.mxu0 %v11080_v60  ;;  %v11087_v60 = vld [vmem:[%s18050_s0 + $0x168] ss:$28 sps:$4 sm:$0xff]  }
 0x16b   :  { %v3216_v35 = vpop.f32.mrf.mxu1  ;;  %10479 = vmatmul.mubr.msk.bf16.gmra.mxu1 %vm2602_vm0, %v11083_v46  ;;  %v13138_v42 = vadd.f32 %v3212_v12, %v2860_v8  ;;  %v2864_v29 = vadd.f32 %v2863_v36, %v12702_v14  ;;  %3497 = vmatprep.mubr.bf16.mxu0 %v11086_v10  ;;  %v11084_v12 = vld [vmem:[%s18050_s0 + $0x160] ss:$28 sps:$4 sm:$0xff]  }
 0x16c   :  { %3850 = vmatprep.mubr.bf16.mxu1 %v18194_v59  ;;  %v2865_v9 = vpop.f32.mrf.mxu0  ;;  %4132 = vmatpush2.bf16.msra.mxu0 %v11186_v47  ;;  %v11096_v47 = vld [vmem:[%s18050_s0 + $0x19c] ss:$28 sps:$4 sm:$0xff]  }
 0x16d   :  { %v3218_v18 = vpop.f32.mrf.mxu1  ;;  %4485 = vmatpush2.bf16.msra.mxu1 %v11189_v20  ;;  %v13142_v7 = vadd.f32 %v3216_v35, %v2864_v29  ;;  %v2866_v21 = vadd.f32 %v2865_v9, %v12709_v16 }
 0x16e   :  { %v2867_v11 = vpop.f32.mrf.mxu0 }
 0x16f   :  { %18197 = vst [vmem:[#allocation14_spill] sm:$0xff] %v13142_v7  ;;  %v3220_v57 = vpop.f32.mrf.mxu1  ;;  %v13151_v46 = vadd.f32 %v3218_v18, %v2866_v21  ;;  %v2868_v36 = vadd.f32 %v2867_v11, %v12702_v14 }
 0x170   :  { %v2869_v35 = vpop.f32.mrf.mxu0 }
 0x171   :  { %18198 = vst [vmem:[#allocation15_spill] sm:$0xff] %v13151_v46  ;;  %v3222_v9 = vpop.f32.mrf.mxu1  ;;  %v13157_v10 = vadd.f32 %v3220_v57, %v2868_v36  ;;  %v2870_v63 = vadd.f32 %v2869_v35, %v12709_v16  ;;  %v11200_v36 = vld [vmem:[%s18051_s1 + $0x188] ss:$16 sps:$4 sm:$0xff]  }
 0x172   :  { %v2873_v20 = vpop.f32.mrf.mxu0  ;;  %3498 = vmatmul.mubr.bf16.gmra.mxu0 %v11084_v12  ;;  %v11202_v12 = vld [vmem:[%s18051_s1 + $0x18c] ss:$16 sps:$4 sm:$0xff]  }
 0x173   :  { %18199 = vst [vmem:[#allocation16_spill] sm:$0xff] %v13157_v10  ;;  %v3226_v8 = vpop.f32.mrf.mxu1  ;;  %10480 = vmatmul.mubr.msk.bf16.gmra.mxu1 %vm2602_vm0, %v11087_v60  ;;  %v13161_v29 = vadd.f32 %v3222_v9, %v2870_v63  ;;  %v2874_v18 = vadd.f32 %v2873_v20, %v12702_v14  ;;  %3507 = vmatprep.mubr.bf16.mxu0 %v11096_v47  ;;  %v11094_v47 = vld [vmem:[%s18050_s0 + $0x198] ss:$28 sps:$4 sm:$0xff]   ;;  %v11097_v9 = vld [vmem:[%s18050_s0 + $0x1a0] ss:$28 sps:$4 sm:$0xff]  }
 0x174   :  { %3860 = vmatprep.mubr.bf16.mxu1 %v18194_v59  ;;  %v2875_v21 = vpop.f32.mrf.mxu0  ;;  %4133 = vmatprep.subr.bf16.mxu0 %v11202_v12 }
 0x175   :  { %18200 = vst [vmem:[#allocation17_spill] sm:$0xff] %v13161_v29  ;;  %v3228_v11 = vpop.f32.mrf.mxu1  ;;  %v13165_v46 = vadd.f32 %v3226_v8, %v2874_v18  ;;  %v2876_v57 = vadd.f32 %v2875_v21, %v12709_v16  ;;  %v11100_v8 = vld [vmem:[%s18050_s0 + $0x1d4] ss:$28 sps:$4 sm:$0xff]   ;;  %v11205_v18 = vld [vmem:[%s18051_s1 + $0x38c] ss:$16 sps:$4 sm:$0xff]   ;;  %4134 = vmatpush2.bf16.msra.mxu0 %v11200_v36 }
 0x176   :  { %v2877_v60 = vpop.f32.mrf.mxu0  ;;  %v11203_v29 = vld [vmem:[%s18051_s1 + $0x388] ss:$16 sps:$4 sm:$0xff]   ;;  %4486 = vmatprep.subr.bf16.mxu1 %v11205_v18 }
 0x177   :  { %18201 = vst [vmem:[#allocation18_spill] sm:$0xff] %v13165_v46  ;;  %v3230_v35 = vpop.f32.mrf.mxu1  ;;  %v13180_v63 = vadd.f32 %v3228_v11, %v2876_v57  ;;  %v2878_v20 = vadd.f32 %v2877_v60, %v12702_v14  ;;  %4487 = vmatpush2.bf16.msra.mxu1 %v11203_v29 }
 0x178   :  { %v2879_v21 = vpop.f32.mrf.mxu0 }
 0x179   :  { %18202 = vst [vmem:[#allocation19_spill] sm:$0xff] %v13180_v63  ;;  %v3232_v46 = vpop.f32.mrf.mxu1  ;;  %v13192_v11 = vadd.f32 %v3230_v35, %v2878_v20  ;;  %v2880_v57 = vadd.f32 %v2879_v21, %v12709_v16 }
 0x17a   :  { %v2883_v60 = vpop.f32.mrf.mxu0  ;;  %3508 = vmatmul.mubr.bf16.gmra.mxu0 %v11094_v47  ;;  %v11098_v47 = vld [vmem:[%s18050_s0 + $0x1d0] ss:$28 sps:$4 sm:$0xff]  }
 0x17b   :  { %18203 = vst [vmem:[#allocation20_spill] sm:$0xff] %v13192_v11  ;;  %v3236_v63 = vpop.f32.mrf.mxu1  ;;  %10481 = vmatmul.mubr.msk.bf16.gmra.mxu1 %vm2602_vm0, %v11097_v9  ;;  %v13196_v12 = vadd.f32 %v3232_v46, %v2880_v57  ;;  %v2884_v10 = vadd.f32 %v2883_v60, %v12702_v14  ;;  %3517 = vmatprep.mubr.bf16.mxu0 %v11100_v8  ;;  %v11101_v46 = vld [vmem:[%s18050_s0 + $0x1d8] ss:$28 sps:$4 sm:$0xff]  }
 0x17c   :  { %3870 = vmatprep.mubr.bf16.mxu1 %v18194_v59  ;;  %v2885_v36 = vpop.f32.mrf.mxu0 }
 0x17d   :  { %18204 = vst [vmem:[#allocation21_spill] sm:$0xff] %v13196_v12  ;;  %v3238_v7 = vpop.f32.mrf.mxu1  ;;  %v13200_v35 = vadd.f32 %v3236_v63, %v2884_v10  ;;  %v2886_v20 = vadd.f32 %v2885_v36, %v12709_v16  ;;  %v11110_v10 = vld [vmem:[%s18050_s0 + $0x20c] ss:$28 sps:$4 sm:$0xff]  }
 0x17e   :  { %v2887_v18 = vpop.f32.mrf.mxu0 }
 0x17f   :  { %18205 = vst [vmem:[#allocation22_spill] sm:$0xff] %v13200_v35  ;;  %v3240_v21 = vpop.f32.mrf.mxu1  ;;  %v13209_v9 = vadd.f32 %v3238_v7, %v2886_v20  ;;  %v2888_v8 = vadd.f32 %v2887_v18, %v12702_v14 }
 0x180   :  { %v2889_v29 = vpop.f32.mrf.mxu0 }
 0x181   :  { %18206 = vst [vmem:[#allocation23_spill] sm:$0xff] %v13209_v9  ;;  %v3242_v63 = vpop.f32.mrf.mxu1  ;;  %v13215_v57 = vadd.f32 %v3240_v21, %v2888_v8  ;;  %v2890_v60 = vadd.f32 %v2889_v29, %v12709_v16 }
 0x182   :  { %v2893_v36 = vpop.f32.mrf.mxu0  ;;  %3518 = vmatmul.mubr.bf16.gmra.mxu0 %v11098_v47  ;;  %v11108_v47 = vld [vmem:[%s18050_s0 + $0x208] ss:$28 sps:$4 sm:$0xff]  }
 0x183   :  { %18207 = vst [vmem:[#allocation24_spill] sm:$0xff] %v13215_v57  ;;  %v3246_v35 = vpop.f32.mrf.mxu1  ;;  %10482 = vmatmul.mubr.msk.bf16.gmra.mxu1 %vm2602_vm0, %v11101_v46  ;;  %v13219_v12 = vadd.f32 %v3242_v63, %v2890_v60  ;;  %v2894_v7 = vadd.f32 %v2893_v36, %v12702_v14  ;;  %3527 = vmatprep.mubr.bf16.mxu0 %v11110_v10  ;;  %v11111_v46 = vld [vmem:[%s18050_s0 + $0x210] ss:$28 sps:$4 sm:$0xff]  }
 0x184   :  { %3880 = vmatprep.mubr.bf16.mxu1 %v18194_v59  ;;  %v2895_v20 = vpop.f32.mrf.mxu0  ;;  %v11216_v60 = vld [vmem:[%s18051_s1 + $0x16c] ss:$16 sps:$4 sm:$0xff]  }
 0x185   :  { %18208 = vst [vmem:[#allocation25_spill] sm:$0xff] %v13219_v12  ;;  %v3248_v18 = vpop.f32.mrf.mxu1  ;;  %v13223_v9 = vadd.f32 %v3246_v35, %v2894_v7  ;;  %v2896_v21 = vadd.f32 %v2895_v20, %v12709_v16  ;;  %v11114_v35 = vld [vmem:[%s18050_s0 + $0x244] ss:$28 sps:$4 sm:$0xff]   ;;  %v11214_v20 = vld [vmem:[%s18051_s1 + $0x168] ss:$16 sps:$4 sm:$0xff]   ;;  %4135 = vmatprep.subr.bf16.mxu0 %v11216_v60 }
 0x186   :  { %v2897_v8 = vpop.f32.mrf.mxu0  ;;  %4136 = vmatpush2.bf16.msra.mxu0 %v11214_v20 }
 0x187   :  { %18209 = vst [vmem:[#allocation26_spill] sm:$0xff] %v13223_v9  ;;  %v3250_v29 = vpop.f32.mrf.mxu1  ;;  %v13232_v63 = vadd.f32 %v3248_v18, %v2896_v21  ;;  %v2898_v10 = vadd.f32 %v2897_v8, %v12702_v14  ;;  %v11217_v21 = vld [vmem:[%s18051_s1 + $0x368] ss:$16 sps:$4 sm:$0xff]   ;;  %v11219_v8 = vld [vmem:[%s18051_s1 + $0x36c] ss:$16 sps:$4 sm:$0xff]  }
 0x188   :  { %v2899_v36 = vpop.f32.mrf.mxu0  ;;  %4488 = vmatprep.subr.bf16.mxu1 %v11219_v8 }
 0x189   :  { %18210 = vst [vmem:[#allocation27_spill] sm:$0xff] %v13232_v63  ;;  %v3252_v7 = vpop.f32.mrf.mxu1  ;;  %v13244_v9 = vadd.f32 %v3250_v29, %v2898_v10  ;;  %v2900_v18 = vadd.f32 %v2899_v36, %v12709_v16  ;;  %4489 = vmatpush2.bf16.msra.mxu1 %v11217_v21 }
 0x18a   :  { %v2903_v63 = vpop.f32.mrf.mxu0  ;;  %3528 = vmatmul.mubr.bf16.gmra.mxu0 %v11108_v47 }
 0x18b   :  { %18211 = vst [vmem:[#allocation28_spill] sm:$0xff] %v13244_v9  ;;  %v3256_v12 = vpop.f32.mrf.mxu1  ;;  %10483 = vmatmul.mubr.msk.bf16.gmra.mxu1 %vm2602_vm0, %v11111_v46  ;;  %v13254_v57 = vadd.f32 %v3252_v7, %v2900_v18  ;;  %v2904_v29 = vadd.f32 %v2903_v63, %v12702_v14  ;;  %3537 = vmatprep.mubr.bf16.mxu0 %v11114_v35  ;;  %v11112_v46 = vld [vmem:[%s18050_s0 + $0x240] ss:$28 sps:$4 sm:$0xff]   ;;  %v11115_v63 = vld [vmem:[%s18050_s0 + $0x248] ss:$28 sps:$4 sm:$0xff]  }
 0x18c   :  { %3890 = vmatprep.mubr.bf16.mxu1 %v18194_v59  ;;  %v2905_v10 = vpop.f32.mrf.mxu0 }
 0x18d   :  { %18212 = vst [vmem:[#allocation29_spill] sm:$0xff] %v13254_v57  ;;  %v3258_v60 = vpop.f32.mrf.mxu1  ;;  %v13258_v36 = vadd.f32 %v3256_v12, %v2904_v29  ;;  %v2906_v9 = vadd.f32 %v2905_v10, %v12709_v16  ;;  %v11124_v12 = vld [vmem:[%s18050_s0 + $0x27c] ss:$28 sps:$4 sm:$0xff]  }
 0x18e   :  { %v2907_v11 = vpop.f32.mrf.mxu0 }
 0x18f   :  { %18213 = vst [vmem:[#allocation30_spill] sm:$0xff] %v13258_v36  ;;  %v3260_v47 = vpop.f32.mrf.mxu1  ;;  %v13267_v35 = vadd.f32 %v3258_v60, %v2906_v9  ;;  %v2908_v7 = vadd.f32 %v2907_v11, %v12702_v14 }
 0x190   :  { %v2909_v20 = vpop.f32.mrf.mxu0 }
 0x191   :  { %18214 = vst [vmem:[#allocation31_spill] sm:$0xff] %v13267_v35  ;;  %v3262_v18 = vpop.f32.mrf.mxu1  ;;  %v13273_v21 = vadd.f32 %v3260_v47, %v2908_v7  ;;  %v2910_v8 = vadd.f32 %v2909_v20, %v12709_v16 }
 0x192   :  { %v2913_v29 = vpop.f32.mrf.mxu0  ;;  %3538 = vmatmul.mubr.bf16.gmra.mxu0 %v11112_v46  ;;  %v11122_v46 = vld [vmem:[%s18050_s0 + $0x278] ss:$28 sps:$4 sm:$0xff]  }
 0x193   :  { %18215 = vst [vmem:[#allocation32_spill] sm:$0xff] %v13273_v21  ;;  %v3266_v10 = vpop.f32.mrf.mxu1  ;;  %10484 = vmatmul.mubr.msk.bf16.gmra.mxu1 %vm2602_vm0, %v11115_v63  ;;  %v13277_v36 = vadd.f32 %v3262_v18, %v2910_v8  ;;  %v2914_v9 = vadd.f32 %v2913_v29, %v12702_v14  ;;  %3547 = vmatprep.mubr.bf16.mxu0 %v11124_v12  ;;  %v11125_v63 = vld [vmem:[%s18050_s0 + $0x280] ss:$28 sps:$4 sm:$0xff]   ;;  %v11128_v8 = vld [vmem:[%s18050_s0 + $0x2b4] ss:$28 sps:$4 sm:$0xff]  }
 0x194   :  { %3900 = vmatprep.mubr.bf16.mxu1 %v18194_v59  ;;  %v2915_v11 = vpop.f32.mrf.mxu0  ;;  %v11230_v29 = vld [vmem:[%s18051_s1 + $0x14c] ss:$16 sps:$4 sm:$0xff]  }
 0x195   :  { %18216 = vst [vmem:[#allocation33_spill] sm:$0xff] %v13277_v36  ;;  %v3268_v60 = vpop.f32.mrf.mxu1  ;;  %v13281_v35 = vadd.f32 %v3266_v10, %v2914_v9  ;;  %v2916_v47 = vadd.f32 %v2915_v11, %v12709_v16  ;;  %v11228_v11 = vld [vmem:[%s18051_s1 + $0x148] ss:$16 sps:$4 sm:$0xff]   ;;  %4137 = vmatprep.subr.bf16.mxu0 %v11230_v29 }
 0x196   :  { %v2917_v7 = vpop.f32.mrf.mxu0  ;;  %4138 = vmatpush2.bf16.msra.mxu0 %v11228_v11 }
 0x197   :  { %18217 = vst [vmem:[#allocation34_spill] sm:$0xff] %v13281_v35  ;;  %v3270_v20 = vpop.f32.mrf.mxu1  ;;  %v13290_v18 = vadd.f32 %v3268_v60, %v2916_v47  ;;  %v2918_v12 = vadd.f32 %v2917_v7, %v12702_v14  ;;  %v11231_v47 = vld [vmem:[%s18051_s1 + $0x348] ss:$16 sps:$4 sm:$0xff]   ;;  %v11233_v7 = vld [vmem:[%s18051_s1 + $0x34c] ss:$16 sps:$4 sm:$0xff]  }
 0x198   :  { %v2919_v10 = vpop.f32.mrf.mxu0  ;;  %4490 = vmatprep.subr.bf16.mxu1 %v11233_v7 }
 0x199   :  { %18218 = vst [vmem:[#allocation35_spill] sm:$0xff] %v13290_v18  ;;  %v3272_v9 = vpop.f32.mrf.mxu1  ;;  %v13302_v35 = vadd.f32 %v3270_v20, %v2918_v12  ;;  %v2920_v60 = vadd.f32 %v2919_v10, %v12709_v16  ;;  %4491 = vmatpush2.bf16.msra.mxu1 %v11231_v47 }
 0x19a   :  { %v2923_v18 = vpop.f32.mrf.mxu0  ;;  %3548 = vmatmul.mubr.bf16.gmra.mxu0 %v11122_v46 }
 0x19b   :  { %18219 = vst [vmem:[#allocation36_spill] sm:$0xff] %v13302_v35  ;;  %v3276_v36 = vpop.f32.mrf.mxu1  ;;  %10485 = vmatmul.mubr.msk.bf16.gmra.mxu1 %vm2602_vm0, %v11125_v63  ;;  %v13312_v21 = vadd.f32 %v3272_v9, %v2920_v60  ;;  %v2924_v20 = vadd.f32 %v2923_v18, %v12702_v14  ;;  %3557 = vmatprep.mubr.bf16.mxu0 %v11128_v8  ;;  %v11126_v63 = vld [vmem:[%s18050_s0 + $0x2b0] ss:$28 sps:$4 sm:$0xff]   ;;  %v11129_v18 = vld [vmem:[%s18050_s0 + $0x2b8] ss:$28 sps:$4 sm:$0xff]  }
 0x19c   :  { %3910 = vmatprep.mubr.bf16.mxu1 %v18194_v59  ;;  %v2925_v12 = vpop.f32.mrf.mxu0 }
 0x19d   :  { %18220 = vst [vmem:[#allocation37_spill] sm:$0xff] %v13312_v21  ;;  %v3278_v29 = vpop.f32.mrf.mxu1  ;;  %v13316_v10 = vadd.f32 %v3276_v36, %v2924_v20  ;;  %v2926_v35 = vadd.f32 %v2925_v12, %v12709_v16  ;;  %v11138_v36 = vld [vmem:[%s18050_s0 + $0x2ec] ss:$28 sps:$4 sm:$0xff]  }
 0x19e   :  { %v2927_v57 = vpop.f32.mrf.mxu0 }
 0x19f   :  { %18221 = vst [vmem:[#allocation38_spill] sm:$0xff] %v13316_v10  ;;  %v3280_v46 = vpop.f32.mrf.mxu1  ;;  %v13325_v8 = vadd.f32 %v3278_v29, %v2926_v35  ;;  %v2928_v9 = vadd.f32 %v2927_v57, %v12702_v14 }
 0x1a0   :  { %v2929_v11 = vpop.f32.mrf.mxu0 }
 0x1a1   :  { %18222 = vst [vmem:[#allocation39_spill] sm:$0xff] %v13325_v8  ;;  %v3282_v60 = vpop.f32.mrf.mxu1  ;;  %v13331_v47 = vadd.f32 %v3280_v46, %v2928_v9  ;;  %v2930_v7 = vadd.f32 %v2929_v11, %v12709_v16 }
 0x1a2   :  { %v2933_v20 = vpop.f32.mrf.mxu0  ;;  %3558 = vmatmul.mubr.bf16.gmra.mxu0 %v11126_v63  ;;  %v11136_v63 = vld [vmem:[%s18050_s0 + $0x2e8] ss:$28 sps:$4 sm:$0xff]  }
 0x1a3   :  { %18223 = vst [vmem:[#allocation40_spill] sm:$0xff] %v13331_v47  ;;  %v3286_v12 = vpop.f32.mrf.mxu1  ;;  %10486 = vmatmul.mubr.msk.bf16.gmra.mxu1 %vm2602_vm0, %v11129_v18  ;;  %v13335_v10 = vadd.f32 %v3282_v60, %v2930_v7  ;;  %v2934_v35 = vadd.f32 %v2933_v20, %v12702_v14  ;;  %3567 = vmatprep.mubr.bf16.mxu0 %v11138_v36  ;;  %v11139_v18 = vld [vmem:[%s18050_s0 + $0x2f0] ss:$28 sps:$4 sm:$0xff]   ;;  %v11142_v7 = vld [vmem:[%s18050_s0 + $0x324] ss:$28 sps:$4 sm:$0xff]  }
 0x1a4   :  { %3920 = vmatprep.mubr.bf16.mxu1 %v18194_v59  ;;  %v2935_v57 = vpop.f32.mrf.mxu0  ;;  %v11244_v20 = vld [vmem:[%s18051_s1 + $0x12c] ss:$16 sps:$4 sm:$0xff]  }
 0x1a5   :  { %18224 = vst [vmem:[#allocation41_spill] sm:$0xff] %v13335_v10  ;;  %v3288_v29 = vpop.f32.mrf.mxu1  ;;  %v13339_v8 = vadd.f32 %v3286_v12, %v2934_v35  ;;  %v2936_v46 = vadd.f32 %v2935_v57, %v12709_v16  ;;  %v11242_v57 = vld [vmem:[%s18051_s1 + $0x128] ss:$16 sps:$4 sm:$0xff]   ;;  %4139 = vmatprep.subr.bf16.mxu0 %v11244_v20 }
 0x1a6   :  { %v2937_v9 = vpop.f32.mrf.mxu0  ;;  %4140 = vmatpush2.bf16.msra.mxu0 %v11242_v57 }
 0x1a7   :  { %18225 = vst [vmem:[#allocation42_spill] sm:$0xff] %v13339_v8  ;;  %v3290_v11 = vpop.f32.mrf.mxu1  ;;  %v13348_v60 = vadd.f32 %v3288_v29, %v2936_v46  ;;  %v2938_v36 = vadd.f32 %v2937_v9, %v12702_v14  ;;  %v11245_v46 = vld [vmem:[%s18051_s1 + $0x328] ss:$16 sps:$4 sm:$0xff]   ;;  %v11247_v9 = vld [vmem:[%s18051_s1 + $0x32c] ss:$16 sps:$4 sm:$0xff]  }
 0x1a8   :  { %v2939_v12 = vpop.f32.mrf.mxu0  ;;  %4492 = vmatprep.subr.bf16.mxu1 %v11247_v9 }
 0x1a9   :  { %18226 = vst [vmem:[#allocation43_spill] sm:$0xff] %v13348_v60  ;;  %v3292_v35 = vpop.f32.mrf.mxu1  ;;  %v13360_v8 = vadd.f32 %v3290_v11, %v2938_v36  ;;  %v2940_v29 = vadd.f32 %v2939_v12, %v12709_v16  ;;  %4493 = vmatpush2.bf16.msra.mxu1 %v11245_v46 }
 0x1aa   :  { %v2943_v60 = vpop.f32.mrf.mxu0  ;;  %3568 = vmatmul.mubr.bf16.gmra.mxu0 %v11136_v63 }
 0x1ab   :  { %18227 = vst [vmem:[#allocation44_spill] sm:$0xff] %v13360_v8  ;;  %v3296_v10 = vpop.f32.mrf.mxu1  ;;  %10487 = vmatmul.mubr.msk.bf16.gmra.mxu1 %vm2602_vm0, %v11139_v18  ;;  %v13370_v47 = vadd.f32 %v3292_v35, %v2940_v29  ;;  %v2944_v11 = vadd.f32 %v2943_v60, %v12702_v14  ;;  %3577 = vmatprep.mubr.bf16.mxu0 %v11142_v7  ;;  %v11140_v18 = vld [vmem:[%s18050_s0 + $0x320] ss:$28 sps:$4 sm:$0xff]   ;;  %v11143_v60 = vld [vmem:[%s18050_s0 + $0x328] ss:$28 sps:$4 sm:$0xff]  }
 0x1ac   :  { %3930 = vmatprep.mubr.bf16.mxu1 %v18194_v59  ;;  %v2945_v36 = vpop.f32.mrf.mxu0 }
 0x1ad   :  { %18228 = vst [vmem:[#allocation45_spill] sm:$0xff] %v13370_v47  ;;  %v3298_v20 = vpop.f32.mrf.mxu1  ;;  %v13374_v12 = vadd.f32 %v3296_v10, %v2944_v11  ;;  %v2946_v8 = vadd.f32 %v2945_v36, %v12709_v16  ;;  %v11152_v10 = vld [vmem:[%s18050_s0 + $0x35c] ss:$28 sps:$4 sm:$0xff]  }
 0x1ae   :  { %v2947_v21 = vpop.f32.mrf.mxu0 }
 0x1af   :  { %18229 = vst [vmem:[#allocation46_spill] sm:$0xff] %v13374_v12  ;;  %v3300_v63 = vpop.f32.mrf.mxu1  ;;  %v13383_v7 = vadd.f32 %v3298_v20, %v2946_v8  ;;  %v2948_v35 = vadd.f32 %v2947_v21, %v12702_v14 }
 0x1b0   :  { %v2949_v57 = vpop.f32.mrf.mxu0 }
 0x1b1   :  { %18230 = vst [vmem:[#allocation47_spill] sm:$0xff] %v13383_v7  ;;  %v3302_v29 = vpop.f32.mrf.mxu1  ;;  %v13389_v46 = vadd.f32 %v3300_v63, %v2948_v35  ;;  %v2950_v9 = vadd.f32 %v2949_v57, %v12709_v16 }
 0x1b2   :  { %v2953_v11 = vpop.f32.mrf.mxu0  ;;  %3578 = vmatmul.mubr.bf16.gmra.mxu0 %v11140_v18  ;;  %v11150_v18 = vld [vmem:[%s18050_s0 + $0x358] ss:$28 sps:$4 sm:$0xff]  }
 0x1b3   :  { %18231 = vst [vmem:[#allocation48_spill] sm:$0xff] %v13389_v46  ;;  %v3306_v36 = vpop.f32.mrf.mxu1  ;;  %10488 = vmatmul.mubr.msk.bf16.gmra.mxu1 %vm2602_vm0, %v11143_v60  ;;  %v13393_v12 = vadd.f32 %v3302_v29, %v2950_v9  ;;  %v2954_v8 = vadd.f32 %v2953_v11, %v12702_v14  ;;  %3587 = vmatprep.mubr.bf16.mxu0 %v11152_v10  ;;  %v11153_v60 = vld [vmem:[%s18050_s0 + $0x360] ss:$28 sps:$4 sm:$0xff]   ;;  %v11156_v9 = vld [vmem:[%s18050_s0 + $0x394] ss:$28 sps:$4 sm:$0xff]  }
 0x1b4   :  { %3940 = vmatprep.mubr.bf16.mxu1 %v18194_v59  ;;  %v2955_v21 = vpop.f32.mrf.mxu0  ;;  %v11258_v11 = vld [vmem:[%s18051_s1 + $0x10c] ss:$16 sps:$4 sm:$0xff]  }
 0x1b5   :  { %18232 = vst [vmem:[#allocation49_spill] sm:$0xff] %v13393_v12  ;;  %v3308_v20 = vpop.f32.mrf.mxu1  ;;  %v13397_v7 = vadd.f32 %v3306_v36, %v2954_v8  ;;  %v2956_v63 = vadd.f32 %v2955_v21, %v12709_v16  ;;  %v11256_v21 = vld [vmem:[%s18051_s1 + $0x108] ss:$16 sps:$4 sm:$0xff]   ;;  %4141 = vmatprep.subr.bf16.mxu0 %v11258_v11 }
 0x1b6   :  { %v2957_v35 = vpop.f32.mrf.mxu0  ;;  %4142 = vmatpush2.bf16.msra.mxu0 %v11256_v21 }
 0x1b7   :  { %18233 = vst [vmem:[#allocation50_spill] sm:$0xff] %v13397_v7  ;;  %v3310_v57 = vpop.f32.mrf.mxu1  ;;  %v13406_v29 = vadd.f32 %v3308_v20, %v2956_v63  ;;  %v2958_v10 = vadd.f32 %v2957_v35, %v12702_v14  ;;  %v11259_v63 = vld [vmem:[%s18051_s1 + $0x308] ss:$16 sps:$4 sm:$0xff]   ;;  %v11261_v35 = vld [vmem:[%s18051_s1 + $0x30c] ss:$16 sps:$4 sm:$0xff]  }
 0x1b8   :  { %v2959_v36 = vpop.f32.mrf.mxu0  ;;  %4494 = vmatprep.subr.bf16.mxu1 %v11261_v35 }
 0x1b9   :  { %18234 = vst [vmem:[#allocation51_spill] sm:$0xff] %v13406_v29  ;;  %v3312_v8 = vpop.f32.mrf.mxu1  ;;  %v13418_v7 = vadd.f32 %v3310_v57, %v2958_v10  ;;  %v2960_v20 = vadd.f32 %v2959_v36, %v12709_v16  ;;  %4495 = vmatpush2.bf16.msra.mxu1 %v11259_v63 }
 0x1ba   :  { %v2963_v29 = vpop.f32.mrf.mxu0  ;;  %3588 = vmatmul.mubr.bf16.gmra.mxu0 %v11150_v18 }
 0x1bb   :  { %18235 = vst [vmem:[#allocation52_spill] sm:$0xff] %v13418_v7  ;;  %v3316_v12 = vpop.f32.mrf.mxu1  ;;  %10489 = vmatmul.mubr.msk.bf16.gmra.mxu1 %vm2602_vm0, %v11153_v60  ;;  %v13428_v46 = vadd.f32 %v3312_v8, %v2960_v20  ;;  %v2964_v57 = vadd.f32 %v2963_v29, %v12702_v14  ;;  %3597 = vmatprep.mubr.bf16.mxu0 %v11156_v9  ;;  %v11154_v60 = vld [vmem:[%s18050_s0 + $0x390] ss:$28 sps:$4 sm:$0xff]   ;;  %v11157_v29 = vld [vmem:[%s18050_s0 + $0x398] ss:$28 sps:$4 sm:$0xff]  }
 0x1bc   :  { %3950 = vmatprep.mubr.bf16.mxu1 %v18194_v59  ;;  %v2965_v10 = vpop.f32.mrf.mxu0 }
 0x1bd   :  { %v3318_v11 = vpop.f32.mrf.mxu1  ;;  %v13432_v36 = vadd.f32 %v3316_v12, %v2964_v57  ;;  %v2966_v7 = vadd.f32 %v2965_v10, %v12709_v16  ;;  %v11166_v12 = vld [vmem:[%s18050_s0 + $0x3cc] ss:$28 sps:$4 sm:$0xff]  }
 0x1be   :  { %v2967_v47 = vpop.f32.mrf.mxu0 }
 0x1bf   :  { %18236 = vst [vmem:[#allocation53_spill] sm:$0xff] %v13432_v36  ;;  %v3320_v18 = vpop.f32.mrf.mxu1  ;;  %v13441_v9 = vadd.f32 %v3318_v11, %v2966_v7  ;;  %v2968_v8 = vadd.f32 %v2967_v47, %v12702_v14 }
 0x1c0   :  { %v2969_v21 = vpop.f32.mrf.mxu0 }
 0x1c1   :  { %18237 = vst [vmem:[#allocation54_spill] sm:$0xff] %v13441_v9  ;;  %v3322_v20 = vpop.f32.mrf.mxu1  ;;  %v13447_v63 = vadd.f32 %v3320_v18, %v2968_v8  ;;  %v2970_v35 = vadd.f32 %v2969_v21, %v12709_v16 }
 0x1c2   :  { %v2973_v57 = vpop.f32.mrf.mxu0  ;;  %3598 = vmatmul.mubr.bf16.gmra.mxu0 %v11154_v60  ;;  %v11164_v60 = vld [vmem:[%s18050_s0 + $0x3c8] ss:$28 sps:$4 sm:$0xff]  }
 0x1c3   :  { %18238 = vst [vmem:[#allocation55_spill] sm:$0xff] %v13447_v63  ;;  %v3326_v10 = vpop.f32.mrf.mxu1  ;;  %10490 = vmatmul.mubr.msk.bf16.gmra.mxu1 %vm2602_vm0, %v11157_v29  ;;  %v13451_v36 = vadd.f32 %v3322_v20, %v2970_v35  ;;  %v2974_v7 = vadd.f32 %v2973_v57, %v12702_v14  ;;  %3607 = vmatprep.mubr.bf16.mxu0 %v11166_v12  ;;  %v11167_v29 = vld [vmem:[%s18050_s0 + $0x3d0] ss:$28 sps:$4 sm:$0xff]   ;;  %v11170_v35 = vld [vmem:[%s18050_s0 + $0x404] ss:$28 sps:$4 sm:$0xff]  }
 0x1c4   :  { %3960 = vmatprep.mubr.bf16.mxu1 %v18194_v59  ;;  %v2975_v47 = vpop.f32.mrf.mxu0  ;;  %v11268_v57 = vld [vmem:[%s18051_s1 + $0x4ec] ss:$16 sps:$4 sm:$0xff]  }
 0x1c5   :  { %18239 = vst [vmem:[#allocation56_spill] sm:$0xff] %v13451_v36  ;;  %v3328_v11 = vpop.f32.mrf.mxu1  ;;  %v13455_v9 = vadd.f32 %v3326_v10, %v2974_v7  ;;  %v2976_v18 = vadd.f32 %v2975_v47, %v12709_v16  ;;  %4817 = vmatprep.subr.bf16.mxu0 %v11268_v57 }
 0x1c6   :  { %v2977_v8 = vpop.f32.mrf.mxu0 }
 0x1c7   :  { %18240 = vst [vmem:[#allocation57_spill] sm:$0xff] %v13455_v9  ;;  %v3330_v21 = vpop.f32.mrf.mxu1  ;;  %v13464_v20 = vadd.f32 %v3328_v11, %v2976_v18  ;;  %v2978_v12 = vadd.f32 %v2977_v8, %v12702_v14  ;;  %v11271_v11 = vld [vmem:[%s18051_s1 + $0x60c] ss:$16 sps:$4 sm:$0xff]  }
 0x1c8   :  { %v2979_v10 = vpop.f32.mrf.mxu0  ;;  %5184 = vmatprep.subr.bf16.mxu1 %v11271_v11 }
 0x1c9   :  { %18241 = vst [vmem:[#allocation58_spill] sm:$0xff] %v13464_v20  ;;  %v3332_v7 = vpop.f32.mrf.mxu1  ;;  %v13473_v47 = vadd.f32 %v3330_v21, %v2978_v12  ;;  %v2980_v9 = vadd.f32 %v2979_v10, %v12709_v16 }
 0x1ca   :  { %v2983_v18 = vpop.f32.mrf.mxu0  ;;  %3608 = vmatmul.mubr.bf16.gmra.mxu0 %v11164_v60  ;;  %v11168_v60 = vld [vmem:[%s18050_s0 + $0x400] ss:$28 sps:$4 sm:$0xff]  }
 0x1cb   :  { %18242 = vst [vmem:[#allocation59_spill] sm:$0xff] %v13473_v47  ;;  %v3336_v8 = vpop.f32.mrf.mxu1  ;;  %10491 = vmatmul.mubr.msk.bf16.gmra.mxu1 %vm2602_vm0, %v11167_v29  ;;  %v13480_v20 = vadd.f32 %v3332_v7, %v2980_v9  ;;  %v2984_v36 = vadd.f32 %v2983_v18, %v12702_v14  ;;  %3617 = vmatprep.mubr.bf16.mxu0 %v11170_v35  ;;  %v11171_v9 = vld [vmem:[%s18050_s0 + $0x408] ss:$28 sps:$4 sm:$0xff]  }
 0x1cc   :  { %3970 = vmatprep.mubr.bf16.mxu1 %v18194_v59  ;;  %v2985_v21 = vpop.f32.mrf.mxu0 }
 0x1cd   :  { %18243 = vst [vmem:[#allocation60_spill] sm:$0xff] %v13480_v20  ;;  %v3338_v12 = vpop.f32.mrf.mxu1  ;;  %v13484_v57 = vadd.f32 %v3336_v8, %v2984_v36  ;;  %v2986_v10 = vadd.f32 %v2985_v21, %v12709_v16  ;;  %v11180_v36 = vld [vmem:[%s18050_s0 + $0x43c] ss:$28 sps:$4 sm:$0xff]  }
 0x1ce   :  { %v2987_v47 = vpop.f32.mrf.mxu0 }
 0x1cf   :  { %18244 = vst [vmem:[#allocation61_spill] sm:$0xff] %v13484_v57  ;;  %v3340_v63 = vpop.f32.mrf.mxu1  ;;  %v13493_v29 = vadd.f32 %v3338_v12, %v2986_v10  ;;  %v2988_v35 = vadd.f32 %v2987_v47, %v12702_v14 }
 0x1d0   :  { %v2989_v7 = vpop.f32.mrf.mxu0 }
 0x1d1   :  { %18245 = vst [vmem:[#allocation62_spill] sm:$0xff] %v13493_v29  ;;  %v3342_v11 = vpop.f32.mrf.mxu1  ;;  %v13499_v18 = vadd.f32 %v3340_v63, %v2988_v35  ;;  %v2990_v8 = vadd.f32 %v2989_v7, %v12709_v16 }
 0x1d2   :  { %v2993_v21 = vpop.f32.mrf.mxu0  ;;  %3618 = vmatmul.mubr.bf16.gmra.mxu0 %v11168_v60  ;;  %v11178_v60 = vld [vmem:[%s18050_s0 + $0x438] ss:$28 sps:$4 sm:$0xff]  }
 0x1d3   :  { %18246 = vst [vmem:[#allocation63_spill] sm:$0xff] %v13499_v18  ;;  %v3346_v57 = vpop.f32.mrf.mxu1  ;;  %10492 = vmatmul.mubr.msk.bf16.gmra.mxu1 %vm2602_vm0, %v11171_v9  ;;  %v13503_v20 = vadd.f32 %v3342_v11, %v2990_v8  ;;  %v2994_v12 = vadd.f32 %v2993_v21, %v12702_v14  ;;  %3627 = vmatprep.mubr.bf16.mxu0 %v11180_v36  ;;  %v11181_v9 = vld [vmem:[%s18050_s0 + $0x440] ss:$28 sps:$4 sm:$0xff]  }
 0x1d4   :  { %3980 = vmatprep.mubr.bf16.mxu1 %v18194_v59  ;;  %v2995_v47 = vpop.f32.mrf.mxu0 }
 0x1d5   :  { %18247 = vst [vmem:[#allocation64_spill] sm:$0xff] %v13503_v20  ;;  %v3348_v10 = vpop.f32.mrf.mxu1  ;;  %v13507_v29 = vadd.f32 %v3346_v57, %v2994_v12  ;;  %v2996_v63 = vadd.f32 %v2995_v47, %v12709_v16  ;;  %v11184_v57 = vld [vmem:[%s18050_s0 + $0x474] ss:$28 sps:$4 sm:$0xff]  }
 0x1d6   :  { %v2997_v35 = vpop.f32.mrf.mxu0 }
 0x1d7   :  { %18248 = vst [vmem:[#allocation65_spill] sm:$0xff] %v13507_v29  ;;  %v3350_v7 = vpop.f32.mrf.mxu1  ;;  %v13516_v11 = vadd.f32 %v3348_v10, %v2996_v63  ;;  %v2998_v36 = vadd.f32 %v2997_v35, %v12702_v14 }
 0x1d8   :  { %v2999_v8 = vpop.f32.mrf.mxu0 }
 0x1d9   :  { %18249 = vst [vmem:[#allocation66_spill] sm:$0xff] %v13516_v11  ;;  %v3352_v21 = vpop.f32.mrf.mxu1  ;;  %v13522_v12 = vadd.f32 %v3350_v7, %v2998_v36  ;;  %v3000_v47 = vadd.f32 %v2999_v8, %v12709_v16 }
 0x1da   :  { %v3003_v29 = vpop.f32.mrf.mxu0  ;;  %3628 = vmatmul.mubr.bf16.gmra.mxu0 %v11178_v60  ;;  %v11182_v60 = vld [vmem:[%s18050_s0 + $0x470] ss:$28 sps:$4 sm:$0xff]  }
 0x1db   :  { %18250 = vst [vmem:[#allocation67_spill] sm:$0xff] %v13522_v12  ;;  %v3356_v20 = vpop.f32.mrf.mxu1  ;;  %10493 = vmatmul.mubr.msk.bf16.gmra.mxu1 %vm2602_vm0, %v11181_v9  ;;  %v13526_v18 = vadd.f32 %v3352_v21, %v3000_v47  ;;  %v3004_v10 = vadd.f32 %v3003_v29, %v12702_v14  ;;  %3637 = vmatprep.mubr.bf16.mxu0 %v11184_v57  ;;  %v11185_v9 = vld [vmem:[%s18050_s0 + $0x478] ss:$28 sps:$4 sm:$0xff]  }
 0x1dc   :  { %3990 = vmatprep.mubr.bf16.mxu1 %v18194_v59  ;;  %v3005_v63 = vpop.f32.mrf.mxu0 }
 0x1dd   :  { %18251 = vst [vmem:[#allocation68_spill] sm:$0xff] %v13526_v18  ;;  %v3358_v35 = vpop.f32.mrf.mxu1  ;;  %v13530_v11 = vadd.f32 %v3356_v20, %v3004_v10  ;;  %v3006_v7 = vadd.f32 %v3005_v63, %v12709_v16  ;;  %v11194_v20 = vld [vmem:[%s18050_s0 + $0x4ac] ss:$28 sps:$4 sm:$0xff]  }
 0x1de   :  { %v3007_v36 = vpop.f32.mrf.mxu0 }
 0x1df   :  { %18252 = vst [vmem:[#allocation69_spill] sm:$0xff] %v13530_v11  ;;  %v3360_v8 = vpop.f32.mrf.mxu1  ;;  %v13539_v29 = vadd.f32 %v3358_v35, %v3006_v7  ;;  %v3008_v57 = vadd.f32 %v3007_v36, %v12702_v14 }
 0x1e0   :  { %v3009_v21 = vpop.f32.mrf.mxu0 }
 0x1e1   :  { %18253 = vst [vmem:[#allocation70_spill] sm:$0xff] %v13539_v29  ;;  %v3362_v47 = vpop.f32.mrf.mxu1  ;;  %v13545_v10 = vadd.f32 %v3360_v8, %v3008_v57  ;;  %v3010_v63 = vadd.f32 %v3009_v21, %v12709_v16 }
 0x1e2   :  { %v3013_v11 = vpop.f32.mrf.mxu0  ;;  %3638 = vmatmul.mubr.bf16.gmra.mxu0 %v11182_v60  ;;  %v11192_v60 = vld [vmem:[%s18050_s0 + $0x4a8] ss:$28 sps:$4 sm:$0xff]  }
 0x1e3   :  { %18254 = vst [vmem:[#allocation71_spill] sm:$0xff] %v13545_v10  ;;  %v3366_v18 = vpop.f32.mrf.mxu1  ;;  %10494 = vmatmul.mubr.msk.bf16.gmra.mxu1 %vm2602_vm0, %v11185_v9  ;;  %v13549_v12 = vadd.f32 %v3362_v47, %v3010_v63  ;;  %v3014_v35 = vadd.f32 %v3013_v11, %v12702_v14  ;;  %3647 = vmatprep.mubr.bf16.mxu0 %v11194_v20  ;;  %v11195_v9 = vld [vmem:[%s18050_s0 + $0x4b0] ss:$28 sps:$4 sm:$0xff]  }
 0x1e4   :  { %4000 = vmatprep.mubr.bf16.mxu1 %v18194_v59  ;;  %v3015_v7 = vpop.f32.mrf.mxu0 }
 0x1e5   :  { %18255 = vst [vmem:[#allocation72_spill] sm:$0xff] %v13549_v12  ;;  %v3368_v36 = vpop.f32.mrf.mxu1  ;;  %v13553_v29 = vadd.f32 %v3366_v18, %v3014_v35  ;;  %v3016_v8 = vadd.f32 %v3015_v7, %v12709_v16  ;;  %v11198_v18 = vld [vmem:[%s18050_s0 + $0x4e4] ss:$28 sps:$4 sm:$0xff]  }
 0x1e6   :  { %v3017_v57 = vpop.f32.mrf.mxu0 }
 0x1e7   :  { %18256 = vst [vmem:[#allocation73_spill] sm:$0xff] %v13553_v29  ;;  %v3370_v21 = vpop.f32.mrf.mxu1  ;;  %v13562_v11 = vadd.f32 %v3368_v36, %v3016_v8  ;;  %v3018_v20 = vadd.f32 %v3017_v57, %v12702_v14 }
 0x1e8   :  { %v3019_v47 = vpop.f32.mrf.mxu0 }
 0x1e9   :  { %18257 = vst [vmem:[#allocation74_spill] sm:$0xff] %v13562_v11  ;;  %v3372_v63 = vpop.f32.mrf.mxu1  ;;  %v13568_v35 = vadd.f32 %v3370_v21, %v3018_v20  ;;  %v3020_v7 = vadd.f32 %v3019_v47, %v12709_v16 }
 0x1ea   :  { %v3023_v29 = vpop.f32.mrf.mxu0  ;;  %3648 = vmatmul.mubr.bf16.gmra.mxu0 %v11192_v60  ;;  %v11196_v60 = vld [vmem:[%s18050_s0 + $0x4e0] ss:$28 sps:$4 sm:$0xff]  }
 0x1eb   :  { %18258 = vst [vmem:[#allocation75_spill] sm:$0xff] %v13568_v35  ;;  %v3376_v12 = vpop.f32.mrf.mxu1  ;;  %10495 = vmatmul.mubr.msk.bf16.gmra.mxu1 %vm2602_vm0, %v11195_v9  ;;  %v13572_v10 = vadd.f32 %v3372_v63, %v3020_v7  ;;  %v3024_v36 = vadd.f32 %v3023_v29, %v12702_v14  ;;  %3657 = vmatprep.mubr.bf16.mxu0 %v11198_v18  ;;  %v11199_v9 = vld [vmem:[%s18050_s0 + $0x4e8] ss:$28 sps:$4 sm:$0xff]  }
 0x1ec   :  { %4010 = vmatprep.mubr.bf16.mxu1 %v18194_v59  ;;  %v3025_v8 = vpop.f32.mrf.mxu0 }
 0x1ed   :  { %18259 = vst [vmem:[#allocation76_spill] sm:$0xff] %v13572_v10  ;;  %v3378_v57 = vpop.f32.mrf.mxu1  ;;  %v13576_v11 = vadd.f32 %v3376_v12, %v3024_v36  ;;  %v3026_v21 = vadd.f32 %v3025_v8, %v12709_v16  ;;  %v11208_v12 = vld [vmem:[%s18050_s0 + $0x51c] ss:$28 sps:$4 sm:$0xff]  }
 0x1ee   :  { %v3027_v20 = vpop.f32.mrf.mxu0 }
 0x1ef   :  { %18260 = vst [vmem:[#allocation77_spill] sm:$0xff] %v13576_v11  ;;  %v3380_v47 = vpop.f32.mrf.mxu1  ;;  %v13585_v29 = vadd.f32 %v3378_v57, %v3026_v21  ;;  %v3028_v18 = vadd.f32 %v3027_v20, %v12702_v14 }
 0x1f0   :  { %v3029_v63 = vpop.f32.mrf.mxu0 }
 0x1f1   :  { %18261 = vst [vmem:[#allocation78_spill] sm:$0xff] %v13585_v29  ;;  %v3382_v7 = vpop.f32.mrf.mxu1  ;;  %v13591_v36 = vadd.f32 %v3380_v47, %v3028_v18  ;;  %v3030_v8 = vadd.f32 %v3029_v63, %v12709_v16 }
 0x1f2   :  { %v3033_v11 = vpop.f32.mrf.mxu0  ;;  %3658 = vmatmul.mubr.bf16.gmra.mxu0 %v11196_v60  ;;  %v11206_v60 = vld [vmem:[%s18050_s0 + $0x518] ss:$28 sps:$4 sm:$0xff]  }
 0x1f3   :  { %18262 = vst [vmem:[#allocation79_spill] sm:$0xff] %v13591_v36  ;;  %v3386_v10 = vpop.f32.mrf.mxu1  ;;  %10496 = vmatmul.mubr.msk.bf16.gmra.mxu1 %vm2602_vm0, %v11199_v9  ;;  %v13595_v35 = vadd.f32 %v3382_v7, %v3030_v8  ;;  %v3034_v57 = vadd.f32 %v3033_v11, %v12702_v14  ;;  %3667 = vmatprep.mubr.bf16.mxu0 %v11208_v12  ;;  %v11209_v9 = vld [vmem:[%s18050_s0 + $0x520] ss:$28 sps:$4 sm:$0xff]  }
 0x1f4   :  { %4020 = vmatprep.mubr.bf16.mxu1 %v18194_v59  ;;  %v3035_v21 = vpop.f32.mrf.mxu0 }
 0x1f5   :  { %18263 = vst [vmem:[#allocation80_spill] sm:$0xff] %v13595_v35  ;;  %v3388_v20 = vpop.f32.mrf.mxu1  ;;  %v13599_v29 = vadd.f32 %v3386_v10, %v3034_v57  ;;  %v3036_v47 = vadd.f32 %v3035_v21, %v12709_v16  ;;  %v11212_v10 = vld [vmem:[%s18050_s0 + $0x554] ss:$28 sps:$4 sm:$0xff]  }
 0x1f6   :  { %v3037_v18 = vpop.f32.mrf.mxu0 }
 0x1f7   :  { %18264 = vst [vmem:[#allocation81_spill] sm:$0xff] %v13599_v29  ;;  %v3390_v63 = vpop.f32.mrf.mxu1  ;;  %v13608_v11 = vadd.f32 %v3388_v20, %v3036_v47  ;;  %v3038_v12 = vadd.f32 %v3037_v18, %v12702_v14 }
 0x1f8   :  { %v3039_v7 = vpop.f32.mrf.mxu0 }
 0x1f9   :  { %18265 = vst [vmem:[#allocation82_spill] sm:$0xff] %v13608_v11  ;;  %v3392_v8 = vpop.f32.mrf.mxu1  ;;  %v13614_v57 = vadd.f32 %v3390_v63, %v3038_v12  ;;  %v3040_v21 = vadd.f32 %v3039_v7, %v12709_v16 }
 0x1fa   :  { %v3043_v29 = vpop.f32.mrf.mxu0  ;;  %3668 = vmatmul.mubr.bf16.gmra.mxu0 %v11206_v60  ;;  %v11210_v60 = vld [vmem:[%s18050_s0 + $0x550] ss:$28 sps:$4 sm:$0xff]  }
 0x1fb   :  { %18266 = vst [vmem:[#allocation83_spill] sm:$0xff] %v13614_v57  ;;  %v3396_v35 = vpop.f32.mrf.mxu1  ;;  %10497 = vmatmul.mubr.msk.bf16.gmra.mxu1 %vm2602_vm0, %v11209_v9  ;;  %v13618_v36 = vadd.f32 %v3392_v8, %v3040_v21  ;;  %v3044_v20 = vadd.f32 %v3043_v29, %v12702_v14  ;;  %3677 = vmatprep.mubr.bf16.mxu0 %v11212_v10  ;;  %v11213_v9 = vld [vmem:[%s18050_s0 + $0x558] ss:$28 sps:$4 sm:$0xff]  }
 0x1fc   :  { %4030 = vmatprep.mubr.bf16.mxu1 %v18194_v59  ;;  %v3045_v47 = vpop.f32.mrf.mxu0 }
 0x1fd   :  { %18267 = vst [vmem:[#allocation84_spill] sm:$0xff] %v13618_v36  ;;  %v3398_v18 = vpop.f32.mrf.mxu1  ;;  %v13622_v11 = vadd.f32 %v3396_v35, %v3044_v20  ;;  %v3046_v63 = vadd.f32 %v3045_v47, %v12709_v16  ;;  %v11222_v35 = vld [vmem:[%s18050_s0 + $0x58c] ss:$28 sps:$4 sm:$0xff]  }
 0x1fe   :  { %v3047_v12 = vpop.f32.mrf.mxu0 }
 0x1ff   :  { %18268 = vst [vmem:[#allocation85_spill] sm:$0xff] %v13622_v11  ;;  %v3400_v7 = vpop.f32.mrf.mxu1  ;;  %v13631_v29 = vadd.f32 %v3398_v18, %v3046_v63  ;;  %v3048_v10 = vadd.f32 %v3047_v12, %v12702_v14 }
 0x200   :  { %v3049_v8 = vpop.f32.mrf.mxu0 }
 0x201   :  { %18269 = vst [vmem:[#allocation86_spill] sm:$0xff] %v13631_v29  ;;  %v3402_v21 = vpop.f32.mrf.mxu1  ;;  %v13637_v20 = vadd.f32 %v3400_v7, %v3048_v10  ;;  %v3050_v47 = vadd.f32 %v3049_v8, %v12709_v16  ;;  %v11220_v16 = vld [vmem:[%s18050_s0 + $0x588] ss:$28 sps:$4 sm:$0xff]  }
 0x202   :  { %v3439_v11 = vpop.f32.mrf.mxu0  ;;  %3678 = vmatmul.mubr.bf16.gmra.mxu0 %v11210_v60  ;;  %v11223_v60 = vld [vmem:[%s18050_s0 + $0x590] ss:$28 sps:$4 sm:$0xff]  }
 0x203   :  { %18270 = vst [vmem:[#allocation87_spill] sm:$0xff] %v13637_v20  ;;  %v3792_v36 = vpop.f32.mrf.mxu1  ;;  %10498 = vmatmul.mubr.msk.bf16.gmra.mxu1 %vm2602_vm0, %v11213_v9  ;;  %v13641_v57 = vadd.f32 %v3402_v21, %v3050_v47  ;;  %v3440_v18 = vadd.f32 %v3439_v11, %v12712_v22  ;;  %3687 = vmatprep.mubr.bf16.mxu0 %v11222_v35  ;;  %v11226_v11 = vld [vmem:[%s18050_s0 + $0x5c4] ss:$28 sps:$4 sm:$0xff]  }
 0x204   :  { %4040 = vmatprep.mubr.bf16.mxu1 %v18194_v59  ;;  %v3441_v14 = vpop.f32.mrf.mxu0 }
 0x205   :  { %18271 = vst [vmem:[#allocation88_spill] sm:$0xff] %v13641_v57  ;;  %v3794_v63 = vpop.f32.mrf.mxu1  ;;  %v3793_v12 = vadd.f32 %v3792_v36, %v3440_v18  ;;  %v3442_v7 = vadd.f32 %v3441_v14, %v12721_v28 }
 0x206   :  { %v3443_v10 = vpop.f32.mrf.mxu0 }
 0x207   :  { %v3796_v20 = vpop.f32.mrf.mxu1  ;;  %v3795_v9 = vadd.f32 %v3794_v63, %v3442_v7  ;;  %v3444_v22 = vadd.f32 %v3443_v10, %v12730_v34  ;;  %v5523_v18 = vmax.f32 %v3793_v12, 0.0  ;;  %v11224_v12 = vld [vmem:[%s18050_s0 + $0x5c0] ss:$28 sps:$4 sm:$0xff]  }
 0x208   :  { %v3445_v36 = vpop.f32.mrf.mxu0 }
 0x209   :  { %v3798_v35 = vpop.f32.mrf.mxu1  ;;  %v3797_v28 = vadd.f32 %v3796_v20, %v3444_v22  ;;  %v3446_v8 = vadd.f32 %v3445_v36, %v12733_v38  ;;  %v5524_v34 = vmax.f32 %v3795_v9, 0.0 }
 0x20a   :  { %v3449_v21 = vpop.f32.mrf.mxu0  ;;  %3688 = vmatmul.mubr.bf16.gmra.mxu0 %v11220_v16 }
 0x20b   :  { %v3802_v47 = vpop.f32.mrf.mxu1  ;;  %10499 = vmatmul.mubr.msk.bf16.gmra.mxu1 %vm2602_vm0, %v11223_v60  ;;  %v5527_v14 = vmax.f32 %v3797_v28, 0.0  ;;  %v3799_v57 = vadd.f32 %v3798_v35, %v3446_v8  ;;  %v3450_v63 = vadd.f32 %v3449_v21, %v12742_v44  ;;  %3697 = vmatprep.mubr.bf16.mxu0 %v11226_v11  ;;  %v11227_v44 = vld [vmem:[%s18050_s0 + $0x5c8] ss:$28 sps:$4 sm:$0xff]  }
 0x20c   :  { %4050 = vmatprep.mubr.bf16.mxu1 %v18194_v59  ;;  %v3451_v7 = vpop.f32.mrf.mxu0 }
 0x20d   :  { %v3804_v10 = vpop.f32.mrf.mxu1  ;;  %v13660_v29 = vpack.c.bf16 %v5527_v14, %v5523_v18  ;;  %v5528_v20 = vmax.f32 %v3799_v57, 0.0  ;;  %v3803_v38 = vadd.f32 %v3802_v47, %v3450_v63  ;;  %v3452_v16 = vadd.f32 %v3451_v7, %v12748_v49  ;;  %v11236_v57 = vld [vmem:[%s18050_s0 + $0x5fc] ss:$28 sps:$4 sm:$0xff]  }
 0x20e   :  { %v3453_v22 = vpop.f32.mrf.mxu0 }
 0x20f   :  { %v3806_v36 = vpop.f32.mrf.mxu1  ;;  %v3805_v60 = vadd.f32 %v3804_v10, %v3452_v16  ;;  %v3454_v9 = vadd.f32 %v3453_v22, %v12754_v54  ;;  %v13673_v11 = vpack.c.bf16 %v5528_v20, %v5524_v34  ;;  %v5531_v18 = vmax.f32 %v3803_v38, 0.0  ;;  %v11234_v38 = vld [vmem:[%s18050_s0 + $0x5f8] ss:$28 sps:$4 sm:$0xff]  }
 0x210   :  { %v3455_v49 = vpop.f32.mrf.mxu0 }
 0x211   :  { %v3808_v35 = vpop.f32.mrf.mxu1  ;;  %v3807_v28 = vadd.f32 %v3806_v36, %v3454_v9  ;;  %v3456_v8 = vadd.f32 %v3455_v49, %v12757_v58  ;;  %v5532_v34 = vmax.f32 %v3805_v60, 0.0  ;;  %v11240_v9 = vld [vmem:[%s18050_s0 + $0x634] ss:$28 sps:$4 sm:$0xff]  }
 0x212   :  { %v3459_v21 = vpop.f32.mrf.mxu0  ;;  %3698 = vmatmul.mubr.bf16.gmra.mxu0 %v11224_v12 }
 0x213   :  { %v3812_v47 = vpop.f32.mrf.mxu1  ;;  %10500 = vmatmul.mubr.msk.bf16.gmra.mxu1 %vm2602_vm0, %v11227_v44  ;;  %v5535_v14 = vmax.f32 %v3807_v28, 0.0  ;;  %v3809_v63 = vadd.f32 %v3808_v35, %v3456_v8  ;;  %v3460_v54 = vadd.f32 %v3459_v21, %v12760_v62  ;;  %3707 = vmatprep.mubr.bf16.mxu0 %v11236_v57  ;;  %v11237_v62 = vld [vmem:[%s18050_s0 + $0x600] ss:$28 sps:$4 sm:$0xff]  }
 0x214   :  { %4060 = vmatprep.mubr.bf16.mxu1 %v18194_v59  ;;  %v3461_v7 = vpop.f32.mrf.mxu0 }
 0x215   :  { %v3814_v10 = vpop.f32.mrf.mxu1  ;;  %v13679_v20 = vpack.c.bf16 %v5535_v14, %v5531_v18  ;;  %v5536_v16 = vmax.f32 %v3809_v63, 0.0  ;;  %v3813_v58 = vadd.f32 %v3812_v47, %v3460_v54  ;;  %v3462_v22 = vadd.f32 %v3461_v7, %v12769_v4 }
 0x216   :  { %v3463_v36 = vpop.f32.mrf.mxu0 }
 0x217   :  { %v3816_v12 = vpop.f32.mrf.mxu1  ;;  %v3815_v44 = vadd.f32 %v3814_v10, %v3462_v22  ;;  %v3464_v60 = vadd.f32 %v3463_v36, %v12778_v13  ;;  %v13692_v57 = vpack.c.bf16 %v5536_v16, %v5532_v34  ;;  %v5539_v47 = vmax.f32 %v3813_v58, 0.0  ;;  %v11238_v58 = vld [vmem:[%s18050_s0 + $0x630] ss:$28 sps:$4 sm:$0xff]  }
 0x218   :  { %v3465_v4 = vpop.f32.mrf.mxu0 }
 0x219   :  { %v3818_v49 = vpop.f32.mrf.mxu1  ;;  %v3817_v35 = vadd.f32 %v3816_v12, %v3464_v60  ;;  %v3466_v28 = vadd.f32 %v3465_v4, %v12781_v19  ;;  %v5540_v63 = vmax.f32 %v3815_v44, 0.0 }
 0x21a   :  { %v3469_v8 = vpop.f32.mrf.mxu0  ;;  %3708 = vmatmul.mubr.bf16.gmra.mxu0 %v11234_v38 }
 0x21b   :  { %v3822_v21 = vpop.f32.mrf.mxu1  ;;  %10501 = vmatmul.mubr.msk.bf16.gmra.mxu1 %vm2602_vm0, %v11237_v62  ;;  %v5543_v18 = vmax.f32 %v3817_v35, 0.0  ;;  %v3819_v14 = vadd.f32 %v3818_v49, %v3466_v28  ;;  %v3470_v13 = vadd.f32 %v3469_v8, %v12790_v26  ;;  %3717 = vmatprep.mubr.bf16.mxu0 %v11240_v9  ;;  %v11241_v26 = vld [vmem:[%s18050_s0 + $0x638] ss:$28 sps:$4 sm:$0xff]   ;;  %v11250_v62 = vld [vmem:[%s18050_s0 + $0x66c] ss:$28 sps:$4 sm:$0xff]  }
 0x21c   :  { %4070 = vmatprep.mubr.bf16.mxu1 %v18194_v59  ;;  %v3471_v54 = vpop.f32.mrf.mxu0 }
 0x21d   :  { %v3824_v34 = vpop.f32.mrf.mxu1  ;;  %v13698_v7 = vpack.c.bf16 %v5543_v18, %v5539_v47  ;;  %v5544_v10 = vmax.f32 %v3819_v14, 0.0  ;;  %v3823_v19 = vadd.f32 %v3822_v21, %v3470_v13  ;;  %v3472_v16 = vadd.f32 %v3471_v54, %v12796_v32 }
 0x21e   :  { %v3473_v22 = vpop.f32.mrf.mxu0 }
 0x21f   :  { %18272 = vst [vmem:[#allocation89_spill] sm:$0xff] %v13698_v7  ;;  %v3826_v36 = vpop.f32.mrf.mxu1  ;;  %v3825_v12 = vadd.f32 %v3824_v34, %v3472_v16  ;;  %v3474_v38 = vadd.f32 %v3473_v22, %v12802_v39  ;;  %v13711_v44 = vpack.c.bf16 %v5544_v10, %v5540_v63  ;;  %v5547_v28 = vmax.f32 %v3823_v19, 0.0  ;;  %v11248_v19 = vld [vmem:[%s18050_s0 + $0x668] ss:$28 sps:$4 sm:$0xff]  }
 0x220   :  { %v3475_v32 = vpop.f32.mrf.mxu0 }
 0x221   :  { %v3828_v60 = vpop.f32.mrf.mxu1  ;;  %v3827_v9 = vadd.f32 %v3826_v36, %v3474_v38  ;;  %v3476_v4 = vadd.f32 %v3475_v32, %v12805_v43  ;;  %v5548_v47 = vmax.f32 %v3825_v12, 0.0  ;;  %v11254_v36 = vld [vmem:[%s18050_s0 + $0x6a4] ss:$28 sps:$4 sm:$0xff]  }
 0x222   :  { %v3479_v49 = vpop.f32.mrf.mxu0  ;;  %3718 = vmatmul.mubr.bf16.gmra.mxu0 %v11238_v58 }
 0x223   :  { %v3832_v35 = vpop.f32.mrf.mxu1  ;;  %10502 = vmatmul.mubr.msk.bf16.gmra.mxu1 %vm2602_vm0, %v11241_v26  ;;  %v5551_v8 = vmax.f32 %v3827_v9, 0.0  ;;  %v3829_v21 = vadd.f32 %v3828_v60, %v3476_v4  ;;  %v3480_v39 = vadd.f32 %v3479_v49, %v12808_v48  ;;  %3727 = vmatprep.mubr.bf16.mxu0 %v11250_v62  ;;  %v11251_v48 = vld [vmem:[%s18050_s0 + $0x670] ss:$28 sps:$4 sm:$0xff]  }
 0x224   :  { %4080 = vmatprep.mubr.bf16.mxu1 %v18194_v59  ;;  %v3481_v18 = vpop.f32.mrf.mxu0 }
 0x225   :  { %v3834_v14 = vpop.f32.mrf.mxu1  ;;  %v13717_v13 = vpack.c.bf16 %v5551_v8, %v5547_v28  ;;  %v5552_v63 = vmax.f32 %v3829_v21, 0.0  ;;  %v3833_v43 = vadd.f32 %v3832_v35, %v3480_v39  ;;  %v3482_v54 = vadd.f32 %v3481_v18, %v12817_v56 }
 0x226   :  { %v3483_v34 = vpop.f32.mrf.mxu0 }
 0x227   :  { %18273 = vst [vmem:[#allocation90_spill] sm:$0xff] %v13717_v13  ;;  %v3836_v10 = vpop.f32.mrf.mxu1  ;;  %v3835_v16 = vadd.f32 %v3834_v14, %v3482_v54  ;;  %v3484_v22 = vadd.f32 %v3483_v34, %v12826_v0  ;;  %v13730_v58 = vpack.c.bf16 %v5552_v63, %v5548_v47  ;;  %v5555_v60 = vmax.f32 %v3833_v43, 0.0  ;;  %v11252_v14 = vld [vmem:[%s18050_s0 + $0x6a0] ss:$28 sps:$4 sm:$0xff]  }
 0x228   :  { %v3485_v56 = vpop.f32.mrf.mxu0  ;;  %v11264_v54 = vld [vmem:[%s18050_s0 + $0x6dc] ss:$28 sps:$4 sm:$0xff]  }
 0x229   :  { %18274 = vst [vmem:[#allocation91_spill] sm:$0xff] %v13730_v58  ;;  %v3838_v26 = vpop.f32.mrf.mxu1  ;;  %v3837_v12 = vadd.f32 %v3836_v10, %v3484_v22  ;;  %v3486_v38 = vadd.f32 %v3485_v56, %v12829_v5  ;;  %v5556_v49 = vmax.f32 %v3835_v16, 0.0 }
 0x22a   :  { %v3489_v62 = vpop.f32.mrf.mxu0  ;;  %3728 = vmatmul.mubr.bf16.gmra.mxu0 %v11248_v19 }
 0x22b   :  { %v3842_v32 = vpop.f32.mrf.mxu1  ;;  %10503 = vmatmul.mubr.msk.bf16.gmra.mxu1 %vm2602_vm0, %v11251_v48  ;;  %v5559_v9 = vmax.f32 %v3837_v12, 0.0  ;;  %v3839_v4 = vadd.f32 %v3838_v26, %v3486_v38  ;;  %v3490_v0 = vadd.f32 %v3489_v62, %v12838_v17  ;;  %3737 = vmatprep.mubr.bf16.mxu0 %v11254_v36  ;;  %v11255_v17 = vld [vmem:[%s18050_s0 + $0x6a8] ss:$28 sps:$4 sm:$0xff]  }
 0x22c   :  { %4090 = vmatprep.mubr.bf16.mxu1 %v18194_v59  ;;  %v3491_v35 = vpop.f32.mrf.mxu0 }
 0x22d   :  { %v3844_v28 = vpop.f32.mrf.mxu1  ;;  %v13736_v8 = vpack.c.bf16 %v5559_v9, %v5555_v60  ;;  %v5560_v21 = vmax.f32 %v3839_v4, 0.0  ;;  %v3843_v5 = vadd.f32 %v3842_v32, %v3490_v0  ;;  %v3492_v39 = vadd.f32 %v3491_v35, %v12844_v24 }
 0x22e   :  { %v3493_v47 = vpop.f32.mrf.mxu0 }
 0x22f   :  { %18275 = vst [vmem:[#allocation92_spill] sm:$0xff] %v13736_v8  ;;  %v3846_v18 = vpop.f32.mrf.mxu1  ;;  %v3845_v63 = vadd.f32 %v3844_v28, %v3492_v39  ;;  %v3494_v43 = vadd.f32 %v3493_v47, %v12850_v31  ;;  %v13749_v34 = vpack.c.bf16 %v5560_v21, %v5556_v49  ;;  %v5563_v36 = vmax.f32 %v3843_v5, 0.0  ;;  %v11262_v49 = vld [vmem:[%s18050_s0 + $0x6d8] ss:$28 sps:$4 sm:$0xff]  }
 0x230   :  { %v3495_v24 = vpop.f32.mrf.mxu0 }
 0x231   :  { %18276 = vst [vmem:[#allocation93_spill] sm:$0xff] %v13749_v34  ;;  %v3848_v10 = vpop.f32.mrf.mxu1  ;;  %v3847_v19 = vadd.f32 %v3846_v18, %v3494_v43  ;;  %v3496_v48 = vadd.f32 %v3495_v24, %v12853_v37  ;;  %v5564_v12 = vmax.f32 %v3845_v63, 0.0  ;;  %v11798_v24 = vld [vmem:[%s18050_s0 + $0xc] ss:$28 sps:$4 sm:$0xff]  }
 0x232   :  { %v3499_v16 = vpop.f32.mrf.mxu0  ;;  %3738 = vmatmul.mubr.bf16.gmra.mxu0 %v11252_v14 }
 0x233   :  { %v3852_v22 = vpop.f32.mrf.mxu1  ;;  %10504 = vmatmul.mubr.msk.bf16.gmra.mxu1 %vm2602_vm0, %v11255_v17  ;;  %v5567_v56 = vmax.f32 %v3847_v19, 0.0  ;;  %v3849_v26 = vadd.f32 %v3848_v10, %v3496_v48  ;;  %v3500_v31 = vadd.f32 %v3499_v16, %v12856_v45  ;;  %3747 = vmatprep.mubr.bf16.mxu0 %v11264_v54  ;;  %v11265_v45 = vld [vmem:[%s18050_s0 + $0x6e0] ss:$28 sps:$4 sm:$0xff]  }
 0x234   :  { %4100 = vmatprep.mubr.bf16.mxu1 %v18194_v59  ;;  %v3501_v38 = vpop.f32.mrf.mxu0 }
 0x235   :  { %v3854_v62 = vpop.f32.mrf.mxu1  ;;  %v13755_v32 = vpack.c.bf16 %v5567_v56, %v5563_v36  ;;  %v5568_v60 = vmax.f32 %v3849_v26, 0.0  ;;  %v3853_v37 = vadd.f32 %v3852_v22, %v3500_v31  ;;  %v3502_v9 = vadd.f32 %v3501_v38, %v12865_v53  ;;  %v11269_v38 = vld [vmem:[%s18051_s1 + $0x608] ss:$16 sps:$4 sm:$0xff]  }
 0x236   :  { %v3503_v4 = vpop.f32.mrf.mxu0 }
 0x237   :  { %18277 = vst [vmem:[#allocation94_spill] sm:$0xff] %v13755_v32  ;;  %v3856_v0 = vpop.f32.mrf.mxu1  ;;  %v3855_v35 = vadd.f32 %v3854_v62, %v3502_v9  ;;  %v3504_v28 = vadd.f32 %v3503_v4, %v12871_v61  ;;  %v13765_v21 = vpack.c.bf16 %v5568_v60, %v5564_v12  ;;  %v5571_v17 = vmax.f32 %v3853_v37, 0.0  ;;  %v11797_v61 = vld [vmem:[%s18050_s0 + $0x4] ss:$28 sps:$4 sm:$0xff]   ;;  %v11266_v12 = vld [vmem:[%s18051_s1 + $0x4e8] ss:$16 sps:$4 sm:$0xff]  }
 0x238   :  { %v3505_v5 = vpop.f32.mrf.mxu0  ;;  %v11274_v4 = vld [vmem:[%s18051_s1 + $0x4cc] ss:$16 sps:$4 sm:$0xff]  }
 0x239   :  { %18278 = vst [vmem:[#allocation95_spill] sm:$0xff] %v13765_v21  ;;  %v3858_v39 = vpop.f32.mrf.mxu1  ;;  %v3857_v47 = vadd.f32 %v3856_v0, %v3504_v28  ;;  %v3506_v53 = vadd.f32 %v3505_v5, %v12874_v3  ;;  %v5572_v3 = vmax.f32 %v3855_v35, 0.0  ;;  %v11329_v21 = vld [vmem:[%s18053_s3 + $0xa0] ss:$16 sps:$4 sm:$0xff]  }
 0x23a   :  { %v3509_v18 = vpop.f32.mrf.mxu0  ;;  %3748 = vmatmul.mubr.bf16.gmra.mxu0 %v11262_v49  ;;  %v11799_v49 = vld [vmem:[%s18050_s0] ss:$28 sps:$4 sm:$0xff]  }
 0x23b   :  { %v3862_v14 = vpop.f32.mrf.mxu1  ;;  %10505 = vmatmul.mubr.msk.bf16.gmra.mxu1 %vm2602_vm0, %v11265_v45  ;;  %v5575_v63 = vmax.f32 %v3857_v47, 0.0  ;;  %v3859_v43 = vadd.f32 %v3858_v39, %v3506_v53  ;;  %v3510_v54 = vadd.f32 %v3509_v18, %v12878_v15  ;;  %4143 = vmatprep.mubr.bf16.mxu0 %v11797_v61  ;;  %v11800_v45 = vld [vmem:[%s18050_s0 + $0x8] ss:$28 sps:$4 sm:$0xff]  }
 0x23c   :  { %4496 = vmatprep.mubr.bf16.mxu1 %v11798_v24  ;;  %v3511_v10 = vpop.f32.mrf.mxu0  ;;  %v11272_v39 = vld [vmem:[%s18051_s1 + $0x4c8] ss:$16 sps:$4 sm:$0xff]  }
 0x23d   :  { %v3864_v19 = vpop.f32.mrf.mxu1  ;;  %v13776_v48 = vpack.c.bf16 %v5575_v63, %v5571_v17  ;;  %v5576_v16 = vmax.f32 %v3859_v43, 0.0  ;;  %v3863_v22 = vadd.f32 %v3862_v14, %v3510_v54  ;;  %v3512_v36 = vadd.f32 %v3511_v10, %v12887_v27  ;;  %v11801_v14 = vld [vmem:[%s18050_s0 + $0x3c] ss:$28 sps:$4 sm:$0xff]   ;;  %v11802_v17 = vld [vmem:[%s18050_s0 + $0x44] ss:$28 sps:$4 sm:$0xff]  }
 0x23e   :  { %v3513_v15 = vpop.f32.mrf.mxu0 }
 0x23f   :  { %18279 = vst [vmem:[#allocation96_spill] sm:$0xff] %v13776_v48  ;;  %v3866_v56 = vpop.f32.mrf.mxu1  ;;  %v3865_v26 = vadd.f32 %v3864_v19, %v3512_v36  ;;  %v3514_v31 = vadd.f32 %v3513_v15, %v12899_v41  ;;  %v13786_v62 = vpack.c.bf16 %v5576_v16, %v5572_v3  ;;  %v5579_v35 = vmax.f32 %v3863_v22, 0.0  ;;  %v11275_v15 = vld [vmem:[%s18051_s1 + $0x4a8] ss:$16 sps:$4 sm:$0xff]  }
 0x240   :  { %v3515_v60 = vpop.f32.mrf.mxu0 }
 0x241   :  { %18280 = vst [vmem:[#allocation97_spill] sm:$0xff] %v13786_v62  ;;  %v3868_v37 = vpop.f32.mrf.mxu1  ;;  %v3867_v9 = vadd.f32 %v3866_v56, %v3514_v31  ;;  %v3516_v27 = vadd.f32 %v3515_v60, %v12909_v52  ;;  %v5580_v47 = vmax.f32 %v3865_v26, 0.0 }
 0x242   :  { %v3519_v41 = vpop.f32.mrf.mxu0  ;;  %4144 = vmatmul.mubr.bf16.vlgmr.msra.gmra.mxu0 %v11799_v49 }
 0x243   :  { %v3872_v0 = vpop.f32.mrf.mxu1  ;;  %4497 = vmatmul.mubr.bf16.vlgmr.msra.gmra.mxu1 %v11800_v45  ;;  %v5583_v28 = vmax.f32 %v3867_v9, 0.0  ;;  %v3869_v5 = vadd.f32 %v3868_v37, %v3516_v27  ;;  %v3520_v52 = vadd.f32 %v3519_v41, %v12925_v6  ;;  %4818 = vmatpush1.bf16.msra.mxu0 %v11266_v12  ;;  %v11277_v6 = vld [vmem:[%s18051_s1 + $0x4ac] ss:$16 sps:$4 sm:$0xff]   ;;  %v11805_v27 = vld [vmem:[%s18050_s0 + $0x74] ss:$28 sps:$4 sm:$0xff]  }
 0x244   :  { %5185 = vmatpush1.bf16.msra.mxu1 %v11269_v38  ;;  %v3521_v53 = vpop.f32.mrf.mxu0  ;;  %4153 = vmatprep.mubr.bf16.mxu0 %v11801_v14  ;;  %v11804_v38 = vld [vmem:[%s18050_s0 + $0x40] ss:$28 sps:$4 sm:$0xff]   ;;  %v11278_v45 = vld [vmem:[%s18051_s1 + $0x488] ss:$16 sps:$4 sm:$0xff]  }
 0x245   :  { %v3874_v18 = vpop.f32.mrf.mxu1  ;;  %4506 = vmatprep.mubr.bf16.mxu1 %v11802_v17  ;;  %v13811_v63 = vpack.c.bf16 %v5583_v28, %v5579_v35  ;;  %v5584_v43 = vmax.f32 %v3869_v5, 0.0  ;;  %v3873_v54 = vadd.f32 %v3872_v0, %v3520_v52  ;;  %v3522_v61 = vadd.f32 %v3521_v53, %v12934_v23  ;;  %4819 = vmatprep.subr.bf16.mxu0 %v11274_v4  ;;  %v11280_v23 = vld [vmem:[%s18051_s1 + $0x48c] ss:$16 sps:$4 sm:$0xff]  }
 0x246   :  { %v3523_v24 = vpop.f32.mrf.mxu0  ;;  %v11806_v4 = vld [vmem:[%s18050_s0 + $0x7c] ss:$28 sps:$4 sm:$0xff]  }
 0x247   :  { %18281 = vst [vmem:[#allocation98_spill] sm:$0xff] %v13811_v63  ;;  %v3876_v3 = vpop.f32.mrf.mxu1  ;;  %v3875_v10 = vadd.f32 %v3874_v18, %v3522_v61  ;;  %v3524_v19 = vadd.f32 %v3523_v24, %v12946_v40  ;;  %4820 = vmatpush1.bf16.msra.mxu0 %v11272_v39  ;;  %v13815_v16 = vpack.c.bf16 %v5584_v43, %v5580_v47  ;;  %v11803_v40 = vld [vmem:[%s18050_s0 + $0x38] ss:$28 sps:$4 sm:$0xff]   ;;  %v5587_v60 = vmax.f32 %v3873_v54, 0.0  ;;  %v11283_v52 = vld [vmem:[%s18051_s1 + $0x46c] ss:$16 sps:$4 sm:$0xff]  }
 0x248   :  { %v3525_v22 = vpop.f32.mrf.mxu0  ;;  %4821 = vmatprep.subr.bf16.mxu0 %v11277_v6  ;;  %v11281_v43 = vld [vmem:[%s18051_s1 + $0x468] ss:$16 sps:$4 sm:$0xff]   ;;  %v11286_v61 = vld [vmem:[%s18051_s1 + $0x44c] ss:$16 sps:$4 sm:$0xff]  }
 0x249   :  { %18282 = vst [vmem:[#allocation99_spill] sm:$0xff] %v13815_v16  ;;  %v3878_v36 = vpop.f32.mrf.mxu1  ;;  %v3877_v56 = vadd.f32 %v3876_v3, %v3524_v19  ;;  %v3526_v26 = vadd.f32 %v3525_v22, %v12956_v55  ;;  %v5588_v41 = vmax.f32 %v3875_v10, 0.0  ;;  %v11808_v10 = vld [vmem:[%s18050_s0 + $0x78] ss:$28 sps:$4 sm:$0xff]  }
 0x24a   :  { %v3529_v31 = vpop.f32.mrf.mxu0  ;;  %4154 = vmatmul.mubr.bf16.gmra.mxu0 %v11803_v40 }
 0x24b   :  { %v3882_v12 = vpop.f32.mrf.mxu1  ;;  %4507 = vmatmul.mubr.bf16.gmra.mxu1 %v11804_v38  ;;  %v5591_v37 = vmax.f32 %v3877_v56, 0.0  ;;  %v3879_v9 = vadd.f32 %v3878_v36, %v3526_v26  ;;  %v3530_v55 = vadd.f32 %v3529_v31, %v12966_v2  ;;  %4163 = vmatprep.mubr.bf16.mxu0 %v11805_v27  ;;  %v11810_v56 = vld [vmem:[%s18050_s0 + $0xb4] ss:$28 sps:$4 sm:$0xff]  }
 0x24c   :  { %4516 = vmatprep.mubr.bf16.mxu1 %v11806_v4  ;;  %v3531_v0 = vpop.f32.mrf.mxu0  ;;  %4822 = vmatpush1.bf16.msra.mxu0 %v11275_v15  ;;  %v11809_v15 = vld [vmem:[%s18050_s0 + $0xac] ss:$28 sps:$4 sm:$0xff]  }
 0x24d   :  { %v3884_v49 = vpop.f32.mrf.mxu1  ;;  %v13840_v35 = vpack.c.bf16 %v5591_v37, %v5587_v60  ;;  %v5592_v2 = vmax.f32 %v3879_v9, 0.0  ;;  %v3883_v28 = vadd.f32 %v3882_v12, %v3530_v55  ;;  %v3532_v5 = vadd.f32 %v3531_v0, %v12981_v30  ;;  %4823 = vmatprep.subr.bf16.mxu0 %v11280_v23  ;;  %v11284_v12 = vld [vmem:[%s18051_s1 + $0x448] ss:$16 sps:$4 sm:$0xff]   ;;  %v11289_v37 = vld [vmem:[%s18051_s1 + $0x42c] ss:$16 sps:$4 sm:$0xff]  }
 0x24e   :  { %v3533_v39 = vpop.f32.mrf.mxu0  ;;  %v18286_v4 = vld [vmem:[#allocation6_spill] sm:$0xff] }
 0x24f   :  { %18283 = vst [vmem:[#allocation100_spill] sm:$0xff] %v13840_v35  ;;  %v3886_v47 = vpop.f32.mrf.mxu1  ;;  %v3885_v53 = vadd.f32 %v3884_v49, %v3532_v5  ;;  %v3534_v18 = vadd.f32 %v3533_v39, %v12993_v50  ;;  %v13847_v14 = vpack.c.bf16 %v5592_v2, %v5588_v41  ;;  %v11807_v50 = vld [vmem:[%s18050_s0 + $0x70] ss:$28 sps:$4 sm:$0xff]   ;;  %v5595_v19 = vmax.f32 %v3883_v28, 0.0  ;;  %v11287_v2 = vld [vmem:[%s18051_s1 + $0x428] ss:$16 sps:$4 sm:$0xff]  }
 0x250   :  { %v3535_v17 = vpop.f32.mrf.mxu0  ;;  %4824 = vmatpush1.bf16.msra.mxu0 %v11278_v45  ;;  %v18288_v28 = vld [vmem:[#allocation7_spill] sm:$0xff] }
 0x251   :  { %18284 = vst [vmem:[#allocation101_spill] sm:$0xff] %v13847_v14  ;;  %v3888_v6 = vpop.f32.mrf.mxu1  ;;  %v3887_v30 = vadd.f32 %v3886_v47, %v3534_v18  ;;  %v3536_v54 = vadd.f32 %v3535_v17, %v13003_v1  ;;  %4825 = vmatprep.subr.bf16.mxu0 %v11283_v52  ;;  %v5596_v26 = vmax.f32 %v3885_v53, 0.0  ;;  %v11292_v52 = vld [vmem:[%s18051_s1 + $0x40c] ss:$16 sps:$4 sm:$0xff]   ;;  %v11811_v53 = vld [vmem:[%s18050_s0 + $0xa8] ss:$28 sps:$4 sm:$0xff]  }
 0x252   :  { %v3539_v24 = vpop.f32.mrf.mxu0  ;;  %4164 = vmatmul.mubr.bf16.gmra.mxu0 %v11807_v50  ;;  %v11812_v18 = vld [vmem:[%s18050_s0 + $0xb0] ss:$28 sps:$4 sm:$0xff]  }
 0x253   :  { %v3892_v3 = vpop.f32.mrf.mxu1  ;;  %4517 = vmatmul.mubr.bf16.gmra.mxu1 %v11808_v10  ;;  %v5599_v22 = vmax.f32 %v3887_v30, 0.0  ;;  %v3889_v1 = vadd.f32 %v3888_v6, %v3536_v54  ;;  %v3540_v36 = vadd.f32 %v3539_v24, %v13013_v25  ;;  %4173 = vmatprep.mubr.bf16.mxu0 %v11809_v15  ;;  %v18289_v30 = vld [vmem:[#allocation8_spill] sm:$0xff]  ;;  %v11814_v24 = vld [vmem:[%s18050_s0 + $0xec] ss:$28 sps:$4 sm:$0xff]   ;;  %v18291_v15 = vld [vmem:[#allocation9_spill] sm:$0xff] }
 0x254   :  { %4526 = vmatprep.mubr.bf16.mxu1 %v11810_v56  ;;  %v3541_v23 = vpop.f32.mrf.mxu0  ;;  %4826 = vmatpush1.bf16.msra.mxu0 %v11281_v43  ;;  %v11323_v35 = vld [vmem:[%s18053_s3 + $0xc0] ss:$16 sps:$4 sm:$0xff]  }
 0x255   :  { %v3894_v31 = vpop.f32.mrf.mxu1  ;;  %v13872_v40 = vpack.c.bf16 %v5599_v22, %v5595_v19  ;;  %v5600_v25 = vmax.f32 %v3889_v1, 0.0  ;;  %v3893_v38 = vadd.f32 %v3892_v3, %v3540_v36  ;;  %v3542_v60 = vadd.f32 %v3541_v23, %v13028_v51  ;;  %4827 = vmatprep.subr.bf16.mxu0 %v11286_v61  ;;  %v11813_v61 = vld [vmem:[%s18050_s0 + $0xe4] ss:$28 sps:$4 sm:$0xff]   ;;  %v11290_v19 = vld [vmem:[%s18051_s1 + $0x408] ss:$16 sps:$4 sm:$0xff]  }
 0x256   :  { %v3543_v9 = vpop.f32.mrf.mxu0 }
 0x257   :  { %18285 = vst [vmem:[#allocation102_spill] sm:$0xff] %v13872_v40  ;;  %v3896_v55 = vpop.f32.mrf.mxu1  ;;  %v3895_v27 = vadd.f32 %v3894_v31, %v3542_v60  ;;  %v3544_v41 = vadd.f32 %v3543_v9, %v18286_v4  ;;  %v13879_v0 = vpack.c.bf16 %v5600_v25, %v5596_v26  ;;  %v5603_v17 = vmax.f32 %v3893_v38, 0.0  ;;  %v11295_v26 = vld [vmem:[%s18051_s1 + $0x5ec] ss:$16 sps:$4 sm:$0xff]   ;;  %v18294_v4 = vld [vmem:[#allocation11_spill] sm:$0xff] }
 0x258   :  { %v3545_v49 = vpop.f32.mrf.mxu0  ;;  %4828 = vmatpush1.bf16.msra.mxu0 %v11284_v12  ;;  %v18292_v25 = vld [vmem:[#allocation10_spill] sm:$0xff] }
 0x259   :  { %18287 = vst [vmem:[#allocation6_spill] sm:$0xff] %v13879_v0  ;;  %v3898_v45 = vpop.f32.mrf.mxu1  ;;  %v3897_v51 = vadd.f32 %v3896_v55, %v3544_v41  ;;  %v3546_v5 = vadd.f32 %v3545_v49, %v18288_v28  ;;  %4829 = vmatprep.subr.bf16.mxu0 %v11289_v37  ;;  %v5604_v3 = vmax.f32 %v3895_v27, 0.0  ;;  %v11293_v55 = vld [vmem:[%s18051_s1 + $0x5e8] ss:$16 sps:$4 sm:$0xff]   ;;  %v11298_v49 = vld [vmem:[%s18051_s1 + $0x5cc] ss:$16 sps:$4 sm:$0xff]  }
 0x25a   :  { %v3549_v39 = vpop.f32.mrf.mxu0  ;;  %4174 = vmatmul.mubr.bf16.gmra.mxu0 %v11811_v53  ;;  %v11816_v28 = vld [vmem:[%s18050_s0 + $0xe8] ss:$28 sps:$4 sm:$0xff]   ;;  %v11927_v0 = vld [vmem:[%s18050_s0 + $0x10] ss:$28 sps:$4 sm:$0xff]  }
 0x25b   :  { %v3902_v47 = vpop.f32.mrf.mxu1  ;;  %4527 = vmatmul.mubr.bf16.gmra.mxu1 %v11812_v18  ;;  %v5607_v6 = vmax.f32 %v3897_v51, 0.0  ;;  %v3899_v43 = vadd.f32 %v3898_v45, %v3546_v5  ;;  %v3550_v54 = vadd.f32 %v3549_v39, %v18289_v30  ;;  %4183 = vmatprep.mubr.bf16.mxu0 %v11813_v61  ;;  %v11815_v51 = vld [vmem:[%s18050_s0 + $0xe0] ss:$28 sps:$4 sm:$0xff]  }
 0x25c   :  { %4536 = vmatprep.mubr.bf16.mxu1 %v11814_v24  ;;  %v3551_v50 = vpop.f32.mrf.mxu0  ;;  %4830 = vmatpush1.bf16.msra.mxu0 %v11287_v2  ;;  %v11817_v18 = vld [vmem:[%s18050_s0 + $0x11c] ss:$28 sps:$4 sm:$0xff]  }
 0x25d   :  { %v3904_v10 = vpop.f32.mrf.mxu1  ;;  %v13904_v22 = vpack.c.bf16 %v5607_v6, %v5603_v17  ;;  %v5608_v1 = vmax.f32 %v3899_v43, 0.0  ;;  %v3903_v36 = vadd.f32 %v3902_v47, %v3550_v54  ;;  %v3552_v56 = vadd.f32 %v3551_v50, %v18291_v15  ;;  %4831 = vmatprep.subr.bf16.mxu0 %v11292_v52  ;;  %v18295_v47 = vld [vmem:[#allocation12_spill] sm:$0xff]  ;;  %v11818_v17 = vld [vmem:[%s18050_s0 + $0x124] ss:$28 sps:$4 sm:$0xff]  }
 0x25e   :  { %v3553_v23 = vpop.f32.mrf.mxu0  ;;  %v11296_v54 = vld [vmem:[%s18051_s1 + $0x5c8] ss:$16 sps:$4 sm:$0xff]   ;;  %v18297_v50 = vld [vmem:[#allocation13_spill] sm:$0xff] }
 0x25f   :  { %18290 = vst [vmem:[#allocation7_spill] sm:$0xff] %v13904_v22  ;;  %v3906_v31 = vpop.f32.mrf.mxu1  ;;  %v3905_v12 = vadd.f32 %v3904_v10, %v3552_v56  ;;  %v3554_v38 = vadd.f32 %v3553_v23, %v18292_v25  ;;  %v13911_v60 = vpack.c.bf16 %v5608_v1, %v5604_v3  ;;  %v5611_v5 = vmax.f32 %v3903_v36, 0.0  ;;  %v11301_v56 = vld [vmem:[%s18051_s1 + $0x5ac] ss:$16 sps:$4 sm:$0xff]  }
 0x260   :  { %v3555_v37 = vpop.f32.mrf.mxu0  ;;  %4832 = vmatpush1.bf16.msra.mxu0 %v11290_v19 }
 0x261   :  { %18293 = vst [vmem:[#allocation8_spill] sm:$0xff] %v13911_v60  ;;  %v3908_v9 = vpop.f32.mrf.mxu1  ;;  %v3907_v27 = vadd.f32 %v3906_v31, %v3554_v38  ;;  %v3556_v41 = vadd.f32 %v3555_v37, %v18294_v4  ;;  %4833 = vmatprep.subr.bf16.mxu0 %v11295_v26  ;;  %v5612_v6 = vmax.f32 %v3905_v12, 0.0  ;;  %v11299_v12 = vld [vmem:[%s18051_s1 + $0x5a8] ss:$16 sps:$4 sm:$0xff]  }
 0x262   :  { %v3559_v45 = vpop.f32.mrf.mxu0  ;;  %4184 = vmatmul.mubr.bf16.gmra.mxu0 %v11815_v51 }
 0x263   :  { %v3912_v2 = vpop.f32.mrf.mxu1  ;;  %4537 = vmatmul.mubr.bf16.gmra.mxu1 %v11816_v28  ;;  %v5615_v52 = vmax.f32 %v3907_v27, 0.0  ;;  %v3909_v39 = vadd.f32 %v3908_v9, %v3556_v41  ;;  %v3560_v53 = vadd.f32 %v3559_v45, %v18295_v47  ;;  %4193 = vmatprep.mubr.bf16.mxu0 %v11817_v18 }
 0x264   :  { %4546 = vmatprep.mubr.bf16.mxu1 %v11818_v17  ;;  %v3561_v43 = vpop.f32.mrf.mxu0  ;;  %4834 = vmatpush2.bf16.msra.mxu0 %v11293_v55  ;;  %v11820_v55 = vld [vmem:[%s18050_s0 + $0x120] ss:$28 sps:$4 sm:$0xff]  }
 0x265   :  { %v3914_v30 = vpop.f32.mrf.mxu1  ;;  %v13936_v61 = vpack.c.bf16 %v5615_v52, %v5611_v5  ;;  %v5616_v24 = vmax.f32 %v3909_v39, 0.0  ;;  %v3913_v3 = vadd.f32 %v3912_v2, %v3560_v53  ;;  %v3562_v10 = vadd.f32 %v3561_v43, %v18297_v50  ;;  %4835 = vmatprep.subr.bf16.mxu0 %v11298_v49  ;;  %v18299_v49 = vld [vmem:[#allocation14_spill] sm:$0xff]  ;;  %v11822_v2 = vld [vmem:[%s18050_s0 + $0x15c] ss:$28 sps:$4 sm:$0xff]   ;;  %v18301_v53 = vld [vmem:[#allocation15_spill] sm:$0xff] }
 0x266   :  { %v3563_v19 = vpop.f32.mrf.mxu0 }
 0x267   :  { %18296 = vst [vmem:[#allocation9_spill] sm:$0xff] %v13936_v61  ;;  %v3916_v1 = vpop.f32.mrf.mxu1  ;;  %v3915_v36 = vadd.f32 %v3914_v30, %v3562_v10  ;;  %v3564_v15 = vadd.f32 %v3563_v19, %v13134_v33  ;;  %v13943_v26 = vpack.c.bf16 %v5616_v24, %v5612_v6  ;;  %v11819_v33 = vld [vmem:[%s18050_s0 + $0x118] ss:$28 sps:$4 sm:$0xff]   ;;  %v5619_v27 = vmax.f32 %v3913_v3, 0.0  ;;  %v18304_v19 = vld [vmem:[#allocation17_spill] sm:$0xff] }
 0x268   :  { %v3565_v23 = vpop.f32.mrf.mxu0  ;;  %4836 = vmatpush2.bf16.msra.mxu0 %v11296_v54  ;;  %v18302_v30 = vld [vmem:[#allocation16_spill] sm:$0xff] }
 0x269   :  { %18298 = vst [vmem:[#allocation10_spill] sm:$0xff] %v13943_v26  ;;  %v3918_v31 = vpop.f32.mrf.mxu1  ;;  %v3917_v25 = vadd.f32 %v3916_v1, %v3564_v15  ;;  %v3566_v38 = vadd.f32 %v3565_v23, %v13138_v42  ;;  %4837 = vmatprep.subr.bf16.mxu0 %v11301_v56  ;;  %v11821_v42 = vld [vmem:[%s18050_s0 + $0x154] ss:$28 sps:$4 sm:$0xff]   ;;  %v5620_v51 = vmax.f32 %v3915_v36, 0.0 }
 0x26a   :  { %v3569_v37 = vpop.f32.mrf.mxu0  ;;  %4194 = vmatmul.mubr.bf16.gmra.mxu0 %v11819_v33  ;;  %v11823_v56 = vld [vmem:[%s18050_s0 + $0x150] ss:$28 sps:$4 sm:$0xff]   ;;  %v11824_v23 = vld [vmem:[%s18050_s0 + $0x158] ss:$28 sps:$4 sm:$0xff]  }
 0x26b   :  { %v3922_v9 = vpop.f32.mrf.mxu1  ;;  %4547 = vmatmul.mubr.bf16.gmra.mxu1 %v11820_v55  ;;  %v5623_v4 = vmax.f32 %v3917_v25, 0.0  ;;  %v3919_v41 = vadd.f32 %v3918_v31, %v3566_v38  ;;  %v3570_v45 = vadd.f32 %v3569_v37, %v18299_v49  ;;  %4203 = vmatprep.mubr.bf16.mxu0 %v11821_v42  ;;  %v18305_v38 = vld [vmem:[#allocation18_spill] sm:$0xff]  ;;  %v11826_v33 = vld [vmem:[%s18050_s0 + $0x194] ss:$28 sps:$4 sm:$0xff]  }
 0x26c   :  { %4556 = vmatprep.mubr.bf16.mxu1 %v11822_v2  ;;  %v3571_v28 = vpop.f32.mrf.mxu0  ;;  %4838 = vmatpush2.bf16.msra.mxu0 %v11299_v12  ;;  %v18307_v42 = vld [vmem:[#allocation19_spill] sm:$0xff] }
 0x26d   :  { %v3924_v5 = vpop.f32.mrf.mxu1  ;;  %v13962_v52 = vpack.c.bf16 %v5623_v4, %v5619_v27  ;;  %v5624_v39 = vmax.f32 %v3919_v41, 0.0  ;;  %v3923_v47 = vadd.f32 %v3922_v9, %v3570_v45  ;;  %v3572_v18 = vadd.f32 %v3571_v28, %v18301_v53  ;;  %v11825_v9 = vld [vmem:[%s18050_s0 + $0x18c] ss:$28 sps:$4 sm:$0xff]  }
 0x26e   :  { %v3573_v17 = vpop.f32.mrf.mxu0  ;;  %v11304_v53 = vld [vmem:[%s18051_s1 + $0x58c] ss:$16 sps:$4 sm:$0xff]  }
 0x26f   :  { %18300 = vst [vmem:[#allocation11_spill] sm:$0xff] %v13962_v52  ;;  %v3926_v6 = vpop.f32.mrf.mxu1  ;;  %v3925_v43 = vadd.f32 %v3924_v5, %v3572_v18  ;;  %v3574_v54 = vadd.f32 %v3573_v17, %v18302_v30  ;;  %v13966_v24 = vpack.c.bf16 %v5624_v39, %v5620_v51  ;;  %v5627_v31 = vmax.f32 %v3923_v47, 0.0  ;;  %v18308_v39 = vld [vmem:[#allocation20_spill] sm:$0xff]  ;;  %4839 = vmatprep.subr.bf16.mxu0 %v11304_v53 }
 0x270   :  { %v3575_v3 = vpop.f32.mrf.mxu0 }
 0x271   :  { %18303 = vst [vmem:[#allocation12_spill] sm:$0xff] %v13966_v24  ;;  %v3928_v50 = vpop.f32.mrf.mxu1  ;;  %v3927_v10 = vadd.f32 %v3926_v6, %v3574_v54  ;;  %v3576_v1 = vadd.f32 %v3575_v3, %v18304_v19  ;;  %v5628_v55 = vmax.f32 %v3925_v43, 0.0  ;;  %v11302_v43 = vld [vmem:[%s18051_s1 + $0x588] ss:$16 sps:$4 sm:$0xff]   ;;  %v18310_v54 = vld [vmem:[#allocation21_spill] sm:$0xff] }
 0x272   :  { %v3579_v36 = vpop.f32.mrf.mxu0  ;;  %4204 = vmatmul.mubr.bf16.gmra.mxu0 %v11823_v56  ;;  %v11827_v19 = vld [vmem:[%s18050_s0 + $0x188] ss:$28 sps:$4 sm:$0xff]  }
 0x273   :  { %v3932_v15 = vpop.f32.mrf.mxu1  ;;  %4557 = vmatmul.mubr.bf16.gmra.mxu1 %v11824_v23  ;;  %v5631_v12 = vmax.f32 %v3927_v10, 0.0  ;;  %v3929_v25 = vadd.f32 %v3928_v50, %v3576_v1  ;;  %v3580_v37 = vadd.f32 %v3579_v36, %v18305_v38  ;;  %4213 = vmatprep.mubr.bf16.mxu0 %v11825_v9  ;;  %v11828_v1 = vld [vmem:[%s18050_s0 + $0x190] ss:$28 sps:$4 sm:$0xff]  }
 0x274   :  { %4566 = vmatprep.mubr.bf16.mxu1 %v11826_v33  ;;  %v3581_v27 = vpop.f32.mrf.mxu0  ;;  %v18311_v23 = vld [vmem:[#allocation22_spill] sm:$0xff]  ;;  %4840 = vmatpush2.bf16.msra.mxu0 %v11302_v43 }
 0x275   :  { %v3934_v4 = vpop.f32.mrf.mxu1  ;;  %v13982_v41 = vpack.c.bf16 %v5631_v12, %v5627_v31  ;;  %v5632_v49 = vmax.f32 %v3929_v25, 0.0  ;;  %v3933_v45 = vadd.f32 %v3932_v15, %v3580_v37  ;;  %v3582_v2 = vadd.f32 %v3581_v27, %v18307_v42  ;;  %v11829_v12 = vld [vmem:[%s18050_s0 + $0x1c4] ss:$28 sps:$4 sm:$0xff]   ;;  %v11830_v25 = vld [vmem:[%s18050_s0 + $0x1cc] ss:$28 sps:$4 sm:$0xff]   ;;  %v18313_v27 = vld [vmem:[#allocation23_spill] sm:$0xff] }
 0x276   :  { %v3583_v51 = vpop.f32.mrf.mxu0 }
 0x277   :  { %18306 = vst [vmem:[#allocation13_spill] sm:$0xff] %v13982_v41  ;;  %v3936_v28 = vpop.f32.mrf.mxu1  ;;  %v3935_v5 = vadd.f32 %v3934_v4, %v3582_v2  ;;  %v3584_v47 = vadd.f32 %v3583_v51, %v18308_v39  ;;  %v13989_v18 = vpack.c.bf16 %v5632_v49, %v5628_v55  ;;  %v5635_v36 = vmax.f32 %v3933_v45, 0.0  ;;  %v18314_v51 = vld [vmem:[#allocation24_spill] sm:$0xff] }
 0x278   :  { %v3585_v17 = vpop.f32.mrf.mxu0 }
 0x279   :  { %18309 = vst [vmem:[#allocation14_spill] sm:$0xff] %v13989_v18  ;;  %v3938_v6 = vpop.f32.mrf.mxu1  ;;  %v3937_v30 = vadd.f32 %v3936_v28, %v3584_v47  ;;  %v3586_v3 = vadd.f32 %v3585_v17, %v18310_v54  ;;  %v5636_v49 = vmax.f32 %v3935_v5, 0.0  ;;  %v11832_v5 = vld [vmem:[%s18050_s0 + $0x1c8] ss:$28 sps:$4 sm:$0xff]  }
 0x27a   :  { %v3589_v50 = vpop.f32.mrf.mxu0  ;;  %4214 = vmatmul.mubr.bf16.gmra.mxu0 %v11827_v19 }
 0x27b   :  { %v3942_v10 = vpop.f32.mrf.mxu1  ;;  %4567 = vmatmul.mubr.bf16.gmra.mxu1 %v11828_v1  ;;  %v5639_v15 = vmax.f32 %v3937_v30, 0.0  ;;  %v3939_v56 = vadd.f32 %v3938_v6, %v3586_v3  ;;  %v3590_v31 = vadd.f32 %v3589_v50, %v18311_v23  ;;  %4223 = vmatprep.mubr.bf16.mxu0 %v11829_v12  ;;  %v18316_v6 = vld [vmem:[#allocation25_spill] sm:$0xff]  ;;  %v18317_v1 = vld [vmem:[#allocation26_spill] sm:$0xff] }
 0x27c   :  { %4576 = vmatprep.mubr.bf16.mxu1 %v11830_v25  ;;  %v3591_v38 = vpop.f32.mrf.mxu0  ;;  %v11831_v3 = vld [vmem:[%s18050_s0 + $0x1c0] ss:$28 sps:$4 sm:$0xff]  }
 0x27d   :  { %v3944_v37 = vpop.f32.mrf.mxu1  ;;  %v14008_v9 = vpack.c.bf16 %v5639_v15, %v5635_v36  ;;  %v5640_v33 = vmax.f32 %v3939_v56, 0.0  ;;  %v3943_v55 = vadd.f32 %v3942_v10, %v3590_v31  ;;  %v3592_v4 = vadd.f32 %v3591_v38, %v18313_v27  ;;  %v11833_v15 = vld [vmem:[%s18050_s0 + $0x1fc] ss:$28 sps:$4 sm:$0xff]   ;;  %v11834_v56 = vld [vmem:[%s18050_s0 + $0x204] ss:$28 sps:$4 sm:$0xff]  }
 0x27e   :  { %v3593_v45 = vpop.f32.mrf.mxu0  ;;  %v11305_v27 = vld [vmem:[%s18051_s1 + $0x568] ss:$16 sps:$4 sm:$0xff]  }
 0x27f   :  { %18312 = vst [vmem:[#allocation15_spill] sm:$0xff] %v14008_v9  ;;  %v3946_v42 = vpop.f32.mrf.mxu1  ;;  %v3945_v2 = vadd.f32 %v3944_v37, %v3592_v4  ;;  %v3594_v28 = vadd.f32 %v3593_v45, %v18314_v51  ;;  %v14012_v53 = vpack.c.bf16 %v5640_v33, %v5636_v49  ;;  %v5643_v50 = vmax.f32 %v3943_v55, 0.0  ;;  %v18319_v33 = vld [vmem:[#allocation27_spill] sm:$0xff]  ;;  %v11307_v4 = vld [vmem:[%s18051_s1 + $0x56c] ss:$16 sps:$4 sm:$0xff]  }
 0x280   :  { %v3595_v39 = vpop.f32.mrf.mxu0  ;;  %4841 = vmatprep.subr.bf16.mxu0 %v11307_v4 }
 0x281   :  { %v3948_v47 = vpop.f32.mrf.mxu1  ;;  %18315 = vst [vmem:[#allocation16_spill] sm:$0xff] %v14012_v53  ;;  %v3947_v17 = vadd.f32 %v3946_v42, %v3594_v28  ;;  %v3596_v30 = vadd.f32 %v3595_v39, %v18316_v6  ;;  %v5644_v23 = vmax.f32 %v3945_v2, 0.0  ;;  %v18320_v2 = vld [vmem:[#allocation28_spill] sm:$0xff]  ;;  %4842 = vmatpush2.bf16.msra.mxu0 %v11305_v27  ;;  %v18322_v6 = vld [vmem:[#allocation29_spill] sm:$0xff] }
 0x282   :  { %v3599_v43 = vpop.f32.mrf.mxu0  ;;  %4224 = vmatmul.mubr.bf16.gmra.mxu0 %v11831_v3  ;;  %v11835_v3 = vld [vmem:[%s18050_s0 + $0x1f8] ss:$28 sps:$4 sm:$0xff]  }
 0x283   :  { %v3952_v54 = vpop.f32.mrf.mxu1  ;;  %4577 = vmatmul.mubr.bf16.gmra.mxu1 %v11832_v5  ;;  %v5647_v10 = vmax.f32 %v3947_v17, 0.0  ;;  %v3949_v19 = vadd.f32 %v3948_v47, %v3596_v30  ;;  %v3600_v36 = vadd.f32 %v3599_v43, %v18317_v1  ;;  %4233 = vmatprep.mubr.bf16.mxu0 %v11833_v15  ;;  %v11836_v5 = vld [vmem:[%s18050_s0 + $0x200] ss:$28 sps:$4 sm:$0xff]   ;;  %v18323_v1 = vld [vmem:[#allocation30_spill] sm:$0xff]  ;;  %v11837_v15 = vld [vmem:[%s18050_s0 + $0x234] ss:$28 sps:$4 sm:$0xff]  }
 0x284   :  { %4586 = vmatprep.mubr.bf16.mxu1 %v11834_v56  ;;  %v3601_v31 = vpop.f32.mrf.mxu0  ;;  %v11838_v56 = vld [vmem:[%s18050_s0 + $0x23c] ss:$28 sps:$4 sm:$0xff]  }
 0x285   :  { %v3954_v12 = vpop.f32.mrf.mxu1  ;;  %v14028_v25 = vpack.c.bf16 %v5647_v10, %v5643_v50  ;;  %v5648_v38 = vmax.f32 %v3949_v19, 0.0  ;;  %v3953_v37 = vadd.f32 %v3952_v54, %v3600_v36  ;;  %v3602_v55 = vadd.f32 %v3601_v31, %v18319_v33 }
 0x286   :  { %v3603_v49 = vpop.f32.mrf.mxu0 }
 0x287   :  { %18318 = vst [vmem:[#allocation17_spill] sm:$0xff] %v14028_v25  ;;  %v3956_v45 = vpop.f32.mrf.mxu1  ;;  %v3955_v42 = vadd.f32 %v3954_v12, %v3602_v55  ;;  %v3604_v51 = vadd.f32 %v3603_v49, %v18320_v2  ;;  %v14038_v28 = vpack.c.bf16 %v5648_v38, %v5644_v23  ;;  %v5651_v50 = vmax.f32 %v3953_v37, 0.0  ;;  %v18325_v55 = vld [vmem:[#allocation31_spill] sm:$0xff]  ;;  %v18326_v2 = vld [vmem:[#allocation32_spill] sm:$0xff] }
 0x288   :  { %v3605_v39 = vpop.f32.mrf.mxu0 }
 0x289   :  { %18321 = vst [vmem:[#allocation18_spill] sm:$0xff] %v14038_v28  ;;  %v3958_v47 = vpop.f32.mrf.mxu1  ;;  %v3957_v17 = vadd.f32 %v3956_v45, %v3604_v51  ;;  %v3606_v30 = vadd.f32 %v3605_v39, %v18322_v6  ;;  %v5652_v23 = vmax.f32 %v3955_v42, 0.0 }
 0x28a   :  { %v3609_v43 = vpop.f32.mrf.mxu0  ;;  %4234 = vmatmul.mubr.bf16.gmra.mxu0 %v11835_v3 }
 0x28b   :  { %v3962_v54 = vpop.f32.mrf.mxu1  ;;  %4587 = vmatmul.mubr.bf16.gmra.mxu1 %v11836_v5  ;;  %v5655_v10 = vmax.f32 %v3957_v17, 0.0  ;;  %v3959_v19 = vadd.f32 %v3958_v47, %v3606_v30  ;;  %v3610_v36 = vadd.f32 %v3609_v43, %v18323_v1  ;;  %4243 = vmatprep.mubr.bf16.mxu0 %v11837_v15  ;;  %v18328_v30 = vld [vmem:[#allocation33_spill] sm:$0xff]  ;;  %v11840_v5 = vld [vmem:[%s18050_s0 + $0x238] ss:$28 sps:$4 sm:$0xff]   ;;  %v18329_v1 = vld [vmem:[#allocation34_spill] sm:$0xff] }
 0x28c   :  { %4596 = vmatprep.mubr.bf16.mxu1 %v11838_v56  ;;  %v3611_v31 = vpop.f32.mrf.mxu0  ;;  %v11841_v15 = vld [vmem:[%s18050_s0 + $0x26c] ss:$28 sps:$4 sm:$0xff]   ;;  %v11842_v56 = vld [vmem:[%s18050_s0 + $0x274] ss:$28 sps:$4 sm:$0xff]  }
 0x28d   :  { %v3964_v12 = vpop.f32.mrf.mxu1  ;;  %v14054_v38 = vpack.c.bf16 %v5655_v10, %v5651_v50  ;;  %v5656_v37 = vmax.f32 %v3959_v19, 0.0  ;;  %v3963_v33 = vadd.f32 %v3962_v54, %v3610_v36  ;;  %v3612_v27 = vadd.f32 %v3611_v31, %v18325_v55  ;;  %v11839_v54 = vld [vmem:[%s18050_s0 + $0x230] ss:$28 sps:$4 sm:$0xff]  }
 0x28e   :  { %v3613_v4 = vpop.f32.mrf.mxu0 }
 0x28f   :  { %18324 = vst [vmem:[#allocation19_spill] sm:$0xff] %v14054_v38  ;;  %v3966_v49 = vpop.f32.mrf.mxu1  ;;  %v3965_v45 = vadd.f32 %v3964_v12, %v3612_v27  ;;  %v3614_v51 = vadd.f32 %v3613_v4, %v18326_v2  ;;  %v14058_v39 = vpack.c.bf16 %v5656_v37, %v5652_v23  ;;  %v5659_v50 = vmax.f32 %v3963_v33, 0.0  ;;  %v18331_v27 = vld [vmem:[#allocation35_spill] sm:$0xff]  ;;  %v11310_v2 = vld [vmem:[%s18051_s1 + $0x54c] ss:$16 sps:$4 sm:$0xff]  }
 0x290   :  { %v3615_v47 = vpop.f32.mrf.mxu0  ;;  %4843 = vmatprep.subr.bf16.mxu0 %v11310_v2 }
 0x291   :  { %18327 = vst [vmem:[#allocation20_spill] sm:$0xff] %v14058_v39  ;;  %v3968_v17 = vpop.f32.mrf.mxu1  ;;  %v3967_v6 = vadd.f32 %v3966_v49, %v3614_v51  ;;  %v3616_v42 = vadd.f32 %v3615_v47, %v18328_v30  ;;  %v5660_v23 = vmax.f32 %v3965_v45, 0.0  ;;  %v11308_v49 = vld [vmem:[%s18051_s1 + $0x548] ss:$16 sps:$4 sm:$0xff]  }
 0x292   :  { %v3619_v43 = vpop.f32.mrf.mxu0  ;;  %4244 = vmatmul.mubr.bf16.gmra.mxu0 %v11839_v54  ;;  %v18332_v45 = vld [vmem:[#allocation36_spill] sm:$0xff]  ;;  %v18334_v54 = vld [vmem:[#allocation37_spill] sm:$0xff] }
 0x293   :  { %v3972_v3 = vpop.f32.mrf.mxu1  ;;  %4597 = vmatmul.mubr.bf16.gmra.mxu1 %v11840_v5  ;;  %v5663_v10 = vmax.f32 %v3967_v6, 0.0  ;;  %v3969_v19 = vadd.f32 %v3968_v17, %v3616_v42  ;;  %v3620_v36 = vadd.f32 %v3619_v43, %v18329_v1  ;;  %4253 = vmatprep.mubr.bf16.mxu0 %v11841_v15  ;;  %v11844_v1 = vld [vmem:[%s18050_s0 + $0x270] ss:$28 sps:$4 sm:$0xff]  }
 0x294   :  { %4606 = vmatprep.mubr.bf16.mxu1 %v11842_v56  ;;  %v3621_v31 = vpop.f32.mrf.mxu0  ;;  %4844 = vmatpush2.bf16.msra.mxu0 %v11308_v49 }
 0x295   :  { %v3974_v12 = vpop.f32.mrf.mxu1  ;;  %v14074_v37 = vpack.c.bf16 %v5663_v10, %v5659_v50  ;;  %v5664_v33 = vmax.f32 %v3969_v19, 0.0  ;;  %v3973_v55 = vadd.f32 %v3972_v3, %v3620_v36  ;;  %v3622_v4 = vadd.f32 %v3621_v31, %v18331_v27  ;;  %v11843_v19 = vld [vmem:[%s18050_s0 + $0x268] ss:$28 sps:$4 sm:$0xff]  }
 0x296   :  { %v3623_v51 = vpop.f32.mrf.mxu0 }
 0x297   :  { %18330 = vst [vmem:[#allocation21_spill] sm:$0xff] %v14074_v37  ;;  %v3976_v47 = vpop.f32.mrf.mxu1  ;;  %v3975_v17 = vadd.f32 %v3974_v12, %v3622_v4  ;;  %v3624_v6 = vadd.f32 %v3623_v51, %v18332_v45  ;;  %v14084_v30 = vpack.c.bf16 %v5664_v33, %v5660_v23  ;;  %v5667_v36 = vmax.f32 %v3973_v55, 0.0  ;;  %v18335_v23 = vld [vmem:[#allocation38_spill] sm:$0xff]  ;;  %v11845_v12 = vld [vmem:[%s18050_s0 + $0x2a4] ss:$28 sps:$4 sm:$0xff]  }
 0x298   :  { %v3625_v42 = vpop.f32.mrf.mxu0  ;;  %v11846_v33 = vld [vmem:[%s18050_s0 + $0x2ac] ss:$28 sps:$4 sm:$0xff]  }
 0x299   :  { %18333 = vst [vmem:[#allocation22_spill] sm:$0xff] %v14084_v30  ;;  %v3978_v43 = vpop.f32.mrf.mxu1  ;;  %v3977_v3 = vadd.f32 %v3976_v47, %v3624_v6  ;;  %v3626_v5 = vadd.f32 %v3625_v42, %v18334_v54  ;;  %v5668_v27 = vmax.f32 %v3975_v17, 0.0  ;;  %v18337_v47 = vld [vmem:[#allocation39_spill] sm:$0xff] }
 0x29a   :  { %v3629_v50 = vpop.f32.mrf.mxu0  ;;  %4254 = vmatmul.mubr.bf16.gmra.mxu0 %v11843_v19 }
 0x29b   :  { %v3982_v10 = vpop.f32.mrf.mxu1  ;;  %4607 = vmatmul.mubr.bf16.gmra.mxu1 %v11844_v1  ;;  %v5671_v15 = vmax.f32 %v3977_v3, 0.0  ;;  %v3979_v56 = vadd.f32 %v3978_v43, %v3626_v5  ;;  %v3630_v31 = vadd.f32 %v3629_v50, %v18335_v23  ;;  %4263 = vmatprep.mubr.bf16.mxu0 %v11845_v12  ;;  %v18338_v3 = vld [vmem:[#allocation40_spill] sm:$0xff]  ;;  %v18340_v23 = vld [vmem:[#allocation41_spill] sm:$0xff] }
 0x29c   :  { %4616 = vmatprep.mubr.bf16.mxu1 %v11846_v33  ;;  %v3631_v4 = vpop.f32.mrf.mxu0 }
 0x29d   :  { %v3984_v49 = vpop.f32.mrf.mxu1  ;;  %v14100_v2 = vpack.c.bf16 %v5671_v15, %v5667_v36  ;;  %v5672_v55 = vmax.f32 %v3979_v56, 0.0  ;;  %v3983_v51 = vadd.f32 %v3982_v10, %v3630_v31  ;;  %v3632_v45 = vadd.f32 %v3631_v4, %v18337_v47  ;;  %v11847_v10 = vld [vmem:[%s18050_s0 + $0x2a0] ss:$28 sps:$4 sm:$0xff]   ;;  %v11848_v36 = vld [vmem:[%s18050_s0 + $0x2a8] ss:$28 sps:$4 sm:$0xff]  }
 0x29e   :  { %v3633_v6 = vpop.f32.mrf.mxu0 }
 0x29f   :  { %18336 = vst [vmem:[#allocation23_spill] sm:$0xff] %v14100_v2  ;;  %v3986_v42 = vpop.f32.mrf.mxu1  ;;  %v3985_v43 = vadd.f32 %v3984_v49, %v3632_v45  ;;  %v3634_v54 = vadd.f32 %v3633_v6, %v18338_v3  ;;  %v14104_v5 = vpack.c.bf16 %v5672_v55, %v5668_v27  ;;  %v5675_v15 = vmax.f32 %v3983_v51, 0.0  ;;  %v18341_v27 = vld [vmem:[#allocation42_spill] sm:$0xff]  ;;  %v11849_v49 = vld [vmem:[%s18050_s0 + $0x2dc] ss:$28 sps:$4 sm:$0xff]  }
 0x2a0   :  { %v3635_v50 = vpop.f32.mrf.mxu0  ;;  %v11850_v55 = vld [vmem:[%s18050_s0 + $0x2e4] ss:$28 sps:$4 sm:$0xff]  }
 0x2a1   :  { %18339 = vst [vmem:[#allocation24_spill] sm:$0xff] %v14104_v5  ;;  %v3988_v19 = vpop.f32.mrf.mxu1  ;;  %v3987_v1 = vadd.f32 %v3986_v42, %v3634_v54  ;;  %v3636_v17 = vadd.f32 %v3635_v50, %v18340_v23  ;;  %v5676_v47 = vmax.f32 %v3985_v43, 0.0  ;;  %v18343_v54 = vld [vmem:[#allocation43_spill] sm:$0xff]  ;;  %v18344_v43 = vld [vmem:[#allocation44_spill] sm:$0xff] }
 0x2a2   :  { %v3639_v12 = vpop.f32.mrf.mxu0  ;;  %4264 = vmatmul.mubr.bf16.gmra.mxu0 %v11847_v10 }
 0x2a3   :  { %v3992_v33 = vpop.f32.mrf.mxu1  ;;  %4617 = vmatmul.mubr.bf16.gmra.mxu1 %v11848_v36  ;;  %v5679_v56 = vmax.f32 %v3987_v1, 0.0  ;;  %v3989_v31 = vadd.f32 %v3988_v19, %v3636_v17  ;;  %v3640_v4 = vadd.f32 %v3639_v12, %v18341_v27  ;;  %4273 = vmatprep.mubr.bf16.mxu0 %v11849_v49  ;;  %v11311_v19 = vld [vmem:[%s18051_s1 + $0x528] ss:$16 sps:$4 sm:$0xff]   ;;  %v11313_v1 = vld [vmem:[%s18051_s1 + $0x52c] ss:$16 sps:$4 sm:$0xff]  }
 0x2a4   :  { %4626 = vmatprep.mubr.bf16.mxu1 %v11850_v55  ;;  %v3641_v45 = vpop.f32.mrf.mxu0  ;;  %4845 = vmatprep.subr.bf16.mxu0 %v11313_v1  ;;  %v11851_v55 = vld [vmem:[%s18050_s0 + $0x2d8] ss:$28 sps:$4 sm:$0xff]  }
 0x2a5   :  { %v3994_v6 = vpop.f32.mrf.mxu1  ;;  %v14120_v42 = vpack.c.bf16 %v5679_v56, %v5675_v15  ;;  %v5680_v51 = vmax.f32 %v3989_v31, 0.0  ;;  %v3993_v3 = vadd.f32 %v3992_v33, %v3640_v4  ;;  %v3642_v50 = vadd.f32 %v3641_v45, %v18343_v54  ;;  %4846 = vmatpush2.bf16.msra.mxu0 %v11311_v19  ;;  %v18346_v31 = vld [vmem:[#allocation45_spill] sm:$0xff]  ;;  %v18347_v54 = vld [vmem:[#allocation46_spill] sm:$0xff]  ;;  %v11853_v19 = vld [vmem:[%s18050_s0 + $0x314] ss:$28 sps:$4 sm:$0xff]  }
 0x2a6   :  { %v3643_v23 = vpop.f32.mrf.mxu0  ;;  %v11852_v45 = vld [vmem:[%s18050_s0 + $0x2e0] ss:$28 sps:$4 sm:$0xff]  }
 0x2a7   :  { %18342 = vst [vmem:[#allocation25_spill] sm:$0xff] %v14120_v42  ;;  %v3996_v17 = vpop.f32.mrf.mxu1  ;;  %v3995_v12 = vadd.f32 %v3994_v6, %v3642_v50  ;;  %v3644_v10 = vadd.f32 %v3643_v23, %v18344_v43  ;;  %v14130_v36 = vpack.c.bf16 %v5680_v51, %v5676_v47  ;;  %v5683_v47 = vmax.f32 %v3993_v3, 0.0  ;;  %v11854_v1 = vld [vmem:[%s18050_s0 + $0x31c] ss:$28 sps:$4 sm:$0xff]  }
 0x2a8   :  { %v3645_v15 = vpop.f32.mrf.mxu0 }
 0x2a9   :  { %18345 = vst [vmem:[#allocation26_spill] sm:$0xff] %v14130_v36  ;;  %v3998_v33 = vpop.f32.mrf.mxu1  ;;  %v3997_v56 = vadd.f32 %v3996_v17, %v3644_v10  ;;  %v3646_v27 = vadd.f32 %v3645_v15, %v18346_v31  ;;  %v5684_v23 = vmax.f32 %v3995_v12, 0.0 }
 0x2aa   :  { %v3649_v4 = vpop.f32.mrf.mxu0  ;;  %4274 = vmatmul.mubr.bf16.gmra.mxu0 %v11851_v55  ;;  %v18350_v55 = vld [vmem:[#allocation48_spill] sm:$0xff] }
 0x2ab   :  { %v4002_v49 = vpop.f32.mrf.mxu1  ;;  %4627 = vmatmul.mubr.bf16.gmra.mxu1 %v11852_v45  ;;  %v5687_v6 = vmax.f32 %v3997_v56, 0.0  ;;  %v3999_v51 = vadd.f32 %v3998_v33, %v3646_v27  ;;  %v3650_v50 = vadd.f32 %v3649_v4, %v18347_v54  ;;  %4283 = vmatprep.mubr.bf16.mxu0 %v11853_v19  ;;  %v18349_v33 = vld [vmem:[#allocation47_spill] sm:$0xff] }
 0x2ac   :  { %4636 = vmatprep.mubr.bf16.mxu1 %v11854_v1  ;;  %v3651_v17 = vpop.f32.mrf.mxu0  ;;  %v18352_v1 = vld [vmem:[#allocation49_spill] sm:$0xff] }
 0x2ad   :  { %v4004_v43 = vpop.f32.mrf.mxu1  ;;  %v14146_v10 = vpack.c.bf16 %v5687_v6, %v5683_v47  ;;  %v5688_v3 = vmax.f32 %v3999_v51, 0.0  ;;  %v4003_v15 = vadd.f32 %v4002_v49, %v3650_v50  ;;  %v3652_v56 = vadd.f32 %v3651_v17, %v18349_v33  ;;  %v11855_v49 = vld [vmem:[%s18050_s0 + $0x310] ss:$28 sps:$4 sm:$0xff]   ;;  %v11856_v47 = vld [vmem:[%s18050_s0 + $0x318] ss:$28 sps:$4 sm:$0xff]  }
 0x2ae   :  { %v3653_v31 = vpop.f32.mrf.mxu0 }
 0x2af   :  { %18348 = vst [vmem:[#allocation27_spill] sm:$0xff] %v14146_v10  ;;  %v4006_v27 = vpop.f32.mrf.mxu1  ;;  %v4005_v4 = vadd.f32 %v4004_v43, %v3652_v56  ;;  %v3654_v45 = vadd.f32 %v3653_v31, %v18350_v55  ;;  %v14150_v54 = vpack.c.bf16 %v5688_v3, %v5684_v23  ;;  %v5691_v6 = vmax.f32 %v4003_v15, 0.0  ;;  %v18353_v23 = vld [vmem:[#allocation50_spill] sm:$0xff]  ;;  %v11858_v3 = vld [vmem:[%s18050_s0 + $0x354] ss:$28 sps:$4 sm:$0xff]  }
 0x2b0   :  { %v3655_v19 = vpop.f32.mrf.mxu0  ;;  %v11857_v43 = vld [vmem:[%s18050_s0 + $0x34c] ss:$28 sps:$4 sm:$0xff]  }
 0x2b1   :  { %18351 = vst [vmem:[#allocation28_spill] sm:$0xff] %v14150_v54  ;;  %v4008_v42 = vpop.f32.mrf.mxu1  ;;  %v4007_v36 = vadd.f32 %v4006_v27, %v3654_v45  ;;  %v3656_v12 = vadd.f32 %v3655_v19, %v18352_v1  ;;  %v5692_v33 = vmax.f32 %v4005_v4, 0.0  ;;  %v11316_v45 = vld [vmem:[%s18051_s1 + $0x50c] ss:$16 sps:$4 sm:$0xff]  }
 0x2b2   :  { %v3659_v2 = vpop.f32.mrf.mxu0  ;;  %4284 = vmatmul.mubr.bf16.gmra.mxu0 %v11855_v49  ;;  %v18356_v4 = vld [vmem:[#allocation52_spill] sm:$0xff]  ;;  %4847 = vmatprep.subr.bf16.mxu0 %v11316_v45 }
 0x2b3   :  { %v4012_v5 = vpop.f32.mrf.mxu1  ;;  %4637 = vmatmul.mubr.bf16.gmra.mxu1 %v11856_v47  ;;  %v5695_v51 = vmax.f32 %v4007_v36, 0.0  ;;  %v4009_v50 = vadd.f32 %v4008_v42, %v3656_v12  ;;  %v3660_v17 = vadd.f32 %v3659_v2, %v18353_v23  ;;  %4293 = vmatprep.mubr.bf16.mxu0 %v11857_v43  ;;  %v18355_v42 = vld [vmem:[#allocation51_spill] sm:$0xff]  ;;  %v11314_v2 = vld [vmem:[%s18051_s1 + $0x508] ss:$16 sps:$4 sm:$0xff]  }
 0x2b4   :  { %4646 = vmatprep.mubr.bf16.mxu1 %v11858_v3  ;;  %v3661_v56 = vpop.f32.mrf.mxu0  ;;  %4848 = vmatpush2.bf16.msra.mxu0 %v11314_v2  ;;  %v11859_v43 = vld [vmem:[%s18050_s0 + $0x348] ss:$28 sps:$4 sm:$0xff]   ;;  %v11860_v3 = vld [vmem:[%s18050_s0 + $0x350] ss:$28 sps:$4 sm:$0xff]  }
 0x2b5   :  { %v4014_v31 = vpop.f32.mrf.mxu1  ;;  %v14166_v27 = vpack.c.bf16 %v5695_v51, %v5691_v6  ;;  %v5696_v15 = vmax.f32 %v4009_v50, 0.0  ;;  %v4013_v36 = vadd.f32 %v4012_v5, %v3660_v17  ;;  %v3662_v55 = vadd.f32 %v3661_v56, %v18355_v42 }
 0x2b6   :  { %v3663_v19 = vpop.f32.mrf.mxu0 }
 0x2b7   :  { %18354 = vst [vmem:[#allocation29_spill] sm:$0xff] %v14166_v27  ;;  %v4016_v1 = vpop.f32.mrf.mxu1  ;;  %v4015_v12 = vadd.f32 %v4014_v31, %v3662_v55  ;;  %v3664_v49 = vadd.f32 %v3663_v19, %v18356_v4  ;;  %v14176_v47 = vpack.c.bf16 %v5696_v15, %v5692_v33  ;;  %v5699_v33 = vmax.f32 %v4013_v36, 0.0  ;;  %v18358_v15 = vld [vmem:[#allocation53_spill] sm:$0xff]  ;;  %v11862_v55 = vld [vmem:[%s18050_s0 + $0x38c] ss:$28 sps:$4 sm:$0xff]  }
 0x2b8   :  { %v3665_v6 = vpop.f32.mrf.mxu0 }
 0x2b9   :  { %18357 = vst [vmem:[#allocation30_spill] sm:$0xff] %v14176_v47  ;;  %v4018_v5 = vpop.f32.mrf.mxu1  ;;  %v4017_v51 = vadd.f32 %v4016_v1, %v3664_v49  ;;  %v3666_v50 = vadd.f32 %v3665_v6, %v13428_v46  ;;  %v11861_v46 = vld [vmem:[%s18050_s0 + $0x384] ss:$28 sps:$4 sm:$0xff]   ;;  %v5700_v2 = vmax.f32 %v4015_v12, 0.0  ;;  %v18360_v49 = vld [vmem:[#allocation54_spill] sm:$0xff] }
 0x2ba   :  { %v3669_v23 = vpop.f32.mrf.mxu0  ;;  %4294 = vmatmul.mubr.bf16.gmra.mxu0 %v11859_v43 }
 0x2bb   :  { %v4022_v17 = vpop.f32.mrf.mxu1  ;;  %4647 = vmatmul.mubr.bf16.gmra.mxu1 %v11860_v3  ;;  %v5703_v56 = vmax.f32 %v4017_v51, 0.0  ;;  %v4019_v31 = vadd.f32 %v4018_v5, %v3666_v50  ;;  %v3670_v42 = vadd.f32 %v3669_v23, %v18358_v15  ;;  %4303 = vmatprep.mubr.bf16.mxu0 %v11861_v46  ;;  %v18361_v23 = vld [vmem:[#allocation55_spill] sm:$0xff] }
 0x2bc   :  { %4656 = vmatprep.mubr.bf16.mxu1 %v11862_v55  ;;  %v3671_v45 = vpop.f32.mrf.mxu0  ;;  %v18363_v55 = vld [vmem:[#allocation56_spill] sm:$0xff] }
 0x2bd   :  { %v4024_v19 = vpop.f32.mrf.mxu1  ;;  %v14192_v1 = vpack.c.bf16 %v5703_v56, %v5699_v33  ;;  %v5704_v36 = vmax.f32 %v4019_v31, 0.0  ;;  %v4023_v4 = vadd.f32 %v4022_v17, %v3670_v42  ;;  %v3672_v6 = vadd.f32 %v3671_v45, %v18360_v49  ;;  %v11863_v17 = vld [vmem:[%s18050_s0 + $0x380] ss:$28 sps:$4 sm:$0xff]   ;;  %v11864_v33 = vld [vmem:[%s18050_s0 + $0x388] ss:$28 sps:$4 sm:$0xff]  }
 0x2be   :  { %v3673_v5 = vpop.f32.mrf.mxu0 }
 0x2bf   :  { %18359 = vst [vmem:[#allocation31_spill] sm:$0xff] %v14192_v1  ;;  %v4026_v51 = vpop.f32.mrf.mxu1  ;;  %v4025_v50 = vadd.f32 %v4024_v19, %v3672_v6  ;;  %v3674_v43 = vadd.f32 %v3673_v5, %v18361_v23  ;;  %v14196_v3 = vpack.c.bf16 %v5704_v36, %v5700_v2  ;;  %v5707_v56 = vmax.f32 %v4023_v4, 0.0  ;;  %v18364_v2 = vld [vmem:[#allocation57_spill] sm:$0xff]  ;;  %v11865_v19 = vld [vmem:[%s18050_s0 + $0x3bc] ss:$28 sps:$4 sm:$0xff]   ;;  %v18366_v23 = vld [vmem:[#allocation58_spill] sm:$0xff] }
 0x2c0   :  { %v3675_v15 = vpop.f32.mrf.mxu0  ;;  %v11866_v36 = vld [vmem:[%s18050_s0 + $0x3c4] ss:$28 sps:$4 sm:$0xff]  }
 0x2c1   :  { %18362 = vst [vmem:[#allocation32_spill] sm:$0xff] %v14196_v3  ;;  %v4028_v46 = vpop.f32.mrf.mxu1  ;;  %v4027_v27 = vadd.f32 %v4026_v51, %v3674_v43  ;;  %v3676_v12 = vadd.f32 %v3675_v15, %v18363_v55  ;;  %v5708_v49 = vmax.f32 %v4025_v50, 0.0  ;;  %v11322_v50 = vld [vmem:[%s18053_s3 + $0x2e4] ss:$16 sps:$4 sm:$0xff]  }
 0x2c2   :  { %v3679_v47 = vpop.f32.mrf.mxu0  ;;  %4304 = vmatmul.mubr.bf16.gmra.mxu0 %v11863_v17  ;;  %7050 = vmatprep.subr.bf16.mxu1 %v11322_v50 }
 0x2c3   :  { %v4032_v10 = vpop.f32.mrf.mxu1  ;;  %4657 = vmatmul.mubr.bf16.gmra.mxu1 %v11864_v33  ;;  %v5711_v31 = vmax.f32 %v4027_v27, 0.0  ;;  %v4029_v42 = vadd.f32 %v4028_v46, %v3676_v12  ;;  %v3680_v45 = vadd.f32 %v3679_v47, %v18364_v2  ;;  %4313 = vmatprep.mubr.bf16.mxu0 %v11865_v19  ;;  %v11319_v47 = vld [vmem:[%s18053_s3 + $0xe4] ss:$16 sps:$4 sm:$0xff]  }
 0x2c4   :  { %4666 = vmatprep.mubr.bf16.mxu1 %v11866_v36  ;;  %v3681_v6 = vpop.f32.mrf.mxu0  ;;  %v18367_v12 = vld [vmem:[#allocation59_spill] sm:$0xff]  ;;  %6697 = vmatprep.subr.bf16.mxu0 %v11319_v47 }
 0x2c5   :  { %v4034_v5 = vpop.f32.mrf.mxu1  ;;  %v14212_v51 = vpack.c.bf16 %v5711_v31, %v5707_v56  ;;  %v5712_v4 = vmax.f32 %v4029_v42, 0.0  ;;  %v4033_v27 = vadd.f32 %v4032_v10, %v3680_v45  ;;  %v3682_v43 = vadd.f32 %v3681_v6, %v18366_v23  ;;  %v18369_v42 = vld [vmem:[#allocation60_spill] sm:$0xff]  ;;  %v18370_v23 = vld [vmem:[#allocation61_spill] sm:$0xff]  ;;  %v11869_v47 = vld [vmem:[%s18050_s0 + $0x3f4] ss:$28 sps:$4 sm:$0xff]  }
 0x2c6   :  { %v3683_v15 = vpop.f32.mrf.mxu0  ;;  %v11867_v36 = vld [vmem:[%s18050_s0 + $0x3b8] ss:$28 sps:$4 sm:$0xff]   ;;  %v11868_v6 = vld [vmem:[%s18050_s0 + $0x3c0] ss:$28 sps:$4 sm:$0xff]  }
 0x2c7   :  { %18365 = vst [vmem:[#allocation33_spill] sm:$0xff] %v14212_v51  ;;  %v4036_v46 = vpop.f32.mrf.mxu1  ;;  %v4035_v55 = vadd.f32 %v4034_v5, %v3682_v43  ;;  %v3684_v17 = vadd.f32 %v3683_v15, %v18367_v12  ;;  %v14222_v33 = vpack.c.bf16 %v5712_v4, %v5708_v49  ;;  %v5715_v49 = vmax.f32 %v4033_v27, 0.0  ;;  %v11870_v15 = vld [vmem:[%s18050_s0 + $0x3fc] ss:$28 sps:$4 sm:$0xff]  }
 0x2c8   :  { %v3685_v56 = vpop.f32.mrf.mxu0 }
 0x2c9   :  { %18368 = vst [vmem:[#allocation34_spill] sm:$0xff] %v14222_v33  ;;  %v4038_v10 = vpop.f32.mrf.mxu1  ;;  %v4037_v31 = vadd.f32 %v4036_v46, %v3684_v17  ;;  %v3686_v2 = vadd.f32 %v3685_v56, %v18369_v42  ;;  %v5716_v46 = vmax.f32 %v4035_v55, 0.0 }
 0x2ca   :  { %v3689_v45 = vpop.f32.mrf.mxu0  ;;  %4314 = vmatmul.mubr.bf16.gmra.mxu0 %v11867_v36  ;;  %v18373_v36 = vld [vmem:[#allocation63_spill] sm:$0xff] }
 0x2cb   :  { %v4042_v19 = vpop.f32.mrf.mxu1  ;;  %4667 = vmatmul.mubr.bf16.gmra.mxu1 %v11868_v6  ;;  %v5719_v5 = vmax.f32 %v4037_v31, 0.0  ;;  %v4039_v4 = vadd.f32 %v4038_v10, %v3686_v2  ;;  %v3690_v43 = vadd.f32 %v3689_v45, %v18370_v23  ;;  %4323 = vmatprep.mubr.bf16.mxu0 %v11869_v47  ;;  %v18372_v10 = vld [vmem:[#allocation62_spill] sm:$0xff] }
 0x2cc   :  { %4676 = vmatprep.mubr.bf16.mxu1 %v11870_v15  ;;  %v3691_v12 = vpop.f32.mrf.mxu0  ;;  %v18375_v15 = vld [vmem:[#allocation64_spill] sm:$0xff] }
 0x2cd   :  { %v4044_v17 = vpop.f32.mrf.mxu1  ;;  %v14238_v50 = vpack.c.bf16 %v5719_v5, %v5715_v49  ;;  %v5720_v27 = vmax.f32 %v4039_v4, 0.0  ;;  %v4043_v56 = vadd.f32 %v4042_v19, %v3690_v43  ;;  %v3692_v31 = vadd.f32 %v3691_v12, %v18372_v10  ;;  %v11871_v19 = vld [vmem:[%s18050_s0 + $0x3f0] ss:$28 sps:$4 sm:$0xff]   ;;  %v11872_v49 = vld [vmem:[%s18050_s0 + $0x3f8] ss:$28 sps:$4 sm:$0xff]  }
 0x2ce   :  { %v3693_v42 = vpop.f32.mrf.mxu0 }
 0x2cf   :  { %18371 = vst [vmem:[#allocation35_spill] sm:$0xff] %v14238_v50  ;;  %v4046_v2 = vpop.f32.mrf.mxu1  ;;  %v4045_v45 = vadd.f32 %v4044_v17, %v3692_v31  ;;  %v3694_v6 = vadd.f32 %v3693_v42, %v18373_v36  ;;  %v14242_v23 = vpack.c.bf16 %v5720_v27, %v5716_v46  ;;  %v5723_v5 = vmax.f32 %v4043_v56, 0.0  ;;  %v18376_v46 = vld [vmem:[#allocation65_spill] sm:$0xff]  ;;  %v11873_v17 = vld [vmem:[%s18050_s0 + $0x42c] ss:$28 sps:$4 sm:$0xff]  }
 0x2d0   :  { %v3695_v47 = vpop.f32.mrf.mxu0  ;;  %v11874_v27 = vld [vmem:[%s18050_s0 + $0x434] ss:$28 sps:$4 sm:$0xff]  }
 0x2d1   :  { %18374 = vst [vmem:[#allocation36_spill] sm:$0xff] %v14242_v23  ;;  %v4048_v51 = vpop.f32.mrf.mxu1  ;;  %v4047_v33 = vadd.f32 %v4046_v2, %v3694_v6  ;;  %v3696_v55 = vadd.f32 %v3695_v47, %v18375_v15  ;;  %v5724_v10 = vmax.f32 %v4045_v45, 0.0  ;;  %v18379_v15 = vld [vmem:[#allocation67_spill] sm:$0xff] }
 0x2d2   :  { %v3699_v1 = vpop.f32.mrf.mxu0  ;;  %4324 = vmatmul.mubr.bf16.gmra.mxu0 %v11871_v19 }
 0x2d3   :  { %v4052_v3 = vpop.f32.mrf.mxu1  ;;  %4677 = vmatmul.mubr.bf16.gmra.mxu1 %v11872_v49  ;;  %v5727_v4 = vmax.f32 %v4047_v33, 0.0  ;;  %v4049_v43 = vadd.f32 %v4048_v51, %v3696_v55  ;;  %v3700_v12 = vadd.f32 %v3699_v1, %v18376_v46  ;;  %4333 = vmatprep.mubr.bf16.mxu0 %v11873_v17  ;;  %v18378_v51 = vld [vmem:[#allocation66_spill] sm:$0xff] }
 0x2d4   :  { %4686 = vmatprep.mubr.bf16.mxu1 %v11874_v27  ;;  %v3701_v31 = vpop.f32.mrf.mxu0  ;;  %v18381_v27 = vld [vmem:[#allocation68_spill] sm:$0xff] }
 0x2d5   :  { %v4054_v42 = vpop.f32.mrf.mxu1  ;;  %v14258_v2 = vpack.c.bf16 %v5727_v4, %v5723_v5  ;;  %v5728_v56 = vmax.f32 %v4049_v43, 0.0  ;;  %v4053_v33 = vadd.f32 %v4052_v3, %v3700_v12  ;;  %v3702_v36 = vadd.f32 %v3701_v31, %v18378_v51  ;;  %v11875_v3 = vld [vmem:[%s18050_s0 + $0x428] ss:$28 sps:$4 sm:$0xff]   ;;  %v11876_v5 = vld [vmem:[%s18050_s0 + $0x430] ss:$28 sps:$4 sm:$0xff]  }
 0x2d6   :  { %v3703_v1 = vpop.f32.mrf.mxu0 }
 0x2d7   :  { %18377 = vst [vmem:[#allocation37_spill] sm:$0xff] %v14258_v2  ;;  %v4056_v6 = vpop.f32.mrf.mxu1  ;;  %v4055_v47 = vadd.f32 %v4054_v42, %v3702_v36  ;;  %v3704_v55 = vadd.f32 %v3703_v1, %v18379_v15  ;;  %v14262_v19 = vpack.c.bf16 %v5728_v56, %v5724_v10  ;;  %v5731_v4 = vmax.f32 %v4053_v33, 0.0  ;;  %v18382_v10 = vld [vmem:[#allocation69_spill] sm:$0xff]  ;;  %v11878_v56 = vld [vmem:[%s18050_s0 + $0x46c] ss:$28 sps:$4 sm:$0xff]  }
 0x2d8   :  { %v3705_v49 = vpop.f32.mrf.mxu0  ;;  %v11877_v42 = vld [vmem:[%s18050_s0 + $0x464] ss:$28 sps:$4 sm:$0xff]  }
 0x2d9   :  { %18380 = vst [vmem:[#allocation38_spill] sm:$0xff] %v14262_v19  ;;  %v4058_v46 = vpop.f32.mrf.mxu1  ;;  %v4057_v17 = vadd.f32 %v4056_v6, %v3704_v55  ;;  %v3706_v45 = vadd.f32 %v3705_v49, %v18381_v27  ;;  %v5732_v51 = vmax.f32 %v4055_v47, 0.0  ;;  %v18384_v55 = vld [vmem:[#allocation70_spill] sm:$0xff]  ;;  %v18385_v27 = vld [vmem:[#allocation71_spill] sm:$0xff] }
 0x2da   :  { %v3709_v50 = vpop.f32.mrf.mxu0  ;;  %4334 = vmatmul.mubr.bf16.gmra.mxu0 %v11875_v3 }
 0x2db   :  { %v4062_v23 = vpop.f32.mrf.mxu1  ;;  %4687 = vmatmul.mubr.bf16.gmra.mxu1 %v11876_v5  ;;  %v5735_v43 = vmax.f32 %v4057_v17, 0.0  ;;  %v4059_v12 = vadd.f32 %v4058_v46, %v3706_v45  ;;  %v3710_v31 = vadd.f32 %v3709_v50, %v18382_v10  ;;  %4343 = vmatprep.mubr.bf16.mxu0 %v11877_v42 }
 0x2dc   :  { %4696 = vmatprep.mubr.bf16.mxu1 %v11878_v56  ;;  %v3711_v36 = vpop.f32.mrf.mxu0  ;;  %v18387_v56 = vld [vmem:[#allocation72_spill] sm:$0xff] }
 0x2dd   :  { %v4064_v1 = vpop.f32.mrf.mxu1  ;;  %v14278_v6 = vpack.c.bf16 %v5735_v43, %v5731_v4  ;;  %v5736_v33 = vmax.f32 %v4059_v12, 0.0  ;;  %v4063_v15 = vadd.f32 %v4062_v23, %v3710_v31  ;;  %v3712_v49 = vadd.f32 %v3711_v36, %v18384_v55  ;;  %v11879_v23 = vld [vmem:[%s18050_s0 + $0x460] ss:$28 sps:$4 sm:$0xff]   ;;  %v11880_v4 = vld [vmem:[%s18050_s0 + $0x468] ss:$28 sps:$4 sm:$0xff]  }
 0x2de   :  { %v3713_v50 = vpop.f32.mrf.mxu0 }
 0x2df   :  { %18383 = vst [vmem:[#allocation39_spill] sm:$0xff] %v14278_v6  ;;  %v4066_v46 = vpop.f32.mrf.mxu1  ;;  %v4065_v17 = vadd.f32 %v4064_v1, %v3712_v49  ;;  %v3714_v45 = vadd.f32 %v3713_v50, %v18385_v27  ;;  %v14282_v3 = vpack.c.bf16 %v5736_v33, %v5732_v51  ;;  %v5739_v43 = vmax.f32 %v4063_v15, 0.0  ;;  %v18388_v51 = vld [vmem:[#allocation73_spill] sm:$0xff]  ;;  %v11881_v1 = vld [vmem:[%s18050_s0 + $0x49c] ss:$28 sps:$4 sm:$0xff]  }
 0x2e0   :  { %v3715_v5 = vpop.f32.mrf.mxu0  ;;  %v11882_v33 = vld [vmem:[%s18050_s0 + $0x4a4] ss:$28 sps:$4 sm:$0xff]  }
 0x2e1   :  { %18386 = vst [vmem:[#allocation40_spill] sm:$0xff] %v14282_v3  ;;  %v4068_v10 = vpop.f32.mrf.mxu1  ;;  %v4067_v42 = vadd.f32 %v4066_v46, %v3714_v45  ;;  %v3716_v47 = vadd.f32 %v3715_v5, %v18387_v56  ;;  %v5740_v55 = vmax.f32 %v4065_v17, 0.0  ;;  %v18390_v45 = vld [vmem:[#allocation74_spill] sm:$0xff]  ;;  %v18391_v56 = vld [vmem:[#allocation75_spill] sm:$0xff] }
 0x2e2   :  { %v3719_v2 = vpop.f32.mrf.mxu0  ;;  %4344 = vmatmul.mubr.bf16.gmra.mxu0 %v11879_v23 }
 0x2e3   :  { %v4072_v19 = vpop.f32.mrf.mxu1  ;;  %4697 = vmatmul.mubr.bf16.gmra.mxu1 %v11880_v4  ;;  %v5743_v12 = vmax.f32 %v4067_v42, 0.0  ;;  %v4069_v31 = vadd.f32 %v4068_v10, %v3716_v47  ;;  %v3720_v36 = vadd.f32 %v3719_v2, %v18388_v51  ;;  %4353 = vmatprep.mubr.bf16.mxu0 %v11881_v1 }
 0x2e4   :  { %4706 = vmatprep.mubr.bf16.mxu1 %v11882_v33  ;;  %v3721_v49 = vpop.f32.mrf.mxu0  ;;  %v18393_v33 = vld [vmem:[#allocation76_spill] sm:$0xff] }
 0x2e5   :  { %v4074_v50 = vpop.f32.mrf.mxu1  ;;  %v14298_v46 = vpack.c.bf16 %v5743_v12, %v5739_v43  ;;  %v5744_v15 = vmax.f32 %v4069_v31, 0.0  ;;  %v4073_v27 = vadd.f32 %v4072_v19, %v3720_v36  ;;  %v3722_v5 = vadd.f32 %v3721_v49, %v18390_v45  ;;  %v11883_v19 = vld [vmem:[%s18050_s0 + $0x498] ss:$28 sps:$4 sm:$0xff]   ;;  %v11884_v43 = vld [vmem:[%s18050_s0 + $0x4a0] ss:$28 sps:$4 sm:$0xff]  }
 0x2e6   :  { %v3723_v2 = vpop.f32.mrf.mxu0 }
 0x2e7   :  { %18389 = vst [vmem:[#allocation41_spill] sm:$0xff] %v14298_v46  ;;  %v4076_v10 = vpop.f32.mrf.mxu1  ;;  %v4075_v42 = vadd.f32 %v4074_v50, %v3722_v5  ;;  %v3724_v47 = vadd.f32 %v3723_v2, %v18391_v56  ;;  %v14302_v23 = vpack.c.bf16 %v5744_v15, %v5740_v55  ;;  %v5747_v12 = vmax.f32 %v4073_v27, 0.0  ;;  %v18394_v55 = vld [vmem:[#allocation77_spill] sm:$0xff]  ;;  %v11885_v50 = vld [vmem:[%s18050_s0 + $0x4d4] ss:$28 sps:$4 sm:$0xff]  }
 0x2e8   :  { %v3725_v4 = vpop.f32.mrf.mxu0  ;;  %v11886_v15 = vld [vmem:[%s18050_s0 + $0x4dc] ss:$28 sps:$4 sm:$0xff]  }
 0x2e9   :  { %18392 = vst [vmem:[#allocation42_spill] sm:$0xff] %v14302_v23  ;;  %v4078_v51 = vpop.f32.mrf.mxu1  ;;  %v4077_v1 = vadd.f32 %v4076_v10, %v3724_v47  ;;  %v3726_v17 = vadd.f32 %v3725_v4, %v18393_v33  ;;  %v5748_v45 = vmax.f32 %v4075_v42, 0.0  ;;  %v18396_v47 = vld [vmem:[#allocation78_spill] sm:$0xff]  ;;  %v18397_v33 = vld [vmem:[#allocation79_spill] sm:$0xff] }
 0x2ea   :  { %v3729_v6 = vpop.f32.mrf.mxu0  ;;  %4354 = vmatmul.mubr.bf16.gmra.mxu0 %v11883_v19 }
 0x2eb   :  { %v4082_v3 = vpop.f32.mrf.mxu1  ;;  %4707 = vmatmul.mubr.bf16.gmra.mxu1 %v11884_v43  ;;  %v5751_v31 = vmax.f32 %v4077_v1, 0.0  ;;  %v4079_v36 = vadd.f32 %v4078_v51, %v3726_v17  ;;  %v3730_v49 = vadd.f32 %v3729_v6, %v18394_v55  ;;  %4363 = vmatprep.mubr.bf16.mxu0 %v11885_v50 }
 0x2ec   :  { %4716 = vmatprep.mubr.bf16.mxu1 %v11886_v15  ;;  %v3731_v5 = vpop.f32.mrf.mxu0  ;;  %v18399_v15 = vld [vmem:[#allocation80_spill] sm:$0xff] }
 0x2ed   :  { %v4084_v2 = vpop.f32.mrf.mxu1  ;;  %v14318_v10 = vpack.c.bf16 %v5751_v31, %v5747_v12  ;;  %v5752_v27 = vmax.f32 %v4079_v36, 0.0  ;;  %v4083_v56 = vadd.f32 %v4082_v3, %v3730_v49  ;;  %v3732_v4 = vadd.f32 %v3731_v5, %v18396_v47  ;;  %v11887_v3 = vld [vmem:[%s18050_s0 + $0x4d0] ss:$28 sps:$4 sm:$0xff]   ;;  %v11888_v12 = vld [vmem:[%s18050_s0 + $0x4d8] ss:$28 sps:$4 sm:$0xff]  }
 0x2ee   :  { %v3733_v6 = vpop.f32.mrf.mxu0 }
 0x2ef   :  { %18395 = vst [vmem:[#allocation43_spill] sm:$0xff] %v14318_v10  ;;  %v4086_v51 = vpop.f32.mrf.mxu1  ;;  %v4085_v1 = vadd.f32 %v4084_v2, %v3732_v4  ;;  %v3734_v17 = vadd.f32 %v3733_v6, %v18397_v33  ;;  %v14322_v19 = vpack.c.bf16 %v5752_v27, %v5748_v45  ;;  %v5755_v31 = vmax.f32 %v4083_v56, 0.0  ;;  %v18400_v45 = vld [vmem:[#allocation81_spill] sm:$0xff]  ;;  %v11889_v2 = vld [vmem:[%s18050_s0 + $0x50c] ss:$28 sps:$4 sm:$0xff]  }
 0x2f0   :  { %v3735_v43 = vpop.f32.mrf.mxu0  ;;  %v11890_v27 = vld [vmem:[%s18050_s0 + $0x514] ss:$28 sps:$4 sm:$0xff]  }
 0x2f1   :  { %18398 = vst [vmem:[#allocation44_spill] sm:$0xff] %v14322_v19  ;;  %v4088_v55 = vpop.f32.mrf.mxu1  ;;  %v4087_v50 = vadd.f32 %v4086_v51, %v3734_v17  ;;  %v3736_v42 = vadd.f32 %v3735_v43, %v18399_v15  ;;  %v5756_v47 = vmax.f32 %v4085_v1, 0.0  ;;  %v18402_v17 = vld [vmem:[#allocation82_spill] sm:$0xff]  ;;  %v18403_v15 = vld [vmem:[#allocation83_spill] sm:$0xff] }
 0x2f2   :  { %v3739_v46 = vpop.f32.mrf.mxu0  ;;  %4364 = vmatmul.mubr.bf16.gmra.mxu0 %v11887_v3 }
 0x2f3   :  { %v4092_v23 = vpop.f32.mrf.mxu1  ;;  %4717 = vmatmul.mubr.bf16.gmra.mxu1 %v11888_v12  ;;  %v5759_v36 = vmax.f32 %v4087_v50, 0.0  ;;  %v4089_v49 = vadd.f32 %v4088_v55, %v3736_v42  ;;  %v3740_v5 = vadd.f32 %v3739_v46, %v18400_v45  ;;  %4373 = vmatprep.mubr.bf16.mxu0 %v11889_v2 }
 0x2f4   :  { %4726 = vmatprep.mubr.bf16.mxu1 %v11890_v27  ;;  %v3741_v4 = vpop.f32.mrf.mxu0  ;;  %v18405_v27 = vld [vmem:[#allocation84_spill] sm:$0xff] }
 0x2f5   :  { %v4094_v6 = vpop.f32.mrf.mxu1  ;;  %v14338_v51 = vpack.c.bf16 %v5759_v36, %v5755_v31  ;;  %v5760_v56 = vmax.f32 %v4089_v49, 0.0  ;;  %v4093_v33 = vadd.f32 %v4092_v23, %v3740_v5  ;;  %v3742_v43 = vadd.f32 %v3741_v4, %v18402_v17  ;;  %v11891_v23 = vld [vmem:[%s18050_s0 + $0x508] ss:$28 sps:$4 sm:$0xff]   ;;  %v11892_v31 = vld [vmem:[%s18050_s0 + $0x510] ss:$28 sps:$4 sm:$0xff]  }
 0x2f6   :  { %v3743_v46 = vpop.f32.mrf.mxu0  ;;  %v18406_v36 = vld [vmem:[#allocation5_spill] sm:$0xff] }
 0x2f7   :  { %18401 = vst [vmem:[#allocation45_spill] sm:$0xff] %v14338_v51  ;;  %v4096_v55 = vpop.f32.mrf.mxu1  ;;  %v4095_v50 = vadd.f32 %v4094_v6, %v3742_v43  ;;  %v3744_v42 = vadd.f32 %v3743_v46, %v18403_v15  ;;  %v14342_v3 = vpack.c.bf16 %v5760_v56, %v5756_v47  ;;  %v18085_v49 = vsub.s32 2, %v18406_v36  ;;  %v18407_v6 = vld [vmem:[#allocation85_spill] sm:$0xff]  ;;  %v11894_v43 = vld [vmem:[%s18050_s0 + $0x54c] ss:$28 sps:$4 sm:$0xff]  }
 0x2f8   :  { %v3745_v12 = vpop.f32.mrf.mxu0  ;;  %v5763_v5 = vmax.f32 %v4093_v33, 0.0  ;;  %v11893_v17 = vld [vmem:[%s18050_s0 + $0x544] ss:$28 sps:$4 sm:$0xff]  }
 0x2f9   :  { %18404 = vst [vmem:[#allocation46_spill] sm:$0xff] %v14342_v3  ;;  %v4098_v45 = vpop.f32.mrf.mxu1  ;;  %v4097_v2 = vadd.f32 %v4096_v55, %v3744_v42  ;;  %v3746_v1 = vadd.f32 %v3745_v12, %v18405_v27  ;;  %v5764_v46 = vmax.f32 %v4095_v50, 0.0  ;;  %v18086_v42 = vsub.s32 3, %v18406_v36 }
 0x2fa   :  { %v3749_v10 = vpop.f32.mrf.mxu0  ;;  %4374 = vmatmul.mubr.bf16.gmra.mxu0 %v11891_v23 }
 0x2fb   :  { %v4102_v19 = vpop.f32.mrf.mxu1  ;;  %4727 = vmatmul.mubr.bf16.gmra.mxu1 %v11892_v31  ;;  %v5767_v47 = vmax.f32 %v4097_v2, 0.0  ;;  %v4099_v4 = vadd.f32 %v4098_v45, %v3746_v1  ;;  %v3750_v56 = vadd.f32 %v3749_v10, %v18407_v6  ;;  %4383 = vmatprep.mubr.bf16.mxu0 %v11893_v17  ;;  %v18409_v10 = vld [vmem:[#allocation86_spill] sm:$0xff]  ;;  %v18410_v31 = vld [vmem:[#allocation87_spill] sm:$0xff]  ;;  %v11895_v17 = vld [vmem:[%s18052_s2] sm:$0xf] }
 0x2fc   :  { %4736 = vmatprep.mubr.bf16.mxu1 %v11894_v43  ;;  %v3751_v55 = vpop.f32.mrf.mxu0  ;;  %v14369_v50 = vrot.slane %v11895_v17, %v18085_v49 }
 0x2fd   :  { %v4104_v15 = vpop.f32.mrf.mxu1  ;;  %v14360_v33 = vpack.c.bf16 %v5767_v47, %v5763_v5  ;;  %v5768_v12 = vmax.f32 %v4099_v4, 0.0  ;;  %v4103_v45 = vadd.f32 %v4102_v19, %v3750_v56  ;;  %v3752_v2 = vadd.f32 %v3751_v55, %v18409_v10  ;;  %v18412_v4 = vld [vmem:[#allocation88_spill] sm:$0xff] }
 0x2fe   :  { %v3753_v27 = vpop.f32.mrf.mxu0  ;;  %v14376_v55 = vrot.slane %v11895_v17, %v18086_v42  ;;  %v11896_v10 = vld [vmem:[%s18050_s0 + $0x540] ss:$28 sps:$4 sm:$0xff]  }
 0x2ff   :  { %18408 = vst [vmem:[#allocation47_spill] sm:$0xff] %v14360_v33  ;;  %v4106_v1 = vpop.f32.mrf.mxu1  ;;  %v4105_v23 = vadd.f32 %v4104_v15, %v3752_v2  ;;  %v3754_v6 = vadd.f32 %v3753_v27, %v18410_v31  ;;  %v14371_v43 = vpack.c.bf16 %v5768_v12, %v5764_v46  ;;  %v11897_v46 = vld [vmem:[%s18050_s0 + $0x548] ss:$28 sps:$4 sm:$0xff]   ;;  %v5771_v12 = vmax.f32 %v4103_v45, 0.0 }
 0x300   :  { %v3755_v5 = vpop.f32.mrf.mxu0  ;;  %v11899_v17 = vld [vmem:[%s18050_s0 + $0x584] ss:$28 sps:$4 sm:$0xff]  }
 0x301   :  { %18411 = vst [vmem:[#allocation48_spill] sm:$0xff] %v14371_v43  ;;  %v4108_v47 = vpop.f32.mrf.mxu1  ;;  %v4107_v19 = vadd.f32 %v4106_v1, %v3754_v6  ;;  %v3756_v56 = vadd.f32 %v3755_v5, %v18412_v4  ;;  %v11898_v6 = vld [vmem:[%s18050_s0 + $0x57c] ss:$28 sps:$4 sm:$0xff]   ;;  %v5772_v5 = vmax.f32 %v4105_v23, 0.0 }
 0x302   :  { %v4145_v15 = vpop.f32.mrf.mxu0  ;;  %4384 = vmatmul.mubr.bf16.gmra.mxu0 %v11896_v10 }
 0x303   :  { %v4498_v2 = vpop.f32.mrf.mxu1  ;;  %4737 = vmatmul.mubr.bf16.gmra.mxu1 %v11897_v46  ;;  %v5775_v27 = vmax.f32 %v4107_v19, 0.0  ;;  %v4109_v1 = vadd.f32 %v4108_v47, %v3756_v56  ;;  %v4146_v31 = vadd.f32 %v4145_v15, %v14369_v50  ;;  %4393 = vmatprep.mubr.bf16.mxu0 %v11898_v6 }
 0x304   :  { %4746 = vmatprep.mubr.bf16.mxu1 %v11899_v17  ;;  %v4147_v4 = vpop.f32.mrf.mxu0 }
 0x305   :  { %v4500_v10 = vpop.f32.mrf.mxu1  ;;  %v14391_v49 = vpack.c.bf16 %v5775_v27, %v5771_v12  ;;  %v5776_v45 = vmax.f32 %v4109_v1, 0.0  ;;  %v14393_v19 = vadd.f32 %v4498_v2, %v4146_v31  ;;  %v4148_v47 = vadd.f32 %v4147_v4, %v14376_v55  ;;  %v11900_v2 = vld [vmem:[%s18050_s0 + $0x578] ss:$28 sps:$4 sm:$0xff]   ;;  %v11901_v31 = vld [vmem:[%s18050_s0 + $0x580] ss:$28 sps:$4 sm:$0xff]  }
 0x306   :  { %v4149_v56 = vpop.f32.mrf.mxu0 }
 0x307   :  { %18413 = vst [vmem:[#allocation49_spill] sm:$0xff] %v14391_v49  ;;  %v4502_v15 = vpop.f32.mrf.mxu1  ;;  %v14396_v46 = vadd.f32 %v4500_v10, %v4148_v47  ;;  %v4150_v6 = vadd.f32 %v4149_v56, %v14369_v50  ;;  %v14399_v42 = vpack.c.bf16 %v5776_v45, %v5772_v5  ;;  %v11903_v10 = vld [vmem:[%s18050_s0 + $0x5bc] ss:$28 sps:$4 sm:$0xff]  }
 0x308   :  { %v4151_v33 = vpop.f32.mrf.mxu0 }
 0x309   :  { %18414 = vst [vmem:[#allocation50_spill] sm:$0xff] %v14399_v42  ;;  %v4504_v17 = vpop.f32.mrf.mxu1  ;;  %v14401_v23 = vadd.f32 %v4502_v15, %v4150_v6  ;;  %v4152_v12 = vadd.f32 %v4151_v33, %v14376_v55  ;;  %v11902_v33 = vld [vmem:[%s18050_s0 + $0x5b4] ss:$28 sps:$4 sm:$0xff]  }
 0x30a   :  { %v4155_v27 = vpop.f32.mrf.mxu0  ;;  %4394 = vmatmul.mubr.bf16.gmra.mxu0 %v11900_v2 }
 0x30b   :  { %v4508_v1 = vpop.f32.mrf.mxu1  ;;  %4747 = vmatmul.mubr.bf16.gmra.mxu1 %v11901_v31  ;;  %v14410_v5 = vadd.f32 %v4504_v17, %v4152_v12  ;;  %v4156_v4 = vadd.f32 %v4155_v27, %v14369_v50  ;;  %4403 = vmatprep.mubr.bf16.mxu0 %v11902_v33 }
 0x30c   :  { %4756 = vmatprep.mubr.bf16.mxu1 %v11903_v10  ;;  %v4157_v45 = vpop.f32.mrf.mxu0  ;;  %v11905_v10 = vld [vmem:[%s18050_s0 + $0x5b8] ss:$28 sps:$4 sm:$0xff]  }
 0x30d   :  { %v4510_v47 = vpop.f32.mrf.mxu1  ;;  %v14419_v56 = vadd.f32 %v4508_v1, %v4156_v4  ;;  %v4158_v15 = vadd.f32 %v4157_v45, %v14376_v55  ;;  %v11904_v1 = vld [vmem:[%s18050_s0 + $0x5b0] ss:$28 sps:$4 sm:$0xff]  }
 0x30e   :  { %v4159_v6 = vpop.f32.mrf.mxu0 }
 0x30f   :  { %v4512_v17 = vpop.f32.mrf.mxu1  ;;  %v14422_v12 = vadd.f32 %v4510_v47, %v4158_v15  ;;  %v4160_v27 = vadd.f32 %v4159_v6, %v14369_v50  ;;  %v11906_v15 = vld [vmem:[%s18050_s0 + $0x5ec] ss:$28 sps:$4 sm:$0xff]   ;;  %v11907_v6 = vld [vmem:[%s18050_s0 + $0x5f4] ss:$28 sps:$4 sm:$0xff]  }
 0x310   :  { %v4161_v2 = vpop.f32.mrf.mxu0 }
 0x311   :  { %v4514_v31 = vpop.f32.mrf.mxu1  ;;  %v14425_v33 = vadd.f32 %v4512_v17, %v4160_v27  ;;  %v4162_v49 = vadd.f32 %v4161_v2, %v14376_v55 }
 0x312   :  { %v4165_v42 = vpop.f32.mrf.mxu0  ;;  %4404 = vmatmul.mubr.bf16.gmra.mxu0 %v11904_v1 }
 0x313   :  { %v4518_v4 = vpop.f32.mrf.mxu1  ;;  %4757 = vmatmul.mubr.bf16.gmra.mxu1 %v11905_v10  ;;  %v14434_v45 = vadd.f32 %v4514_v31, %v4162_v49  ;;  %v4166_v47 = vadd.f32 %v4165_v42, %v14369_v50  ;;  %4413 = vmatprep.mubr.bf16.mxu0 %v11906_v15 }
 0x314   :  { %4766 = vmatprep.mubr.bf16.mxu1 %v11907_v6  ;;  %v4167_v17 = vpop.f32.mrf.mxu0  ;;  %v11909_v6 = vld [vmem:[%s18050_s0 + $0x5f0] ss:$28 sps:$4 sm:$0xff]  }
 0x315   :  { %v4520_v27 = vpop.f32.mrf.mxu1  ;;  %v14443_v2 = vadd.f32 %v4518_v4, %v4166_v47  ;;  %v4168_v1 = vadd.f32 %v4167_v17, %v14376_v55  ;;  %v11908_v4 = vld [vmem:[%s18050_s0 + $0x5e8] ss:$28 sps:$4 sm:$0xff]  }
 0x316   :  { %v4169_v49 = vpop.f32.mrf.mxu0 }
 0x317   :  { %v4522_v31 = vpop.f32.mrf.mxu1  ;;  %v14446_v10 = vadd.f32 %v4520_v27, %v4168_v1  ;;  %v4170_v42 = vadd.f32 %v4169_v49, %v14369_v50  ;;  %v11911_v1 = vld [vmem:[%s18050_s0 + $0x62c] ss:$28 sps:$4 sm:$0xff]  }
 0x318   :  { %v4171_v43 = vpop.f32.mrf.mxu0 }
 0x319   :  { %v4524_v51 = vpop.f32.mrf.mxu1  ;;  %v14449_v15 = vadd.f32 %v4522_v31, %v4170_v42  ;;  %v4172_v3 = vadd.f32 %v4171_v43, %v14376_v55  ;;  %v11910_v43 = vld [vmem:[%s18050_s0 + $0x624] ss:$28 sps:$4 sm:$0xff]  }
 0x31a   :  { %v4175_v36 = vpop.f32.mrf.mxu0  ;;  %4414 = vmatmul.mubr.bf16.gmra.mxu0 %v11908_v4 }
 0x31b   :  { %v4528_v47 = vpop.f32.mrf.mxu1  ;;  %4767 = vmatmul.mubr.bf16.gmra.mxu1 %v11909_v6  ;;  %v14458_v17 = vadd.f32 %v4524_v51, %v4172_v3  ;;  %v4176_v27 = vadd.f32 %v4175_v36, %v14369_v50  ;;  %4423 = vmatprep.mubr.bf16.mxu0 %v11910_v43 }
 0x31c   :  { %4776 = vmatprep.mubr.bf16.mxu1 %v11911_v1  ;;  %v4177_v49 = vpop.f32.mrf.mxu0  ;;  %v11913_v1 = vld [vmem:[%s18050_s0 + $0x628] ss:$28 sps:$4 sm:$0xff]  }
 0x31d   :  { %v4530_v31 = vpop.f32.mrf.mxu1  ;;  %v14467_v42 = vadd.f32 %v4528_v47, %v4176_v27  ;;  %v4178_v4 = vadd.f32 %v4177_v49, %v14376_v55  ;;  %v11912_v47 = vld [vmem:[%s18050_s0 + $0x620] ss:$28 sps:$4 sm:$0xff]  }
 0x31e   :  { %v4179_v51 = vpop.f32.mrf.mxu0 }
 0x31f   :  { %v4532_v3 = vpop.f32.mrf.mxu1  ;;  %v14470_v6 = vadd.f32 %v4530_v31, %v4178_v4  ;;  %v4180_v36 = vadd.f32 %v4179_v51, %v14369_v50  ;;  %v11915_v4 = vld [vmem:[%s18050_s0 + $0x664] ss:$28 sps:$4 sm:$0xff]  }
 0x320   :  { %v4181_v54 = vpop.f32.mrf.mxu0 }
 0x321   :  { %v4534_v37 = vpop.f32.mrf.mxu1  ;;  %v14473_v43 = vadd.f32 %v4532_v3, %v4180_v36  ;;  %v4182_v30 = vadd.f32 %v4181_v54, %v14376_v55  ;;  %v11914_v54 = vld [vmem:[%s18050_s0 + $0x65c] ss:$28 sps:$4 sm:$0xff]  }
 0x322   :  { %v4185_v38 = vpop.f32.mrf.mxu0  ;;  %4424 = vmatmul.mubr.bf16.gmra.mxu0 %v11912_v47 }
 0x323   :  { %v4538_v27 = vpop.f32.mrf.mxu1  ;;  %4777 = vmatmul.mubr.bf16.gmra.mxu1 %v11913_v1  ;;  %v14482_v49 = vadd.f32 %v4534_v37, %v4182_v30  ;;  %v4186_v31 = vadd.f32 %v4185_v38, %v14369_v50  ;;  %4433 = vmatprep.mubr.bf16.mxu0 %v11914_v54 }
 0x324   :  { %4786 = vmatprep.mubr.bf16.mxu1 %v11915_v4  ;;  %v4187_v51 = vpop.f32.mrf.mxu0  ;;  %v11917_v4 = vld [vmem:[%s18050_s0 + $0x660] ss:$28 sps:$4 sm:$0xff]  }
 0x325   :  { %v4540_v3 = vpop.f32.mrf.mxu1  ;;  %v14491_v36 = vadd.f32 %v4538_v27, %v4186_v31  ;;  %v4188_v47 = vadd.f32 %v4187_v51, %v14376_v55  ;;  %v11916_v27 = vld [vmem:[%s18050_s0 + $0x658] ss:$28 sps:$4 sm:$0xff]  }
 0x326   :  { %v4189_v37 = vpop.f32.mrf.mxu0 }
 0x327   :  { %v4542_v30 = vpop.f32.mrf.mxu1  ;;  %v14494_v1 = vadd.f32 %v4540_v3, %v4188_v47  ;;  %v4190_v38 = vadd.f32 %v4189_v37, %v14369_v50  ;;  %v11919_v47 = vld [vmem:[%s18050_s0 + $0x69c] ss:$28 sps:$4 sm:$0xff]  }
 0x328   :  { %v4191_v39 = vpop.f32.mrf.mxu0 }
 0x329   :  { %v4544_v25 = vpop.f32.mrf.mxu1  ;;  %v14497_v54 = vadd.f32 %v4542_v30, %v4190_v38  ;;  %v4192_v28 = vadd.f32 %v4191_v39, %v14376_v55  ;;  %v11918_v39 = vld [vmem:[%s18050_s0 + $0x694] ss:$28 sps:$4 sm:$0xff]  }
 0x32a   :  { %v4195_v9 = vpop.f32.mrf.mxu0  ;;  %4434 = vmatmul.mubr.bf16.gmra.mxu0 %v11916_v27 }
 0x32b   :  { %v4548_v31 = vpop.f32.mrf.mxu1  ;;  %4787 = vmatmul.mubr.bf16.gmra.mxu1 %v11917_v4  ;;  %v14506_v51 = vadd.f32 %v4544_v25, %v4192_v28  ;;  %v4196_v3 = vadd.f32 %v4195_v9, %v14369_v50  ;;  %4443 = vmatprep.mubr.bf16.mxu0 %v11918_v39 }
 0x32c   :  { %4796 = vmatprep.mubr.bf16.mxu1 %v11919_v47  ;;  %v4197_v37 = vpop.f32.mrf.mxu0  ;;  %v11921_v47 = vld [vmem:[%s18050_s0 + $0x698] ss:$28 sps:$4 sm:$0xff]  }
 0x32d   :  { %v4550_v30 = vpop.f32.mrf.mxu1  ;;  %v14515_v38 = vadd.f32 %v4548_v31, %v4196_v3  ;;  %v4198_v27 = vadd.f32 %v4197_v37, %v14376_v55  ;;  %v11920_v31 = vld [vmem:[%s18050_s0 + $0x690] ss:$28 sps:$4 sm:$0xff]  }
 0x32e   :  { %v4199_v25 = vpop.f32.mrf.mxu0 }
 0x32f   :  { %v4552_v28 = vpop.f32.mrf.mxu1  ;;  %v14518_v4 = vadd.f32 %v4550_v30, %v4198_v27  ;;  %v4200_v9 = vadd.f32 %v4199_v25, %v14369_v50  ;;  %v11923_v27 = vld [vmem:[%s18050_s0 + $0x6d4] ss:$28 sps:$4 sm:$0xff]  }
 0x330   :  { %v4201_v53 = vpop.f32.mrf.mxu0 }
 0x331   :  { %v4554_v41 = vpop.f32.mrf.mxu1  ;;  %v14521_v39 = vadd.f32 %v4552_v28, %v4200_v9  ;;  %v4202_v18 = vadd.f32 %v4201_v53, %v14376_v55  ;;  %v11922_v53 = vld [vmem:[%s18050_s0 + $0x6cc] ss:$28 sps:$4 sm:$0xff]  }
 0x332   :  { %v4205_v52 = vpop.f32.mrf.mxu0  ;;  %4444 = vmatmul.mubr.bf16.gmra.mxu0 %v11920_v31 }
 0x333   :  { %v4558_v3 = vpop.f32.mrf.mxu1  ;;  %4797 = vmatmul.mubr.bf16.gmra.mxu1 %v11921_v47  ;;  %v14530_v37 = vadd.f32 %v4554_v41, %v4202_v18  ;;  %v4206_v30 = vadd.f32 %v4205_v52, %v14369_v50  ;;  %4453 = vmatprep.mubr.bf16.mxu0 %v11922_v53 }
 0x334   :  { %4806 = vmatprep.mubr.bf16.mxu1 %v11923_v27  ;;  %v4207_v25 = vpop.f32.mrf.mxu0  ;;  %v11925_v27 = vld [vmem:[%s18050_s0 + $0x6d0] ss:$28 sps:$4 sm:$0xff]  }
 0x335   :  { %v4560_v28 = vpop.f32.mrf.mxu1  ;;  %v14539_v9 = vadd.f32 %v4558_v3, %v4206_v30  ;;  %v4208_v31 = vadd.f32 %v4207_v25, %v14376_v55  ;;  %v11924_v3 = vld [vmem:[%s18050_s0 + $0x6c8] ss:$28 sps:$4 sm:$0xff]  }
 0x336   :  { %v4209_v41 = vpop.f32.mrf.mxu0 }
 0x337   :  { %v4562_v18 = vpop.f32.mrf.mxu1  ;;  %v14542_v47 = vadd.f32 %v4560_v28, %v4208_v31  ;;  %v4210_v52 = vadd.f32 %v4209_v41, %v14369_v50 }
 0x338   :  { %v4211_v24 = vpop.f32.mrf.mxu0 }
 0x339   :  { %v4564_v61 = vpop.f32.mrf.mxu1  ;;  %v14545_v53 = vadd.f32 %v4562_v18, %v4210_v52  ;;  %v4212_v26 = vadd.f32 %v4211_v24, %v14376_v55  ;;  %v11926_v24 = vld [vmem:[%s18050_s0 + $0x14] ss:$28 sps:$4 sm:$0xff]  }
 0x33a   :  { %v4215_v22 = vpop.f32.mrf.mxu0  ;;  %4454 = vmatmul.mubr.bf16.gmra.mxu0 %v11924_v3 }
 0x33b   :  { %v4568_v30 = vpop.f32.mrf.mxu1  ;;  %4807 = vmatmul.mubr.bf16.gmra.mxu1 %v11925_v27  ;;  %v14554_v25 = vadd.f32 %v4564_v61, %v4212_v26  ;;  %v4216_v28 = vadd.f32 %v4215_v22, %v14369_v50  ;;  %4849 = vmatprep.mubr.bf16.mxu0 %v11926_v24  ;;  %v11317_v22 = vld [vmem:[%s18053_s3 + $0xe0] ss:$16 sps:$4 sm:$0xff]  }
 0x33c   :  { %5202 = vmatprep.mubr.bf16.mxu1 %v18194_v59  ;;  %v4217_v31 = vpop.f32.mrf.mxu0  ;;  %v11320_v26 = vld [vmem:[%s18053_s3 + $0x2e0] ss:$16 sps:$4 sm:$0xff]  }
 0x33d   :  { %v4570_v41 = vpop.f32.mrf.mxu1  ;;  %v14561_v18 = vadd.f32 %v4568_v30, %v4216_v28  ;;  %v4218_v52 = vadd.f32 %v4217_v31, %v14376_v55  ;;  %v11325_v31 = vld [vmem:[%s18053_s3 + $0xc4] ss:$16 sps:$4 sm:$0xff]  }
 0x33e   :  { %v4219_v3 = vpop.f32.mrf.mxu0 }
 0x33f   :  { %v4572_v60 = vpop.f32.mrf.mxu1  ;;  %v14564_v27 = vadd.f32 %v4570_v41, %v4218_v52  ;;  %v4220_v61 = vadd.f32 %v4219_v3, %v14369_v50  ;;  %v11328_v41 = vld [vmem:[%s18053_s3 + $0x2c4] ss:$16 sps:$4 sm:$0xff]  }
 0x340   :  { %v4221_v24 = vpop.f32.mrf.mxu0 }
 0x341   :  { %v4574_v40 = vpop.f32.mrf.mxu1  ;;  %v14573_v30 = vadd.f32 %v4572_v60, %v4220_v61  ;;  %v4222_v28 = vadd.f32 %v4221_v24, %v14376_v55  ;;  %v11928_v60 = vld [vmem:[%s18050_s0 + $0x18] ss:$28 sps:$4 sm:$0xff]  }
 0x342   :  { %v4225_v52 = vpop.f32.mrf.mxu0  ;;  %4850 = vmatmul.mubr.bf16.vlgmr.msra.gmra.mxu0 %v11927_v0  ;;  %v11326_v0 = vld [vmem:[%s18053_s3 + $0x2c0] ss:$16 sps:$4 sm:$0xff]  }
 0x343   :  { %v4578_v3 = vpop.f32.mrf.mxu1  ;;  %10506 = vmatmul.mubr.msk.bf16.vlgmr.msra.gmra.mxu1 %vm2602_vm0, %v11928_v60  ;;  %v14589_v61 = vadd.f32 %v4574_v40, %v4222_v28  ;;  %v4226_v24 = vadd.f32 %v4225_v52, %v14369_v50  ;;  %6698 = vmatpush1.bf16.msra.mxu0 %v11317_v22  ;;  %v11929_v60 = vld [vmem:[%s18050_s0 + $0x4c] ss:$28 sps:$4 sm:$0xff]   ;;  %v11331_v40 = vld [vmem:[%s18053_s3 + $0xa4] ss:$16 sps:$4 sm:$0xff]  }
 0x344   :  { %7051 = vmatpush1.bf16.msra.mxu1 %v11320_v26  ;;  %v4227_v14 = vpop.f32.mrf.mxu0  ;;  %4859 = vmatprep.mubr.bf16.mxu0 %v11929_v60  ;;  %v11334_v22 = vld [vmem:[%s18053_s3 + $0x2a4] ss:$16 sps:$4 sm:$0xff]  }
 0x345   :  { %v4580_v63 = vpop.f32.mrf.mxu1  ;;  %5212 = vmatprep.mubr.bf16.mxu1 %v18194_v59  ;;  %v14608_v26 = vadd.f32 %v4578_v3, %v4226_v24  ;;  %v4228_v28 = vadd.f32 %v4227_v14, %v14376_v55  ;;  %6699 = vmatprep.subr.bf16.mxu0 %v11325_v31  ;;  %v11332_v14 = vld [vmem:[%s18053_s3 + $0x2a0] ss:$16 sps:$4 sm:$0xff]  }
 0x346   :  { %7052 = vmatprep.subr.bf16.mxu1 %v11328_v41  ;;  %v4229_v52 = vpop.f32.mrf.mxu0  ;;  %v11340_v41 = vld [vmem:[%s18053_s3 + $0x284] ss:$16 sps:$4 sm:$0xff]  }
 0x347   :  { %v4582_v16 = vpop.f32.mrf.mxu1  ;;  %v14611_v48 = vadd.f32 %v4580_v63, %v4228_v28  ;;  %v4230_v60 = vadd.f32 %v4229_v52, %v14369_v50  ;;  %6700 = vmatpush1.bf16.msra.mxu0 %v11323_v35  ;;  %v11337_v35 = vld [vmem:[%s18053_s3 + $0x84] ss:$16 sps:$4 sm:$0xff]  }
 0x348   :  { %7053 = vmatpush1.bf16.msra.mxu1 %v11326_v0  ;;  %v4231_v62 = vpop.f32.mrf.mxu0  ;;  %6701 = vmatprep.subr.bf16.mxu0 %v11331_v40  ;;  %v11930_v0 = vld [vmem:[%s18050_s0 + $0x48] ss:$28 sps:$4 sm:$0xff]  }
 0x349   :  { %v4584_v32 = vpop.f32.mrf.mxu1  ;;  %7054 = vmatprep.subr.bf16.mxu1 %v11334_v22  ;;  %v14620_v31 = vadd.f32 %v4582_v16, %v4230_v60  ;;  %v4232_v63 = vadd.f32 %v4231_v62, %v14376_v55  ;;  %v11931_v16 = vld [vmem:[%s18050_s0 + $0x50] ss:$28 sps:$4 sm:$0xff]   ;;  %v11932_v22 = vld [vmem:[%s18050_s0 + $0x84] ss:$28 sps:$4 sm:$0xff]  }
 0x34a   :  { %v4235_v3 = vpop.f32.mrf.mxu0  ;;  %4860 = vmatmul.mubr.bf16.gmra.mxu0 %v11930_v0  ;;  %v11335_v60 = vld [vmem:[%s18053_s3 + $0x80] ss:$16 sps:$4 sm:$0xff]   ;;  %v11343_v0 = vld [vmem:[%s18053_s3 + $0x64] ss:$16 sps:$4 sm:$0xff]  }
 0x34b   :  { %v4588_v24 = vpop.f32.mrf.mxu1  ;;  %10507 = vmatmul.mubr.msk.bf16.gmra.mxu1 %vm2602_vm0, %v11931_v16  ;;  %v14636_v62 = vadd.f32 %v4584_v32, %v4232_v63  ;;  %v4236_v40 = vadd.f32 %v4235_v3, %v14369_v50  ;;  %4869 = vmatprep.mubr.bf16.mxu0 %v11932_v22  ;;  %v11338_v32 = vld [vmem:[%s18053_s3 + $0x280] ss:$16 sps:$4 sm:$0xff]  }
 0x34c   :  { %5222 = vmatprep.mubr.bf16.mxu1 %v18194_v59  ;;  %v4237_v28 = vpop.f32.mrf.mxu0  ;;  %6702 = vmatpush1.bf16.msra.mxu0 %v11329_v21  ;;  %v11346_v21 = vld [vmem:[%s18053_s3 + $0x264] ss:$16 sps:$4 sm:$0xff]  }
 0x34d   :  { %v4590_v52 = vpop.f32.mrf.mxu1  ;;  %7055 = vmatpush1.bf16.msra.mxu1 %v11332_v14  ;;  %v14649_v63 = vadd.f32 %v4588_v24, %v4236_v40  ;;  %v4238_v3 = vadd.f32 %v4237_v28, %v14376_v55  ;;  %6703 = vmatprep.subr.bf16.mxu0 %v11337_v35  ;;  %v11341_v35 = vld [vmem:[%s18053_s3 + $0x60] ss:$16 sps:$4 sm:$0xff]  }
 0x34e   :  { %7056 = vmatprep.subr.bf16.mxu1 %v11340_v41  ;;  %v4239_v14 = vpop.f32.mrf.mxu0  ;;  %v11344_v41 = vld [vmem:[%s18053_s3 + $0x260] ss:$16 sps:$4 sm:$0xff]  }
 0x34f   :  { %v4592_v16 = vpop.f32.mrf.mxu1  ;;  %v14658_v22 = vadd.f32 %v4590_v52, %v4238_v3  ;;  %v4240_v8 = vadd.f32 %v4239_v14, %v14369_v50  ;;  %v11349_v52 = vld [vmem:[%s18053_s3 + $0x44] ss:$16 sps:$4 sm:$0xff]   ;;  %v11933_v14 = vld [vmem:[%s18050_s0 + $0x80] ss:$28 sps:$4 sm:$0xff]  }
 0x350   :  { %v4241_v24 = vpop.f32.mrf.mxu0  ;;  %6704 = vmatpush1.bf16.msra.mxu0 %v11335_v60  ;;  %v11352_v60 = vld [vmem:[%s18053_s3 + $0x244] ss:$16 sps:$4 sm:$0xff]  }
 0x351   :  { %v4594_v40 = vpop.f32.mrf.mxu1  ;;  %7057 = vmatpush1.bf16.msra.mxu1 %v11338_v32  ;;  %v14667_v28 = vadd.f32 %v4592_v16, %v4240_v8  ;;  %v4242_v34 = vadd.f32 %v4241_v24, %v14376_v55  ;;  %6705 = vmatprep.subr.bf16.mxu0 %v11343_v0  ;;  %v11934_v8 = vld [vmem:[%s18050_s0 + $0x88] ss:$28 sps:$4 sm:$0xff]   ;;  %v11935_v16 = vld [vmem:[%s18050_s0 + $0xbc] ss:$28 sps:$4 sm:$0xff]  }
 0x352   :  { %7058 = vmatprep.subr.bf16.mxu1 %v11346_v21  ;;  %v4245_v32 = vpop.f32.mrf.mxu0  ;;  %4870 = vmatmul.mubr.bf16.gmra.mxu0 %v11933_v14  ;;  %v11347_v14 = vld [vmem:[%s18053_s3 + $0x40] ss:$16 sps:$4 sm:$0xff]  }
 0x353   :  { %18415 = vst [vmem:[#allocation51_spill] sm:$0xff] %v14667_v28  ;;  %v4598_v3 = vpop.f32.mrf.mxu1  ;;  %10508 = vmatmul.mubr.msk.bf16.gmra.mxu1 %vm2602_vm0, %v11934_v8  ;;  %v14683_v0 = vadd.f32 %v4594_v40, %v4242_v34  ;;  %v4246_v21 = vadd.f32 %v4245_v32, %v14369_v50  ;;  %4879 = vmatprep.mubr.bf16.mxu0 %v11935_v16  ;;  %v11350_v34 = vld [vmem:[%s18053_s3 + $0x240] ss:$16 sps:$4 sm:$0xff]   ;;  %v11355_v8 = vld [vmem:[%s18053_s3 + $0x24] ss:$16 sps:$4 sm:$0xff]  }
 0x354   :  { %5232 = vmatprep.mubr.bf16.mxu1 %v18194_v59  ;;  %v4247_v24 = vpop.f32.mrf.mxu0  ;;  %6706 = vmatpush1.bf16.msra.mxu0 %v11341_v35  ;;  %v11358_v35 = vld [vmem:[%s18053_s3 + $0x224] ss:$16 sps:$4 sm:$0xff]  }
 0x355   :  { %18416 = vst [vmem:[#allocation52_spill] sm:$0xff] %v14683_v0  ;;  %v4600_v13 = vpop.f32.mrf.mxu1  ;;  %7059 = vmatpush1.bf16.msra.mxu1 %v11344_v41  ;;  %v14696_v40 = vadd.f32 %v4598_v3, %v4246_v21  ;;  %v4248_v32 = vadd.f32 %v4247_v24, %v14376_v55  ;;  %6707 = vmatprep.subr.bf16.mxu0 %v11349_v52  ;;  %v11353_v52 = vld [vmem:[%s18053_s3 + $0x20] ss:$16 sps:$4 sm:$0xff]  }
 0x356   :  { %7060 = vmatprep.subr.bf16.mxu1 %v11352_v60  ;;  %v4249_v41 = vpop.f32.mrf.mxu0  ;;  %v11356_v60 = vld [vmem:[%s18053_s3 + $0x220] ss:$16 sps:$4 sm:$0xff]  }
 0x357   :  { %18417 = vst [vmem:[#allocation53_spill] sm:$0xff] %v14696_v40  ;;  %v4602_v16 = vpop.f32.mrf.mxu1  ;;  %v14705_v58 = vadd.f32 %v4600_v13, %v4248_v32  ;;  %v4250_v7 = vadd.f32 %v4249_v41, %v14369_v50  ;;  %v11361_v13 = vld [vmem:[%s18053_s3 + $0x4] ss:$16 sps:$4 sm:$0xff]  }
 0x358   :  { %v4251_v3 = vpop.f32.mrf.mxu0  ;;  %6708 = vmatpush1.bf16.msra.mxu0 %v11347_v14  ;;  %v11364_v14 = vld [vmem:[%s18053_s3 + $0x204] ss:$16 sps:$4 sm:$0xff]  }
 0x359   :  { %18418 = vst [vmem:[#allocation54_spill] sm:$0xff] %v14705_v58  ;;  %v4604_v21 = vpop.f32.mrf.mxu1  ;;  %7061 = vmatpush1.bf16.msra.mxu1 %v11350_v34  ;;  %v14714_v24 = vadd.f32 %v4602_v16, %v4250_v7  ;;  %v4252_v40 = vadd.f32 %v4251_v3, %v14376_v55  ;;  %6709 = vmatprep.subr.bf16.mxu0 %v11355_v8  ;;  %v11936_v41 = vld [vmem:[%s18050_s0 + $0xb8] ss:$28 sps:$4 sm:$0xff]   ;;  %v11937_v7 = vld [vmem:[%s18050_s0 + $0xc0] ss:$28 sps:$4 sm:$0xff]  }
 0x35a   :  { %7062 = vmatprep.subr.bf16.mxu1 %v11358_v35  ;;  %v4255_v34 = vpop.f32.mrf.mxu0  ;;  %4880 = vmatmul.mubr.bf16.gmra.mxu0 %v11936_v41  ;;  %v11938_v16 = vld [vmem:[%s18050_s0 + $0xf4] ss:$28 sps:$4 sm:$0xff]  }
 0x35b   :  { %18419 = vst [vmem:[#allocation55_spill] sm:$0xff] %v14714_v24  ;;  %v4608_v32 = vpop.f32.mrf.mxu1  ;;  %10509 = vmatmul.mubr.msk.bf16.gmra.mxu1 %vm2602_vm0, %v11937_v7  ;;  %v14730_v8 = vadd.f32 %v4604_v21, %v4252_v40  ;;  %v4256_v35 = vadd.f32 %v4255_v34, %v14369_v50  ;;  %4889 = vmatprep.mubr.bf16.mxu0 %v11938_v16  ;;  %v11359_v41 = vld [vmem:[%s18053_s3] ss:$16 sps:$4 sm:$0xff]   ;;  %v11367_v7 = vld [vmem:[%s18053_s3 + $0x1e4] ss:$16 sps:$4 sm:$0xff]  }
 0x35c   :  { %5242 = vmatprep.mubr.bf16.mxu1 %v18194_v59  ;;  %v4257_v3 = vpop.f32.mrf.mxu0  ;;  %6710 = vmatpush1.bf16.msra.mxu0 %v11353_v52  ;;  %v11362_v40 = vld [vmem:[%s18053_s3 + $0x200] ss:$16 sps:$4 sm:$0xff]   ;;  %v11370_v52 = vld [vmem:[%s18053_s3 + $0x3e4] ss:$16 sps:$4 sm:$0xff]  }
 0x35d   :  { %18420 = vst [vmem:[#allocation56_spill] sm:$0xff] %v14730_v8  ;;  %v4610_v24 = vpop.f32.mrf.mxu1  ;;  %7063 = vmatpush1.bf16.msra.mxu1 %v11356_v60  ;;  %v14743_v21 = vadd.f32 %v4608_v32, %v4256_v35  ;;  %v4258_v34 = vadd.f32 %v4257_v3, %v14376_v55  ;;  %6711 = vmatprep.subr.bf16.mxu0 %v11361_v13  ;;  %v11365_v13 = vld [vmem:[%s18053_s3 + $0x1e0] ss:$16 sps:$4 sm:$0xff]  }
 0x35e   :  { %7064 = vmatprep.subr.bf16.mxu1 %v11364_v14  ;;  %v4259_v60 = vpop.f32.mrf.mxu0  ;;  %v11368_v14 = vld [vmem:[%s18053_s3 + $0x3e0] ss:$16 sps:$4 sm:$0xff]  }
 0x35f   :  { %18421 = vst [vmem:[#allocation57_spill] sm:$0xff] %v14743_v21  ;;  %v4612_v16 = vpop.f32.mrf.mxu1  ;;  %v14752_v8 = vadd.f32 %v4610_v24, %v4258_v34  ;;  %v4260_v58 = vadd.f32 %v4259_v60, %v14369_v50  ;;  %v11373_v24 = vld [vmem:[%s18053_s3 + $0x1c4] ss:$16 sps:$4 sm:$0xff]   ;;  %v11939_v60 = vld [vmem:[%s18050_s0 + $0xf0] ss:$28 sps:$4 sm:$0xff]  }
 0x360   :  { %v4261_v32 = vpop.f32.mrf.mxu0  ;;  %6712 = vmatpush1.bf16.msra.mxu0 %v11359_v41  ;;  %v11376_v41 = vld [vmem:[%s18053_s3 + $0x3c4] ss:$16 sps:$4 sm:$0xff]  }
 0x361   :  { %18422 = vst [vmem:[#allocation58_spill] sm:$0xff] %v14752_v8  ;;  %v4614_v35 = vpop.f32.mrf.mxu1  ;;  %7065 = vmatpush1.bf16.msra.mxu1 %v11362_v40  ;;  %v14761_v3 = vadd.f32 %v4612_v16, %v4260_v58  ;;  %v4262_v21 = vadd.f32 %v4261_v32, %v14376_v55  ;;  %6713 = vmatprep.subr.bf16.mxu0 %v11367_v7  ;;  %v11940_v58 = vld [vmem:[%s18050_s0 + $0xf8] ss:$28 sps:$4 sm:$0xff]   ;;  %v11941_v16 = vld [vmem:[%s18050_s0 + $0x12c] ss:$28 sps:$4 sm:$0xff]  }
 0x362   :  { %7066 = vmatprep.subr.bf16.mxu1 %v11370_v52  ;;  %v4265_v40 = vpop.f32.mrf.mxu0  ;;  %4890 = vmatmul.mubr.bf16.gmra.mxu0 %v11939_v60  ;;  %v11371_v60 = vld [vmem:[%s18053_s3 + $0x1c0] ss:$16 sps:$4 sm:$0xff]   ;;  %v11382_v8 = vld [vmem:[%s18053_s3 + $0x3a4] ss:$16 sps:$4 sm:$0xff]  }
 0x363   :  { %18423 = vst [vmem:[#allocation59_spill] sm:$0xff] %v14761_v3  ;;  %v4618_v34 = vpop.f32.mrf.mxu1  ;;  %10510 = vmatmul.mubr.msk.bf16.gmra.mxu1 %vm2602_vm0, %v11940_v58  ;;  %v14777_v7 = vadd.f32 %v4614_v35, %v4262_v21  ;;  %v4266_v52 = vadd.f32 %v4265_v40, %v14369_v50  ;;  %4899 = vmatprep.mubr.bf16.mxu0 %v11941_v16  ;;  %v11374_v21 = vld [vmem:[%s18053_s3 + $0x3c0] ss:$16 sps:$4 sm:$0xff]   ;;  %v11379_v58 = vld [vmem:[%s18053_s3 + $0x1a4] ss:$16 sps:$4 sm:$0xff]  }
 0x364   :  { %5252 = vmatprep.mubr.bf16.mxu1 %v18194_v59  ;;  %v4267_v32 = vpop.f32.mrf.mxu0  ;;  %6714 = vmatpush2.bf16.msra.mxu0 %v11365_v13 }
 0x365   :  { %18424 = vst [vmem:[#allocation60_spill] sm:$0xff] %v14777_v7  ;;  %v4620_v3 = vpop.f32.mrf.mxu1  ;;  %7067 = vmatpush2.bf16.msra.mxu1 %v11368_v14  ;;  %v14790_v35 = vadd.f32 %v4618_v34, %v4266_v52  ;;  %v4268_v40 = vadd.f32 %v4267_v32, %v14376_v55  ;;  %6715 = vmatprep.subr.bf16.mxu0 %v11373_v24  ;;  %v11377_v24 = vld [vmem:[%s18053_s3 + $0x1a0] ss:$16 sps:$4 sm:$0xff]  }
 0x366   :  { %7068 = vmatprep.subr.bf16.mxu1 %v11376_v41  ;;  %v4269_v13 = vpop.f32.mrf.mxu0  ;;  %v11380_v41 = vld [vmem:[%s18053_s3 + $0x3a0] ss:$16 sps:$4 sm:$0xff]  }
 0x367   :  { %18425 = vst [vmem:[#allocation61_spill] sm:$0xff] %v14790_v35  ;;  %v4622_v14 = vpop.f32.mrf.mxu1  ;;  %v14796_v16 = vadd.f32 %v4620_v3, %v4268_v40  ;;  %v4270_v7 = vadd.f32 %v4269_v13, %v14369_v50 }
 0x368   :  { %v4271_v34 = vpop.f32.mrf.mxu0  ;;  %6716 = vmatpush2.bf16.msra.mxu0 %v11371_v60  ;;  %v11942_v60 = vld [vmem:[%s18050_s0 + $0x128] ss:$28 sps:$4 sm:$0xff]  }
 0x369   :  { %18426 = vst [vmem:[#allocation62_spill] sm:$0xff] %v14796_v16  ;;  %v4624_v52 = vpop.f32.mrf.mxu1  ;;  %7069 = vmatpush2.bf16.msra.mxu1 %v11374_v21  ;;  %v14808_v3 = vadd.f32 %v4622_v14, %v4270_v7  ;;  %v4272_v32 = vadd.f32 %v4271_v34, %v14376_v55  ;;  %6717 = vmatprep.subr.bf16.mxu0 %v11379_v58  ;;  %v11943_v21 = vld [vmem:[%s18050_s0 + $0x130] ss:$28 sps:$4 sm:$0xff]  }
 0x36a   :  { %7070 = vmatprep.subr.bf16.mxu1 %v11382_v8  ;;  %v4275_v40 = vpop.f32.mrf.mxu0  ;;  %4900 = vmatmul.mubr.bf16.gmra.mxu0 %v11942_v60  ;;  %v11944_v8 = vld [vmem:[%s18050_s0 + $0x164] ss:$28 sps:$4 sm:$0xff]  }
 0x36b   :  { %18427 = vst [vmem:[#allocation63_spill] sm:$0xff] %v14808_v3  ;;  %v4628_v13 = vpop.f32.mrf.mxu1  ;;  %10511 = vmatmul.mubr.msk.bf16.gmra.mxu1 %vm2602_vm0, %v11943_v21  ;;  %v14818_v16 = vadd.f32 %v4624_v52, %v4272_v32  ;;  %v4276_v7 = vadd.f32 %v4275_v40, %v14369_v50  ;;  %4909 = vmatprep.mubr.bf16.mxu0 %v11944_v8 }
 0x36c   :  { %5262 = vmatprep.mubr.bf16.mxu1 %v18194_v59  ;;  %v4277_v58 = vpop.f32.mrf.mxu0  ;;  %6718 = vmatpush2.bf16.msra.mxu0 %v11377_v24  ;;  %v11945_v24 = vld [vmem:[%s18050_s0 + $0x160] ss:$28 sps:$4 sm:$0xff]  }
 0x36d   :  { %18428 = vst [vmem:[#allocation64_spill] sm:$0xff] %v14818_v16  ;;  %v4630_v14 = vpop.f32.mrf.mxu1  ;;  %7071 = vmatpush2.bf16.msra.mxu1 %v11380_v41  ;;  %v14825_v34 = vadd.f32 %v4628_v13, %v4276_v7  ;;  %v4278_v60 = vadd.f32 %v4277_v58, %v14376_v55  ;;  %v11946_v41 = vld [vmem:[%s18050_s0 + $0x168] ss:$28 sps:$4 sm:$0xff]  }
 0x36e   :  { %v4279_v21 = vpop.f32.mrf.mxu0 }
 0x36f   :  { %18429 = vst [vmem:[#allocation65_spill] sm:$0xff] %v14825_v34  ;;  %v4632_v52 = vpop.f32.mrf.mxu1  ;;  %v14828_v32 = vadd.f32 %v4630_v14, %v4278_v60  ;;  %v4280_v40 = vadd.f32 %v4279_v21, %v14369_v50 }
 0x370   :  { %v4281_v16 = vpop.f32.mrf.mxu0 }
 0x371   :  { %18430 = vst [vmem:[#allocation66_spill] sm:$0xff] %v14828_v32  ;;  %v4634_v3 = vpop.f32.mrf.mxu1  ;;  %v14831_v35 = vadd.f32 %v4632_v52, %v4280_v40  ;;  %v4282_v8 = vadd.f32 %v4281_v16, %v14376_v55  ;;  %v11947_v16 = vld [vmem:[%s18050_s0 + $0x19c] ss:$28 sps:$4 sm:$0xff]  }
 0x372   :  { %v4285_v0 = vpop.f32.mrf.mxu0  ;;  %4910 = vmatmul.mubr.bf16.gmra.mxu0 %v11945_v24 }
 0x373   :  { %18431 = vst [vmem:[#allocation67_spill] sm:$0xff] %v14831_v35  ;;  %v4638_v28 = vpop.f32.mrf.mxu1  ;;  %10512 = vmatmul.mubr.msk.bf16.gmra.mxu1 %vm2602_vm0, %v11946_v41  ;;  %v14841_v13 = vadd.f32 %v4634_v3, %v4282_v8  ;;  %v4286_v7 = vadd.f32 %v4285_v0, %v14369_v50  ;;  %4919 = vmatprep.mubr.bf16.mxu0 %v11947_v16  ;;  %v11383_v3 = vld [vmem:[%s18053_s3 + $0x180] ss:$16 sps:$4 sm:$0xff]   ;;  %v11385_v0 = vld [vmem:[%s18053_s3 + $0x184] ss:$16 sps:$4 sm:$0xff]  }
 0x374   :  { %5272 = vmatprep.mubr.bf16.mxu1 %v18194_v59  ;;  %v4287_v58 = vpop.f32.mrf.mxu0  ;;  %6719 = vmatprep.subr.bf16.mxu0 %v11385_v0  ;;  %v11386_v16 = vld [vmem:[%s18053_s3 + $0x380] ss:$16 sps:$4 sm:$0xff]   ;;  %v11948_v0 = vld [vmem:[%s18050_s0 + $0x198] ss:$28 sps:$4 sm:$0xff]  }
 0x375   :  { %18432 = vst [vmem:[#allocation68_spill] sm:$0xff] %v14841_v13  ;;  %v4640_v14 = vpop.f32.mrf.mxu1  ;;  %v14848_v60 = vadd.f32 %v4638_v28, %v4286_v7  ;;  %v4288_v21 = vadd.f32 %v4287_v58, %v14376_v55  ;;  %v11388_v28 = vld [vmem:[%s18053_s3 + $0x384] ss:$16 sps:$4 sm:$0xff]   ;;  %6720 = vmatpush2.bf16.msra.mxu0 %v11383_v3  ;;  %v11949_v3 = vld [vmem:[%s18050_s0 + $0x1a0] ss:$28 sps:$4 sm:$0xff]  }
 0x376   :  { %v4289_v52 = vpop.f32.mrf.mxu0  ;;  %7072 = vmatprep.subr.bf16.mxu1 %v11388_v28 }
 0x377   :  { %18433 = vst [vmem:[#allocation69_spill] sm:$0xff] %v14848_v60  ;;  %v4642_v40 = vpop.f32.mrf.mxu1  ;;  %v14857_v8 = vadd.f32 %v4640_v14, %v4288_v21  ;;  %v4290_v24 = vadd.f32 %v4289_v52, %v14369_v50  ;;  %7073 = vmatpush2.bf16.msra.mxu1 %v11386_v16  ;;  %v11951_v16 = vld [vmem:[%s18050_s0 + $0x1d0] ss:$28 sps:$4 sm:$0xff]  }
 0x378   :  { %v4291_v41 = vpop.f32.mrf.mxu0 }
 0x379   :  { %18434 = vst [vmem:[#allocation70_spill] sm:$0xff] %v14857_v8  ;;  %v4644_v7 = vpop.f32.mrf.mxu1  ;;  %v14866_v58 = vadd.f32 %v4642_v40, %v4290_v24  ;;  %v4292_v60 = vadd.f32 %v4291_v41, %v14376_v55  ;;  %v11950_v24 = vld [vmem:[%s18050_s0 + $0x1d4] ss:$28 sps:$4 sm:$0xff]  }
 0x37a   :  { %v4295_v14 = vpop.f32.mrf.mxu0  ;;  %4920 = vmatmul.mubr.bf16.gmra.mxu0 %v11948_v0 }
 0x37b   :  { %18435 = vst [vmem:[#allocation71_spill] sm:$0xff] %v14866_v58  ;;  %v4648_v21 = vpop.f32.mrf.mxu1  ;;  %10513 = vmatmul.mubr.msk.bf16.gmra.mxu1 %vm2602_vm0, %v11949_v3  ;;  %v14876_v52 = vadd.f32 %v4644_v7, %v4292_v60  ;;  %v4296_v40 = vadd.f32 %v4295_v14, %v14369_v50  ;;  %4929 = vmatprep.mubr.bf16.mxu0 %v11950_v24 }
 0x37c   :  { %5282 = vmatprep.mubr.bf16.mxu1 %v18194_v59  ;;  %v4297_v28 = vpop.f32.mrf.mxu0 }
 0x37d   :  { %18436 = vst [vmem:[#allocation72_spill] sm:$0xff] %v14876_v52  ;;  %v4650_v41 = vpop.f32.mrf.mxu1  ;;  %v14883_v0 = vadd.f32 %v4648_v21, %v4296_v40  ;;  %v4298_v58 = vadd.f32 %v4297_v28, %v14376_v55  ;;  %v11953_v40 = vld [vmem:[%s18050_s0 + $0x20c] ss:$28 sps:$4 sm:$0xff]  }
 0x37e   :  { %v4299_v8 = vpop.f32.mrf.mxu0 }
 0x37f   :  { %18437 = vst [vmem:[#allocation73_spill] sm:$0xff] %v14883_v0  ;;  %v4652_v3 = vpop.f32.mrf.mxu1  ;;  %v14886_v60 = vadd.f32 %v4650_v41, %v4298_v58  ;;  %v4300_v7 = vadd.f32 %v4299_v8, %v14369_v50  ;;  %v11952_v58 = vld [vmem:[%s18050_s0 + $0x1d8] ss:$28 sps:$4 sm:$0xff]  }
 0x380   :  { %v4301_v14 = vpop.f32.mrf.mxu0 }
 0x381   :  { %18438 = vst [vmem:[#allocation74_spill] sm:$0xff] %v14886_v60  ;;  %v4654_v52 = vpop.f32.mrf.mxu1  ;;  %v14889_v13 = vadd.f32 %v4652_v3, %v4300_v7  ;;  %v4302_v24 = vadd.f32 %v4301_v14, %v14376_v55 }
 0x382   :  { %v4305_v35 = vpop.f32.mrf.mxu0  ;;  %4930 = vmatmul.mubr.bf16.gmra.mxu0 %v11951_v16 }
 0x383   :  { %18439 = vst [vmem:[#allocation75_spill] sm:$0xff] %v14889_v13  ;;  %v4658_v32 = vpop.f32.mrf.mxu1  ;;  %10514 = vmatmul.mubr.msk.bf16.gmra.mxu1 %vm2602_vm0, %v11952_v58  ;;  %v14899_v8 = vadd.f32 %v4654_v52, %v4302_v24  ;;  %v4306_v21 = vadd.f32 %v4305_v35, %v14369_v50  ;;  %4939 = vmatprep.mubr.bf16.mxu0 %v11953_v40  ;;  %v11391_v35 = vld [vmem:[%s18053_s3 + $0x164] ss:$16 sps:$4 sm:$0xff]  }
 0x384   :  { %5292 = vmatprep.mubr.bf16.mxu1 %v18194_v59  ;;  %v4307_v28 = vpop.f32.mrf.mxu0  ;;  %6721 = vmatprep.subr.bf16.mxu0 %v11391_v35 }
 0x385   :  { %18440 = vst [vmem:[#allocation76_spill] sm:$0xff] %v14899_v8  ;;  %v4660_v41 = vpop.f32.mrf.mxu1  ;;  %v14906_v3 = vadd.f32 %v4658_v32, %v4306_v21  ;;  %v4308_v7 = vadd.f32 %v4307_v28, %v14376_v55  ;;  %v11389_v8 = vld [vmem:[%s18053_s3 + $0x160] ss:$16 sps:$4 sm:$0xff]  }
 0x386   :  { %v4309_v14 = vpop.f32.mrf.mxu0  ;;  %v11392_v28 = vld [vmem:[%s18053_s3 + $0x360] ss:$16 sps:$4 sm:$0xff]   ;;  %6722 = vmatpush2.bf16.msra.mxu0 %v11389_v8 }
 0x387   :  { %18441 = vst [vmem:[#allocation77_spill] sm:$0xff] %v14906_v3  ;;  %v4662_v16 = vpop.f32.mrf.mxu1  ;;  %v14909_v58 = vadd.f32 %v4660_v41, %v4308_v7  ;;  %v4310_v52 = vadd.f32 %v4309_v14, %v14369_v50  ;;  %v11394_v41 = vld [vmem:[%s18053_s3 + $0x364] ss:$16 sps:$4 sm:$0xff]  }
 0x388   :  { %v4311_v24 = vpop.f32.mrf.mxu0  ;;  %7074 = vmatprep.subr.bf16.mxu1 %v11394_v41  ;;  %v11957_v41 = vld [vmem:[%s18050_s0 + $0x240] ss:$28 sps:$4 sm:$0xff]  }
 0x389   :  { %18442 = vst [vmem:[#allocation78_spill] sm:$0xff] %v14909_v58  ;;  %v4664_v40 = vpop.f32.mrf.mxu1  ;;  %v14918_v32 = vadd.f32 %v4662_v16, %v4310_v52  ;;  %v4312_v21 = vadd.f32 %v4311_v24, %v14376_v55  ;;  %v11954_v58 = vld [vmem:[%s18050_s0 + $0x208] ss:$28 sps:$4 sm:$0xff]   ;;  %v11955_v16 = vld [vmem:[%s18050_s0 + $0x210] ss:$28 sps:$4 sm:$0xff]   ;;  %7075 = vmatpush2.bf16.msra.mxu1 %v11392_v28 }
 0x38a   :  { %v4315_v7 = vpop.f32.mrf.mxu0  ;;  %4940 = vmatmul.mubr.bf16.gmra.mxu0 %v11954_v58  ;;  %v11956_v24 = vld [vmem:[%s18050_s0 + $0x244] ss:$28 sps:$4 sm:$0xff]   ;;  %v11959_v28 = vld [vmem:[%s18050_s0 + $0x27c] ss:$28 sps:$4 sm:$0xff]  }
 0x38b   :  { %18443 = vst [vmem:[#allocation79_spill] sm:$0xff] %v14918_v32  ;;  %v4668_v14 = vpop.f32.mrf.mxu1  ;;  %10515 = vmatmul.mubr.msk.bf16.gmra.mxu1 %vm2602_vm0, %v11955_v16  ;;  %v14934_v52 = vadd.f32 %v4664_v40, %v4312_v21  ;;  %v4316_v35 = vadd.f32 %v4315_v7, %v14369_v50  ;;  %4949 = vmatprep.mubr.bf16.mxu0 %v11956_v24 }
 0x38c   :  { %5302 = vmatprep.mubr.bf16.mxu1 %v18194_v59  ;;  %v4317_v32 = vpop.f32.mrf.mxu0 }
 0x38d   :  { %18444 = vst [vmem:[#allocation80_spill] sm:$0xff] %v14934_v52  ;;  %v4670_v3 = vpop.f32.mrf.mxu1  ;;  %v14941_v58 = vadd.f32 %v4668_v14, %v4316_v35  ;;  %v4318_v13 = vadd.f32 %v4317_v32, %v14376_v55 }
 0x38e   :  { %v4319_v40 = vpop.f32.mrf.mxu0 }
 0x38f   :  { %18445 = vst [vmem:[#allocation81_spill] sm:$0xff] %v14941_v58  ;;  %v4672_v21 = vpop.f32.mrf.mxu1  ;;  %v14944_v16 = vadd.f32 %v4670_v3, %v4318_v13  ;;  %v4320_v7 = vadd.f32 %v4319_v40, %v14369_v50  ;;  %v11958_v13 = vld [vmem:[%s18050_s0 + $0x248] ss:$28 sps:$4 sm:$0xff]  }
 0x390   :  { %v4321_v52 = vpop.f32.mrf.mxu0 }
 0x391   :  { %18446 = vst [vmem:[#allocation82_spill] sm:$0xff] %v14944_v16  ;;  %v4674_v60 = vpop.f32.mrf.mxu1  ;;  %v14947_v24 = vadd.f32 %v4672_v21, %v4320_v7  ;;  %v4322_v0 = vadd.f32 %v4321_v52, %v14376_v55 }
 0x392   :  { %v4325_v34 = vpop.f32.mrf.mxu0  ;;  %4950 = vmatmul.mubr.bf16.gmra.mxu0 %v11957_v41 }
 0x393   :  { %18447 = vst [vmem:[#allocation83_spill] sm:$0xff] %v14947_v24  ;;  %v4678_v8 = vpop.f32.mrf.mxu1  ;;  %10516 = vmatmul.mubr.msk.bf16.gmra.mxu1 %vm2602_vm0, %v11958_v13  ;;  %v14957_v3 = vadd.f32 %v4674_v60, %v4322_v0  ;;  %v4326_v32 = vadd.f32 %v4325_v34, %v14369_v50  ;;  %4959 = vmatprep.mubr.bf16.mxu0 %v11959_v28  ;;  %v11397_v34 = vld [vmem:[%s18053_s3 + $0x144] ss:$16 sps:$4 sm:$0xff]   ;;  %v11395_v28 = vld [vmem:[%s18053_s3 + $0x140] ss:$16 sps:$4 sm:$0xff]  }
 0x394   :  { %5312 = vmatprep.mubr.bf16.mxu1 %v18194_v59  ;;  %v4327_v14 = vpop.f32.mrf.mxu0  ;;  %6723 = vmatprep.subr.bf16.mxu0 %v11397_v34 }
 0x395   :  { %18448 = vst [vmem:[#allocation84_spill] sm:$0xff] %v14957_v3  ;;  %v4680_v52 = vpop.f32.mrf.mxu1  ;;  %v14964_v35 = vadd.f32 %v4678_v8, %v4326_v32  ;;  %v4328_v40 = vadd.f32 %v4327_v14, %v14376_v55  ;;  %v11398_v14 = vld [vmem:[%s18053_s3 + $0x340] ss:$16 sps:$4 sm:$0xff]   ;;  %6724 = vmatpush2.bf16.msra.mxu0 %v11395_v28 }
 0x396   :  { %v4329_v21 = vpop.f32.mrf.mxu0 }
 0x397   :  { %18449 = vst [vmem:[#allocation85_spill] sm:$0xff] %v14964_v35  ;;  %v4682_v7 = vpop.f32.mrf.mxu1  ;;  %v14967_v41 = vadd.f32 %v4680_v52, %v4328_v40  ;;  %v4330_v0 = vadd.f32 %v4329_v21, %v14369_v50  ;;  %v11400_v52 = vld [vmem:[%s18053_s3 + $0x344] ss:$16 sps:$4 sm:$0xff]  }
 0x398   :  { %v4331_v60 = vpop.f32.mrf.mxu0  ;;  %7076 = vmatprep.subr.bf16.mxu1 %v11400_v52  ;;  %v11963_v52 = vld [vmem:[%s18050_s0 + $0x2b0] ss:$28 sps:$4 sm:$0xff]  }
 0x399   :  { %18450 = vst [vmem:[#allocation86_spill] sm:$0xff] %v14967_v41  ;;  %v4684_v13 = vpop.f32.mrf.mxu1  ;;  %v14976_v8 = vadd.f32 %v4682_v7, %v4330_v0  ;;  %v4332_v32 = vadd.f32 %v4331_v60, %v14376_v55  ;;  %v11960_v41 = vld [vmem:[%s18050_s0 + $0x278] ss:$28 sps:$4 sm:$0xff]   ;;  %v11961_v7 = vld [vmem:[%s18050_s0 + $0x280] ss:$28 sps:$4 sm:$0xff]   ;;  %7077 = vmatpush2.bf16.msra.mxu1 %v11398_v14 }
 0x39a   :  { %v4335_v40 = vpop.f32.mrf.mxu0  ;;  %4960 = vmatmul.mubr.bf16.gmra.mxu0 %v11960_v41  ;;  %v11962_v60 = vld [vmem:[%s18050_s0 + $0x2b4] ss:$28 sps:$4 sm:$0xff]   ;;  %v11965_v14 = vld [vmem:[%s18050_s0 + $0x2ec] ss:$28 sps:$4 sm:$0xff]  }
 0x39b   :  { %18451 = vst [vmem:[#allocation87_spill] sm:$0xff] %v14976_v8  ;;  %v4688_v21 = vpop.f32.mrf.mxu1  ;;  %10517 = vmatmul.mubr.msk.bf16.gmra.mxu1 %vm2602_vm0, %v11961_v7  ;;  %v14992_v0 = vadd.f32 %v4684_v13, %v4332_v32  ;;  %v4336_v34 = vadd.f32 %v4335_v40, %v14369_v50  ;;  %4969 = vmatprep.mubr.bf16.mxu0 %v11962_v60 }
 0x39c   :  { %5322 = vmatprep.mubr.bf16.mxu1 %v18194_v59  ;;  %v4337_v8 = vpop.f32.mrf.mxu0 }
 0x39d   :  { %18452 = vst [vmem:[#allocation88_spill] sm:$0xff] %v14992_v0  ;;  %v4690_v35 = vpop.f32.mrf.mxu1  ;;  %v14999_v41 = vadd.f32 %v4688_v21, %v4336_v34  ;;  %v4338_v3 = vadd.f32 %v4337_v8, %v14376_v55 }
 0x39e   :  { %v4339_v13 = vpop.f32.mrf.mxu0 }
 0x39f   :  { %18453 = vst [vmem:[#allocation103_spill] sm:$0xff] %v14999_v41  ;;  %v4692_v32 = vpop.f32.mrf.mxu1  ;;  %v15002_v7 = vadd.f32 %v4690_v35, %v4338_v3  ;;  %v4340_v40 = vadd.f32 %v4339_v13, %v14369_v50  ;;  %v11964_v3 = vld [vmem:[%s18050_s0 + $0x2b8] ss:$28 sps:$4 sm:$0xff]  }
 0x3a0   :  { %v4341_v0 = vpop.f32.mrf.mxu0 }
 0x3a1   :  { %18454 = vst [vmem:[#allocation104_spill] sm:$0xff] %v15002_v7  ;;  %v4694_v24 = vpop.f32.mrf.mxu1  ;;  %v15005_v60 = vadd.f32 %v4692_v32, %v4340_v40  ;;  %v4342_v16 = vadd.f32 %v4341_v0, %v14376_v55 }
 0x3a2   :  { %v4345_v58 = vpop.f32.mrf.mxu0  ;;  %4970 = vmatmul.mubr.bf16.gmra.mxu0 %v11963_v52 }
 0x3a3   :  { %18455 = vst [vmem:[#allocation105_spill] sm:$0xff] %v15005_v60  ;;  %v4698_v28 = vpop.f32.mrf.mxu1  ;;  %10518 = vmatmul.mubr.msk.bf16.gmra.mxu1 %vm2602_vm0, %v11964_v3  ;;  %v15015_v35 = vadd.f32 %v4694_v24, %v4342_v16  ;;  %v4346_v8 = vadd.f32 %v4345_v58, %v14369_v50  ;;  %4979 = vmatprep.mubr.bf16.mxu0 %v11965_v14  ;;  %v11403_v58 = vld [vmem:[%s18053_s3 + $0x124] ss:$16 sps:$4 sm:$0xff]   ;;  %v11401_v14 = vld [vmem:[%s18053_s3 + $0x120] ss:$16 sps:$4 sm:$0xff]  }
 0x3a4   :  { %5332 = vmatprep.mubr.bf16.mxu1 %v18194_v59  ;;  %v4347_v21 = vpop.f32.mrf.mxu0  ;;  %6725 = vmatprep.subr.bf16.mxu0 %v11403_v58 }
 0x3a5   :  { %18456 = vst [vmem:[#allocation106_spill] sm:$0xff] %v15015_v35  ;;  %v4700_v0 = vpop.f32.mrf.mxu1  ;;  %v15022_v34 = vadd.f32 %v4698_v28, %v4346_v8  ;;  %v4348_v13 = vadd.f32 %v4347_v21, %v14376_v55  ;;  %v11404_v21 = vld [vmem:[%s18053_s3 + $0x320] ss:$16 sps:$4 sm:$0xff]   ;;  %6726 = vmatpush2.bf16.msra.mxu0 %v11401_v14 }
 0x3a6   :  { %v4349_v32 = vpop.f32.mrf.mxu0 }
 0x3a7   :  { %18457 = vst [vmem:[#allocation107_spill] sm:$0xff] %v15022_v34  ;;  %v4702_v40 = vpop.f32.mrf.mxu1  ;;  %v15025_v52 = vadd.f32 %v4700_v0, %v4348_v13  ;;  %v4350_v16 = vadd.f32 %v4349_v32, %v14369_v50  ;;  %v11406_v0 = vld [vmem:[%s18053_s3 + $0x324] ss:$16 sps:$4 sm:$0xff]  }
 0x3a8   :  { %v4351_v24 = vpop.f32.mrf.mxu0  ;;  %7078 = vmatprep.subr.bf16.mxu1 %v11406_v0  ;;  %v11969_v0 = vld [vmem:[%s18050_s0 + $0x320] ss:$28 sps:$4 sm:$0xff]  }
 0x3a9   :  { %18458 = vst [vmem:[#allocation108_spill] sm:$0xff] %v15025_v52  ;;  %v4704_v3 = vpop.f32.mrf.mxu1  ;;  %v15034_v28 = vadd.f32 %v4702_v40, %v4350_v16  ;;  %v4352_v8 = vadd.f32 %v4351_v24, %v14376_v55  ;;  %v11966_v52 = vld [vmem:[%s18050_s0 + $0x2e8] ss:$28 sps:$4 sm:$0xff]   ;;  %v11967_v40 = vld [vmem:[%s18050_s0 + $0x2f0] ss:$28 sps:$4 sm:$0xff]   ;;  %7079 = vmatpush2.bf16.msra.mxu1 %v11404_v21 }
 0x3aa   :  { %v4355_v13 = vpop.f32.mrf.mxu0  ;;  %4980 = vmatmul.mubr.bf16.gmra.mxu0 %v11966_v52  ;;  %v11968_v24 = vld [vmem:[%s18050_s0 + $0x324] ss:$28 sps:$4 sm:$0xff]   ;;  %v11971_v21 = vld [vmem:[%s18050_s0 + $0x35c] ss:$28 sps:$4 sm:$0xff]  }
 0x3ab   :  { %18459 = vst [vmem:[#allocation109_spill] sm:$0xff] %v15034_v28  ;;  %v4708_v32 = vpop.f32.mrf.mxu1  ;;  %10519 = vmatmul.mubr.msk.bf16.gmra.mxu1 %vm2602_vm0, %v11967_v40  ;;  %v15050_v16 = vadd.f32 %v4704_v3, %v4352_v8  ;;  %v4356_v58 = vadd.f32 %v4355_v13, %v14369_v50  ;;  %4989 = vmatprep.mubr.bf16.mxu0 %v11968_v24 }
 0x3ac   :  { %5342 = vmatprep.mubr.bf16.mxu1 %v18194_v59  ;;  %v4357_v28 = vpop.f32.mrf.mxu0 }
 0x3ad   :  { %18460 = vst [vmem:[#allocation110_spill] sm:$0xff] %v15050_v16  ;;  %v4710_v34 = vpop.f32.mrf.mxu1  ;;  %v15057_v52 = vadd.f32 %v4708_v32, %v4356_v58  ;;  %v4358_v35 = vadd.f32 %v4357_v28, %v14376_v55 }
 0x3ae   :  { %v4359_v3 = vpop.f32.mrf.mxu0 }
 0x3af   :  { %18461 = vst [vmem:[#allocation111_spill] sm:$0xff] %v15057_v52  ;;  %v4712_v8 = vpop.f32.mrf.mxu1  ;;  %v15060_v40 = vadd.f32 %v4710_v34, %v4358_v35  ;;  %v4360_v13 = vadd.f32 %v4359_v3, %v14369_v50  ;;  %v11970_v35 = vld [vmem:[%s18050_s0 + $0x328] ss:$28 sps:$4 sm:$0xff]  }
 0x3b0   :  { %v4361_v16 = vpop.f32.mrf.mxu0 }
 0x3b1   :  { %18462 = vst [vmem:[#allocation112_spill] sm:$0xff] %v15060_v40  ;;  %v4714_v60 = vpop.f32.mrf.mxu1  ;;  %v15063_v24 = vadd.f32 %v4712_v8, %v4360_v13  ;;  %v4362_v7 = vadd.f32 %v4361_v16, %v14376_v55 }
 0x3b2   :  { %v4365_v41 = vpop.f32.mrf.mxu0  ;;  %4990 = vmatmul.mubr.bf16.gmra.mxu0 %v11969_v0 }
 0x3b3   :  { %18463 = vst [vmem:[#allocation113_spill] sm:$0xff] %v15063_v24  ;;  %v4718_v14 = vpop.f32.mrf.mxu1  ;;  %10520 = vmatmul.mubr.msk.bf16.gmra.mxu1 %vm2602_vm0, %v11970_v35  ;;  %v15073_v34 = vadd.f32 %v4714_v60, %v4362_v7  ;;  %v4366_v28 = vadd.f32 %v4365_v41, %v14369_v50  ;;  %4999 = vmatprep.mubr.bf16.mxu0 %v11971_v21  ;;  %v11409_v41 = vld [vmem:[%s18053_s3 + $0x104] ss:$16 sps:$4 sm:$0xff]   ;;  %v11407_v21 = vld [vmem:[%s18053_s3 + $0x100] ss:$16 sps:$4 sm:$0xff]  }
 0x3b4   :  { %5352 = vmatprep.mubr.bf16.mxu1 %v18194_v59  ;;  %v4367_v32 = vpop.f32.mrf.mxu0  ;;  %6727 = vmatprep.subr.bf16.mxu0 %v11409_v41 }
 0x3b5   :  { %18464 = vst [vmem:[#allocation114_spill] sm:$0xff] %v15073_v34  ;;  %v4720_v16 = vpop.f32.mrf.mxu1  ;;  %v15080_v58 = vadd.f32 %v4718_v14, %v4366_v28  ;;  %v4368_v3 = vadd.f32 %v4367_v32, %v14376_v55  ;;  %v11410_v32 = vld [vmem:[%s18053_s3 + $0x300] ss:$16 sps:$4 sm:$0xff]   ;;  %6728 = vmatpush2.bf16.msra.mxu0 %v11407_v21 }
 0x3b6   :  { %v4369_v8 = vpop.f32.mrf.mxu0 }
 0x3b7   :  { %18465 = vst [vmem:[#allocation115_spill] sm:$0xff] %v15080_v58  ;;  %v4722_v13 = vpop.f32.mrf.mxu1  ;;  %v15083_v0 = vadd.f32 %v4720_v16, %v4368_v3  ;;  %v4370_v7 = vadd.f32 %v4369_v8, %v14369_v50  ;;  %v11412_v16 = vld [vmem:[%s18053_s3 + $0x304] ss:$16 sps:$4 sm:$0xff]  }
 0x3b8   :  { %v4371_v60 = vpop.f32.mrf.mxu0  ;;  %7080 = vmatprep.subr.bf16.mxu1 %v11412_v16  ;;  %v11975_v16 = vld [vmem:[%s18050_s0 + $0x390] ss:$28 sps:$4 sm:$0xff]  }
 0x3b9   :  { %18466 = vst [vmem:[#allocation116_spill] sm:$0xff] %v15083_v0  ;;  %v4724_v35 = vpop.f32.mrf.mxu1  ;;  %v15092_v14 = vadd.f32 %v4722_v13, %v4370_v7  ;;  %v4372_v28 = vadd.f32 %v4371_v60, %v14376_v55  ;;  %v11972_v0 = vld [vmem:[%s18050_s0 + $0x358] ss:$28 sps:$4 sm:$0xff]   ;;  %v11973_v13 = vld [vmem:[%s18050_s0 + $0x360] ss:$28 sps:$4 sm:$0xff]   ;;  %7081 = vmatpush2.bf16.msra.mxu1 %v11410_v32 }
 0x3ba   :  { %v4375_v3 = vpop.f32.mrf.mxu0  ;;  %5000 = vmatmul.mubr.bf16.gmra.mxu0 %v11972_v0  ;;  %v11974_v60 = vld [vmem:[%s18050_s0 + $0x394] ss:$28 sps:$4 sm:$0xff]   ;;  %v11977_v32 = vld [vmem:[%s18050_s0 + $0x3cc] ss:$28 sps:$4 sm:$0xff]  }
 0x3bb   :  { %18467 = vst [vmem:[#allocation117_spill] sm:$0xff] %v15092_v14  ;;  %v4728_v8 = vpop.f32.mrf.mxu1  ;;  %10521 = vmatmul.mubr.msk.bf16.gmra.mxu1 %vm2602_vm0, %v11973_v13  ;;  %v15108_v7 = vadd.f32 %v4724_v35, %v4372_v28  ;;  %v4376_v41 = vadd.f32 %v4375_v3, %v14369_v50  ;;  %5009 = vmatprep.mubr.bf16.mxu0 %v11974_v60 }
 0x3bc   :  { %5362 = vmatprep.mubr.bf16.mxu1 %v18194_v59  ;;  %v4377_v14 = vpop.f32.mrf.mxu0 }
 0x3bd   :  { %18468 = vst [vmem:[#allocation118_spill] sm:$0xff] %v15108_v7  ;;  %v4730_v58 = vpop.f32.mrf.mxu1  ;;  %v15115_v0 = vadd.f32 %v4728_v8, %v4376_v41  ;;  %v4378_v34 = vadd.f32 %v4377_v14, %v14376_v55 }
 0x3be   :  { %v4379_v35 = vpop.f32.mrf.mxu0 }
 0x3bf   :  { %v4732_v28 = vpop.f32.mrf.mxu1  ;;  %v15118_v13 = vadd.f32 %v4730_v58, %v4378_v34  ;;  %v4380_v3 = vadd.f32 %v4379_v35, %v14369_v50  ;;  %v11976_v34 = vld [vmem:[%s18050_s0 + $0x398] ss:$28 sps:$4 sm:$0xff]  }
 0x3c0   :  { %v4381_v7 = vpop.f32.mrf.mxu0 }
 0x3c1   :  { %18469 = vst [vmem:[#allocation119_spill] sm:$0xff] %v15118_v13  ;;  %v4734_v24 = vpop.f32.mrf.mxu1  ;;  %v15121_v60 = vadd.f32 %v4732_v28, %v4380_v3  ;;  %v4382_v40 = vadd.f32 %v4381_v7, %v14376_v55 }
 0x3c2   :  { %v4385_v52 = vpop.f32.mrf.mxu0  ;;  %5010 = vmatmul.mubr.bf16.gmra.mxu0 %v11975_v16 }
 0x3c3   :  { %18470 = vst [vmem:[#allocation120_spill] sm:$0xff] %v15121_v60  ;;  %v4738_v21 = vpop.f32.mrf.mxu1  ;;  %10522 = vmatmul.mubr.msk.bf16.gmra.mxu1 %vm2602_vm0, %v11976_v34  ;;  %v15131_v58 = vadd.f32 %v4734_v24, %v4382_v40  ;;  %v4386_v14 = vadd.f32 %v4385_v52, %v14369_v50  ;;  %5019 = vmatprep.mubr.bf16.mxu0 %v11977_v32  ;;  %v11415_v52 = vld [vmem:[%s18053_s3 + $0xec] ss:$16 sps:$4 sm:$0xff]  }
 0x3c4   :  { %5372 = vmatprep.mubr.bf16.mxu1 %v18194_v59  ;;  %v4387_v8 = vpop.f32.mrf.mxu0  ;;  %7403 = vmatprep.subr.bf16.mxu0 %v11415_v52 }
 0x3c5   :  { %18471 = vst [vmem:[#allocation121_spill] sm:$0xff] %v15131_v58  ;;  %v4740_v7 = vpop.f32.mrf.mxu1  ;;  %v15138_v41 = vadd.f32 %v4738_v21, %v4386_v14  ;;  %v4388_v35 = vadd.f32 %v4387_v8, %v14376_v55  ;;  %v11418_v21 = vld [vmem:[%s18053_s3 + $0x2ec] ss:$16 sps:$4 sm:$0xff]  }
 0x3c6   :  { %v4389_v28 = vpop.f32.mrf.mxu0  ;;  %7756 = vmatprep.subr.bf16.mxu1 %v11418_v21  ;;  %v11981_v21 = vld [vmem:[%s18050_s0 + $0x400] ss:$28 sps:$4 sm:$0xff]  }
 0x3c7   :  { %18472 = vst [vmem:[#allocation122_spill] sm:$0xff] %v15138_v41  ;;  %v4742_v3 = vpop.f32.mrf.mxu1  ;;  %v15141_v16 = vadd.f32 %v4740_v7, %v4388_v35  ;;  %v4390_v40 = vadd.f32 %v4389_v28, %v14369_v50  ;;  %v11978_v7 = vld [vmem:[%s18050_s0 + $0x3c8] ss:$28 sps:$4 sm:$0xff]   ;;  %v11979_v35 = vld [vmem:[%s18050_s0 + $0x3d0] ss:$28 sps:$4 sm:$0xff]  }
 0x3c8   :  { %v4391_v24 = vpop.f32.mrf.mxu0 }
 0x3c9   :  { %18473 = vst [vmem:[#allocation123_spill] sm:$0xff] %v15141_v16  ;;  %v4744_v34 = vpop.f32.mrf.mxu1  ;;  %v15147_v32 = vadd.f32 %v4742_v3, %v4390_v40  ;;  %v4392_v58 = vadd.f32 %v4391_v24, %v14376_v55  ;;  %v11980_v40 = vld [vmem:[%s18050_s0 + $0x404] ss:$28 sps:$4 sm:$0xff]  }
 0x3ca   :  { %v4395_v14 = vpop.f32.mrf.mxu0  ;;  %5020 = vmatmul.mubr.bf16.gmra.mxu0 %v11978_v7 }
 0x3cb   :  { %18474 = vst [vmem:[#allocation124_spill] sm:$0xff] %v15147_v32  ;;  %v4748_v8 = vpop.f32.mrf.mxu1  ;;  %10523 = vmatmul.mubr.msk.bf16.gmra.mxu1 %vm2602_vm0, %v11979_v35  ;;  %v15160_v28 = vadd.f32 %v4744_v34, %v4392_v58  ;;  %v4396_v3 = vadd.f32 %v4395_v14, %v14369_v50  ;;  %5029 = vmatprep.mubr.bf16.mxu0 %v11980_v40 }
 0x3cc   :  { %5382 = vmatprep.mubr.bf16.mxu1 %v18194_v59  ;;  %v4397_v52 = vpop.f32.mrf.mxu0 }
 0x3cd   :  { %18475 = vst [vmem:[#allocation125_spill] sm:$0xff] %v15160_v28  ;;  %v4750_v24 = vpop.f32.mrf.mxu1  ;;  %v15167_v7 = vadd.f32 %v4748_v8, %v4396_v3  ;;  %v4398_v32 = vadd.f32 %v4397_v52, %v14376_v55  ;;  %v11983_v3 = vld [vmem:[%s18050_s0 + $0x43c] ss:$28 sps:$4 sm:$0xff]  }
 0x3ce   :  { %v4399_v16 = vpop.f32.mrf.mxu0 }
 0x3cf   :  { %v4752_v35 = vpop.f32.mrf.mxu1  ;;  %v15170_v58 = vadd.f32 %v4750_v24, %v4398_v32  ;;  %v4400_v34 = vadd.f32 %v4399_v16, %v14369_v50  ;;  %v11982_v32 = vld [vmem:[%s18050_s0 + $0x408] ss:$28 sps:$4 sm:$0xff]  }
 0x3d0   :  { %v4401_v14 = vpop.f32.mrf.mxu0 }
 0x3d1   :  { %18476 = vst [vmem:[#allocation126_spill] sm:$0xff] %v15170_v58  ;;  %v4754_v28 = vpop.f32.mrf.mxu1  ;;  %v15173_v41 = vadd.f32 %v4752_v35, %v4400_v34  ;;  %v4402_v40 = vadd.f32 %v4401_v14, %v14376_v55 }
 0x3d2   :  { %v4405_v60 = vpop.f32.mrf.mxu0  ;;  %5030 = vmatmul.mubr.bf16.gmra.mxu0 %v11981_v21 }
 0x3d3   :  { %18477 = vst [vmem:[#allocation127_spill] sm:$0xff] %v15173_v41  ;;  %v4758_v13 = vpop.f32.mrf.mxu1  ;;  %10524 = vmatmul.mubr.msk.bf16.gmra.mxu1 %vm2602_vm0, %v11982_v32  ;;  %v15183_v16 = vadd.f32 %v4754_v28, %v4402_v40  ;;  %v4406_v8 = vadd.f32 %v4405_v60, %v14369_v50  ;;  %5039 = vmatprep.mubr.bf16.mxu0 %v11983_v3 }
 0x3d4   :  { %5392 = vmatprep.mubr.bf16.mxu1 %v18194_v59  ;;  %v4407_v52 = vpop.f32.mrf.mxu0 }
 0x3d5   :  { %18478 = vst [vmem:[#allocation128_spill] sm:$0xff] %v15183_v16  ;;  %v4760_v24 = vpop.f32.mrf.mxu1  ;;  %v15190_v35 = vadd.f32 %v4758_v13, %v4406_v8  ;;  %v4408_v34 = vadd.f32 %v4407_v52, %v14376_v55  ;;  %v11984_v13 = vld [vmem:[%s18050_s0 + $0x438] ss:$28 sps:$4 sm:$0xff]   ;;  %v11985_v8 = vld [vmem:[%s18050_s0 + $0x440] ss:$28 sps:$4 sm:$0xff]  }
 0x3d6   :  { %v4409_v14 = vpop.f32.mrf.mxu0 }
 0x3d7   :  { %18479 = vst [vmem:[#allocation129_spill] sm:$0xff] %v15190_v35  ;;  %v4762_v21 = vpop.f32.mrf.mxu1  ;;  %v15193_v32 = vadd.f32 %v4760_v24, %v4408_v34  ;;  %v4410_v28 = vadd.f32 %v4409_v14, %v14369_v50  ;;  %v11986_v34 = vld [vmem:[%s18050_s0 + $0x474] ss:$28 sps:$4 sm:$0xff]  }
 0x3d8   :  { %v4411_v60 = vpop.f32.mrf.mxu0 }
 0x3d9   :  { %18480 = vst [vmem:[#allocation130_spill] sm:$0xff] %v15193_v32  ;;  %v4764_v40 = vpop.f32.mrf.mxu1  ;;  %v15196_v16 = vadd.f32 %v4762_v21, %v4410_v28  ;;  %v4412_v3 = vadd.f32 %v4411_v60, %v14376_v55 }
 0x3da   :  { %v4415_v41 = vpop.f32.mrf.mxu0  ;;  %5040 = vmatmul.mubr.bf16.gmra.mxu0 %v11984_v13 }
 0x3db   :  { %18481 = vst [vmem:[#allocation131_spill] sm:$0xff] %v15196_v16  ;;  %v4768_v58 = vpop.f32.mrf.mxu1  ;;  %10525 = vmatmul.mubr.msk.bf16.gmra.mxu1 %vm2602_vm0, %v11985_v8  ;;  %v15206_v52 = vadd.f32 %v4764_v40, %v4412_v3  ;;  %v4416_v24 = vadd.f32 %v4415_v41, %v14369_v50  ;;  %5049 = vmatprep.mubr.bf16.mxu0 %v11986_v34 }
 0x3dc   :  { %5402 = vmatprep.mubr.bf16.mxu1 %v18194_v59  ;;  %v4417_v14 = vpop.f32.mrf.mxu0 }
 0x3dd   :  { %18482 = vst [vmem:[#allocation132_spill] sm:$0xff] %v15206_v52  ;;  %v4770_v21 = vpop.f32.mrf.mxu1  ;;  %v15213_v28 = vadd.f32 %v4768_v58, %v4416_v24  ;;  %v4418_v60 = vadd.f32 %v4417_v14, %v14376_v55  ;;  %v11987_v58 = vld [vmem:[%s18050_s0 + $0x470] ss:$28 sps:$4 sm:$0xff]   ;;  %v11988_v24 = vld [vmem:[%s18050_s0 + $0x478] ss:$28 sps:$4 sm:$0xff]  }
 0x3de   :  { %v4419_v13 = vpop.f32.mrf.mxu0 }
 0x3df   :  { %18483 = vst [vmem:[#allocation133_spill] sm:$0xff] %v15213_v28  ;;  %v4772_v16 = vpop.f32.mrf.mxu1  ;;  %v15216_v8 = vadd.f32 %v4770_v21, %v4418_v60  ;;  %v4420_v40 = vadd.f32 %v4419_v13, %v14369_v50  ;;  %v11989_v21 = vld [vmem:[%s18050_s0 + $0x4ac] ss:$28 sps:$4 sm:$0xff]  }
 0x3e0   :  { %v4421_v41 = vpop.f32.mrf.mxu0 }
 0x3e1   :  { %18484 = vst [vmem:[#allocation134_spill] sm:$0xff] %v15216_v8  ;;  %v4774_v3 = vpop.f32.mrf.mxu1  ;;  %v15219_v52 = vadd.f32 %v4772_v16, %v4420_v40  ;;  %v4422_v34 = vadd.f32 %v4421_v41, %v14376_v55 }
 0x3e2   :  { %v4425_v32 = vpop.f32.mrf.mxu0  ;;  %5050 = vmatmul.mubr.bf16.gmra.mxu0 %v11987_v58 }
 0x3e3   :  { %18485 = vst [vmem:[#allocation135_spill] sm:$0xff] %v15219_v52  ;;  %v4778_v35 = vpop.f32.mrf.mxu1  ;;  %10526 = vmatmul.mubr.msk.bf16.gmra.mxu1 %vm2602_vm0, %v11988_v24  ;;  %v15229_v14 = vadd.f32 %v4774_v3, %v4422_v34  ;;  %v4426_v16 = vadd.f32 %v4425_v32, %v14369_v50  ;;  %5059 = vmatprep.mubr.bf16.mxu0 %v11989_v21 }
 0x3e4   :  { %5412 = vmatprep.mubr.bf16.mxu1 %v18194_v59  ;;  %v4427_v60 = vpop.f32.mrf.mxu0 }
 0x3e5   :  { %18486 = vst [vmem:[#allocation136_spill] sm:$0xff] %v15229_v14  ;;  %v4780_v13 = vpop.f32.mrf.mxu1  ;;  %v15236_v40 = vadd.f32 %v4778_v35, %v4426_v16  ;;  %v4428_v41 = vadd.f32 %v4427_v60, %v14376_v55  ;;  %v11990_v35 = vld [vmem:[%s18050_s0 + $0x4a8] ss:$28 sps:$4 sm:$0xff]   ;;  %v11991_v16 = vld [vmem:[%s18050_s0 + $0x4b0] ss:$28 sps:$4 sm:$0xff]  }
 0x3e6   :  { %v4429_v58 = vpop.f32.mrf.mxu0 }
 0x3e7   :  { %18487 = vst [vmem:[#allocation137_spill] sm:$0xff] %v15236_v40  ;;  %v4782_v52 = vpop.f32.mrf.mxu1  ;;  %v15239_v24 = vadd.f32 %v4780_v13, %v4428_v41  ;;  %v4430_v3 = vadd.f32 %v4429_v58, %v14369_v50  ;;  %v11992_v13 = vld [vmem:[%s18050_s0 + $0x4e4] ss:$28 sps:$4 sm:$0xff]  }
 0x3e8   :  { %v4431_v32 = vpop.f32.mrf.mxu0 }
 0x3e9   :  { %18488 = vst [vmem:[#allocation138_spill] sm:$0xff] %v15239_v24  ;;  %v4784_v34 = vpop.f32.mrf.mxu1  ;;  %v15242_v14 = vadd.f32 %v4782_v52, %v4430_v3  ;;  %v4432_v21 = vadd.f32 %v4431_v32, %v14376_v55 }
 0x3ea   :  { %v4435_v8 = vpop.f32.mrf.mxu0  ;;  %5060 = vmatmul.mubr.bf16.gmra.mxu0 %v11990_v35 }
 0x3eb   :  { %18489 = vst [vmem:[#allocation139_spill] sm:$0xff] %v15242_v14  ;;  %v4788_v28 = vpop.f32.mrf.mxu1  ;;  %10527 = vmatmul.mubr.msk.bf16.gmra.mxu1 %vm2602_vm0, %v11991_v16  ;;  %v15252_v60 = vadd.f32 %v4784_v34, %v4432_v21  ;;  %v4436_v52 = vadd.f32 %v4435_v8, %v14369_v50  ;;  %5069 = vmatprep.mubr.bf16.mxu0 %v11992_v13 }
 0x3ec   :  { %5422 = vmatprep.mubr.bf16.mxu1 %v18194_v59  ;;  %v4437_v41 = vpop.f32.mrf.mxu0 }
 0x3ed   :  { %18490 = vst [vmem:[#allocation140_spill] sm:$0xff] %v15252_v60  ;;  %v4790_v58 = vpop.f32.mrf.mxu1  ;;  %v15259_v3 = vadd.f32 %v4788_v28, %v4436_v52  ;;  %v4438_v32 = vadd.f32 %v4437_v41, %v14376_v55  ;;  %v11993_v28 = vld [vmem:[%s18050_s0 + $0x4e0] ss:$28 sps:$4 sm:$0xff]   ;;  %v11994_v52 = vld [vmem:[%s18050_s0 + $0x4e8] ss:$28 sps:$4 sm:$0xff]  }
 0x3ee   :  { %v4439_v35 = vpop.f32.mrf.mxu0 }
 0x3ef   :  { %18491 = vst [vmem:[#allocation141_spill] sm:$0xff] %v15259_v3  ;;  %v4792_v14 = vpop.f32.mrf.mxu1  ;;  %v15262_v16 = vadd.f32 %v4790_v58, %v4438_v32  ;;  %v4440_v34 = vadd.f32 %v4439_v35, %v14369_v50  ;;  %v11995_v58 = vld [vmem:[%s18050_s0 + $0x51c] ss:$28 sps:$4 sm:$0xff]  }
 0x3f0   :  { %v4441_v8 = vpop.f32.mrf.mxu0 }
 0x3f1   :  { %18492 = vst [vmem:[#allocation142_spill] sm:$0xff] %v15262_v16  ;;  %v4794_v21 = vpop.f32.mrf.mxu1  ;;  %v15265_v60 = vadd.f32 %v4792_v14, %v4440_v34  ;;  %v4442_v13 = vadd.f32 %v4441_v8, %v14376_v55 }
 0x3f2   :  { %v4445_v24 = vpop.f32.mrf.mxu0  ;;  %5070 = vmatmul.mubr.bf16.gmra.mxu0 %v11993_v28 }
 0x3f3   :  { %18493 = vst [vmem:[#allocation143_spill] sm:$0xff] %v15265_v60  ;;  %v4798_v40 = vpop.f32.mrf.mxu1  ;;  %10528 = vmatmul.mubr.msk.bf16.gmra.mxu1 %vm2602_vm0, %v11994_v52  ;;  %v15275_v41 = vadd.f32 %v4794_v21, %v4442_v13  ;;  %v4446_v14 = vadd.f32 %v4445_v24, %v14369_v50  ;;  %5079 = vmatprep.mubr.bf16.mxu0 %v11995_v58 }
 0x3f4   :  { %5432 = vmatprep.mubr.bf16.mxu1 %v18194_v59  ;;  %v4447_v32 = vpop.f32.mrf.mxu0 }
 0x3f5   :  { %18494 = vst [vmem:[#allocation144_spill] sm:$0xff] %v15275_v41  ;;  %v4800_v35 = vpop.f32.mrf.mxu1  ;;  %v15282_v34 = vadd.f32 %v4798_v40, %v4446_v14  ;;  %v4448_v8 = vadd.f32 %v4447_v32, %v14376_v55  ;;  %v11996_v40 = vld [vmem:[%s18050_s0 + $0x518] ss:$28 sps:$4 sm:$0xff]   ;;  %v11997_v14 = vld [vmem:[%s18050_s0 + $0x520] ss:$28 sps:$4 sm:$0xff]  }
 0x3f6   :  { %v4449_v28 = vpop.f32.mrf.mxu0 }
 0x3f7   :  { %18495 = vst [vmem:[#allocation145_spill] sm:$0xff] %v15282_v34  ;;  %v4802_v60 = vpop.f32.mrf.mxu1  ;;  %v15285_v52 = vadd.f32 %v4800_v35, %v4448_v8  ;;  %v4450_v21 = vadd.f32 %v4449_v28, %v14369_v50  ;;  %v11998_v35 = vld [vmem:[%s18050_s0 + $0x554] ss:$28 sps:$4 sm:$0xff]  }
 0x3f8   :  { %v4451_v24 = vpop.f32.mrf.mxu0 }
 0x3f9   :  { %18496 = vst [vmem:[#allocation146_spill] sm:$0xff] %v15285_v52  ;;  %v4804_v13 = vpop.f32.mrf.mxu1  ;;  %v15288_v41 = vadd.f32 %v4802_v60, %v4450_v21  ;;  %v4452_v58 = vadd.f32 %v4451_v24, %v14376_v55 }
 0x3fa   :  { %v4455_v16 = vpop.f32.mrf.mxu0  ;;  %5080 = vmatmul.mubr.bf16.gmra.mxu0 %v11996_v40 }
 0x3fb   :  { %18497 = vst [vmem:[#allocation147_spill] sm:$0xff] %v15288_v41  ;;  %v4808_v3 = vpop.f32.mrf.mxu1  ;;  %10529 = vmatmul.mubr.msk.bf16.gmra.mxu1 %vm2602_vm0, %v11997_v14  ;;  %v15298_v32 = vadd.f32 %v4804_v13, %v4452_v58  ;;  %v4456_v60 = vadd.f32 %v4455_v16, %v14369_v50  ;;  %5089 = vmatprep.mubr.bf16.mxu0 %v11998_v35 }
 0x3fc   :  { %5442 = vmatprep.mubr.bf16.mxu1 %v18194_v59  ;;  %v4457_v8 = vpop.f32.mrf.mxu0 }
 0x3fd   :  { %18498 = vst [vmem:[#allocation148_spill] sm:$0xff] %v15298_v32  ;;  %v4810_v28 = vpop.f32.mrf.mxu1  ;;  %v15305_v21 = vadd.f32 %v4808_v3, %v4456_v60  ;;  %v4458_v24 = vadd.f32 %v4457_v8, %v14376_v55  ;;  %v11999_v3 = vld [vmem:[%s18050_s0 + $0x550] ss:$28 sps:$4 sm:$0xff]   ;;  %v12000_v8 = vld [vmem:[%s18050_s0 + $0x558] ss:$28 sps:$4 sm:$0xff]  }
 0x3fe   :  { %v4459_v40 = vpop.f32.mrf.mxu0 }
 0x3ff   :  { %18499 = vst [vmem:[#allocation149_spill] sm:$0xff] %v15305_v21  ;;  %v4812_v41 = vpop.f32.mrf.mxu1  ;;  %v15308_v14 = vadd.f32 %v4810_v28, %v4458_v24  ;;  %v4460_v13 = vadd.f32 %v4459_v40, %v14369_v50 }
 0x400   :  { %v4461_v16 = vpop.f32.mrf.mxu0 }
 0x401   :  { %18500 = vst [vmem:[#allocation150_spill] sm:$0xff] %v15308_v14  ;;  %v4814_v58 = vpop.f32.mrf.mxu1  ;;  %v15311_v32 = vadd.f32 %v4812_v41, %v4460_v13  ;;  %v4462_v35 = vadd.f32 %v4461_v16, %v14376_v55  ;;  %v12001_v55 = vld [vmem:[%s18050_s0 + $0x58c] ss:$28 sps:$4 sm:$0xff]  }
 0x402   :  { %v4851_v52 = vpop.f32.mrf.mxu0  ;;  %5090 = vmatmul.mubr.bf16.gmra.mxu0 %v11999_v3 }
 0x403   :  { %18501 = vst [vmem:[#allocation151_spill] sm:$0xff] %v15311_v32  ;;  %v5204_v60 = vpop.f32.mrf.mxu1  ;;  %10530 = vmatmul.mubr.msk.bf16.gmra.mxu1 %vm2602_vm0, %v12000_v8  ;;  %v15321_v50 = vadd.f32 %v4814_v58, %v4462_v35  ;;  %v4852_v41 = vadd.f32 %v4851_v52, %v14393_v19  ;;  %5099 = vmatprep.mubr.bf16.mxu0 %v12001_v55  ;;  %v12002_v55 = vld [vmem:[%s18050_s0 + $0x588] ss:$28 sps:$4 sm:$0xff]  }
 0x404   :  { %5452 = vmatprep.mubr.bf16.mxu1 %v18194_v59  ;;  %v4853_v28 = vpop.f32.mrf.mxu0 }
 0x405   :  { %18502 = vst [vmem:[#allocation152_spill] sm:$0xff] %v15321_v50  ;;  %v5206_v24 = vpop.f32.mrf.mxu1  ;;  %v4854_v40 = vadd.f32 %v4853_v28, %v14396_v46  ;;  %v5205_v3 = vadd.f32 %v5204_v60, %v4852_v41  ;;  %v12003_v46 = vld [vmem:[%s18050_s0 + $0x590] ss:$28 sps:$4 sm:$0xff]  }
 0x406   :  { %v4855_v13 = vpop.f32.mrf.mxu0 }
 0x407   :  { %v5208_v16 = vpop.f32.mrf.mxu1  ;;  %v4856_v8 = vadd.f32 %v4855_v13, %v14401_v23  ;;  %v5207_v50 = vadd.f32 %v5206_v24, %v4854_v40  ;;  %v5525_v23 = vmax.f32 %v5205_v3, 0.0 }
 0x408   :  { %v4857_v58 = vpop.f32.mrf.mxu0 }
 0x409   :  { %v5210_v35 = vpop.f32.mrf.mxu1  ;;  %v5209_v19 = vadd.f32 %v5208_v16, %v4856_v8  ;;  %v4858_v52 = vadd.f32 %v4857_v58, %v14410_v5  ;;  %v12004_v5 = vld [vmem:[%s18050_s0 + $0x5c4] ss:$28 sps:$4 sm:$0xff]   ;;  %v5526_v13 = vmax.f32 %v5207_v50, 0.0 }
 0x40a   :  { %v4861_v32 = vpop.f32.mrf.mxu0  ;;  %5100 = vmatmul.mubr.bf16.gmra.mxu0 %v12002_v55  ;;  %v12005_v50 = vld [vmem:[%s18050_s0 + $0x5c0] ss:$28 sps:$4 sm:$0xff]  }
 0x40b   :  { %v5214_v14 = vpop.f32.mrf.mxu1  ;;  %10531 = vmatmul.mubr.msk.bf16.gmra.mxu1 %vm2602_vm0, %v12003_v46  ;;  %v5529_v60 = vmax.f32 %v5209_v19, 0.0  ;;  %v5211_v41 = vadd.f32 %v5210_v35, %v4858_v52  ;;  %v4862_v28 = vadd.f32 %v4861_v32, %v14419_v56  ;;  %5109 = vmatprep.mubr.bf16.mxu0 %v12004_v5 }
 0x40c   :  { %5462 = vmatprep.mubr.bf16.mxu1 %v18194_v59  ;;  %v4863_v24 = vpop.f32.mrf.mxu0 }
 0x40d   :  { %v5216_v40 = vpop.f32.mrf.mxu1  ;;  %v15343_v16 = vpack.c.bf16 %v5529_v60, %v5525_v23  ;;  %v5530_v8 = vmax.f32 %v5211_v41, 0.0  ;;  %v4864_v58 = vadd.f32 %v4863_v24, %v14422_v12  ;;  %v5215_v35 = vadd.f32 %v5214_v14, %v4862_v28  ;;  %v12006_v14 = vld [vmem:[%s18050_s0 + $0x5c8] ss:$28 sps:$4 sm:$0xff]  }
 0x40e   :  { %v4865_v3 = vpop.f32.mrf.mxu0 }
 0x40f   :  { %v5218_v19 = vpop.f32.mrf.mxu1  ;;  %v4866_v56 = vadd.f32 %v4865_v3, %v14425_v33  ;;  %v15347_v32 = vpack.c.bf16 %v5530_v8, %v5526_v13  ;;  %v5217_v46 = vadd.f32 %v5216_v40, %v4864_v58  ;;  %v5533_v33 = vmax.f32 %v5215_v35, 0.0 }
 0x410   :  { %v4867_v52 = vpop.f32.mrf.mxu0 }
 0x411   :  { %v5220_v55 = vpop.f32.mrf.mxu1  ;;  %v5219_v5 = vadd.f32 %v5218_v19, %v4866_v56  ;;  %v4868_v21 = vadd.f32 %v4867_v52, %v14434_v45  ;;  %v12007_v45 = vld [vmem:[%s18050_s0 + $0x5fc] ss:$28 sps:$4 sm:$0xff]   ;;  %v5534_v40 = vmax.f32 %v5217_v46, 0.0 }
 0x412   :  { %v4871_v34 = vpop.f32.mrf.mxu0  ;;  %5110 = vmatmul.mubr.bf16.gmra.mxu0 %v12005_v50  ;;  %v12008_v46 = vld [vmem:[%s18050_s0 + $0x5f8] ss:$28 sps:$4 sm:$0xff]  }
 0x413   :  { %v5224_v12 = vpop.f32.mrf.mxu1  ;;  %10532 = vmatmul.mubr.msk.bf16.gmra.mxu1 %vm2602_vm0, %v12006_v14  ;;  %v5537_v23 = vmax.f32 %v5219_v5, 0.0  ;;  %v5221_v60 = vadd.f32 %v5220_v55, %v4868_v21  ;;  %v4872_v41 = vadd.f32 %v4871_v34, %v14443_v2  ;;  %5119 = vmatprep.mubr.bf16.mxu0 %v12007_v45 }
 0x414   :  { %5472 = vmatprep.mubr.bf16.mxu1 %v18194_v59  ;;  %v4873_v28 = vpop.f32.mrf.mxu0 }
 0x415   :  { %v5226_v24 = vpop.f32.mrf.mxu1  ;;  %v15362_v13 = vpack.c.bf16 %v5537_v23, %v5533_v33  ;;  %v5538_v8 = vmax.f32 %v5221_v60, 0.0  ;;  %v4874_v58 = vadd.f32 %v4873_v28, %v14446_v10  ;;  %v5225_v21 = vadd.f32 %v5224_v12, %v4872_v41  ;;  %v12009_v12 = vld [vmem:[%s18050_s0 + $0x600] ss:$28 sps:$4 sm:$0xff]  }
 0x416   :  { %v4875_v3 = vpop.f32.mrf.mxu0 }
 0x417   :  { %v5228_v19 = vpop.f32.mrf.mxu1  ;;  %v4876_v2 = vadd.f32 %v4875_v3, %v14449_v15  ;;  %v15366_v34 = vpack.c.bf16 %v5538_v8, %v5534_v40  ;;  %v5227_v52 = vadd.f32 %v5226_v24, %v4874_v58  ;;  %v5541_v15 = vmax.f32 %v5225_v21, 0.0 }
 0x418   :  { %v4877_v35 = vpop.f32.mrf.mxu0 }
 0x419   :  { %v5230_v56 = vpop.f32.mrf.mxu1  ;;  %v5229_v55 = vadd.f32 %v5228_v19, %v4876_v2  ;;  %v4878_v5 = vadd.f32 %v4877_v35, %v14458_v17  ;;  %v12010_v17 = vld [vmem:[%s18050_s0 + $0x634] ss:$28 sps:$4 sm:$0xff]   ;;  %v5542_v45 = vmax.f32 %v5227_v52, 0.0 }
 0x41a   :  { %v4881_v50 = vpop.f32.mrf.mxu0  ;;  %5120 = vmatmul.mubr.bf16.gmra.mxu0 %v12008_v46  ;;  %v12011_v52 = vld [vmem:[%s18050_s0 + $0x630] ss:$28 sps:$4 sm:$0xff]  }
 0x41b   :  { %v5234_v10 = vpop.f32.mrf.mxu1  ;;  %10533 = vmatmul.mubr.msk.bf16.gmra.mxu1 %vm2602_vm0, %v12009_v12  ;;  %v5545_v14 = vmax.f32 %v5229_v55, 0.0  ;;  %v5231_v33 = vadd.f32 %v5230_v56, %v4878_v5  ;;  %v4882_v23 = vadd.f32 %v4881_v50, %v14467_v42  ;;  %5129 = vmatprep.mubr.bf16.mxu0 %v12010_v17  ;;  %v12012_v50 = vld [vmem:[%s18050_s0 + $0x638] ss:$28 sps:$4 sm:$0xff]  }
 0x41c   :  { %5482 = vmatprep.mubr.bf16.mxu1 %v18194_v59  ;;  %v4883_v60 = vpop.f32.mrf.mxu0 }
 0x41d   :  { %v5236_v41 = vpop.f32.mrf.mxu1  ;;  %v15381_v28 = vpack.c.bf16 %v5545_v14, %v5541_v15  ;;  %v5546_v24 = vmax.f32 %v5231_v33, 0.0  ;;  %v4884_v40 = vadd.f32 %v4883_v60, %v14470_v6  ;;  %v5235_v3 = vadd.f32 %v5234_v10, %v4882_v23 }
 0x41e   :  { %v4885_v8 = vpop.f32.mrf.mxu0 }
 0x41f   :  { %v5238_v58 = vpop.f32.mrf.mxu1  ;;  %v4886_v42 = vadd.f32 %v4885_v8, %v14473_v43  ;;  %v15385_v19 = vpack.c.bf16 %v5546_v24, %v5542_v45  ;;  %v5237_v35 = vadd.f32 %v5236_v41, %v4884_v40  ;;  %v5549_v43 = vmax.f32 %v5235_v3, 0.0 }
 0x420   :  { %v4887_v21 = vpop.f32.mrf.mxu0 }
 0x421   :  { %v5240_v2 = vpop.f32.mrf.mxu1  ;;  %v5239_v56 = vadd.f32 %v5238_v58, %v4886_v42  ;;  %v4888_v55 = vadd.f32 %v4887_v21, %v14482_v49  ;;  %v12013_v49 = vld [vmem:[%s18050_s0 + $0x66c] ss:$28 sps:$4 sm:$0xff]   ;;  %v5550_v33 = vmax.f32 %v5237_v35, 0.0 }
 0x422   :  { %v4891_v5 = vpop.f32.mrf.mxu0  ;;  %5130 = vmatmul.mubr.bf16.gmra.mxu0 %v12011_v52  ;;  %v12014_v35 = vld [vmem:[%s18050_s0 + $0x668] ss:$28 sps:$4 sm:$0xff]  }
 0x423   :  { %v5244_v6 = vpop.f32.mrf.mxu1  ;;  %10534 = vmatmul.mubr.msk.bf16.gmra.mxu1 %vm2602_vm0, %v12012_v50  ;;  %v5553_v46 = vmax.f32 %v5239_v56, 0.0  ;;  %v5241_v10 = vadd.f32 %v5240_v2, %v4888_v55  ;;  %v4892_v12 = vadd.f32 %v4891_v5, %v14491_v36  ;;  %5139 = vmatprep.mubr.bf16.mxu0 %v12013_v49  ;;  %v12015_v56 = vld [vmem:[%s18050_s0 + $0x670] ss:$28 sps:$4 sm:$0xff]  }
 0x424   :  { %5492 = vmatprep.mubr.bf16.mxu1 %v18194_v59  ;;  %v4893_v15 = vpop.f32.mrf.mxu0 }
 0x425   :  { %v5246_v14 = vpop.f32.mrf.mxu1  ;;  %v15400_v23 = vpack.c.bf16 %v5553_v46, %v5549_v43  ;;  %v5554_v17 = vmax.f32 %v5241_v10, 0.0  ;;  %v4894_v60 = vadd.f32 %v4893_v15, %v14494_v1  ;;  %v5245_v24 = vadd.f32 %v5244_v6, %v4892_v12 }
 0x426   :  { %v4895_v41 = vpop.f32.mrf.mxu0 }
 0x427   :  { %v5248_v45 = vpop.f32.mrf.mxu1  ;;  %v4896_v36 = vadd.f32 %v4895_v41, %v14497_v54  ;;  %v15404_v40 = vpack.c.bf16 %v5554_v17, %v5550_v33  ;;  %v5247_v3 = vadd.f32 %v5246_v14, %v4894_v60  ;;  %v5557_v54 = vmax.f32 %v5245_v24, 0.0 }
 0x428   :  { %v4897_v8 = vpop.f32.mrf.mxu0 }
 0x429   :  { %v5250_v58 = vpop.f32.mrf.mxu1  ;;  %v5249_v42 = vadd.f32 %v5248_v45, %v4896_v36  ;;  %v4898_v21 = vadd.f32 %v4897_v8, %v14506_v51  ;;  %v12016_v51 = vld [vmem:[%s18050_s0 + $0x6a4] ss:$28 sps:$4 sm:$0xff]   ;;  %v5558_v43 = vmax.f32 %v5247_v3, 0.0 }
 0x42a   :  { %v4901_v2 = vpop.f32.mrf.mxu0  ;;  %5140 = vmatmul.mubr.bf16.gmra.mxu0 %v12014_v35  ;;  %v12017_v8 = vld [vmem:[%s18050_s0 + $0x6a0] ss:$28 sps:$4 sm:$0xff]  }
 0x42b   :  { %v5254_v1 = vpop.f32.mrf.mxu1  ;;  %10535 = vmatmul.mubr.msk.bf16.gmra.mxu1 %vm2602_vm0, %v12015_v56  ;;  %v5561_v55 = vmax.f32 %v5249_v42, 0.0  ;;  %v5251_v5 = vadd.f32 %v5250_v58, %v4898_v21  ;;  %v4902_v52 = vadd.f32 %v4901_v2, %v14515_v38  ;;  %5149 = vmatprep.mubr.bf16.mxu0 %v12016_v51  ;;  %v12018_v58 = vld [vmem:[%s18050_s0 + $0x6a8] ss:$28 sps:$4 sm:$0xff]  }
 0x42c   :  { %5502 = vmatprep.mubr.bf16.mxu1 %v18194_v59  ;;  %v4903_v6 = vpop.f32.mrf.mxu0 }
 0x42d   :  { %v5256_v50 = vpop.f32.mrf.mxu1  ;;  %v15419_v46 = vpack.c.bf16 %v5561_v55, %v5557_v54  ;;  %v5562_v10 = vmax.f32 %v5251_v5, 0.0  ;;  %v4904_v12 = vadd.f32 %v4903_v6, %v14518_v4  ;;  %v5255_v14 = vadd.f32 %v5254_v1, %v4902_v52 }
 0x42e   :  { %v4905_v49 = vpop.f32.mrf.mxu0 }
 0x42f   :  { %v5258_v15 = vpop.f32.mrf.mxu1  ;;  %v4906_v38 = vadd.f32 %v4905_v49, %v14521_v39  ;;  %v15423_v33 = vpack.c.bf16 %v5562_v10, %v5558_v43  ;;  %v5257_v41 = vadd.f32 %v5256_v50, %v4904_v12  ;;  %v5565_v39 = vmax.f32 %v5255_v14, 0.0  ;;  %v12020_v14 = vld [vmem:[%s18050_s0 + $0x6d8] ss:$28 sps:$4 sm:$0xff]  }
 0x430   :  { %v4907_v17 = vpop.f32.mrf.mxu0 }
 0x431   :  { %v5260_v60 = vpop.f32.mrf.mxu1  ;;  %v5259_v45 = vadd.f32 %v5258_v15, %v4906_v38  ;;  %v4908_v24 = vadd.f32 %v4907_v17, %v14530_v37  ;;  %v12019_v37 = vld [vmem:[%s18050_s0 + $0x6dc] ss:$28 sps:$4 sm:$0xff]   ;;  %v5566_v1 = vmax.f32 %v5257_v41, 0.0 }
 0x432   :  { %v4911_v36 = vpop.f32.mrf.mxu0  ;;  %5150 = vmatmul.mubr.bf16.gmra.mxu0 %v12017_v8  ;;  %v12021_v38 = vld [vmem:[%s18050_s0 + $0x6e0] ss:$28 sps:$4 sm:$0xff]  }
 0x433   :  { %v5264_v4 = vpop.f32.mrf.mxu1  ;;  %10536 = vmatmul.mubr.msk.bf16.gmra.mxu1 %vm2602_vm0, %v12018_v58  ;;  %v5569_v3 = vmax.f32 %v5259_v45, 0.0  ;;  %v5261_v42 = vadd.f32 %v5260_v60, %v4908_v24  ;;  %v4912_v21 = vadd.f32 %v4911_v36, %v14539_v9  ;;  %5159 = vmatprep.mubr.bf16.mxu0 %v12019_v37 }
 0x434   :  { %5512 = vmatprep.mubr.bf16.mxu1 %v18194_v59  ;;  %v4913_v2 = vpop.f32.mrf.mxu0 }
 0x435   :  { %v5266_v35 = vpop.f32.mrf.mxu1  ;;  %v15438_v56 = vpack.c.bf16 %v5569_v3, %v5565_v39  ;;  %v5570_v54 = vmax.f32 %v5261_v42, 0.0  ;;  %v4914_v55 = vadd.f32 %v4913_v2, %v14542_v47  ;;  %v5265_v51 = vadd.f32 %v5264_v4, %v4912_v21  ;;  %v11413_v2 = vld [vmem:[%s18053_s3 + $0xe8] ss:$16 sps:$4 sm:$0xff]  }
 0x436   :  { %v4915_v5 = vpop.f32.mrf.mxu0 }
 0x437   :  { %v5268_v52 = vpop.f32.mrf.mxu1  ;;  %v4916_v9 = vadd.f32 %v4915_v5, %v14545_v53  ;;  %v15442_v6 = vpack.c.bf16 %v5570_v54, %v5566_v1  ;;  %v5267_v10 = vadd.f32 %v5266_v35, %v4914_v55  ;;  %v5573_v53 = vmax.f32 %v5265_v51, 0.0  ;;  %v11416_v35 = vld [vmem:[%s18053_s3 + $0x2e8] ss:$16 sps:$4 sm:$0xff]   ;;  %v11424_v55 = vld [vmem:[%s18053_s3 + $0x2cc] ss:$16 sps:$4 sm:$0xff]  }
 0x438   :  { %v4917_v50 = vpop.f32.mrf.mxu0 }
 0x439   :  { %v5270_v43 = vpop.f32.mrf.mxu1  ;;  %v5269_v12 = vadd.f32 %v5268_v52, %v4916_v9  ;;  %v4918_v49 = vadd.f32 %v4917_v50, %v14554_v25  ;;  %v5574_v24 = vmax.f32 %v5267_v10, 0.0 }
 0x43a   :  { %v4921_v15 = vpop.f32.mrf.mxu0  ;;  %5160 = vmatmul.mubr.bf16.gmra.mxu0 %v12020_v14 }
 0x43b   :  { %v5274_v47 = vpop.f32.mrf.mxu1  ;;  %10537 = vmatmul.mubr.msk.bf16.gmra.mxu1 %vm2602_vm0, %v12021_v38  ;;  %v5577_v17 = vmax.f32 %v5269_v12, 0.0  ;;  %v5271_v60 = vadd.f32 %v5270_v43, %v4918_v49  ;;  %v4922_v41 = vadd.f32 %v4921_v15, %v14561_v18  ;;  %6729 = vmatprep.mubr.bf16.mxu0 %v13673_v11  ;;  %v11419_v12 = vld [vmem:[%s18053_s3 + $0xc8] ss:$16 sps:$4 sm:$0xff]   ;;  %v11427_v38 = vld [vmem:[%s18053_s3 + $0xac] ss:$16 sps:$4 sm:$0xff]  }
 0x43c   :  { %7082 = vmatprep.mubr.bf16.mxu1 %v15347_v32  ;;  %v4923_v25 = vpop.f32.mrf.mxu0  ;;  %v11422_v49 = vld [vmem:[%s18053_s3 + $0x2c8] ss:$16 sps:$4 sm:$0xff]  }
 0x43d   :  { %v5276_v45 = vpop.f32.mrf.mxu1  ;;  %v15455_v36 = vpack.c.bf16 %v5577_v17, %v5573_v53  ;;  %v5578_v8 = vmax.f32 %v5271_v60, 0.0  ;;  %v4924_v4 = vadd.f32 %v4923_v25, %v14564_v27  ;;  %v5275_v3 = vadd.f32 %v5274_v47, %v4922_v41  ;;  %v11430_v53 = vld [vmem:[%s18053_s3 + $0x2ac] ss:$16 sps:$4 sm:$0xff]  }
 0x43e   :  { %v4925_v58 = vpop.f32.mrf.mxu0 }
 0x43f   :  { %18503 = vst [vmem:[#allocation153_spill] sm:$0xff] %v15455_v36  ;;  %v5278_v39 = vpop.f32.mrf.mxu1  ;;  %v4926_v42 = vadd.f32 %v4925_v58, %v14573_v30  ;;  %v15459_v21 = vpack.c.bf16 %v5578_v8, %v5574_v24  ;;  %v5277_v1 = vadd.f32 %v5276_v45, %v4924_v4  ;;  %v11421_v30 = vld [vmem:[%s18053_s3 + $0xcc] ss:$16 sps:$4 sm:$0xff]   ;;  %v5581_v51 = vmax.f32 %v5275_v3, 0.0  ;;  %v11428_v4 = vld [vmem:[%s18053_s3 + $0x2a8] ss:$16 sps:$4 sm:$0xff]  }
 0x440   :  { %v4927_v18 = vpop.f32.mrf.mxu0 }
 0x441   :  { %18504 = vst [vmem:[#allocation154_spill] sm:$0xff] %v15459_v21  ;;  %v5280_v37 = vpop.f32.mrf.mxu1  ;;  %v5279_v54 = vadd.f32 %v5278_v39, %v4926_v42  ;;  %v4928_v27 = vadd.f32 %v4927_v18, %v14589_v61  ;;  %v5582_v15 = vmax.f32 %v5277_v1, 0.0  ;;  %v11436_v42 = vld [vmem:[%s18053_s3 + $0x28c] ss:$16 sps:$4 sm:$0xff]  }
 0x442   :  { %v4931_v5 = vpop.f32.mrf.mxu0  ;;  %6730 = vmatmul.mubr.bf16.vlgmr.msra.gmra.mxu0 %v13660_v29 }
 0x443   :  { %v5284_v52 = vpop.f32.mrf.mxu1  ;;  %7083 = vmatmul.mubr.bf16.vlgmr.msra.gmra.mxu1 %v15343_v16  ;;  %v5585_v9 = vmax.f32 %v5279_v54, 0.0  ;;  %v5281_v50 = vadd.f32 %v5280_v37, %v4928_v27  ;;  %v4932_v43 = vadd.f32 %v4931_v5, %v14608_v26  ;;  %6739 = vmatprep.mubr.bf16.mxu0 %v13692_v57 }
 0x444   :  { %7092 = vmatprep.mubr.bf16.mxu1 %v15366_v34  ;;  %7404 = vmatpush1.bf16.msra.mxu0 %v11413_v2  ;;  %v4933_v61 = vpop.f32.mrf.mxu0 }
 0x445   :  { %v5286_v10 = vpop.f32.mrf.mxu1  ;;  %7757 = vmatpush1.bf16.msra.mxu1 %v11416_v35  ;;  %v15485_v14 = vpack.c.bf16 %v5585_v9, %v5581_v51  ;;  %v5586_v26 = vmax.f32 %v5281_v50, 0.0  ;;  %v4934_v47 = vadd.f32 %v4933_v61, %v14611_v48  ;;  %7405 = vmatprep.subr.bf16.mxu0 %v11421_v30  ;;  %v5285_v41 = vadd.f32 %v5284_v52, %v4932_v43  ;;  %v11425_v48 = vld [vmem:[%s18053_s3 + $0xa8] ss:$16 sps:$4 sm:$0xff]   ;;  %v11439_v9 = vld [vmem:[%s18053_s3 + $0x6c] ss:$16 sps:$4 sm:$0xff]  }
 0x446   :  { %7758 = vmatprep.subr.bf16.mxu1 %v11424_v55  ;;  %v4935_v17 = vpop.f32.mrf.mxu0  ;;  %v11431_v30 = vld [vmem:[%s18053_s3 + $0x88] ss:$16 sps:$4 sm:$0xff]   ;;  %v11442_v50 = vld [vmem:[%s18053_s3 + $0x26c] ss:$16 sps:$4 sm:$0xff]  }
 0x447   :  { %18505 = vst [vmem:[#allocation155_spill] sm:$0xff] %v15485_v14  ;;  %v5288_v60 = vpop.f32.mrf.mxu1  ;;  %v4936_v25 = vadd.f32 %v4935_v17, %v14620_v31  ;;  %v15495_v45 = vpack.c.bf16 %v5586_v26, %v5582_v15  ;;  %v5287_v58 = vadd.f32 %v5286_v10, %v4934_v47  ;;  %v11433_v31 = vld [vmem:[%s18053_s3 + $0x8c] ss:$16 sps:$4 sm:$0xff]   ;;  %v5589_v2 = vmax.f32 %v5285_v41, 0.0  ;;  %v11434_v55 = vld [vmem:[%s18053_s3 + $0x288] ss:$16 sps:$4 sm:$0xff]  }
 0x448   :  { %v4937_v24 = vpop.f32.mrf.mxu0  ;;  %7406 = vmatpush1.bf16.msra.mxu0 %v11419_v12  ;;  %v18508_v12 = vld [vmem:[#allocation51_spill] sm:$0xff] }
 0x449   :  { %18506 = vst [vmem:[#allocation156_spill] sm:$0xff] %v15495_v45  ;;  %v5290_v8 = vpop.f32.mrf.mxu1  ;;  %7759 = vmatpush1.bf16.msra.mxu1 %v11422_v49  ;;  %v5289_v39 = vadd.f32 %v5288_v60, %v4936_v25  ;;  %v4938_v3 = vadd.f32 %v4937_v24, %v14636_v62  ;;  %7407 = vmatprep.subr.bf16.mxu0 %v11427_v38  ;;  %v5590_v5 = vmax.f32 %v5287_v58, 0.0  ;;  %v11440_v38 = vld [vmem:[%s18053_s3 + $0x268] ss:$16 sps:$4 sm:$0xff]   ;;  %v11445_v25 = vld [vmem:[%s18053_s3 + $0x4c] ss:$16 sps:$4 sm:$0xff]  }
 0x44a   :  { %7760 = vmatprep.subr.bf16.mxu1 %v11430_v53  ;;  %v4941_v18 = vpop.f32.mrf.mxu0  ;;  %6740 = vmatmul.mubr.bf16.gmra.mxu0 %v13679_v20  ;;  %v18510_v60 = vld [vmem:[#allocation52_spill] sm:$0xff] }
 0x44b   :  { %v5294_v37 = vpop.f32.mrf.mxu1  ;;  %7093 = vmatmul.mubr.bf16.gmra.mxu1 %v15362_v13  ;;  %v5593_v35 = vmax.f32 %v5289_v39, 0.0  ;;  %v5291_v1 = vadd.f32 %v5290_v8, %v4938_v3  ;;  %v4942_v62 = vadd.f32 %v4941_v18, %v14649_v63  ;;  %6749 = vmatprep.mubr.bf16.mxu0 %v13711_v44  ;;  %v11448_v24 = vld [vmem:[%s18053_s3 + $0x24c] ss:$16 sps:$4 sm:$0xff]   ;;  %v18513_v18 = vld [vmem:[#allocation91_spill] sm:$0xff] }
 0x44c   :  { %7102 = vmatprep.mubr.bf16.mxu1 %v15385_v19  ;;  %v4943_v54 = vpop.f32.mrf.mxu0  ;;  %7408 = vmatpush1.bf16.msra.mxu0 %v11425_v48 }
 0x44d   :  { %v5296_v27 = vpop.f32.mrf.mxu1  ;;  %7761 = vmatpush1.bf16.msra.mxu1 %v11428_v4  ;;  %v15521_v52 = vpack.c.bf16 %v5593_v35, %v5589_v2  ;;  %v5594_v63 = vmax.f32 %v5291_v1, 0.0  ;;  %v4944_v51 = vadd.f32 %v4943_v54, %v14658_v22  ;;  %7409 = vmatprep.subr.bf16.mxu0 %v11433_v31  ;;  %v5295_v10 = vadd.f32 %v5294_v37, %v4942_v62  ;;  %v11437_v22 = vld [vmem:[%s18053_s3 + $0x68] ss:$16 sps:$4 sm:$0xff]   ;;  %v18511_v4 = vld [vmem:[#allocation89_spill] sm:$0xff] }
 0x44e   :  { %7762 = vmatprep.subr.bf16.mxu1 %v11436_v42  ;;  %v4945_v43 = vpop.f32.mrf.mxu0  ;;  %v18512_v31 = vld [vmem:[#allocation53_spill] sm:$0xff]  ;;  %v11443_v35 = vld [vmem:[%s18053_s3 + $0x48] ss:$16 sps:$4 sm:$0xff]  }
 0x44f   :  { %18507 = vst [vmem:[#allocation157_spill] sm:$0xff] %v15521_v52  ;;  %v5298_v61 = vpop.f32.mrf.mxu1  ;;  %v4946_v49 = vadd.f32 %v4945_v43, %v18508_v12  ;;  %v15531_v15 = vpack.c.bf16 %v5594_v63, %v5590_v5  ;;  %v5297_v53 = vadd.f32 %v5296_v27, %v4944_v51  ;;  %v5597_v58 = vmax.f32 %v5295_v10, 0.0  ;;  %v11446_v1 = vld [vmem:[%s18053_s3 + $0x248] ss:$16 sps:$4 sm:$0xff]   ;;  %v11451_v5 = vld [vmem:[%s18053_s3 + $0x2c] ss:$16 sps:$4 sm:$0xff]  }
 0x450   :  { %v4947_v26 = vpop.f32.mrf.mxu0  ;;  %7410 = vmatpush1.bf16.msra.mxu0 %v11431_v30  ;;  %v18515_v30 = vld [vmem:[#allocation54_spill] sm:$0xff]  ;;  %v18516_v43 = vld [vmem:[#allocation55_spill] sm:$0xff] }
 0x451   :  { %18509 = vst [vmem:[#allocation51_spill] sm:$0xff] %v15531_v15  ;;  %v5300_v47 = vpop.f32.mrf.mxu1  ;;  %7763 = vmatpush1.bf16.msra.mxu1 %v11434_v55  ;;  %v5299_v17 = vadd.f32 %v5298_v61, %v4946_v49  ;;  %v4948_v41 = vadd.f32 %v4947_v26, %v18510_v60  ;;  %7411 = vmatprep.subr.bf16.mxu0 %v11439_v9  ;;  %v5598_v62 = vmax.f32 %v5297_v53, 0.0  ;;  %v11454_v63 = vld [vmem:[%s18053_s3 + $0x22c] ss:$16 sps:$4 sm:$0xff]   ;;  %v11449_v26 = vld [vmem:[%s18053_s3 + $0x28] ss:$16 sps:$4 sm:$0xff]  }
 0x452   :  { %7764 = vmatprep.subr.bf16.mxu1 %v11442_v50  ;;  %v4951_v8 = vpop.f32.mrf.mxu0  ;;  %6750 = vmatmul.mubr.bf16.gmra.mxu0 %v18511_v4  ;;  %v18518_v53 = vld [vmem:[#allocation56_spill] sm:$0xff] }
 0x453   :  { %v5304_v48 = vpop.f32.mrf.mxu1  ;;  %7103 = vmatmul.mubr.bf16.gmra.mxu1 %v15381_v28  ;;  %v5601_v39 = vmax.f32 %v5299_v17, 0.0  ;;  %v5301_v3 = vadd.f32 %v5300_v47, %v4948_v41  ;;  %v4952_v42 = vadd.f32 %v4951_v8, %v18512_v31  ;;  %6759 = vmatprep.mubr.bf16.mxu0 %v18513_v18  ;;  %v11452_v47 = vld [vmem:[%s18053_s3 + $0x228] ss:$16 sps:$4 sm:$0xff]   ;;  %v11457_v60 = vld [vmem:[%s18053_s3 + $0xc] ss:$16 sps:$4 sm:$0xff]  }
 0x454   :  { %7112 = vmatprep.mubr.bf16.mxu1 %v15404_v40  ;;  %v4953_v37 = vpop.f32.mrf.mxu0  ;;  %7412 = vmatpush1.bf16.msra.mxu0 %v11437_v22  ;;  %v11460_v41 = vld [vmem:[%s18053_s3 + $0x20c] ss:$16 sps:$4 sm:$0xff]  }
 0x455   :  { %v5306_v2 = vpop.f32.mrf.mxu1  ;;  %7765 = vmatpush1.bf16.msra.mxu1 %v11440_v38  ;;  %v15557_v54 = vpack.c.bf16 %v5601_v39, %v5597_v58  ;;  %v5602_v27 = vmax.f32 %v5301_v3, 0.0  ;;  %v4954_v55 = vadd.f32 %v4953_v37, %v18515_v30  ;;  %7413 = vmatprep.subr.bf16.mxu0 %v11445_v25  ;;  %v5305_v50 = vadd.f32 %v5304_v48, %v4952_v42  ;;  %v18519_v8 = vld [vmem:[#allocation90_spill] sm:$0xff]  ;;  %v18520_v3 = vld [vmem:[#allocation57_spill] sm:$0xff] }
 0x456   :  { %7766 = vmatprep.subr.bf16.mxu1 %v11448_v24  ;;  %v4955_v51 = vpop.f32.mrf.mxu0  ;;  %v18521_v42 = vld [vmem:[#allocation93_spill] sm:$0xff] }
 0x457   :  { %18514 = vst [vmem:[#allocation52_spill] sm:$0xff] %v15557_v54  ;;  %v5308_v9 = vpop.f32.mrf.mxu1  ;;  %v4956_v61 = vadd.f32 %v4955_v51, %v18516_v43  ;;  %v15567_v10 = vpack.c.bf16 %v5602_v27, %v5598_v62  ;;  %v5307_v22 = vadd.f32 %v5306_v2, %v4954_v55  ;;  %v5605_v48 = vmax.f32 %v5305_v50, 0.0  ;;  %v18523_v55 = vld [vmem:[#allocation58_spill] sm:$0xff] }
 0x458   :  { %v4957_v12 = vpop.f32.mrf.mxu0  ;;  %7414 = vmatpush1.bf16.msra.mxu0 %v11443_v35  ;;  %v11455_v35 = vld [vmem:[%s18053_s3 + $0x8] ss:$16 sps:$4 sm:$0xff]   ;;  %v11466_v51 = vld [vmem:[%s18053_s3 + $0x3ec] ss:$16 sps:$4 sm:$0xff]  }
 0x459   :  { %18517 = vst [vmem:[#allocation89_spill] sm:$0xff] %v15567_v10  ;;  %v5310_v49 = vpop.f32.mrf.mxu1  ;;  %7767 = vmatpush1.bf16.msra.mxu1 %v11446_v1  ;;  %v5309_v38 = vadd.f32 %v5308_v9, %v4956_v61  ;;  %v4958_v17 = vadd.f32 %v4957_v12, %v18518_v53  ;;  %7415 = vmatprep.subr.bf16.mxu0 %v11451_v5  ;;  %v11458_v1 = vld [vmem:[%s18053_s3 + $0x208] ss:$16 sps:$4 sm:$0xff]   ;;  %v5606_v62 = vmax.f32 %v5307_v22, 0.0  ;;  %v18524_v61 = vld [vmem:[#allocation59_spill] sm:$0xff] }
 0x45a   :  { %7768 = vmatprep.subr.bf16.mxu1 %v11454_v63  ;;  %v4961_v25 = vpop.f32.mrf.mxu0  ;;  %6760 = vmatmul.mubr.bf16.gmra.mxu0 %v18519_v8  ;;  %v11463_v63 = vld [vmem:[%s18053_s3 + $0x1ec] ss:$16 sps:$4 sm:$0xff]   ;;  %v11461_v22 = vld [vmem:[%s18053_s3 + $0x1e8] ss:$16 sps:$4 sm:$0xff]  }
 0x45b   :  { %v5314_v24 = vpop.f32.mrf.mxu1  ;;  %7113 = vmatmul.mubr.bf16.gmra.mxu1 %v15400_v23  ;;  %v5609_v58 = vmax.f32 %v5309_v38, 0.0  ;;  %v5311_v39 = vadd.f32 %v5310_v49, %v4958_v17  ;;  %v4962_v31 = vadd.f32 %v4961_v25, %v18520_v3  ;;  %6769 = vmatprep.mubr.bf16.mxu0 %v18521_v42  ;;  %v11464_v38 = vld [vmem:[%s18053_s3 + $0x3e8] ss:$16 sps:$4 sm:$0xff]   ;;  %v11469_v25 = vld [vmem:[%s18053_s3 + $0x1cc] ss:$16 sps:$4 sm:$0xff]  }
 0x45c   :  { %7122 = vmatprep.mubr.bf16.mxu1 %v15423_v33  ;;  %v4963_v37 = vpop.f32.mrf.mxu0  ;;  %7416 = vmatpush1.bf16.msra.mxu0 %v11449_v26 }
 0x45d   :  { %v5316_v2 = vpop.f32.mrf.mxu1  ;;  %7769 = vmatpush1.bf16.msra.mxu1 %v11452_v47  ;;  %v15593_v27 = vpack.c.bf16 %v5609_v58, %v5605_v48  ;;  %v5610_v30 = vmax.f32 %v5311_v39, 0.0  ;;  %v4964_v5 = vadd.f32 %v4963_v37, %v18523_v55  ;;  %7417 = vmatprep.subr.bf16.mxu0 %v11457_v60  ;;  %v5315_v43 = vadd.f32 %v5314_v24, %v4962_v31  ;;  %v18526_v60 = vld [vmem:[#allocation60_spill] sm:$0xff] }
 0x45e   :  { %7770 = vmatprep.subr.bf16.mxu1 %v11460_v41  ;;  %v4965_v9 = vpop.f32.mrf.mxu0  ;;  %v11472_v24 = vld [vmem:[%s18053_s3 + $0x3cc] ss:$16 sps:$4 sm:$0xff]   ;;  %v11467_v55 = vld [vmem:[%s18053_s3 + $0x1c8] ss:$16 sps:$4 sm:$0xff]  }
 0x45f   :  { %18522 = vst [vmem:[#allocation53_spill] sm:$0xff] %v15593_v27  ;;  %v5318_v50 = vpop.f32.mrf.mxu1  ;;  %v4966_v12 = vadd.f32 %v4965_v9, %v18524_v61  ;;  %v15603_v49 = vpack.c.bf16 %v5610_v30, %v5606_v62  ;;  %v5317_v53 = vadd.f32 %v5316_v2, %v4964_v5  ;;  %v18527_v39 = vld [vmem:[#allocation92_spill] sm:$0xff]  ;;  %v5613_v3 = vmax.f32 %v5315_v43, 0.0  ;;  %v18528_v2 = vld [vmem:[#allocation61_spill] sm:$0xff] }
 0x460   :  { %v4967_v26 = vpop.f32.mrf.mxu0  ;;  %7418 = vmatpush1.bf16.msra.mxu0 %v11455_v35  ;;  %v11470_v5 = vld [vmem:[%s18053_s3 + $0x3c8] ss:$16 sps:$4 sm:$0xff]  }
 0x461   :  { %18525 = vst [vmem:[#allocation91_spill] sm:$0xff] %v15603_v49  ;;  %v5320_v47 = vpop.f32.mrf.mxu1  ;;  %7771 = vmatpush1.bf16.msra.mxu1 %v11458_v1  ;;  %v5319_v17 = vadd.f32 %v5318_v50, %v4966_v12  ;;  %v4968_v41 = vadd.f32 %v4967_v26, %v18526_v60  ;;  %7419 = vmatprep.subr.bf16.mxu0 %v11463_v63  ;;  %v18529_v1 = vld [vmem:[#allocation95_spill] sm:$0xff]  ;;  %v5614_v63 = vmax.f32 %v5317_v53, 0.0  ;;  %v18531_v50 = vld [vmem:[#allocation62_spill] sm:$0xff] }
 0x462   :  { %7772 = vmatprep.subr.bf16.mxu1 %v11466_v51  ;;  %v4971_v48 = vpop.f32.mrf.mxu0  ;;  %6770 = vmatmul.mubr.bf16.gmra.mxu0 %v18527_v39 }
 0x463   :  { %v5324_v58 = vpop.f32.mrf.mxu1  ;;  %7123 = vmatmul.mubr.bf16.gmra.mxu1 %v15419_v46  ;;  %v5617_v31 = vmax.f32 %v5319_v17, 0.0  ;;  %v5321_v37 = vadd.f32 %v5320_v47, %v4968_v41  ;;  %v4972_v35 = vadd.f32 %v4971_v48, %v18528_v2  ;;  %6779 = vmatprep.mubr.bf16.mxu0 %v18529_v1  ;;  %v18532_v47 = vld [vmem:[#allocation63_spill] sm:$0xff]  ;;  %v11475_v17 = vld [vmem:[%s18053_s3 + $0x1ac] ss:$16 sps:$4 sm:$0xff]   ;;  %v11473_v41 = vld [vmem:[%s18053_s3 + $0x1a8] ss:$16 sps:$4 sm:$0xff]  }
 0x464   :  { %7132 = vmatprep.mubr.bf16.mxu1 %v15442_v6  ;;  %v4973_v62 = vpop.f32.mrf.mxu0  ;;  %7420 = vmatpush2.bf16.msra.mxu0 %v11461_v22  ;;  %v18534_v48 = vld [vmem:[#allocation64_spill] sm:$0xff] }
 0x465   :  { %v5326_v30 = vpop.f32.mrf.mxu1  ;;  %7773 = vmatpush2.bf16.msra.mxu1 %v11464_v38  ;;  %v15629_v51 = vpack.c.bf16 %v5617_v31, %v5613_v3  ;;  %v5618_v9 = vmax.f32 %v5321_v37, 0.0  ;;  %v4974_v43 = vadd.f32 %v4973_v62, %v18531_v50  ;;  %7421 = vmatprep.subr.bf16.mxu0 %v11469_v25  ;;  %v5325_v26 = vadd.f32 %v5324_v58, %v4972_v35  ;;  %v11476_v3 = vld [vmem:[%s18053_s3 + $0x3a8] ss:$16 sps:$4 sm:$0xff]   ;;  %v11478_v31 = vld [vmem:[%s18053_s3 + $0x3ac] ss:$16 sps:$4 sm:$0xff]  }
 0x466   :  { %7774 = vmatprep.subr.bf16.mxu1 %v11472_v24  ;;  %v4975_v61 = vpop.f32.mrf.mxu0  ;;  %v18535_v35 = vld [vmem:[#allocation94_spill] sm:$0xff] }
 0x467   :  { %18530 = vst [vmem:[#allocation54_spill] sm:$0xff] %v15629_v51  ;;  %v5328_v12 = vpop.f32.mrf.mxu1  ;;  %v4976_v22 = vadd.f32 %v4975_v61, %v18532_v47  ;;  %v15633_v38 = vpack.c.bf16 %v5618_v9, %v5614_v63  ;;  %v5327_v25 = vadd.f32 %v5326_v30, %v4974_v43  ;;  %v5621_v62 = vmax.f32 %v5325_v26, 0.0  ;;  %v18537_v9 = vld [vmem:[#allocation97_spill] sm:$0xff] }
 0x468   :  { %v4977_v60 = vpop.f32.mrf.mxu0  ;;  %7422 = vmatpush2.bf16.msra.mxu0 %v11467_v55 }
 0x469   :  { %18533 = vst [vmem:[#allocation55_spill] sm:$0xff] %v15633_v38  ;;  %v5330_v53 = vpop.f32.mrf.mxu1  ;;  %7775 = vmatpush2.bf16.msra.mxu1 %v11470_v5  ;;  %v5329_v24 = vadd.f32 %v5328_v12, %v4976_v22  ;;  %v4978_v58 = vadd.f32 %v4977_v60, %v18534_v48  ;;  %7423 = vmatprep.subr.bf16.mxu0 %v11475_v17  ;;  %v18536_v5 = vld [vmem:[#allocation65_spill] sm:$0xff]  ;;  %v5622_v61 = vmax.f32 %v5327_v25, 0.0  ;;  %v18539_v22 = vld [vmem:[#allocation66_spill] sm:$0xff] }
 0x46a   :  { %v4981_v37 = vpop.f32.mrf.mxu0  ;;  %6780 = vmatmul.mubr.bf16.gmra.mxu0 %v18535_v35  ;;  %7776 = vmatprep.subr.bf16.mxu1 %v11478_v31 }
 0x46b   :  { %v5334_v2 = vpop.f32.mrf.mxu1  ;;  %7133 = vmatmul.mubr.bf16.gmra.mxu1 %v15438_v56  ;;  %v5625_v30 = vmax.f32 %v5329_v24, 0.0  ;;  %v5331_v55 = vadd.f32 %v5330_v53, %v4978_v58  ;;  %v4982_v63 = vadd.f32 %v4981_v37, %v18536_v5  ;;  %6789 = vmatprep.mubr.bf16.mxu0 %v18537_v9  ;;  %v18540_v24 = vld [vmem:[#allocation67_spill] sm:$0xff] }
 0x46c   :  { %7142 = vmatprep.mubr.bf16.mxu1 %v15459_v21  ;;  %v4983_v50 = vpop.f32.mrf.mxu0  ;;  %7424 = vmatpush2.bf16.msra.mxu0 %v11473_v41  ;;  %v18542_v41 = vld [vmem:[#allocation68_spill] sm:$0xff] }
 0x46d   :  { %v5336_v43 = vpop.f32.mrf.mxu1  ;;  %v15653_v12 = vpack.c.bf16 %v5625_v30, %v5621_v62  ;;  %v5626_v47 = vmax.f32 %v5331_v55, 0.0  ;;  %v4984_v17 = vadd.f32 %v4983_v50, %v18539_v22  ;;  %7777 = vmatpush2.bf16.msra.mxu1 %v11476_v3  ;;  %v5335_v53 = vadd.f32 %v5334_v2, %v4982_v63  ;;  %v18543_v30 = vld [vmem:[#allocation96_spill] sm:$0xff]  ;;  %v18544_v2 = vld [vmem:[#allocation69_spill] sm:$0xff]  ;;  %v18545_v22 = vld [vmem:[#allocation99_spill] sm:$0xff] }
 0x46e   :  { %v4985_v26 = vpop.f32.mrf.mxu0 }
 0x46f   :  { %18538 = vst [vmem:[#allocation56_spill] sm:$0xff] %v15653_v12  ;;  %v5338_v60 = vpop.f32.mrf.mxu1  ;;  %v4986_v48 = vadd.f32 %v4985_v26, %v18540_v24  ;;  %v15657_v58 = vpack.c.bf16 %v5626_v47, %v5622_v61  ;;  %v5337_v21 = vadd.f32 %v5336_v43, %v4984_v17  ;;  %v5629_v3 = vmax.f32 %v5335_v53, 0.0  ;;  %v18548_v53 = vld [vmem:[#allocation71_spill] sm:$0xff] }
 0x470   :  { %v4987_v37 = vpop.f32.mrf.mxu0 }
 0x471   :  { %18541 = vst [vmem:[#allocation90_spill] sm:$0xff] %v15657_v58  ;;  %v5340_v5 = vpop.f32.mrf.mxu1  ;;  %v5339_v9 = vadd.f32 %v5338_v60, %v4986_v48  ;;  %v4988_v31 = vadd.f32 %v4987_v37, %v18542_v41  ;;  %v5630_v47 = vmax.f32 %v5337_v21, 0.0  ;;  %v18547_v60 = vld [vmem:[#allocation70_spill] sm:$0xff] }
 0x472   :  { %v4991_v25 = vpop.f32.mrf.mxu0  ;;  %6790 = vmatmul.mubr.bf16.gmra.mxu0 %v18543_v30  ;;  %v11479_v21 = vld [vmem:[%s18053_s3 + $0x188] ss:$16 sps:$4 sm:$0xff]  }
 0x473   :  { %v5344_v62 = vpop.f32.mrf.mxu1  ;;  %7143 = vmatmul.mubr.bf16.gmra.mxu1 %v15455_v36  ;;  %v5633_v55 = vmax.f32 %v5339_v9, 0.0  ;;  %v5341_v50 = vadd.f32 %v5340_v5, %v4988_v31  ;;  %v4992_v63 = vadd.f32 %v4991_v25, %v18544_v2  ;;  %6799 = vmatprep.mubr.bf16.mxu0 %v18545_v22  ;;  %v11481_v31 = vld [vmem:[%s18053_s3 + $0x18c] ss:$16 sps:$4 sm:$0xff]  }
 0x474   :  { %7152 = vmatprep.mubr.bf16.mxu1 %v15495_v45  ;;  %v4993_v61 = vpop.f32.mrf.mxu0  ;;  %7425 = vmatprep.subr.bf16.mxu0 %v11481_v31 }
 0x475   :  { %v5346_v43 = vpop.f32.mrf.mxu1  ;;  %v15665_v17 = vpack.c.bf16 %v5633_v55, %v5629_v3  ;;  %v5634_v26 = vmax.f32 %v5341_v50, 0.0  ;;  %v4994_v24 = vadd.f32 %v4993_v61, %v18547_v60  ;;  %v5345_v41 = vadd.f32 %v5344_v62, %v4992_v63  ;;  %v18550_v50 = vld [vmem:[#allocation72_spill] sm:$0xff]  ;;  %v18551_v60 = vld [vmem:[#allocation98_spill] sm:$0xff]  ;;  %7426 = vmatpush2.bf16.msra.mxu0 %v11479_v21 }
 0x476   :  { %v4995_v48 = vpop.f32.mrf.mxu0  ;;  %v11482_v62 = vld [vmem:[%s18053_s3 + $0x388] ss:$16 sps:$4 sm:$0xff]   ;;  %v11484_v63 = vld [vmem:[%s18053_s3 + $0x38c] ss:$16 sps:$4 sm:$0xff]  }
 0x477   :  { %18546 = vst [vmem:[#allocation57_spill] sm:$0xff] %v15665_v17  ;;  %v5348_v37 = vpop.f32.mrf.mxu1  ;;  %v4996_v9 = vadd.f32 %v4995_v48, %v18548_v53  ;;  %v15669_v5 = vpack.c.bf16 %v5634_v26, %v5630_v47  ;;  %v5347_v3 = vadd.f32 %v5346_v43, %v4994_v24  ;;  %v5637_v48 = vmax.f32 %v5345_v41, 0.0  ;;  %7778 = vmatprep.subr.bf16.mxu1 %v11484_v63  ;;  %v18558_v21 = vld [vmem:[#allocation76_spill] sm:$0xff] }
 0x478   :  { %v4997_v25 = vpop.f32.mrf.mxu0  ;;  %7779 = vmatpush2.bf16.msra.mxu1 %v11482_v62 }
 0x479   :  { %18549 = vst [vmem:[#allocation93_spill] sm:$0xff] %v15669_v5  ;;  %v5350_v2 = vpop.f32.mrf.mxu1  ;;  %v5349_v55 = vadd.f32 %v5348_v37, %v4996_v9  ;;  %v4998_v61 = vadd.f32 %v4997_v25, %v18550_v50  ;;  %v18552_v37 = vld [vmem:[#allocation73_spill] sm:$0xff]  ;;  %v5638_v50 = vmax.f32 %v5347_v3, 0.0 }
 0x47a   :  { %v5001_v47 = vpop.f32.mrf.mxu0  ;;  %6800 = vmatmul.mubr.bf16.gmra.mxu0 %v18551_v60  ;;  %v18553_v9 = vld [vmem:[#allocation101_spill] sm:$0xff]  ;;  %v18555_v60 = vld [vmem:[#allocation74_spill] sm:$0xff] }
 0x47b   :  { %v5354_v26 = vpop.f32.mrf.mxu1  ;;  %7153 = vmatmul.mubr.bf16.gmra.mxu1 %v15485_v14  ;;  %v5641_v43 = vmax.f32 %v5349_v55, 0.0  ;;  %v5351_v24 = vadd.f32 %v5350_v2, %v4998_v61  ;;  %v5002_v53 = vadd.f32 %v5001_v47, %v18552_v37  ;;  %6809 = vmatprep.mubr.bf16.mxu0 %v18553_v9  ;;  %v18556_v61 = vld [vmem:[#allocation75_spill] sm:$0xff] }
 0x47c   :  { %7162 = vmatprep.mubr.bf16.mxu1 %v15531_v15  ;;  %v5003_v31 = vpop.f32.mrf.mxu0 }
 0x47d   :  { %v5356_v25 = vpop.f32.mrf.mxu1  ;;  %v15689_v45 = vpack.c.bf16 %v5641_v43, %v5637_v48  ;;  %v5642_v22 = vmax.f32 %v5351_v24, 0.0  ;;  %v5004_v36 = vadd.f32 %v5003_v31, %v18555_v60  ;;  %v5355_v2 = vadd.f32 %v5354_v26, %v5002_v53  ;;  %v18559_v43 = vld [vmem:[#allocation100_spill] sm:$0xff]  ;;  %v18560_v26 = vld [vmem:[#allocation77_spill] sm:$0xff]  ;;  %v18561_v31 = vld [vmem:[#allocation6_spill] sm:$0xff] }
 0x47e   :  { %v5005_v41 = vpop.f32.mrf.mxu0 }
 0x47f   :  { %18554 = vst [vmem:[#allocation58_spill] sm:$0xff] %v15689_v45  ;;  %v5358_v55 = vpop.f32.mrf.mxu1  ;;  %v5006_v47 = vadd.f32 %v5005_v41, %v18556_v61  ;;  %v15693_v37 = vpack.c.bf16 %v5642_v22, %v5638_v50  ;;  %v5357_v14 = vadd.f32 %v5356_v25, %v5004_v36  ;;  %v5645_v62 = vmax.f32 %v5355_v2, 0.0  ;;  %v18563_v41 = vld [vmem:[#allocation78_spill] sm:$0xff]  ;;  %v18564_v2 = vld [vmem:[#allocation79_spill] sm:$0xff] }
 0x480   :  { %v5007_v9 = vpop.f32.mrf.mxu0 }
 0x481   :  { %18557 = vst [vmem:[#allocation59_spill] sm:$0xff] %v15693_v37  ;;  %v5360_v15 = vpop.f32.mrf.mxu1  ;;  %v5359_v30 = vadd.f32 %v5358_v55, %v5006_v47  ;;  %v5008_v63 = vadd.f32 %v5007_v9, %v18558_v21  ;;  %v5646_v25 = vmax.f32 %v5357_v14, 0.0  ;;  %v11485_v14 = vld [vmem:[%s18053_s3 + $0x168] ss:$16 sps:$4 sm:$0xff]  }
 0x482   :  { %v5011_v3 = vpop.f32.mrf.mxu0  ;;  %6810 = vmatmul.mubr.bf16.gmra.mxu0 %v18559_v43 }
 0x483   :  { %v5364_v48 = vpop.f32.mrf.mxu1  ;;  %7163 = vmatmul.mubr.bf16.gmra.mxu1 %v15521_v52  ;;  %v5649_v60 = vmax.f32 %v5359_v30, 0.0  ;;  %v5361_v24 = vadd.f32 %v5360_v15, %v5008_v63  ;;  %v5012_v53 = vadd.f32 %v5011_v3, %v18560_v26  ;;  %6819 = vmatprep.mubr.bf16.mxu0 %v18561_v31  ;;  %v11487_v63 = vld [vmem:[%s18053_s3 + $0x16c] ss:$16 sps:$4 sm:$0xff]  }
 0x484   :  { %7172 = vmatprep.mubr.bf16.mxu1 %v15567_v10  ;;  %v5013_v22 = vpop.f32.mrf.mxu0  ;;  %7427 = vmatprep.subr.bf16.mxu0 %v11487_v63 }
 0x485   :  { %v5366_v36 = vpop.f32.mrf.mxu1  ;;  %v15701_v50 = vpack.c.bf16 %v5649_v60, %v5645_v62  ;;  %v5650_v9 = vmax.f32 %v5361_v24, 0.0  ;;  %v5014_v55 = vadd.f32 %v5013_v22, %v18563_v41  ;;  %v5365_v21 = vadd.f32 %v5364_v48, %v5012_v53  ;;  %v18566_v24 = vld [vmem:[#allocation80_spill] sm:$0xff]  ;;  %v18567_v41 = vld [vmem:[#allocation102_spill] sm:$0xff]  ;;  %7428 = vmatpush2.bf16.msra.mxu0 %v11485_v14 }
 0x486   :  { %v5015_v61 = vpop.f32.mrf.mxu0  ;;  %v11488_v48 = vld [vmem:[%s18053_s3 + $0x368] ss:$16 sps:$4 sm:$0xff]   ;;  %v11490_v53 = vld [vmem:[%s18053_s3 + $0x36c] ss:$16 sps:$4 sm:$0xff]  }
 0x487   :  { %18562 = vst [vmem:[#allocation60_spill] sm:$0xff] %v15701_v50  ;;  %v5368_v47 = vpop.f32.mrf.mxu1  ;;  %v5016_v30 = vadd.f32 %v5015_v61, %v18564_v2  ;;  %v15705_v15 = vpack.c.bf16 %v5650_v9, %v5646_v25  ;;  %v5367_v62 = vadd.f32 %v5366_v36, %v5014_v55  ;;  %v5653_v61 = vmax.f32 %v5365_v21, 0.0  ;;  %7780 = vmatprep.subr.bf16.mxu1 %v11490_v53  ;;  %v18574_v14 = vld [vmem:[#allocation84_spill] sm:$0xff] }
 0x488   :  { %v5017_v3 = vpop.f32.mrf.mxu0  ;;  %7781 = vmatpush2.bf16.msra.mxu1 %v11488_v48 }
 0x489   :  { %18565 = vst [vmem:[#allocation92_spill] sm:$0xff] %v15705_v15  ;;  %v5370_v26 = vpop.f32.mrf.mxu1  ;;  %v5369_v60 = vadd.f32 %v5368_v47, %v5016_v30  ;;  %v5018_v22 = vadd.f32 %v5017_v3, %v18566_v24  ;;  %v18568_v47 = vld [vmem:[#allocation81_spill] sm:$0xff]  ;;  %v18569_v30 = vld [vmem:[#allocation8_spill] sm:$0xff]  ;;  %v5654_v24 = vmax.f32 %v5367_v62, 0.0 }
 0x48a   :  { %v5021_v25 = vpop.f32.mrf.mxu0  ;;  %6820 = vmatmul.mubr.bf16.gmra.mxu0 %v18567_v41  ;;  %v18571_v41 = vld [vmem:[#allocation82_spill] sm:$0xff] }
 0x48b   :  { %v5374_v9 = vpop.f32.mrf.mxu1  ;;  %7173 = vmatmul.mubr.bf16.gmra.mxu1 %v15557_v54  ;;  %v5657_v36 = vmax.f32 %v5369_v60, 0.0  ;;  %v5371_v55 = vadd.f32 %v5370_v26, %v5018_v22  ;;  %v5022_v2 = vadd.f32 %v5021_v25, %v18568_v47  ;;  %6829 = vmatprep.mubr.bf16.mxu0 %v18569_v30  ;;  %v18572_v22 = vld [vmem:[#allocation83_spill] sm:$0xff] }
 0x48c   :  { %7182 = vmatprep.mubr.bf16.mxu1 %v15603_v49  ;;  %v5023_v63 = vpop.f32.mrf.mxu0 }
 0x48d   :  { %v5376_v3 = vpop.f32.mrf.mxu1  ;;  %v15725_v10 = vpack.c.bf16 %v5657_v36, %v5653_v61  ;;  %v5658_v31 = vmax.f32 %v5371_v55, 0.0  ;;  %v5024_v52 = vadd.f32 %v5023_v63, %v18571_v41  ;;  %v5375_v26 = vadd.f32 %v5374_v9, %v5022_v2  ;;  %v18575_v36 = vld [vmem:[#allocation7_spill] sm:$0xff]  ;;  %v18576_v9 = vld [vmem:[#allocation85_spill] sm:$0xff]  ;;  %v18577_v63 = vld [vmem:[#allocation10_spill] sm:$0xff] }
 0x48e   :  { %v5025_v21 = vpop.f32.mrf.mxu0 }
 0x48f   :  { %18570 = vst [vmem:[#allocation61_spill] sm:$0xff] %v15725_v10  ;;  %v5378_v60 = vpop.f32.mrf.mxu1  ;;  %v5026_v25 = vadd.f32 %v5025_v21, %v18572_v22  ;;  %v15729_v47 = vpack.c.bf16 %v5658_v31, %v5654_v24  ;;  %v5377_v54 = vadd.f32 %v5376_v3, %v5024_v52  ;;  %v5661_v48 = vmax.f32 %v5375_v26, 0.0  ;;  %v18579_v21 = vld [vmem:[#allocation86_spill] sm:$0xff]  ;;  %v18580_v26 = vld [vmem:[#allocation87_spill] sm:$0xff] }
 0x490   :  { %v5027_v30 = vpop.f32.mrf.mxu0 }
 0x491   :  { %18573 = vst [vmem:[#allocation95_spill] sm:$0xff] %v15729_v47  ;;  %v5380_v49 = vpop.f32.mrf.mxu1  ;;  %v5379_v43 = vadd.f32 %v5378_v60, %v5026_v25  ;;  %v5028_v53 = vadd.f32 %v5027_v30, %v18574_v14  ;;  %v5662_v3 = vmax.f32 %v5377_v54, 0.0  ;;  %v11491_v54 = vld [vmem:[%s18053_s3 + $0x148] ss:$16 sps:$4 sm:$0xff]  }
 0x492   :  { %v5031_v62 = vpop.f32.mrf.mxu0  ;;  %6830 = vmatmul.mubr.bf16.gmra.mxu0 %v18575_v36 }
 0x493   :  { %v5384_v61 = vpop.f32.mrf.mxu1  ;;  %7183 = vmatmul.mubr.bf16.gmra.mxu1 %v15593_v27  ;;  %v5665_v41 = vmax.f32 %v5379_v43, 0.0  ;;  %v5381_v55 = vadd.f32 %v5380_v49, %v5028_v53  ;;  %v5032_v2 = vadd.f32 %v5031_v62, %v18576_v9  ;;  %6839 = vmatprep.mubr.bf16.mxu0 %v18577_v63  ;;  %v11493_v53 = vld [vmem:[%s18053_s3 + $0x14c] ss:$16 sps:$4 sm:$0xff]  }
 0x494   :  { %7192 = vmatprep.mubr.bf16.mxu1 %v15633_v38  ;;  %v5033_v31 = vpop.f32.mrf.mxu0  ;;  %7429 = vmatprep.subr.bf16.mxu0 %v11493_v53 }
 0x495   :  { %v5386_v52 = vpop.f32.mrf.mxu1  ;;  %v15737_v24 = vpack.c.bf16 %v5665_v41, %v5661_v48  ;;  %v5666_v30 = vmax.f32 %v5381_v55, 0.0  ;;  %v5034_v60 = vadd.f32 %v5033_v31, %v18579_v21  ;;  %v5385_v14 = vadd.f32 %v5384_v61, %v5032_v2  ;;  %v18582_v55 = vld [vmem:[#allocation88_spill] sm:$0xff]  ;;  %v18583_v21 = vld [vmem:[#allocation9_spill] sm:$0xff]  ;;  %7430 = vmatpush2.bf16.msra.mxu0 %v11491_v54  ;;  %v18590_v54 = vld [vmem:[#allocation106_spill] sm:$0xff] }
 0x496   :  { %v5035_v22 = vpop.f32.mrf.mxu0  ;;  %v11494_v61 = vld [vmem:[%s18053_s3 + $0x348] ss:$16 sps:$4 sm:$0xff]   ;;  %v11496_v2 = vld [vmem:[%s18053_s3 + $0x34c] ss:$16 sps:$4 sm:$0xff]  }
 0x497   :  { %18578 = vst [vmem:[#allocation62_spill] sm:$0xff] %v15737_v24  ;;  %v5388_v25 = vpop.f32.mrf.mxu1  ;;  %v5036_v43 = vadd.f32 %v5035_v22, %v18580_v26  ;;  %v15741_v49 = vpack.c.bf16 %v5666_v30, %v5662_v3  ;;  %v5387_v48 = vadd.f32 %v5386_v52, %v5034_v60  ;;  %v5669_v22 = vmax.f32 %v5385_v14, 0.0  ;;  %7782 = vmatprep.subr.bf16.mxu1 %v11496_v2 }
 0x498   :  { %v5037_v62 = vpop.f32.mrf.mxu0  ;;  %7783 = vmatpush2.bf16.msra.mxu1 %v11494_v61 }
 0x499   :  { %18581 = vst [vmem:[#allocation63_spill] sm:$0xff] %v15741_v49  ;;  %v5390_v9 = vpop.f32.mrf.mxu1  ;;  %v5389_v41 = vadd.f32 %v5388_v25, %v5036_v43  ;;  %v5038_v31 = vadd.f32 %v5037_v62, %v18582_v55  ;;  %v18584_v25 = vld [vmem:[#allocation103_spill] sm:$0xff]  ;;  %v18585_v43 = vld [vmem:[#allocation12_spill] sm:$0xff]  ;;  %v5670_v55 = vmax.f32 %v5387_v48, 0.0 }
 0x49a   :  { %v5041_v3 = vpop.f32.mrf.mxu0  ;;  %6840 = vmatmul.mubr.bf16.gmra.mxu0 %v18583_v21  ;;  %v18587_v21 = vld [vmem:[#allocation104_spill] sm:$0xff] }
 0x49b   :  { %v5394_v30 = vpop.f32.mrf.mxu1  ;;  %7193 = vmatmul.mubr.bf16.gmra.mxu1 %v15629_v51  ;;  %v5673_v52 = vmax.f32 %v5389_v41, 0.0  ;;  %v5391_v60 = vadd.f32 %v5390_v9, %v5038_v31  ;;  %v5042_v26 = vadd.f32 %v5041_v3, %v18584_v25  ;;  %6849 = vmatprep.mubr.bf16.mxu0 %v18585_v43  ;;  %v18588_v31 = vld [vmem:[#allocation105_spill] sm:$0xff] }
 0x49c   :  { %7202 = vmatprep.mubr.bf16.mxu1 %v15657_v58  ;;  %v5043_v53 = vpop.f32.mrf.mxu0 }
 0x49d   :  { %v5396_v62 = vpop.f32.mrf.mxu1  ;;  %v15761_v38 = vpack.c.bf16 %v5673_v52, %v5669_v22  ;;  %v5674_v63 = vmax.f32 %v5391_v60, 0.0  ;;  %v5044_v27 = vadd.f32 %v5043_v53, %v18587_v21  ;;  %v5395_v9 = vadd.f32 %v5394_v30, %v5042_v26  ;;  %v18591_v52 = vld [vmem:[#allocation11_spill] sm:$0xff]  ;;  %v18593_v53 = vld [vmem:[#allocation14_spill] sm:$0xff] }
 0x49e   :  { %v5045_v14 = vpop.f32.mrf.mxu0  ;;  %v18592_v30 = vld [vmem:[#allocation107_spill] sm:$0xff] }
 0x49f   :  { %18586 = vst [vmem:[#allocation64_spill] sm:$0xff] %v15761_v38  ;;  %v5398_v41 = vpop.f32.mrf.mxu1  ;;  %v5046_v3 = vadd.f32 %v5045_v14, %v18588_v31  ;;  %v15765_v25 = vpack.c.bf16 %v5674_v63, %v5670_v55  ;;  %v5397_v51 = vadd.f32 %v5396_v62, %v5044_v27  ;;  %v5677_v61 = vmax.f32 %v5395_v9, 0.0  ;;  %v18595_v14 = vld [vmem:[#allocation108_spill] sm:$0xff]  ;;  %v18596_v9 = vld [vmem:[#allocation109_spill] sm:$0xff] }
 0x4a0   :  { %v5047_v43 = vpop.f32.mrf.mxu0 }
 0x4a1   :  { %18589 = vst [vmem:[#allocation94_spill] sm:$0xff] %v15765_v25  ;;  %v5400_v58 = vpop.f32.mrf.mxu1  ;;  %v5399_v36 = vadd.f32 %v5398_v41, %v5046_v3  ;;  %v5048_v2 = vadd.f32 %v5047_v43, %v18590_v54  ;;  %v5678_v62 = vmax.f32 %v5397_v51, 0.0  ;;  %v11497_v51 = vld [vmem:[%s18053_s3 + $0x128] ss:$16 sps:$4 sm:$0xff]  }
 0x4a2   :  { %v5051_v48 = vpop.f32.mrf.mxu0  ;;  %6850 = vmatmul.mubr.bf16.gmra.mxu0 %v18591_v52 }
 0x4a3   :  { %v5404_v22 = vpop.f32.mrf.mxu1  ;;  %7203 = vmatmul.mubr.bf16.gmra.mxu1 %v15653_v12  ;;  %v5681_v21 = vmax.f32 %v5399_v36, 0.0  ;;  %v5401_v60 = vadd.f32 %v5400_v58, %v5048_v2  ;;  %v5052_v26 = vadd.f32 %v5051_v48, %v18592_v30  ;;  %6859 = vmatprep.mubr.bf16.mxu0 %v18593_v53  ;;  %v11499_v2 = vld [vmem:[%s18053_s3 + $0x12c] ss:$16 sps:$4 sm:$0xff]  }
 0x4a4   :  { %7212 = vmatprep.mubr.bf16.mxu1 %v15669_v5  ;;  %v5053_v63 = vpop.f32.mrf.mxu0  ;;  %7431 = vmatprep.subr.bf16.mxu0 %v11499_v2 }
 0x4a5   :  { %v5406_v27 = vpop.f32.mrf.mxu1  ;;  %v15773_v55 = vpack.c.bf16 %v5681_v21, %v5677_v61  ;;  %v5682_v43 = vmax.f32 %v5401_v60, 0.0  ;;  %v5054_v41 = vadd.f32 %v5053_v63, %v18595_v14  ;;  %v5405_v54 = vadd.f32 %v5404_v22, %v5052_v26  ;;  %v18598_v60 = vld [vmem:[#allocation110_spill] sm:$0xff]  ;;  %v18599_v14 = vld [vmem:[#allocation13_spill] sm:$0xff]  ;;  %7432 = vmatpush2.bf16.msra.mxu0 %v11497_v51 }
 0x4a6   :  { %v5055_v31 = vpop.f32.mrf.mxu0  ;;  %v11500_v22 = vld [vmem:[%s18053_s3 + $0x328] ss:$16 sps:$4 sm:$0xff]   ;;  %v11502_v26 = vld [vmem:[%s18053_s3 + $0x32c] ss:$16 sps:$4 sm:$0xff]  }
 0x4a7   :  { %18594 = vst [vmem:[#allocation65_spill] sm:$0xff] %v15773_v55  ;;  %v5408_v3 = vpop.f32.mrf.mxu1  ;;  %v5056_v36 = vadd.f32 %v5055_v31, %v18596_v9  ;;  %v15777_v58 = vpack.c.bf16 %v5682_v43, %v5678_v62  ;;  %v5407_v61 = vadd.f32 %v5406_v27, %v5054_v41  ;;  %v5685_v31 = vmax.f32 %v5405_v54, 0.0  ;;  %7784 = vmatprep.subr.bf16.mxu1 %v11502_v26  ;;  %v18606_v51 = vld [vmem:[#allocation114_spill] sm:$0xff] }
 0x4a8   :  { %v5057_v48 = vpop.f32.mrf.mxu0  ;;  %7785 = vmatpush2.bf16.msra.mxu1 %v11500_v22 }
 0x4a9   :  { %18597 = vst [vmem:[#allocation66_spill] sm:$0xff] %v15777_v58  ;;  %v5410_v30 = vpop.f32.mrf.mxu1  ;;  %v5409_v21 = vadd.f32 %v5408_v3, %v5056_v36  ;;  %v5058_v63 = vadd.f32 %v5057_v48, %v18598_v60  ;;  %v18600_v3 = vld [vmem:[#allocation111_spill] sm:$0xff]  ;;  %v18601_v36 = vld [vmem:[#allocation16_spill] sm:$0xff]  ;;  %v5686_v60 = vmax.f32 %v5407_v61, 0.0 }
 0x4aa   :  { %v5061_v62 = vpop.f32.mrf.mxu0  ;;  %6860 = vmatmul.mubr.bf16.gmra.mxu0 %v18599_v14  ;;  %v18603_v14 = vld [vmem:[#allocation112_spill] sm:$0xff] }
 0x4ab   :  { %v5414_v43 = vpop.f32.mrf.mxu1  ;;  %7213 = vmatmul.mubr.bf16.gmra.mxu1 %v15665_v17  ;;  %v5689_v27 = vmax.f32 %v5409_v21, 0.0  ;;  %v5411_v41 = vadd.f32 %v5410_v30, %v5058_v63  ;;  %v5062_v9 = vadd.f32 %v5061_v62, %v18600_v3  ;;  %6869 = vmatprep.mubr.bf16.mxu0 %v18601_v36  ;;  %v18604_v63 = vld [vmem:[#allocation113_spill] sm:$0xff] }
 0x4ac   :  { %7222 = vmatprep.mubr.bf16.mxu1 %v15693_v37  ;;  %v5063_v2 = vpop.f32.mrf.mxu0 }
 0x4ad   :  { %v5416_v48 = vpop.f32.mrf.mxu1  ;;  %v15797_v5 = vpack.c.bf16 %v5689_v27, %v5685_v31  ;;  %v5690_v53 = vmax.f32 %v5411_v41, 0.0  ;;  %v5064_v12 = vadd.f32 %v5063_v2, %v18603_v14  ;;  %v5415_v30 = vadd.f32 %v5414_v43, %v5062_v9  ;;  %v18607_v27 = vld [vmem:[#allocation15_spill] sm:$0xff]  ;;  %v18609_v2 = vld [vmem:[#allocation18_spill] sm:$0xff] }
 0x4ae   :  { %v5065_v54 = vpop.f32.mrf.mxu0  ;;  %v18608_v43 = vld [vmem:[#allocation115_spill] sm:$0xff] }
 0x4af   :  { %18602 = vst [vmem:[#allocation67_spill] sm:$0xff] %v15797_v5  ;;  %v5418_v21 = vpop.f32.mrf.mxu1  ;;  %v5066_v62 = vadd.f32 %v5065_v54, %v18604_v63  ;;  %v15801_v3 = vpack.c.bf16 %v5690_v53, %v5686_v60  ;;  %v5417_v17 = vadd.f32 %v5416_v48, %v5064_v12  ;;  %v5693_v22 = vmax.f32 %v5415_v30, 0.0  ;;  %v18611_v54 = vld [vmem:[#allocation116_spill] sm:$0xff]  ;;  %v18612_v30 = vld [vmem:[#allocation117_spill] sm:$0xff] }
 0x4b0   :  { %v5067_v36 = vpop.f32.mrf.mxu0 }
 0x4b1   :  { %18605 = vst [vmem:[#allocation68_spill] sm:$0xff] %v15801_v3  ;;  %v5420_v37 = vpop.f32.mrf.mxu1  ;;  %v5419_v52 = vadd.f32 %v5418_v21, %v5066_v62  ;;  %v5068_v26 = vadd.f32 %v5067_v36, %v18606_v51  ;;  %v5694_v48 = vmax.f32 %v5417_v17, 0.0  ;;  %v11503_v17 = vld [vmem:[%s18053_s3 + $0x108] ss:$16 sps:$4 sm:$0xff]  }
 0x4b2   :  { %v5071_v61 = vpop.f32.mrf.mxu0  ;;  %6870 = vmatmul.mubr.bf16.gmra.mxu0 %v18607_v27 }
 0x4b3   :  { %v5424_v31 = vpop.f32.mrf.mxu1  ;;  %7223 = vmatmul.mubr.bf16.gmra.mxu1 %v15689_v45  ;;  %v5697_v14 = vmax.f32 %v5419_v52, 0.0  ;;  %v5421_v41 = vadd.f32 %v5420_v37, %v5068_v26  ;;  %v5072_v9 = vadd.f32 %v5071_v61, %v18608_v43  ;;  %6879 = vmatprep.mubr.bf16.mxu0 %v18609_v2  ;;  %v11505_v26 = vld [vmem:[%s18053_s3 + $0x10c] ss:$16 sps:$4 sm:$0xff]  }
 0x4b4   :  { %7232 = vmatprep.mubr.bf16.mxu1 %v15705_v15  ;;  %v5073_v53 = vpop.f32.mrf.mxu0  ;;  %7433 = vmatprep.subr.bf16.mxu0 %v11505_v26 }
 0x4b5   :  { %v5426_v12 = vpop.f32.mrf.mxu1  ;;  %v15809_v60 = vpack.c.bf16 %v5697_v14, %v5693_v22  ;;  %v5698_v36 = vmax.f32 %v5421_v41, 0.0  ;;  %v5074_v21 = vadd.f32 %v5073_v53, %v18611_v54  ;;  %v5425_v51 = vadd.f32 %v5424_v31, %v5072_v9  ;;  %v18614_v41 = vld [vmem:[#allocation118_spill] sm:$0xff]  ;;  %v18615_v54 = vld [vmem:[#allocation17_spill] sm:$0xff]  ;;  %7434 = vmatpush2.bf16.msra.mxu0 %v11503_v17 }
 0x4b6   :  { %v5075_v63 = vpop.f32.mrf.mxu0  ;;  %v11506_v31 = vld [vmem:[%s18053_s3 + $0x308] ss:$16 sps:$4 sm:$0xff]   ;;  %v11508_v9 = vld [vmem:[%s18053_s3 + $0x30c] ss:$16 sps:$4 sm:$0xff]   ;;  %8756 = vmatprep.subr.bf16.mxu0 %v18194_v59 }
 0x4b7   :  { %18610 = vst [vmem:[#allocation69_spill] sm:$0xff] %v15809_v60  ;;  %v5428_v62 = vpop.f32.mrf.mxu1  ;;  %v5076_v52 = vadd.f32 %v5075_v63, %v18612_v30  ;;  %v15813_v37 = vpack.c.bf16 %v5698_v36, %v5694_v48  ;;  %v5427_v22 = vadd.f32 %v5426_v12, %v5074_v21  ;;  %v5701_v63 = vmax.f32 %v5425_v51, 0.0  ;;  %v18616_v30 = vld [vmem:[#allocation20_spill] sm:$0xff]  ;;  %7786 = vmatprep.subr.bf16.mxu1 %v11508_v9 }
 0x4b8   :  { %v5077_v61 = vpop.f32.mrf.mxu0  ;;  %7787 = vmatpush2.bf16.msra.mxu1 %v11506_v31  ;;  %v18622_v31 = vld [vmem:[#allocation19_spill] sm:$0xff] }
 0x4b9   :  { %18613 = vst [vmem:[#allocation70_spill] sm:$0xff] %v15813_v37  ;;  %v5430_v43 = vpop.f32.mrf.mxu1  ;;  %v5429_v14 = vadd.f32 %v5428_v62, %v5076_v52  ;;  %v5078_v53 = vadd.f32 %v5077_v61, %v18614_v41  ;;  %v5702_v61 = vmax.f32 %v5427_v22, 0.0  ;;  %9045 = vmatprep.subr.bf16.mxu1 %v18194_v59 }
 0x4ba   :  { %v5081_v48 = vpop.f32.mrf.mxu0  ;;  %6880 = vmatmul.mubr.bf16.gmra.mxu0 %v18615_v54  ;;  %v18618_v54 = vld [vmem:[#allocation119_spill] sm:$0xff] }
 0x4bb   :  { %v5434_v36 = vpop.f32.mrf.mxu1  ;;  %7233 = vmatmul.mubr.bf16.gmra.mxu1 %v15701_v50  ;;  %v5705_v12 = vmax.f32 %v5429_v14, 0.0  ;;  %v5431_v21 = vadd.f32 %v5430_v43, %v5078_v53  ;;  %v5082_v62 = vadd.f32 %v5081_v48, %v15115_v0  ;;  %6889 = vmatprep.mubr.bf16.mxu0 %v18616_v30  ;;  %v18619_v14 = vld [vmem:[#allocation120_spill] sm:$0xff] }
 0x4bc   :  { %7242 = vmatprep.mubr.bf16.mxu1 %v15729_v47  ;;  %v5083_v52 = vpop.f32.mrf.mxu0 }
 0x4bd   :  { %v5436_v26 = vpop.f32.mrf.mxu1  ;;  %v15833_v41 = vpack.c.bf16 %v5705_v12, %v5701_v63  ;;  %v5706_v15 = vmax.f32 %v5431_v21, 0.0  ;;  %v5084_v2 = vadd.f32 %v5083_v52, %v18618_v54  ;;  %v5435_v0 = vadd.f32 %v5434_v36, %v5082_v62  ;;  %v18621_v12 = vld [vmem:[#allocation121_spill] sm:$0xff]  ;;  %v18623_v36 = vld [vmem:[#allocation122_spill] sm:$0xff] }
 0x4be   :  { %v5085_v51 = vpop.f32.mrf.mxu0 }
 0x4bf   :  { %18617 = vst [vmem:[#allocation71_spill] sm:$0xff] %v15833_v41  ;;  %v5438_v43 = vpop.f32.mrf.mxu1  ;;  %v5086_v53 = vadd.f32 %v5085_v51, %v18619_v14  ;;  %v15839_v48 = vpack.c.bf16 %v5706_v15, %v5702_v61  ;;  %v5437_v22 = vadd.f32 %v5436_v26, %v5084_v2  ;;  %v5709_v52 = vmax.f32 %v5435_v0, 0.0  ;;  %v18624_v51 = vld [vmem:[#allocation22_spill] sm:$0xff]  ;;  %v18626_v14 = vld [vmem:[#allocation123_spill] sm:$0xff]  ;;  %v18627_v0 = vld [vmem:[#allocation124_spill] sm:$0xff] }
 0x4c0   :  { %v5087_v17 = vpop.f32.mrf.mxu0 }
 0x4c1   :  { %18620 = vst [vmem:[#allocation72_spill] sm:$0xff] %v15839_v48  ;;  %v5440_v9 = vpop.f32.mrf.mxu1  ;;  %v5439_v63 = vadd.f32 %v5438_v43, %v5086_v53  ;;  %v5088_v21 = vadd.f32 %v5087_v17, %v18621_v12  ;;  %v5710_v26 = vmax.f32 %v5437_v22, 0.0 }
 0x4c2   :  { %v5091_v47 = vpop.f32.mrf.mxu0  ;;  %6890 = vmatmul.mubr.bf16.gmra.mxu0 %v18622_v31 }
 0x4c3   :  { %v5444_v54 = vpop.f32.mrf.mxu1  ;;  %7243 = vmatmul.mubr.bf16.gmra.mxu1 %v15725_v10  ;;  %v5713_v30 = vmax.f32 %v5439_v63, 0.0  ;;  %v5441_v50 = vadd.f32 %v5440_v9, %v5088_v21  ;;  %v5092_v62 = vadd.f32 %v5091_v47, %v18623_v36  ;;  %6899 = vmatprep.mubr.bf16.mxu0 %v18624_v51 }
 0x4c4   :  { %7252 = vmatprep.mubr.bf16.mxu1 %v15741_v49  ;;  %v5093_v15 = vpop.f32.mrf.mxu0  ;;  %v18629_v49 = vld [vmem:[#allocation125_spill] sm:$0xff] }
 0x4c5   :  { %v5446_v2 = vpop.f32.mrf.mxu1  ;;  %v15847_v61 = vpack.c.bf16 %v5713_v30, %v5709_v52  ;;  %v5714_v43 = vmax.f32 %v5441_v50, 0.0  ;;  %v5094_v53 = vadd.f32 %v5093_v15, %v18626_v14  ;;  %v5445_v10 = vadd.f32 %v5444_v54, %v5092_v62  ;;  %v18630_v30 = vld [vmem:[#allocation21_spill] sm:$0xff]  ;;  %v18631_v62 = vld [vmem:[#allocation24_spill] sm:$0xff] }
 0x4c6   :  { %v5095_v17 = vpop.f32.mrf.mxu0 }
 0x4c7   :  { %18625 = vst [vmem:[#allocation73_spill] sm:$0xff] %v15847_v61  ;;  %v5448_v12 = vpop.f32.mrf.mxu1  ;;  %v5096_v63 = vadd.f32 %v5095_v17, %v18627_v0  ;;  %v15851_v9 = vpack.c.bf16 %v5714_v43, %v5710_v26  ;;  %v5447_v36 = vadd.f32 %v5446_v2, %v5094_v53  ;;  %v5717_v50 = vmax.f32 %v5445_v10, 0.0  ;;  %v18633_v53 = vld [vmem:[#allocation126_spill] sm:$0xff]  ;;  %v18634_v10 = vld [vmem:[#allocation127_spill] sm:$0xff] }
 0x4c8   :  { %v5097_v47 = vpop.f32.mrf.mxu0 }
 0x4c9   :  { %18628 = vst [vmem:[#allocation74_spill] sm:$0xff] %v15851_v9  ;;  %v5450_v21 = vpop.f32.mrf.mxu1  ;;  %v5449_v51 = vadd.f32 %v5448_v12, %v5096_v63  ;;  %v5098_v31 = vadd.f32 %v5097_v47, %v18629_v49  ;;  %v5718_v43 = vmax.f32 %v5447_v36, 0.0 }
 0x4ca   :  { %v5101_v45 = vpop.f32.mrf.mxu0  ;;  %6900 = vmatmul.mubr.bf16.gmra.mxu0 %v18630_v30 }
 0x4cb   :  { %v5454_v22 = vpop.f32.mrf.mxu1  ;;  %7253 = vmatmul.mubr.bf16.gmra.mxu1 %v15737_v24  ;;  %v5721_v52 = vmax.f32 %v5449_v51, 0.0  ;;  %v5451_v15 = vadd.f32 %v5450_v21, %v5098_v31  ;;  %v5102_v54 = vadd.f32 %v5101_v45, %v15167_v7  ;;  %6909 = vmatprep.mubr.bf16.mxu0 %v18631_v62 }
 0x4cc   :  { %7262 = vmatprep.mubr.bf16.mxu1 %v15765_v25  ;;  %v5103_v26 = vpop.f32.mrf.mxu0  ;;  %v18636_v25 = vld [vmem:[#allocation128_spill] sm:$0xff] }
 0x4cd   :  { %v5456_v2 = vpop.f32.mrf.mxu1  ;;  %v15859_v14 = vpack.c.bf16 %v5721_v52, %v5717_v50  ;;  %v5722_v49 = vmax.f32 %v5451_v15, 0.0  ;;  %v5104_v17 = vadd.f32 %v5103_v26, %v18633_v53  ;;  %v5455_v63 = vadd.f32 %v5454_v22, %v5102_v54  ;;  %v18637_v50 = vld [vmem:[#allocation23_spill] sm:$0xff]  ;;  %v18638_v22 = vld [vmem:[#allocation129_spill] sm:$0xff]  ;;  %v18639_v53 = vld [vmem:[#allocation26_spill] sm:$0xff] }
 0x4ce   :  { %v5105_v12 = vpop.f32.mrf.mxu0 }
 0x4cf   :  { %18632 = vst [vmem:[#allocation75_spill] sm:$0xff] %v15859_v14  ;;  %v5458_v0 = vpop.f32.mrf.mxu1  ;;  %v5106_v51 = vadd.f32 %v5105_v12, %v18634_v10  ;;  %v15863_v31 = vpack.c.bf16 %v5722_v49, %v5718_v43  ;;  %v5457_v47 = vadd.f32 %v5456_v2, %v5104_v17  ;;  %v5725_v52 = vmax.f32 %v5455_v63, 0.0  ;;  %v18641_v12 = vld [vmem:[#allocation130_spill] sm:$0xff]  ;;  %v18642_v63 = vld [vmem:[#allocation131_spill] sm:$0xff] }
 0x4d0   :  { %v5107_v7 = vpop.f32.mrf.mxu0 }
 0x4d1   :  { %18635 = vst [vmem:[#allocation76_spill] sm:$0xff] %v15863_v31  ;;  %v5460_v45 = vpop.f32.mrf.mxu1  ;;  %v5459_v21 = vadd.f32 %v5458_v0, %v5106_v51  ;;  %v5108_v62 = vadd.f32 %v5107_v7, %v18636_v25  ;;  %v5726_v49 = vmax.f32 %v5457_v47, 0.0 }
 0x4d2   :  { %v5111_v24 = vpop.f32.mrf.mxu0  ;;  %6910 = vmatmul.mubr.bf16.gmra.mxu0 %v18637_v50 }
 0x4d3   :  { %v5464_v36 = vpop.f32.mrf.mxu1  ;;  %7263 = vmatmul.mubr.bf16.gmra.mxu1 %v15761_v38  ;;  %v5729_v15 = vmax.f32 %v5459_v21, 0.0  ;;  %v5461_v26 = vadd.f32 %v5460_v45, %v5108_v62  ;;  %v5112_v54 = vadd.f32 %v5111_v24, %v18638_v22  ;;  %6919 = vmatprep.mubr.bf16.mxu0 %v18639_v53 }
 0x4d4   :  { %7272 = vmatprep.mubr.bf16.mxu1 %v15777_v58  ;;  %v5113_v43 = vpop.f32.mrf.mxu0  ;;  %v18644_v58 = vld [vmem:[#allocation132_spill] sm:$0xff] }
 0x4d5   :  { %v5466_v2 = vpop.f32.mrf.mxu1  ;;  %v15871_v17 = vpack.c.bf16 %v5729_v15, %v5725_v52  ;;  %v5730_v25 = vmax.f32 %v5461_v26, 0.0  ;;  %v5114_v0 = vadd.f32 %v5113_v43, %v18641_v12  ;;  %v5465_v7 = vadd.f32 %v5464_v36, %v5112_v54  ;;  %v18645_v52 = vld [vmem:[#allocation25_spill] sm:$0xff]  ;;  %v18647_v12 = vld [vmem:[#allocation28_spill] sm:$0xff] }
 0x4d6   :  { %v5115_v10 = vpop.f32.mrf.mxu0  ;;  %v18646_v36 = vld [vmem:[#allocation133_spill] sm:$0xff] }
 0x4d7   :  { %18640 = vst [vmem:[#allocation77_spill] sm:$0xff] %v15871_v17  ;;  %v5468_v51 = vpop.f32.mrf.mxu1  ;;  %v5116_v21 = vadd.f32 %v5115_v10, %v18642_v63  ;;  %v15875_v62 = vpack.c.bf16 %v5730_v25, %v5726_v49  ;;  %v5467_v22 = vadd.f32 %v5466_v2, %v5114_v0  ;;  %v5733_v15 = vmax.f32 %v5465_v7, 0.0  ;;  %v18648_v10 = vld [vmem:[#allocation134_spill] sm:$0xff]  ;;  %v18649_v7 = vld [vmem:[#allocation135_spill] sm:$0xff] }
 0x4d8   :  { %v5117_v24 = vpop.f32.mrf.mxu0 }
 0x4d9   :  { %18643 = vst [vmem:[#allocation78_spill] sm:$0xff] %v15875_v62  ;;  %v5470_v45 = vpop.f32.mrf.mxu1  ;;  %v5469_v53 = vadd.f32 %v5468_v51, %v5116_v21  ;;  %v5118_v38 = vadd.f32 %v5117_v24, %v18644_v58  ;;  %v5734_v25 = vmax.f32 %v5467_v22, 0.0 }
 0x4da   :  { %v5121_v50 = vpop.f32.mrf.mxu0  ;;  %6920 = vmatmul.mubr.bf16.gmra.mxu0 %v18645_v52 }
 0x4db   :  { %v5474_v47 = vpop.f32.mrf.mxu1  ;;  %7273 = vmatmul.mubr.bf16.gmra.mxu1 %v15773_v55  ;;  %v5737_v26 = vmax.f32 %v5469_v53, 0.0  ;;  %v5471_v43 = vadd.f32 %v5470_v45, %v5118_v38  ;;  %v5122_v54 = vadd.f32 %v5121_v50, %v18646_v36  ;;  %6929 = vmatprep.mubr.bf16.mxu0 %v18647_v12 }
 0x4dc   :  { %7282 = vmatprep.mubr.bf16.mxu1 %v15801_v3  ;;  %v5123_v49 = vpop.f32.mrf.mxu0  ;;  %v18651_v3 = vld [vmem:[#allocation136_spill] sm:$0xff] }
 0x4dd   :  { %v5476_v2 = vpop.f32.mrf.mxu1  ;;  %v15883_v0 = vpack.c.bf16 %v5737_v26, %v5733_v15  ;;  %v5738_v58 = vmax.f32 %v5471_v43, 0.0  ;;  %v5124_v51 = vadd.f32 %v5123_v49, %v18648_v10  ;;  %v5475_v24 = vadd.f32 %v5474_v47, %v5122_v54  ;;  %v18652_v15 = vld [vmem:[#allocation27_spill] sm:$0xff]  ;;  %v18653_v47 = vld [vmem:[#allocation137_spill] sm:$0xff]  ;;  %v18654_v10 = vld [vmem:[#allocation30_spill] sm:$0xff] }
 0x4de   :  { %v5125_v63 = vpop.f32.mrf.mxu0 }
 0x4df   :  { %v5478_v21 = vpop.f32.mrf.mxu1  ;;  %v5126_v53 = vadd.f32 %v5125_v63, %v18649_v7  ;;  %v15887_v38 = vpack.c.bf16 %v5738_v58, %v5734_v25  ;;  %v5477_v36 = vadd.f32 %v5476_v2, %v5124_v51  ;;  %v5741_v26 = vmax.f32 %v5475_v24, 0.0  ;;  %v18655_v63 = vld [vmem:[#allocation138_spill] sm:$0xff]  ;;  %v18656_v24 = vld [vmem:[#allocation139_spill] sm:$0xff] }
 0x4e0   :  { %v5127_v50 = vpop.f32.mrf.mxu0 }
 0x4e1   :  { %18650 = vst [vmem:[#allocation79_spill] sm:$0xff] %v15887_v38  ;;  %v5480_v45 = vpop.f32.mrf.mxu1  ;;  %v5479_v12 = vadd.f32 %v5478_v21, %v5126_v53  ;;  %v5128_v55 = vadd.f32 %v5127_v50, %v18651_v3  ;;  %v5742_v58 = vmax.f32 %v5477_v36, 0.0 }
 0x4e2   :  { %v5131_v52 = vpop.f32.mrf.mxu0  ;;  %6930 = vmatmul.mubr.bf16.gmra.mxu0 %v18652_v15 }
 0x4e3   :  { %v5484_v22 = vpop.f32.mrf.mxu1  ;;  %7283 = vmatmul.mubr.bf16.gmra.mxu1 %v15797_v5  ;;  %v5745_v43 = vmax.f32 %v5479_v12, 0.0  ;;  %v5481_v49 = vadd.f32 %v5480_v45, %v5128_v55  ;;  %v5132_v54 = vadd.f32 %v5131_v52, %v18653_v47  ;;  %6939 = vmatprep.mubr.bf16.mxu0 %v18654_v10 }
 0x4e4   :  { %7292 = vmatprep.mubr.bf16.mxu1 %v15813_v37  ;;  %v5133_v25 = vpop.f32.mrf.mxu0  ;;  %v18658_v37 = vld [vmem:[#allocation140_spill] sm:$0xff] }
 0x4e5   :  { %v5486_v2 = vpop.f32.mrf.mxu1  ;;  %v15895_v51 = vpack.c.bf16 %v5745_v43, %v5741_v26  ;;  %v5746_v3 = vmax.f32 %v5481_v49, 0.0  ;;  %v5134_v21 = vadd.f32 %v5133_v25, %v18655_v63  ;;  %v5485_v50 = vadd.f32 %v5484_v22, %v5132_v54  ;;  %v18659_v26 = vld [vmem:[#allocation29_spill] sm:$0xff]  ;;  %v18661_v63 = vld [vmem:[#allocation32_spill] sm:$0xff] }
 0x4e6   :  { %v5135_v7 = vpop.f32.mrf.mxu0  ;;  %v18660_v22 = vld [vmem:[#allocation141_spill] sm:$0xff] }
 0x4e7   :  { %v5488_v53 = vpop.f32.mrf.mxu1  ;;  %v5136_v12 = vadd.f32 %v5135_v7, %v18656_v24  ;;  %v15899_v55 = vpack.c.bf16 %v5746_v3, %v5742_v58  ;;  %v5487_v47 = vadd.f32 %v5486_v2, %v5134_v21  ;;  %v5749_v43 = vmax.f32 %v5485_v50, 0.0  ;;  %v18662_v7 = vld [vmem:[#allocation142_spill] sm:$0xff]  ;;  %v18663_v50 = vld [vmem:[#allocation143_spill] sm:$0xff] }
 0x4e8   :  { %v5137_v52 = vpop.f32.mrf.mxu0 }
 0x4e9   :  { %18657 = vst [vmem:[#allocation80_spill] sm:$0xff] %v15899_v55  ;;  %v5490_v45 = vpop.f32.mrf.mxu1  ;;  %v5489_v10 = vadd.f32 %v5488_v53, %v5136_v12  ;;  %v5138_v5 = vadd.f32 %v5137_v52, %v18658_v37  ;;  %v5750_v3 = vmax.f32 %v5487_v47, 0.0 }
 0x4ea   :  { %v5141_v15 = vpop.f32.mrf.mxu0  ;;  %6940 = vmatmul.mubr.bf16.gmra.mxu0 %v18659_v26 }
 0x4eb   :  { %v5494_v36 = vpop.f32.mrf.mxu1  ;;  %7293 = vmatmul.mubr.bf16.gmra.mxu1 %v15809_v60  ;;  %v5753_v49 = vmax.f32 %v5489_v10, 0.0  ;;  %v5491_v25 = vadd.f32 %v5490_v45, %v5138_v5  ;;  %v5142_v54 = vadd.f32 %v5141_v15, %v18660_v22  ;;  %6949 = vmatprep.mubr.bf16.mxu0 %v18661_v63 }
 0x4ec   :  { %7302 = vmatprep.mubr.bf16.mxu1 %v15839_v48  ;;  %v5143_v58 = vpop.f32.mrf.mxu0  ;;  %v18665_v48 = vld [vmem:[#allocation144_spill] sm:$0xff] }
 0x4ed   :  { %v5496_v2 = vpop.f32.mrf.mxu1  ;;  %v15907_v21 = vpack.c.bf16 %v5753_v49, %v5749_v43  ;;  %v5754_v37 = vmax.f32 %v5491_v25, 0.0  ;;  %v5144_v53 = vadd.f32 %v5143_v58, %v18662_v7  ;;  %v5495_v52 = vadd.f32 %v5494_v36, %v5142_v54  ;;  %v18666_v43 = vld [vmem:[#allocation31_spill] sm:$0xff]  ;;  %v18667_v36 = vld [vmem:[#allocation145_spill] sm:$0xff]  ;;  %v18668_v7 = vld [vmem:[#allocation34_spill] sm:$0xff] }
 0x4ee   :  { %v5145_v24 = vpop.f32.mrf.mxu0 }
 0x4ef   :  { %v5498_v12 = vpop.f32.mrf.mxu1  ;;  %v5146_v10 = vadd.f32 %v5145_v24, %v18663_v50  ;;  %v15911_v5 = vpack.c.bf16 %v5754_v37, %v5750_v3  ;;  %v5497_v22 = vadd.f32 %v5496_v2, %v5144_v53  ;;  %v5757_v49 = vmax.f32 %v5495_v52, 0.0  ;;  %v18669_v24 = vld [vmem:[#allocation146_spill] sm:$0xff]  ;;  %v18670_v52 = vld [vmem:[#allocation147_spill] sm:$0xff] }
 0x4f0   :  { %v5147_v15 = vpop.f32.mrf.mxu0 }
 0x4f1   :  { %18664 = vst [vmem:[#allocation81_spill] sm:$0xff] %v15911_v5  ;;  %v5500_v45 = vpop.f32.mrf.mxu1  ;;  %v5499_v63 = vadd.f32 %v5498_v12, %v5146_v10  ;;  %v5148_v60 = vadd.f32 %v5147_v15, %v18665_v48  ;;  %v5758_v37 = vmax.f32 %v5497_v22, 0.0 }
 0x4f2   :  { %v5151_v26 = vpop.f32.mrf.mxu0  ;;  %6950 = vmatmul.mubr.bf16.gmra.mxu0 %v18666_v43 }
 0x4f3   :  { %v5504_v47 = vpop.f32.mrf.mxu1  ;;  %7303 = vmatmul.mubr.bf16.gmra.mxu1 %v15833_v41  ;;  %v5761_v25 = vmax.f32 %v5499_v63, 0.0  ;;  %v5501_v58 = vadd.f32 %v5500_v45, %v5148_v60  ;;  %v5152_v54 = vadd.f32 %v5151_v26, %v18667_v36  ;;  %6959 = vmatprep.mubr.bf16.mxu0 %v18668_v7 }
 0x4f4   :  { %7312 = vmatprep.mubr.bf16.mxu1 %v15851_v9  ;;  %v5153_v3 = vpop.f32.mrf.mxu0  ;;  %v18672_v9 = vld [vmem:[#allocation148_spill] sm:$0xff] }
 0x4f5   :  { %v5506_v2 = vpop.f32.mrf.mxu1  ;;  %v15919_v53 = vpack.c.bf16 %v5761_v25, %v5757_v49  ;;  %v5762_v48 = vmax.f32 %v5501_v58, 0.0  ;;  %v5154_v12 = vadd.f32 %v5153_v3, %v18669_v24  ;;  %v5505_v15 = vadd.f32 %v5504_v47, %v5152_v54  ;;  %v18673_v49 = vld [vmem:[#allocation33_spill] sm:$0xff]  ;;  %v18675_v24 = vld [vmem:[#allocation36_spill] sm:$0xff] }
 0x4f6   :  { %v5155_v50 = vpop.f32.mrf.mxu0  ;;  %v18674_v47 = vld [vmem:[#allocation149_spill] sm:$0xff] }
 0x4f7   :  { %v5508_v10 = vpop.f32.mrf.mxu1  ;;  %v5156_v63 = vadd.f32 %v5155_v50, %v18670_v52  ;;  %v15923_v60 = vpack.c.bf16 %v5762_v48, %v5758_v37  ;;  %v5507_v36 = vadd.f32 %v5506_v2, %v5154_v12  ;;  %v5765_v25 = vmax.f32 %v5505_v15, 0.0 }
 0x4f8   :  { %v5157_v26 = vpop.f32.mrf.mxu0 }
 0x4f9   :  { %18671 = vst [vmem:[#allocation82_spill] sm:$0xff] %v15923_v60  ;;  %v5510_v45 = vpop.f32.mrf.mxu1  ;;  %v5509_v7 = vadd.f32 %v5508_v10, %v5156_v63  ;;  %v5158_v41 = vadd.f32 %v5157_v26, %v18672_v9  ;;  %v6035_v9 = vld [vmem:[%s18054_s4] sm:$0xf]  ;;  %v5766_v48 = vmax.f32 %v5507_v36, 0.0  ;;  %v18676_v10 = vld [vmem:[#allocation150_spill] sm:$0xff] }
 0x4fa   :  { %v5161_v43 = vpop.f32.mrf.mxu0  ;;  %6960 = vmatmul.mubr.bf16.gmra.mxu0 %v18673_v49  ;;  %v18678_v26 = vld [vmem:[#allocation5_spill] sm:$0xff] }
 0x4fb   :  { %v5514_v22 = vpop.f32.mrf.mxu1  ;;  %7313 = vmatmul.mubr.bf16.gmra.mxu1 %v15847_v61  ;;  %v5769_v58 = vmax.f32 %v5509_v7, 0.0  ;;  %v5511_v3 = vadd.f32 %v5510_v45, %v5158_v41  ;;  %v5162_v54 = vadd.f32 %v5161_v43, %v18674_v47  ;;  %6969 = vmatprep.mubr.bf16.mxu0 %v18675_v24  ;;  %v18677_v43 = vld [vmem:[#allocation151_spill] sm:$0xff]  ;;  %v18679_v45 = vsub.s32 0, %v18678_v26 }
 0x4fc   :  { %7322 = vmatprep.mubr.bf16.mxu1 %v15863_v31  ;;  %v5163_v37 = vpop.f32.mrf.mxu0 }
 0x4fd   :  { %v5516_v2 = vpop.f32.mrf.mxu1  ;;  %v15934_v12 = vpack.c.bf16 %v5769_v58, %v5765_v25  ;;  %v5770_v50 = vmax.f32 %v5511_v3, 0.0  ;;  %v5164_v15 = vadd.f32 %v5163_v37, %v18676_v10  ;;  %v5515_v52 = vadd.f32 %v5514_v22, %v5162_v54  ;;  %v18681_v25 = vld [vmem:[#allocation152_spill] sm:$0xff]  ;;  %v18683_v22 = vld [vmem:[#allocation35_spill] sm:$0xff] }
 0x4fe   :  { %v5165_v7 = vpop.f32.mrf.mxu0  ;;  %v15940_v47 = vrot.slane %v6035_v9, %v18679_v45  ;;  %v18682_v3 = vsub.s32 1, %v18678_v26 }
 0x4ff   :  { %v5518_v41 = vpop.f32.mrf.mxu1  ;;  %v5166_v63 = vadd.f32 %v5165_v7, %v18677_v43  ;;  %v15942_v31 = vpack.c.bf16 %v5770_v50, %v5766_v48  ;;  %v5517_v24 = vadd.f32 %v5516_v2, %v5164_v15  ;;  %v5773_v7 = vmax.f32 %v5515_v52, 0.0  ;;  %v18684_v50 = vld [vmem:[#allocation38_spill] sm:$0xff] }
 0x500   :  { %v5167_v61 = vpop.f32.mrf.mxu0  ;;  %v15947_v37 = vrot.slane %v6035_v9, %v18682_v3 }
 0x501   :  { %18680 = vst [vmem:[#allocation83_spill] sm:$0xff] %v15942_v31  ;;  %v5520_v49 = vpop.f32.mrf.mxu1  ;;  %v5519_v36 = vadd.f32 %v5518_v41, %v5166_v63  ;;  %v5168_v58 = vadd.f32 %v5167_v61, %v18681_v25  ;;  %v5774_v61 = vmax.f32 %v5517_v24, 0.0 }
 0x502   :  { %v6731_v10 = vpop.f32.mrf.mxu0  ;;  %6970 = vmatmul.mubr.bf16.gmra.mxu0 %v18683_v22 }
 0x503   :  { %v7084_v54 = vpop.f32.mrf.mxu1  ;;  %7323 = vmatmul.mubr.bf16.gmra.mxu1 %v15859_v14  ;;  %v5777_v43 = vmax.f32 %v5519_v36, 0.0  ;;  %v5521_v48 = vadd.f32 %v5520_v49, %v5168_v58  ;;  %v6732_v2 = vadd.f32 %v6731_v10, %v15940_v47  ;;  %6979 = vmatprep.mubr.bf16.mxu0 %v18684_v50  ;;  %v18686_v14 = vld [vmem:[#allocation37_spill] sm:$0xff] }
 0x504   :  { %7332 = vmatprep.mubr.bf16.mxu1 %v15875_v62  ;;  %v6733_v15 = vpop.f32.mrf.mxu0 }
 0x505   :  { %v7086_v41 = vpop.f32.mrf.mxu1  ;;  %v15954_v9 = vpack.c.bf16 %v5777_v43, %v5773_v7  ;;  %v5778_v63 = vmax.f32 %v5521_v48, 0.0  ;;  %v7085_v45 = vadd.f32 %v7084_v54, %v6732_v2  ;;  %v6734_v25 = vadd.f32 %v6733_v15, %v15947_v37  ;;  %v18687_v15 = vld [vmem:[#allocation40_spill] sm:$0xff] }
 0x506   :  { %v6735_v3 = vpop.f32.mrf.mxu0 }
 0x507   :  { %v7088_v26 = vpop.f32.mrf.mxu1  ;;  %v7087_v52 = vadd.f32 %v7086_v41, %v6734_v25  ;;  %v6736_v49 = vadd.f32 %v6735_v3, %v15940_v47  ;;  %v15958_v36 = vpack.c.bf16 %v5778_v63, %v5774_v61  ;;  %v8109_v54 = vmax.f32 %v7085_v45, 0.0 }
 0x508   :  { %v6737_v58 = vpop.f32.mrf.mxu0 }
 0x509   :  { %18685 = vst [vmem:[#allocation84_spill] sm:$0xff] %v15958_v36  ;;  %v7090_v10 = vpop.f32.mrf.mxu1  ;;  %v7089_v50 = vadd.f32 %v7088_v26, %v6736_v49  ;;  %v6738_v24 = vadd.f32 %v6737_v58, %v15947_v37  ;;  %v8110_v61 = vmax.f32 %v7087_v52, 0.0 }
 0x50a   :  { %v6741_v62 = vpop.f32.mrf.mxu0  ;;  %6980 = vmatmul.mubr.bf16.gmra.mxu0 %v18686_v14  ;;  %v18690_v14 = vld [vmem:[#allocation39_spill] sm:$0xff] }
 0x50b   :  { %v7094_v7 = vpop.f32.mrf.mxu1  ;;  %7333 = vmatmul.mubr.bf16.gmra.mxu1 %v15871_v17  ;;  %v8113_v43 = vmax.f32 %v7089_v50, 0.0  ;;  %v7091_v48 = vadd.f32 %v7090_v10, %v6738_v24  ;;  %v6742_v2 = vadd.f32 %v6741_v62, %v15940_v47  ;;  %6989 = vmatprep.mubr.bf16.mxu0 %v18687_v15 }
 0x50c   :  { %7342 = vmatprep.mubr.bf16.mxu1 %v15887_v38  ;;  %v6743_v41 = vpop.f32.mrf.mxu0 }
 0x50d   :  { %v7096_v26 = vpop.f32.mrf.mxu1  ;;  %v15966_v63 = vpack.c.bf16 %v8113_v43, %v8109_v54  ;;  %v8114_v25 = vmax.f32 %v7091_v48, 0.0  ;;  %v7095_v3 = vadd.f32 %v7094_v7, %v6742_v2  ;;  %v6744_v49 = vadd.f32 %v6743_v41, %v15947_v37  ;;  %v18691_v41 = vld [vmem:[#allocation42_spill] sm:$0xff] }
 0x50e   :  { %v6745_v58 = vpop.f32.mrf.mxu0 }
 0x50f   :  { %18688 = vst [vmem:[#allocation85_spill] sm:$0xff] %v15966_v63  ;;  %v7098_v17 = vpop.f32.mrf.mxu1  ;;  %v7097_v45 = vadd.f32 %v7096_v26, %v6744_v49  ;;  %v6746_v50 = vadd.f32 %v6745_v58, %v15940_v47  ;;  %v15970_v10 = vpack.c.bf16 %v8114_v25, %v8110_v61  ;;  %v8117_v7 = vmax.f32 %v7095_v3, 0.0 }
 0x510   :  { %v6747_v62 = vpop.f32.mrf.mxu0 }
 0x511   :  { %18689 = vst [vmem:[#allocation86_spill] sm:$0xff] %v15970_v10  ;;  %v7100_v24 = vpop.f32.mrf.mxu1  ;;  %v7099_v15 = vadd.f32 %v7098_v17, %v6746_v50  ;;  %v6748_v52 = vadd.f32 %v6747_v62, %v15947_v37  ;;  %v8118_v61 = vmax.f32 %v7097_v45, 0.0 }
 0x512   :  { %v6751_v38 = vpop.f32.mrf.mxu0  ;;  %6990 = vmatmul.mubr.bf16.gmra.mxu0 %v18690_v14 }
 0x513   :  { %v7104_v54 = vpop.f32.mrf.mxu1  ;;  %7343 = vmatmul.mubr.bf16.gmra.mxu1 %v15883_v0  ;;  %v8121_v43 = vmax.f32 %v7099_v15, 0.0  ;;  %v7101_v48 = vadd.f32 %v7100_v24, %v6748_v52  ;;  %v6752_v2 = vadd.f32 %v6751_v38, %v15940_v47  ;;  %6999 = vmatprep.mubr.bf16.mxu0 %v18691_v41  ;;  %v18694_v41 = vld [vmem:[#allocation41_spill] sm:$0xff] }
 0x514   :  { %7352 = vmatprep.mubr.bf16.mxu1 %v15899_v55  ;;  %v6753_v26 = vpop.f32.mrf.mxu0 }
 0x515   :  { %v7106_v17 = vpop.f32.mrf.mxu1  ;;  %v15978_v25 = vpack.c.bf16 %v8121_v43, %v8117_v7  ;;  %v8122_v49 = vmax.f32 %v7101_v48, 0.0  ;;  %v7105_v58 = vadd.f32 %v7104_v54, %v6752_v2  ;;  %v6754_v50 = vadd.f32 %v6753_v26, %v15947_v37  ;;  %v18695_v26 = vld [vmem:[#allocation44_spill] sm:$0xff] }
 0x516   :  { %v6755_v62 = vpop.f32.mrf.mxu0 }
 0x517   :  { %18692 = vst [vmem:[#allocation87_spill] sm:$0xff] %v15978_v25  ;;  %v7108_v63 = vpop.f32.mrf.mxu1  ;;  %v7107_v3 = vadd.f32 %v7106_v17, %v6754_v50  ;;  %v6756_v15 = vadd.f32 %v6755_v62, %v15940_v47  ;;  %v15982_v24 = vpack.c.bf16 %v8122_v49, %v8118_v61  ;;  %v8125_v54 = vmax.f32 %v7105_v58, 0.0 }
 0x518   :  { %v6757_v38 = vpop.f32.mrf.mxu0 }
 0x519   :  { %18693 = vst [vmem:[#allocation88_spill] sm:$0xff] %v15982_v24  ;;  %v7110_v52 = vpop.f32.mrf.mxu1  ;;  %v7109_v10 = vadd.f32 %v7108_v63, %v6756_v15  ;;  %v6758_v45 = vadd.f32 %v6757_v38, %v15947_v37  ;;  %v8126_v61 = vmax.f32 %v7107_v3, 0.0 }
 0x51a   :  { %v6761_v55 = vpop.f32.mrf.mxu0  ;;  %7000 = vmatmul.mubr.bf16.gmra.mxu0 %v18694_v41 }
 0x51b   :  { %v7114_v7 = vpop.f32.mrf.mxu1  ;;  %7353 = vmatmul.mubr.bf16.gmra.mxu1 %v15895_v51  ;;  %v8129_v43 = vmax.f32 %v7109_v10, 0.0  ;;  %v7111_v48 = vadd.f32 %v7110_v52, %v6758_v45  ;;  %v6762_v2 = vadd.f32 %v6761_v55, %v15940_v47  ;;  %7009 = vmatprep.mubr.bf16.mxu0 %v18695_v26  ;;  %v18698_v26 = vld [vmem:[#allocation43_spill] sm:$0xff] }
 0x51c   :  { %7362 = vmatprep.mubr.bf16.mxu1 %v15911_v5  ;;  %v6763_v17 = vpop.f32.mrf.mxu0 }
 0x51d   :  { %v7116_v63 = vpop.f32.mrf.mxu1  ;;  %v15990_v49 = vpack.c.bf16 %v8129_v43, %v8125_v54  ;;  %v8130_v50 = vmax.f32 %v7111_v48, 0.0  ;;  %v7115_v62 = vadd.f32 %v7114_v7, %v6762_v2  ;;  %v6764_v15 = vadd.f32 %v6763_v17, %v15947_v37  ;;  %v18699_v17 = vld [vmem:[#allocation46_spill] sm:$0xff] }
 0x51e   :  { %v6765_v38 = vpop.f32.mrf.mxu0 }
 0x51f   :  { %18696 = vst [vmem:[#allocation103_spill] sm:$0xff] %v15990_v49  ;;  %v7118_v25 = vpop.f32.mrf.mxu1  ;;  %v7117_v58 = vadd.f32 %v7116_v63, %v6764_v15  ;;  %v6766_v10 = vadd.f32 %v6765_v38, %v15940_v47  ;;  %v15994_v52 = vpack.c.bf16 %v8130_v50, %v8126_v61  ;;  %v8133_v7 = vmax.f32 %v7115_v62, 0.0 }
 0x520   :  { %v6767_v55 = vpop.f32.mrf.mxu0 }
 0x521   :  { %18697 = vst [vmem:[#allocation104_spill] sm:$0xff] %v15994_v52  ;;  %v7120_v45 = vpop.f32.mrf.mxu1  ;;  %v7119_v24 = vadd.f32 %v7118_v25, %v6766_v10  ;;  %v6768_v3 = vadd.f32 %v6767_v55, %v15947_v37  ;;  %v8134_v61 = vmax.f32 %v7117_v58, 0.0 }
 0x522   :  { %v6771_v5 = vpop.f32.mrf.mxu0  ;;  %7010 = vmatmul.mubr.bf16.gmra.mxu0 %v18698_v26 }
 0x523   :  { %v7124_v54 = vpop.f32.mrf.mxu1  ;;  %7363 = vmatmul.mubr.bf16.gmra.mxu1 %v15907_v21  ;;  %v8137_v43 = vmax.f32 %v7119_v24, 0.0  ;;  %v7121_v48 = vadd.f32 %v7120_v45, %v6768_v3  ;;  %v6772_v2 = vadd.f32 %v6771_v5, %v15940_v47  ;;  %7019 = vmatprep.mubr.bf16.mxu0 %v18699_v17  ;;  %v18702_v17 = vld [vmem:[#allocation45_spill] sm:$0xff] }
 0x524   :  { %7372 = vmatprep.mubr.bf16.mxu1 %v15923_v60  ;;  %v6773_v63 = vpop.f32.mrf.mxu0 }
 0x525   :  { %v7126_v25 = vpop.f32.mrf.mxu1  ;;  %v16002_v50 = vpack.c.bf16 %v8137_v43, %v8133_v7  ;;  %v8138_v15 = vmax.f32 %v7121_v48, 0.0  ;;  %v7125_v38 = vadd.f32 %v7124_v54, %v6772_v2  ;;  %v6774_v10 = vadd.f32 %v6773_v63, %v15947_v37  ;;  %v18703_v63 = vld [vmem:[#allocation48_spill] sm:$0xff] }
 0x526   :  { %v6775_v55 = vpop.f32.mrf.mxu0 }
 0x527   :  { %18700 = vst [vmem:[#allocation105_spill] sm:$0xff] %v16002_v50  ;;  %v7128_v49 = vpop.f32.mrf.mxu1  ;;  %v7127_v62 = vadd.f32 %v7126_v25, %v6774_v10  ;;  %v6776_v24 = vadd.f32 %v6775_v55, %v15940_v47  ;;  %v16006_v45 = vpack.c.bf16 %v8138_v15, %v8134_v61  ;;  %v8141_v54 = vmax.f32 %v7125_v38, 0.0 }
 0x528   :  { %v6777_v5 = vpop.f32.mrf.mxu0 }
 0x529   :  { %18701 = vst [vmem:[#allocation106_spill] sm:$0xff] %v16006_v45  ;;  %v7130_v3 = vpop.f32.mrf.mxu1  ;;  %v7129_v52 = vadd.f32 %v7128_v49, %v6776_v24  ;;  %v6778_v58 = vadd.f32 %v6777_v5, %v15947_v37  ;;  %v8142_v61 = vmax.f32 %v7127_v62, 0.0 }
 0x52a   :  { %v6781_v60 = vpop.f32.mrf.mxu0  ;;  %7020 = vmatmul.mubr.bf16.gmra.mxu0 %v18702_v17 }
 0x52b   :  { %v7134_v7 = vpop.f32.mrf.mxu1  ;;  %7373 = vmatmul.mubr.bf16.gmra.mxu1 %v15919_v53  ;;  %v8145_v43 = vmax.f32 %v7129_v52, 0.0  ;;  %v7131_v48 = vadd.f32 %v7130_v3, %v6778_v58  ;;  %v6782_v2 = vadd.f32 %v6781_v60, %v15940_v47  ;;  %7029 = vmatprep.mubr.bf16.mxu0 %v18703_v63  ;;  %v18706_v63 = vld [vmem:[#allocation47_spill] sm:$0xff] }
 0x52c   :  { %7382 = vmatprep.mubr.bf16.mxu1 %v15942_v31  ;;  %v6783_v25 = vpop.f32.mrf.mxu0 }
 0x52d   :  { %v7136_v49 = vpop.f32.mrf.mxu1  ;;  %v16014_v15 = vpack.c.bf16 %v8145_v43, %v8141_v54  ;;  %v8146_v10 = vmax.f32 %v7131_v48, 0.0  ;;  %v7135_v55 = vadd.f32 %v7134_v7, %v6782_v2  ;;  %v6784_v24 = vadd.f32 %v6783_v25, %v15947_v37  ;;  %v18707_v25 = vld [vmem:[#allocation50_spill] sm:$0xff] }
 0x52e   :  { %v6785_v5 = vpop.f32.mrf.mxu0 }
 0x52f   :  { %18704 = vst [vmem:[#allocation107_spill] sm:$0xff] %v16014_v15  ;;  %v7138_v50 = vpop.f32.mrf.mxu1  ;;  %v7137_v38 = vadd.f32 %v7136_v49, %v6784_v24  ;;  %v6786_v52 = vadd.f32 %v6785_v5, %v15940_v47  ;;  %v16018_v3 = vpack.c.bf16 %v8146_v10, %v8142_v61  ;;  %v8149_v7 = vmax.f32 %v7135_v55, 0.0 }
 0x530   :  { %v6787_v60 = vpop.f32.mrf.mxu0 }
 0x531   :  { %18705 = vst [vmem:[#allocation108_spill] sm:$0xff] %v16018_v3  ;;  %v7140_v58 = vpop.f32.mrf.mxu1  ;;  %v7139_v45 = vadd.f32 %v7138_v50, %v6786_v52  ;;  %v6788_v62 = vadd.f32 %v6787_v60, %v15947_v37  ;;  %v8150_v61 = vmax.f32 %v7137_v38, 0.0 }
 0x532   :  { %v6791_v31 = vpop.f32.mrf.mxu0  ;;  %7030 = vmatmul.mubr.bf16.gmra.mxu0 %v18706_v63 }
 0x533   :  { %v7144_v54 = vpop.f32.mrf.mxu1  ;;  %7383 = vmatmul.mubr.bf16.gmra.mxu1 %v15934_v12  ;;  %v8153_v43 = vmax.f32 %v7139_v45, 0.0  ;;  %v7141_v48 = vadd.f32 %v7140_v58, %v6788_v62  ;;  %v6792_v2 = vadd.f32 %v6791_v31, %v15940_v47  ;;  %7039 = vmatprep.mubr.bf16.mxu0 %v18707_v25  ;;  %v18709_v25 = vld [vmem:[#allocation49_spill] sm:$0xff] }
 0x534   :  { %7392 = vmatprep.mubr.bf16.mxu1 %v15958_v36  ;;  %v6793_v49 = vpop.f32.mrf.mxu0 }
 0x535   :  { %v7146_v50 = vpop.f32.mrf.mxu1  ;;  %v16026_v10 = vpack.c.bf16 %v8153_v43, %v8149_v7  ;;  %v8154_v24 = vmax.f32 %v7141_v48, 0.0  ;;  %v7145_v5 = vadd.f32 %v7144_v54, %v6792_v2  ;;  %v6794_v52 = vadd.f32 %v6793_v49, %v15947_v37 }
 0x536   :  { %v6795_v60 = vpop.f32.mrf.mxu0 }
 0x537   :  { %18708 = vst [vmem:[#allocation109_spill] sm:$0xff] %v16026_v10  ;;  %v7148_v15 = vpop.f32.mrf.mxu1  ;;  %v7147_v55 = vadd.f32 %v7146_v50, %v6794_v52  ;;  %v6796_v45 = vadd.f32 %v6795_v60, %v15940_v47  ;;  %v16030_v58 = vpack.c.bf16 %v8154_v24, %v8150_v61  ;;  %v8157_v54 = vmax.f32 %v7145_v5, 0.0  ;;  %v18855_v10 = vld [vmem:[#allocation84_spill] sm:$0xff] }
 0x538   :  { %v6797_v31 = vpop.f32.mrf.mxu0 }
 0x539   :  { %v7150_v62 = vpop.f32.mrf.mxu1  ;;  %v7149_v3 = vadd.f32 %v7148_v15, %v6796_v45  ;;  %v6798_v38 = vadd.f32 %v6797_v31, %v15947_v37  ;;  %v8158_v61 = vmax.f32 %v7147_v55, 0.0  ;;  %v11510_v55 = vld [vmem:[%s18055_s5 + $0xb8] sm:$0xff]  }
 0x53a   :  { %v6801_v36 = vpop.f32.mrf.mxu0  ;;  %7040 = vmatmul.mubr.bf16.gmra.mxu0 %v18709_v25 }
 0x53b   :  { %v7154_v7 = vpop.f32.mrf.mxu1  ;;  %7393 = vmatmul.mubr.bf16.gmra.mxu1 %v15954_v9  ;;  %v8161_v43 = vmax.f32 %v7149_v3, 0.0  ;;  %v7151_v48 = vadd.f32 %v7150_v62, %v6798_v38  ;;  %v6802_v2 = vadd.f32 %v6801_v36, %v15940_v47  ;;  %7435 = vmatprep.mubr.bf16.mxu0 %v13673_v11 }
 0x53c   :  { %7788 = vmatprep.mubr.bf16.mxu1 %v15347_v32  ;;  %v6803_v49 = vpop.f32.mrf.mxu0  ;;  %v11509_v32 = vld [vmem:[%s18055_s5 + $0x38] sm:$0xff]  }
 0x53d   :  { %v7156_v15 = vpop.f32.mrf.mxu1  ;;  %v16038_v50 = vpack.c.bf16 %v8161_v43, %v8157_v54  ;;  %v8162_v24 = vmax.f32 %v7151_v48, 0.0  ;;  %v7155_v52 = vadd.f32 %v7154_v7, %v6802_v2  ;;  %v6804_v60 = vadd.f32 %v6803_v49, %v15947_v37 }
 0x53e   :  { %v6805_v45 = vpop.f32.mrf.mxu0 }
 0x53f   :  { %18710 = vst [vmem:[#allocation110_spill] sm:$0xff] %v16038_v50  ;;  %v7158_v31 = vpop.f32.mrf.mxu1  ;;  %v7157_v5 = vadd.f32 %v7156_v15, %v6804_v60  ;;  %v6806_v3 = vadd.f32 %v6805_v45, %v15940_v47  ;;  %v16042_v62 = vpack.c.bf16 %v8162_v24, %v8158_v61  ;;  %v8165_v48 = vmax.f32 %v7155_v52, 0.0 }
 0x540   :  { %v6807_v36 = vpop.f32.mrf.mxu0 }
 0x541   :  { %18711 = vst [vmem:[#allocation111_spill] sm:$0xff] %v16042_v62  ;;  %v7160_v11 = vpop.f32.mrf.mxu1  ;;  %v7159_v38 = vadd.f32 %v7158_v31, %v6806_v3  ;;  %v6808_v7 = vadd.f32 %v6807_v36, %v15947_v37  ;;  %v8166_v15 = vmax.f32 %v7157_v5, 0.0  ;;  %v18854_v62 = vld [vmem:[#allocation50_spill] sm:$0xff] }
 0x542   :  { %v6811_v54 = vpop.f32.mrf.mxu0  ;;  %7436 = vmatmul.mubr.bf16.vlgmr.msra.gmra.mxu0 %v13660_v29  ;;  %v11511_v29 = vld [vmem:[%s18055_s5 + $0x30] sm:$0xff]  }
 0x543   :  { %v7164_v43 = vpop.f32.mrf.mxu1  ;;  %7789 = vmatmul.mubr.bf16.vlgmr.msra.gmra.mxu1 %v15343_v16  ;;  %v8169_v2 = vmax.f32 %v7159_v38, 0.0  ;;  %v7161_v61 = vadd.f32 %v7160_v11, %v6808_v7  ;;  %v6812_v49 = vadd.f32 %v6811_v54, %v15940_v47  ;;  %7445 = vmatprep.mubr.bf16.mxu0 %v13692_v57  ;;  %v11512_v16 = vld [vmem:[%s18055_s5 + $0xb0] sm:$0xff]   ;;  %v11513_v38 = vld [vmem:[%s18055_s5 + $0x28] sm:$0xff]  }
 0x544   :  { %7798 = vmatprep.mubr.bf16.mxu1 %v15366_v34  ;;  %8757 = vmatpush1.bf16.msra.mxu0 %v11509_v32  ;;  %v6813_v24 = vpop.f32.mrf.mxu0  ;;  %v11514_v7 = vld [vmem:[%s18055_s5 + $0xa8] sm:$0xff]  }
 0x545   :  { %v7166_v60 = vpop.f32.mrf.mxu1  ;;  %9046 = vmatpush1.bf16.msra.mxu1 %v11510_v55  ;;  %v16062_v52 = vpack.c.bf16 %v8169_v2, %v8165_v48  ;;  %v8170_v45 = vmax.f32 %v7161_v61, 0.0  ;;  %v7165_v31 = vadd.f32 %v7164_v43, %v6812_v49  ;;  %v6814_v57 = vadd.f32 %v6813_v24, %v15947_v37  ;;  %8758 = vmatprep.subr.bf16.mxu0 %v18194_v59 }
 0x546   :  { %9047 = vmatprep.subr.bf16.mxu1 %v18194_v59  ;;  %v6815_v34 = vpop.f32.mrf.mxu0 }
 0x547   :  { %18712 = vst [vmem:[#allocation112_spill] sm:$0xff] %v16062_v52  ;;  %v7168_v5 = vpop.f32.mrf.mxu1  ;;  %v7167_v3 = vadd.f32 %v7166_v60, %v6814_v57  ;;  %v6816_v36 = vadd.f32 %v6815_v34, %v15940_v47  ;;  %v16068_v11 = vpack.c.bf16 %v8170_v45, %v8166_v15  ;;  %v8173_v61 = vmax.f32 %v7165_v31, 0.0 }
 0x548   :  { %v6817_v32 = vpop.f32.mrf.mxu0  ;;  %8759 = vmatpush1.bf16.msra.mxu0 %v11511_v29 }
 0x549   :  { %18713 = vst [vmem:[#allocation113_spill] sm:$0xff] %v16068_v11  ;;  %v7170_v55 = vpop.f32.mrf.mxu1  ;;  %9048 = vmatpush1.bf16.msra.mxu1 %v11512_v16  ;;  %v7169_v54 = vadd.f32 %v7168_v5, %v6816_v36  ;;  %v6818_v43 = vadd.f32 %v6817_v32, %v15947_v37  ;;  %8760 = vmatprep.subr.bf16.mxu0 %v18194_v59  ;;  %v8174_v60 = vmax.f32 %v7167_v3, 0.0 }
 0x54a   :  { %9049 = vmatprep.subr.bf16.mxu1 %v18194_v59  ;;  %v6821_v48 = vpop.f32.mrf.mxu0  ;;  %7446 = vmatmul.mubr.bf16.gmra.mxu0 %v13679_v20  ;;  %v11515_v20 = vld [vmem:[%s18055_s5 + $0x20] sm:$0xff]  }
 0x54b   :  { %v7174_v2 = vpop.f32.mrf.mxu1  ;;  %7799 = vmatmul.mubr.bf16.gmra.mxu1 %v15362_v13  ;;  %v8177_v49 = vmax.f32 %v7169_v54, 0.0  ;;  %v7171_v15 = vadd.f32 %v7170_v55, %v6818_v43  ;;  %v6822_v24 = vadd.f32 %v6821_v48, %v15940_v47  ;;  %7455 = vmatprep.mubr.bf16.mxu0 %v13711_v44  ;;  %v11516_v13 = vld [vmem:[%s18055_s5 + $0xa0] sm:$0xff]  }
 0x54c   :  { %7808 = vmatprep.mubr.bf16.mxu1 %v15385_v19  ;;  %v6823_v29 = vpop.f32.mrf.mxu0  ;;  %8761 = vmatpush1.bf16.msra.mxu0 %v11513_v38  ;;  %v11517_v38 = vld [vmem:[%s18055_s5 + $0x18] sm:$0xff]  }
 0x54d   :  { %v7176_v16 = vpop.f32.mrf.mxu1  ;;  %9050 = vmatpush1.bf16.msra.mxu1 %v11514_v7  ;;  %v16090_v45 = vpack.c.bf16 %v8177_v49, %v8173_v61  ;;  %v8178_v31 = vmax.f32 %v7171_v15, 0.0  ;;  %v7175_v57 = vadd.f32 %v7174_v2, %v6822_v24  ;;  %v6824_v44 = vadd.f32 %v6823_v29, %v15947_v37  ;;  %8762 = vmatprep.subr.bf16.mxu0 %v18194_v59  ;;  %v11518_v7 = vld [vmem:[%s18055_s5 + $0x98] sm:$0xff]  }
 0x54e   :  { %9051 = vmatprep.subr.bf16.mxu1 %v18194_v59  ;;  %v6825_v19 = vpop.f32.mrf.mxu0 }
 0x54f   :  { %18714 = vst [vmem:[#allocation114_spill] sm:$0xff] %v16090_v45  ;;  %v7178_v34 = vpop.f32.mrf.mxu1  ;;  %v7177_v5 = vadd.f32 %v7176_v16, %v6824_v44  ;;  %v6826_v3 = vadd.f32 %v6825_v19, %v15940_v47  ;;  %v16096_v36 = vpack.c.bf16 %v8178_v31, %v8174_v60  ;;  %v8181_v61 = vmax.f32 %v7175_v57, 0.0 }
 0x550   :  { %v6827_v32 = vpop.f32.mrf.mxu0  ;;  %8763 = vmatpush1.bf16.msra.mxu0 %v11515_v20 }
 0x551   :  { %18715 = vst [vmem:[#allocation15_spill] sm:$0xff] %v16096_v36  ;;  %v7180_v55 = vpop.f32.mrf.mxu1  ;;  %9052 = vmatpush1.bf16.msra.mxu1 %v11516_v13  ;;  %v7179_v54 = vadd.f32 %v7178_v34, %v6826_v3  ;;  %v6828_v43 = vadd.f32 %v6827_v32, %v15947_v37  ;;  %8764 = vmatprep.subr.bf16.mxu0 %v18194_v59  ;;  %v8182_v60 = vmax.f32 %v7177_v5, 0.0  ;;  %v11521_v32 = vld [vmem:[%s18055_s5 + $0x8] sm:$0xff]  }
 0x552   :  { %9053 = vmatprep.subr.bf16.mxu1 %v18194_v59  ;;  %v6831_v48 = vpop.f32.mrf.mxu0  ;;  %7456 = vmatmul.mubr.bf16.gmra.mxu0 %v18511_v4  ;;  %v11519_v4 = vld [vmem:[%s18055_s5 + $0x10] sm:$0xff]  }
 0x553   :  { %v7184_v2 = vpop.f32.mrf.mxu1  ;;  %7809 = vmatmul.mubr.bf16.gmra.mxu1 %v15381_v28  ;;  %v8185_v49 = vmax.f32 %v7179_v54, 0.0  ;;  %v7181_v15 = vadd.f32 %v7180_v55, %v6828_v43  ;;  %v6832_v24 = vadd.f32 %v6831_v48, %v15940_v47  ;;  %7465 = vmatprep.mubr.bf16.mxu0 %v18513_v18  ;;  %v11520_v28 = vld [vmem:[%s18055_s5 + $0x90] sm:$0xff]   ;;  %v11522_v55 = vld [vmem:[%s18055_s5 + $0x88] sm:$0xff]  }
 0x554   :  { %7818 = vmatprep.mubr.bf16.mxu1 %v15404_v40  ;;  %v6833_v29 = vpop.f32.mrf.mxu0  ;;  %8765 = vmatpush1.bf16.msra.mxu0 %v11517_v38 }
 0x555   :  { %v7186_v16 = vpop.f32.mrf.mxu1  ;;  %9054 = vmatpush1.bf16.msra.mxu1 %v11518_v7  ;;  %v16118_v20 = vpack.c.bf16 %v8185_v49, %v8181_v61  ;;  %v8186_v13 = vmax.f32 %v7181_v15, 0.0  ;;  %v7185_v31 = vadd.f32 %v7184_v2, %v6832_v24  ;;  %v6834_v18 = vadd.f32 %v6833_v29, %v15947_v37  ;;  %8766 = vmatprep.subr.bf16.mxu0 %v18194_v59 }
 0x556   :  { %9055 = vmatprep.subr.bf16.mxu1 %v18194_v59  ;;  %v6835_v40 = vpop.f32.mrf.mxu0 }
 0x557   :  { %18716 = vst [vmem:[#allocation115_spill] sm:$0xff] %v16118_v20  ;;  %v7188_v57 = vpop.f32.mrf.mxu1  ;;  %v7187_v44 = vadd.f32 %v7186_v16, %v6834_v18  ;;  %v6836_v19 = vadd.f32 %v6835_v40, %v15940_v47  ;;  %v16124_v34 = vpack.c.bf16 %v8186_v13, %v8182_v60  ;;  %v8189_v48 = vmax.f32 %v7185_v31, 0.0 }
 0x558   :  { %v6837_v5 = vpop.f32.mrf.mxu0  ;;  %8767 = vmatpush1.bf16.msra.mxu0 %v11519_v4 }
 0x559   :  { %18717 = vst [vmem:[#allocation116_spill] sm:$0xff] %v16124_v34  ;;  %v7190_v3 = vpop.f32.mrf.mxu1  ;;  %9056 = vmatpush1.bf16.msra.mxu1 %v11520_v28  ;;  %v7189_v38 = vadd.f32 %v7188_v57, %v6836_v19  ;;  %v6838_v7 = vadd.f32 %v6837_v5, %v15947_v37  ;;  %8768 = vmatprep.subr.bf16.mxu0 %v18194_v59  ;;  %v8190_v15 = vmax.f32 %v7187_v44, 0.0  ;;  %v11525_v44 = vld [vmem:[%s18055_s5 + $0x78] sm:$0xff]  }
 0x55a   :  { %9057 = vmatprep.subr.bf16.mxu1 %v18194_v59  ;;  %v6841_v54 = vpop.f32.mrf.mxu0  ;;  %7466 = vmatmul.mubr.bf16.gmra.mxu0 %v18519_v8  ;;  %v11523_v8 = vld [vmem:[%s18055_s5] sm:$0xff]   ;;  %v11526_v19 = vld [vmem:[%s18055_s5 + $0xf8] sm:$0xff]  }
 0x55b   :  { %v7194_v43 = vpop.f32.mrf.mxu1  ;;  %7819 = vmatmul.mubr.bf16.gmra.mxu1 %v15400_v23  ;;  %v8193_v2 = vmax.f32 %v7189_v38, 0.0  ;;  %v7191_v61 = vadd.f32 %v7190_v3, %v6838_v7  ;;  %v6842_v49 = vadd.f32 %v6841_v54, %v15940_v47  ;;  %7475 = vmatprep.mubr.bf16.mxu0 %v18521_v42  ;;  %v11524_v23 = vld [vmem:[%s18055_s5 + $0x80] sm:$0xff]  }
 0x55c   :  { %7828 = vmatprep.mubr.bf16.mxu1 %v15423_v33  ;;  %v6843_v24 = vpop.f32.mrf.mxu0  ;;  %8769 = vmatpush1.bf16.msra.mxu0 %v11521_v32 }
 0x55d   :  { %v7196_v60 = vpop.f32.mrf.mxu1  ;;  %9058 = vmatpush1.bf16.msra.mxu1 %v11522_v55  ;;  %v16146_v29 = vpack.c.bf16 %v8193_v2, %v8189_v48  ;;  %v8194_v16 = vmax.f32 %v7191_v61, 0.0  ;;  %v7195_v4 = vadd.f32 %v7194_v43, %v6842_v49  ;;  %v6844_v42 = vadd.f32 %v6843_v24, %v15947_v37  ;;  %8770 = vmatprep.subr.bf16.mxu0 %v18194_v59 }
 0x55e   :  { %9059 = vmatprep.subr.bf16.mxu1 %v18194_v59  ;;  %v6845_v33 = vpop.f32.mrf.mxu0 }
 0x55f   :  { %18718 = vst [vmem:[#allocation117_spill] sm:$0xff] %v16146_v29  ;;  %v7198_v28 = vpop.f32.mrf.mxu1  ;;  %v7197_v13 = vadd.f32 %v7196_v60, %v6844_v42  ;;  %v6846_v31 = vadd.f32 %v6845_v33, %v15940_v47  ;;  %v16152_v18 = vpack.c.bf16 %v8194_v16, %v8190_v15  ;;  %v8197_v38 = vmax.f32 %v7195_v4, 0.0  ;;  %v11529_v33 = vld [vmem:[%s18055_s5 + $0x68] sm:$0xff]   ;;  %v18849_v29 = vld [vmem:[#allocation48_spill] sm:$0xff] }
 0x560   :  { %v6847_v40 = vpop.f32.mrf.mxu0  ;;  %8771 = vmatpush1.bf16.msra.mxu0 %v11523_v8 }
 0x561   :  { %18719 = vst [vmem:[#allocation118_spill] sm:$0xff] %v16152_v18  ;;  %v7200_v57 = vpop.f32.mrf.mxu1  ;;  %9060 = vmatpush1.bf16.msra.mxu1 %v11524_v23  ;;  %v7199_v5 = vadd.f32 %v7198_v28, %v6846_v31  ;;  %v6848_v3 = vadd.f32 %v6847_v40, %v15947_v37  ;;  %8772 = vmatprep.subr.bf16.mxu0 %v18194_v59  ;;  %v8198_v48 = vmax.f32 %v7197_v13, 0.0  ;;  %v11530_v31 = vld [vmem:[%s18055_s5 + $0xe8] sm:$0xff]   ;;  %v18850_v18 = vld [vmem:[#allocation83_spill] sm:$0xff] }
 0x562   :  { %9061 = vmatprep.subr.bf16.mxu1 %v18194_v59  ;;  %v6851_v32 = vpop.f32.mrf.mxu0  ;;  %7476 = vmatmul.mubr.bf16.gmra.mxu0 %v18527_v39  ;;  %v11527_v39 = vld [vmem:[%s18055_s5 + $0x70] sm:$0xff]  }
 0x563   :  { %v7204_v55 = vpop.f32.mrf.mxu1  ;;  %7829 = vmatmul.mubr.bf16.gmra.mxu1 %v15419_v46  ;;  %v8201_v7 = vmax.f32 %v7199_v5, 0.0  ;;  %v7201_v54 = vadd.f32 %v7200_v57, %v6848_v3  ;;  %v6852_v43 = vadd.f32 %v6851_v32, %v15940_v47  ;;  %7485 = vmatprep.mubr.bf16.mxu0 %v18529_v1  ;;  %v11528_v46 = vld [vmem:[%s18055_s5 + $0xf0] sm:$0xff]   ;;  %v18722_v32 = vld [vmem:[#allocation97_spill] sm:$0xff] }
 0x564   :  { %7838 = vmatprep.mubr.bf16.mxu1 %v15442_v6  ;;  %v6853_v2 = vpop.f32.mrf.mxu0  ;;  %8773 = vmatpush2.bf16.msra.mxu0 %v11525_v44 }
 0x565   :  { %v7206_v61 = vpop.f32.mrf.mxu1  ;;  %9062 = vmatpush2.bf16.msra.mxu1 %v11526_v19  ;;  %v16174_v49 = vpack.c.bf16 %v8201_v7, %v8197_v38  ;;  %v8202_v15 = vmax.f32 %v7201_v54, 0.0  ;;  %v7205_v24 = vadd.f32 %v7204_v55, %v6852_v43  ;;  %v6854_v1 = vadd.f32 %v6853_v2, %v15947_v37  ;;  %8774 = vmatprep.subr.bf16.mxu0 %v18194_v59  ;;  %v18723_v55 = vld [vmem:[#allocation154_spill] sm:$0xff] }
 0x566   :  { %9063 = vmatprep.subr.bf16.mxu1 %v18194_v59  ;;  %v6855_v6 = vpop.f32.mrf.mxu0 }
 0x567   :  { %18720 = vst [vmem:[#allocation119_spill] sm:$0xff] %v16174_v49  ;;  %v7208_v60 = vpop.f32.mrf.mxu1  ;;  %v7207_v8 = vadd.f32 %v7206_v61, %v6854_v1  ;;  %v6856_v23 = vadd.f32 %v6855_v6, %v15940_v47  ;;  %v16180_v16 = vpack.c.bf16 %v8202_v15, %v8198_v48  ;;  %v8205_v44 = vmax.f32 %v7205_v24, 0.0 }
 0x568   :  { %v6857_v4 = vpop.f32.mrf.mxu0  ;;  %8775 = vmatpush2.bf16.msra.mxu0 %v11527_v39 }
 0x569   :  { %18721 = vst [vmem:[#allocation120_spill] sm:$0xff] %v16180_v16  ;;  %v7210_v42 = vpop.f32.mrf.mxu1  ;;  %9064 = vmatpush2.bf16.msra.mxu1 %v11528_v46  ;;  %v7209_v28 = vadd.f32 %v7208_v60, %v6856_v23  ;;  %v6858_v13 = vadd.f32 %v6857_v4, %v15947_v37  ;;  %8776 = vmatprep.subr.bf16.mxu0 %v18194_v59  ;;  %v8206_v38 = vmax.f32 %v7207_v8, 0.0  ;;  %v18726_v4 = vld [vmem:[#allocation96_spill] sm:$0xff] }
 0x56a   :  { %9065 = vmatprep.subr.bf16.mxu1 %v18194_v59  ;;  %v6861_v40 = vpop.f32.mrf.mxu0  ;;  %7486 = vmatmul.mubr.bf16.gmra.mxu0 %v18535_v35 }
 0x56b   :  { %v7214_v57 = vpop.f32.mrf.mxu1  ;;  %7839 = vmatmul.mubr.bf16.gmra.mxu1 %v15438_v56  ;;  %v8209_v19 = vmax.f32 %v7209_v28, 0.0  ;;  %v7211_v5 = vadd.f32 %v7210_v42, %v6858_v13  ;;  %v6862_v3 = vadd.f32 %v6861_v40, %v15940_v47  ;;  %7495 = vmatprep.mubr.bf16.mxu0 %v18722_v32  ;;  %v18727_v42 = vld [vmem:[#allocation153_spill] sm:$0xff]  ;;  %v18728_v40 = vld [vmem:[#allocation99_spill] sm:$0xff] }
 0x56c   :  { %7848 = vmatprep.mubr.bf16.mxu1 %v18723_v55  ;;  %v6863_v7 = vpop.f32.mrf.mxu0  ;;  %8777 = vmatpush2.bf16.msra.mxu0 %v11529_v33 }
 0x56d   :  { %v7216_v54 = vpop.f32.mrf.mxu1  ;;  %9066 = vmatpush2.bf16.msra.mxu1 %v11530_v31  ;;  %v16196_v43 = vpack.c.bf16 %v8209_v19, %v8205_v44  ;;  %v8210_v48 = vmax.f32 %v7211_v5, 0.0  ;;  %v7215_v35 = vadd.f32 %v7214_v57, %v6862_v3  ;;  %v6864_v56 = vadd.f32 %v6863_v7, %v15947_v37  ;;  %8778 = vmatprep.subr.bf16.mxu0 %v18194_v59  ;;  %v18729_v57 = vld [vmem:[#allocation156_spill] sm:$0xff] }
 0x56e   :  { %9067 = vmatprep.subr.bf16.mxu1 %v18194_v59  ;;  %v6865_v2 = vpop.f32.mrf.mxu0 }
 0x56f   :  { %18724 = vst [vmem:[#allocation121_spill] sm:$0xff] %v16196_v43  ;;  %v7218_v61 = vpop.f32.mrf.mxu1  ;;  %v7217_v39 = vadd.f32 %v7216_v54, %v6864_v56  ;;  %v6866_v46 = vadd.f32 %v6865_v2, %v15940_v47  ;;  %v16202_v15 = vpack.c.bf16 %v8210_v48, %v8206_v38  ;;  %v8213_v33 = vmax.f32 %v7215_v35, 0.0  ;;  %v11531_v56 = vld [vmem:[%s18055_s5 + $0x60] sm:$0xff]  }
 0x570   :  { %v6867_v24 = vpop.f32.mrf.mxu0  ;;  %8779 = vmatpush2.bf16.msra.mxu0 %v11531_v56 }
 0x571   :  { %18725 = vst [vmem:[#allocation122_spill] sm:$0xff] %v16202_v15  ;;  %v7220_v1 = vpop.f32.mrf.mxu1  ;;  %v7219_v6 = vadd.f32 %v7218_v61, %v6866_v46  ;;  %v6868_v60 = vadd.f32 %v6867_v24, %v15947_v37  ;;  %v8214_v44 = vmax.f32 %v7217_v39, 0.0  ;;  %8780 = vmatprep.subr.bf16.mxu0 %v18194_v59 }
 0x572   :  { %v6871_v8 = vpop.f32.mrf.mxu0  ;;  %7496 = vmatmul.mubr.bf16.gmra.mxu0 %v18726_v4 }
 0x573   :  { %v7224_v23 = vpop.f32.mrf.mxu1  ;;  %7849 = vmatmul.mubr.bf16.gmra.mxu1 %v18727_v42  ;;  %v8217_v28 = vmax.f32 %v7219_v6, 0.0  ;;  %v7221_v13 = vadd.f32 %v7220_v1, %v6868_v60  ;;  %v6872_v31 = vadd.f32 %v6871_v8, %v15940_v47  ;;  %7505 = vmatprep.mubr.bf16.mxu0 %v18728_v40  ;;  %v11532_v1 = vld [vmem:[%s18055_s5 + $0xe0] sm:$0xff]   ;;  %v18732_v8 = vld [vmem:[#allocation98_spill] sm:$0xff] }
 0x574   :  { %7858 = vmatprep.mubr.bf16.mxu1 %v18729_v57  ;;  %v6873_v19 = vpop.f32.mrf.mxu0  ;;  %9068 = vmatpush2.bf16.msra.mxu1 %v11532_v1 }
 0x575   :  { %v7226_v5 = vpop.f32.mrf.mxu1  ;;  %v16210_v3 = vpack.c.bf16 %v8217_v28, %v8213_v33  ;;  %v8218_v32 = vmax.f32 %v7221_v13, 0.0  ;;  %v7225_v55 = vadd.f32 %v7224_v23, %v6872_v31  ;;  %v6874_v38 = vadd.f32 %v6873_v19, %v15947_v37  ;;  %v18733_v23 = vld [vmem:[#allocation155_spill] sm:$0xff]  ;;  %v18734_v13 = vld [vmem:[#allocation101_spill] sm:$0xff]  ;;  %9069 = vmatprep.subr.bf16.mxu1 %v18194_v59 }
 0x576   :  { %v6875_v7 = vpop.f32.mrf.mxu0  ;;  %v18735_v31 = vld [vmem:[#allocation51_spill] sm:$0xff] }
 0x577   :  { %18730 = vst [vmem:[#allocation123_spill] sm:$0xff] %v16210_v3  ;;  %v7228_v54 = vpop.f32.mrf.mxu1  ;;  %v7227_v48 = vadd.f32 %v7226_v5, %v6874_v38  ;;  %v6876_v35 = vadd.f32 %v6875_v7, %v15940_v47  ;;  %v16217_v2 = vpack.c.bf16 %v8218_v32, %v8214_v44  ;;  %v8221_v4 = vmax.f32 %v7225_v55, 0.0 }
 0x578   :  { %v6877_v61 = vpop.f32.mrf.mxu0 }
 0x579   :  { %18731 = vst [vmem:[#allocation124_spill] sm:$0xff] %v16217_v2  ;;  %v7230_v39 = vpop.f32.mrf.mxu1  ;;  %v7229_v46 = vadd.f32 %v7228_v54, %v6876_v35  ;;  %v6878_v24 = vadd.f32 %v6877_v61, %v15947_v37  ;;  %v8222_v40 = vmax.f32 %v7227_v48, 0.0 }
 0x57a   :  { %v6881_v6 = vpop.f32.mrf.mxu0  ;;  %7506 = vmatmul.mubr.bf16.gmra.mxu0 %v18732_v8 }
 0x57b   :  { %v7234_v60 = vpop.f32.mrf.mxu1  ;;  %7859 = vmatmul.mubr.bf16.gmra.mxu1 %v18733_v23  ;;  %v8225_v42 = vmax.f32 %v7229_v46, 0.0  ;;  %v7231_v33 = vadd.f32 %v7230_v39, %v6878_v24  ;;  %v6882_v28 = vadd.f32 %v6881_v6, %v15940_v47  ;;  %7515 = vmatprep.mubr.bf16.mxu0 %v18734_v13  ;;  %v18738_v6 = vld [vmem:[#allocation100_spill] sm:$0xff] }
 0x57c   :  { %7868 = vmatprep.mubr.bf16.mxu1 %v18735_v31  ;;  %v6883_v57 = vpop.f32.mrf.mxu0 }
 0x57d   :  { %v7236_v44 = vpop.f32.mrf.mxu1  ;;  %v16229_v19 = vpack.c.bf16 %v8225_v42, %v8221_v4  ;;  %v8226_v5 = vmax.f32 %v7231_v33, 0.0  ;;  %v7235_v32 = vadd.f32 %v7234_v60, %v6882_v28  ;;  %v6884_v55 = vadd.f32 %v6883_v57, %v15947_v37  ;;  %v18739_v60 = vld [vmem:[#allocation157_spill] sm:$0xff]  ;;  %v18740_v33 = vld [vmem:[#allocation6_spill] sm:$0xff] }
 0x57e   :  { %v6885_v38 = vpop.f32.mrf.mxu0  ;;  %v18741_v28 = vld [vmem:[#allocation89_spill] sm:$0xff] }
 0x57f   :  { %18736 = vst [vmem:[#allocation125_spill] sm:$0xff] %v16229_v19  ;;  %v7238_v7 = vpop.f32.mrf.mxu1  ;;  %v7237_v54 = vadd.f32 %v7236_v44, %v6884_v55  ;;  %v6886_v35 = vadd.f32 %v6885_v38, %v15940_v47  ;;  %v16234_v56 = vpack.c.bf16 %v8226_v5, %v8222_v40  ;;  %v8229_v8 = vmax.f32 %v7235_v32, 0.0 }
 0x580   :  { %v6887_v48 = vpop.f32.mrf.mxu0 }
 0x581   :  { %18737 = vst [vmem:[#allocation21_spill] sm:$0xff] %v16234_v56  ;;  %v7240_v61 = vpop.f32.mrf.mxu1  ;;  %v7239_v39 = vadd.f32 %v7238_v7, %v6886_v35  ;;  %v6888_v46 = vadd.f32 %v6887_v48, %v15947_v37  ;;  %v8230_v13 = vmax.f32 %v7237_v54, 0.0  ;;  %v11533_v48 = vld [vmem:[%s18055_s5 + $0x58] sm:$0xff]  }
 0x582   :  { %v6891_v24 = vpop.f32.mrf.mxu0  ;;  %7516 = vmatmul.mubr.bf16.gmra.mxu0 %v18738_v6 }
 0x583   :  { %v7244_v1 = vpop.f32.mrf.mxu1  ;;  %7869 = vmatmul.mubr.bf16.gmra.mxu1 %v18739_v60  ;;  %v8233_v23 = vmax.f32 %v7239_v39, 0.0  ;;  %v7241_v4 = vadd.f32 %v7240_v61, %v6888_v46  ;;  %v6892_v42 = vadd.f32 %v6891_v24, %v15940_v47  ;;  %7525 = vmatprep.mubr.bf16.mxu0 %v18740_v33 }
 0x584   :  { %7878 = vmatprep.mubr.bf16.mxu1 %v18741_v28  ;;  %v6893_v31 = vpop.f32.mrf.mxu0  ;;  %8781 = vmatpush2.bf16.msra.mxu0 %v11533_v48 }
 0x585   :  { %v7246_v40 = vpop.f32.mrf.mxu1  ;;  %v16242_v57 = vpack.c.bf16 %v8233_v23, %v8229_v8  ;;  %v8234_v44 = vmax.f32 %v7241_v4, 0.0  ;;  %v7245_v5 = vadd.f32 %v7244_v1, %v6892_v42  ;;  %v6894_v55 = vadd.f32 %v6893_v31, %v15947_v37  ;;  %v11534_v1 = vld [vmem:[%s18055_s5 + $0xd8] sm:$0xff]   ;;  %v18744_v8 = vld [vmem:[#allocation102_spill] sm:$0xff]  ;;  %v18747_v31 = vld [vmem:[#allocation91_spill] sm:$0xff]  ;;  %8782 = vmatprep.subr.bf16.mxu0 %v18194_v59 }
 0x586   :  { %v6895_v38 = vpop.f32.mrf.mxu0  ;;  %v18745_v23 = vld [vmem:[#allocation52_spill] sm:$0xff]  ;;  %9070 = vmatpush2.bf16.msra.mxu1 %v11534_v1 }
 0x587   :  { %18742 = vst [vmem:[#allocation126_spill] sm:$0xff] %v16242_v57  ;;  %v7248_v7 = vpop.f32.mrf.mxu1  ;;  %v7247_v32 = vadd.f32 %v7246_v40, %v6894_v55  ;;  %v6896_v35 = vadd.f32 %v6895_v38, %v15940_v47  ;;  %v16249_v61 = vpack.c.bf16 %v8234_v44, %v8230_v13  ;;  %v8237_v4 = vmax.f32 %v7245_v5, 0.0  ;;  %v18746_v13 = vld [vmem:[#allocation8_spill] sm:$0xff]  ;;  %9071 = vmatprep.subr.bf16.mxu1 %v18194_v59 }
 0x588   :  { %v6897_v54 = vpop.f32.mrf.mxu0 }
 0x589   :  { %18743 = vst [vmem:[#allocation127_spill] sm:$0xff] %v16249_v61  ;;  %v7250_v39 = vpop.f32.mrf.mxu1  ;;  %v7249_v46 = vadd.f32 %v7248_v7, %v6896_v35  ;;  %v6898_v24 = vadd.f32 %v6897_v54, %v15947_v37  ;;  %v8238_v40 = vmax.f32 %v7247_v32, 0.0 }
 0x58a   :  { %v6901_v6 = vpop.f32.mrf.mxu0  ;;  %7526 = vmatmul.mubr.bf16.gmra.mxu0 %v18744_v8 }
 0x58b   :  { %v7254_v60 = vpop.f32.mrf.mxu1  ;;  %7879 = vmatmul.mubr.bf16.gmra.mxu1 %v18745_v23  ;;  %v8241_v42 = vmax.f32 %v7249_v46, 0.0  ;;  %v7251_v33 = vadd.f32 %v7250_v39, %v6898_v24  ;;  %v6902_v28 = vadd.f32 %v6901_v6, %v15940_v47  ;;  %7535 = vmatprep.mubr.bf16.mxu0 %v18746_v13 }
 0x58c   :  { %7888 = vmatprep.mubr.bf16.mxu1 %v18747_v31  ;;  %v6903_v44 = vpop.f32.mrf.mxu0 }
 0x58d   :  { %v7256_v55 = vpop.f32.mrf.mxu1  ;;  %v16261_v38 = vpack.c.bf16 %v8241_v42, %v8237_v4  ;;  %v8242_v7 = vmax.f32 %v7251_v33, 0.0  ;;  %v7255_v35 = vadd.f32 %v7254_v60, %v6902_v28  ;;  %v6904_v5 = vadd.f32 %v6903_v44, %v15947_v37  ;;  %v18750_v42 = vld [vmem:[#allocation7_spill] sm:$0xff]  ;;  %v18751_v60 = vld [vmem:[#allocation53_spill] sm:$0xff]  ;;  %v18752_v44 = vld [vmem:[#allocation10_spill] sm:$0xff] }
 0x58e   :  { %v6905_v48 = vpop.f32.mrf.mxu0 }
 0x58f   :  { %18748 = vst [vmem:[#allocation128_spill] sm:$0xff] %v16261_v38  ;;  %v7258_v54 = vpop.f32.mrf.mxu1  ;;  %v7257_v39 = vadd.f32 %v7256_v55, %v6904_v5  ;;  %v6906_v46 = vadd.f32 %v6905_v48, %v15940_v47  ;;  %v16266_v24 = vpack.c.bf16 %v8242_v7, %v8238_v40  ;;  %v8245_v33 = vmax.f32 %v7255_v35, 0.0  ;;  %v18753_v40 = vld [vmem:[#allocation55_spill] sm:$0xff] }
 0x590   :  { %v6907_v32 = vpop.f32.mrf.mxu0 }
 0x591   :  { %18749 = vst [vmem:[#allocation129_spill] sm:$0xff] %v16266_v24  ;;  %v7260_v6 = vpop.f32.mrf.mxu1  ;;  %v7259_v1 = vadd.f32 %v7258_v54, %v6906_v46  ;;  %v6908_v8 = vadd.f32 %v6907_v32, %v15947_v37  ;;  %v8246_v55 = vmax.f32 %v7257_v39, 0.0 }
 0x592   :  { %v6911_v23 = vpop.f32.mrf.mxu0  ;;  %7536 = vmatmul.mubr.bf16.gmra.mxu0 %v18750_v42 }
 0x593   :  { %v7264_v4 = vpop.f32.mrf.mxu1  ;;  %7889 = vmatmul.mubr.bf16.gmra.mxu1 %v18751_v60  ;;  %v8249_v28 = vmax.f32 %v7259_v1, 0.0  ;;  %v7261_v13 = vadd.f32 %v7260_v6, %v6908_v8  ;;  %v6912_v31 = vadd.f32 %v6911_v23, %v15940_v47  ;;  %7545 = vmatprep.mubr.bf16.mxu0 %v18752_v44  ;;  %v11535_v1 = vld [vmem:[%s18055_s5 + $0x50] sm:$0xff]  }
 0x594   :  { %7898 = vmatprep.mubr.bf16.mxu1 %v18753_v40  ;;  %v6913_v7 = vpop.f32.mrf.mxu0  ;;  %8783 = vmatpush2.bf16.msra.mxu0 %v11535_v1  ;;  %v18757_v40 = vld [vmem:[#allocation54_spill] sm:$0xff] }
 0x595   :  { %v7266_v5 = vpop.f32.mrf.mxu1  ;;  %v16274_v48 = vpack.c.bf16 %v8249_v28, %v8245_v33  ;;  %v8250_v54 = vmax.f32 %v7261_v13, 0.0  ;;  %v7265_v46 = vadd.f32 %v7264_v4, %v6912_v31  ;;  %v6914_v32 = vadd.f32 %v6913_v7, %v15947_v37  ;;  %v11536_v4 = vld [vmem:[%s18055_s5 + $0xd0] sm:$0xff]   ;;  %v18756_v31 = vld [vmem:[#allocation9_spill] sm:$0xff]  ;;  %8784 = vmatprep.subr.bf16.mxu0 %v18194_v59 }
 0x596   :  { %v6915_v42 = vpop.f32.mrf.mxu0  ;;  %9072 = vmatpush2.bf16.msra.mxu1 %v11536_v4 }
 0x597   :  { %18754 = vst [vmem:[#allocation130_spill] sm:$0xff] %v16274_v48  ;;  %v7268_v60 = vpop.f32.mrf.mxu1  ;;  %v7267_v35 = vadd.f32 %v7266_v5, %v6914_v32  ;;  %v6916_v6 = vadd.f32 %v6915_v42, %v15940_v47  ;;  %v16281_v8 = vpack.c.bf16 %v8250_v54, %v8246_v55  ;;  %v8253_v7 = vmax.f32 %v7265_v46, 0.0  ;;  %v18758_v32 = vld [vmem:[#allocation12_spill] sm:$0xff]  ;;  %v18759_v42 = vld [vmem:[#allocation90_spill] sm:$0xff]  ;;  %9073 = vmatprep.subr.bf16.mxu1 %v18194_v59 }
 0x598   :  { %v6917_v39 = vpop.f32.mrf.mxu0 }
 0x599   :  { %18755 = vst [vmem:[#allocation131_spill] sm:$0xff] %v16281_v8  ;;  %v7270_v23 = vpop.f32.mrf.mxu1  ;;  %v7269_v44 = vadd.f32 %v7268_v60, %v6916_v6  ;;  %v6918_v33 = vadd.f32 %v6917_v39, %v15947_v37  ;;  %v8254_v60 = vmax.f32 %v7267_v35, 0.0 }
 0x59a   :  { %v6921_v28 = vpop.f32.mrf.mxu0  ;;  %7546 = vmatmul.mubr.bf16.gmra.mxu0 %v18756_v31 }
 0x59b   :  { %v7274_v13 = vpop.f32.mrf.mxu1  ;;  %7899 = vmatmul.mubr.bf16.gmra.mxu1 %v18757_v40  ;;  %v8257_v5 = vmax.f32 %v7269_v44, 0.0  ;;  %v7271_v55 = vadd.f32 %v7270_v23, %v6918_v33  ;;  %v6922_v54 = vadd.f32 %v6921_v28, %v15940_v47  ;;  %7555 = vmatprep.mubr.bf16.mxu0 %v18758_v32 }
 0x59c   :  { %7908 = vmatprep.mubr.bf16.mxu1 %v18759_v42  ;;  %v6923_v6 = vpop.f32.mrf.mxu0 }
 0x59d   :  { %v7276_v1 = vpop.f32.mrf.mxu1  ;;  %v16293_v39 = vpack.c.bf16 %v8257_v5, %v8253_v7  ;;  %v8258_v31 = vmax.f32 %v7271_v55, 0.0  ;;  %v7275_v48 = vadd.f32 %v7274_v13, %v6922_v54  ;;  %v6924_v46 = vadd.f32 %v6923_v6, %v15947_v37  ;;  %v18762_v55 = vld [vmem:[#allocation11_spill] sm:$0xff]  ;;  %v18763_v13 = vld [vmem:[#allocation56_spill] sm:$0xff] }
 0x59e   :  { %v6925_v23 = vpop.f32.mrf.mxu0 }
 0x59f   :  { %18760 = vst [vmem:[#allocation132_spill] sm:$0xff] %v16293_v39  ;;  %v7278_v44 = vpop.f32.mrf.mxu1  ;;  %v7277_v33 = vadd.f32 %v7276_v1, %v6924_v46  ;;  %v6926_v28 = vadd.f32 %v6925_v23, %v15940_v47  ;;  %v16298_v40 = vpack.c.bf16 %v8258_v31, %v8254_v60  ;;  %v8261_v54 = vmax.f32 %v7275_v48, 0.0  ;;  %v18764_v46 = vld [vmem:[#allocation14_spill] sm:$0xff]  ;;  %v18765_v60 = vld [vmem:[#allocation93_spill] sm:$0xff] }
 0x5a0   :  { %v6927_v35 = vpop.f32.mrf.mxu0 }
 0x5a1   :  { %18761 = vst [vmem:[#allocation133_spill] sm:$0xff] %v16298_v40  ;;  %v7280_v32 = vpop.f32.mrf.mxu1  ;;  %v7279_v4 = vadd.f32 %v7278_v44, %v6926_v28  ;;  %v6928_v42 = vadd.f32 %v6927_v35, %v15947_v37  ;;  %v8262_v31 = vmax.f32 %v7277_v33, 0.0 }
 0x5a2   :  { %v6931_v7 = vpop.f32.mrf.mxu0  ;;  %7556 = vmatmul.mubr.bf16.gmra.mxu0 %v18762_v55 }
 0x5a3   :  { %v7284_v5 = vpop.f32.mrf.mxu1  ;;  %7909 = vmatmul.mubr.bf16.gmra.mxu1 %v18763_v13  ;;  %v8265_v6 = vmax.f32 %v7279_v4, 0.0  ;;  %v7281_v39 = vadd.f32 %v7280_v32, %v6928_v42  ;;  %v6932_v1 = vadd.f32 %v6931_v7, %v15940_v47  ;;  %7565 = vmatprep.mubr.bf16.mxu0 %v18764_v46  ;;  %v11537_v4 = vld [vmem:[%s18055_s5 + $0x48] sm:$0xff]  }
 0x5a4   :  { %7918 = vmatprep.mubr.bf16.mxu1 %v18765_v60  ;;  %v6933_v23 = vpop.f32.mrf.mxu0  ;;  %8785 = vmatpush2.bf16.msra.mxu0 %v11537_v4 }
 0x5a5   :  { %v7286_v44 = vpop.f32.mrf.mxu1  ;;  %v16306_v28 = vpack.c.bf16 %v8265_v6, %v8261_v54  ;;  %v8266_v35 = vmax.f32 %v7281_v39, 0.0  ;;  %v7285_v40 = vadd.f32 %v7284_v5, %v6932_v1  ;;  %v6934_v55 = vadd.f32 %v6933_v23, %v15947_v37  ;;  %v11538_v39 = vld [vmem:[%s18055_s5 + $0xc8] sm:$0xff]   ;;  %v18768_v1 = vld [vmem:[#allocation13_spill] sm:$0xff]  ;;  %8786 = vmatprep.subr.bf16.mxu0 %v18194_v59 }
 0x5a6   :  { %v6935_v8 = vpop.f32.mrf.mxu0  ;;  %9074 = vmatpush2.bf16.msra.mxu1 %v11538_v39 }
 0x5a7   :  { %18766 = vst [vmem:[#allocation134_spill] sm:$0xff] %v16306_v28  ;;  %v7288_v13 = vpop.f32.mrf.mxu1  ;;  %v7287_v48 = vadd.f32 %v7286_v44, %v6934_v55  ;;  %v6936_v32 = vadd.f32 %v6935_v8, %v15940_v47  ;;  %v16313_v42 = vpack.c.bf16 %v8266_v35, %v8262_v31  ;;  %v18769_v8 = vld [vmem:[#allocation57_spill] sm:$0xff]  ;;  %v8269_v60 = vmax.f32 %v7285_v40, 0.0  ;;  %v18770_v35 = vld [vmem:[#allocation16_spill] sm:$0xff]  ;;  %v18771_v55 = vld [vmem:[#allocation59_spill] sm:$0xff]  ;;  %9075 = vmatprep.subr.bf16.mxu1 %v18194_v59 }
 0x5a8   :  { %v6937_v33 = vpop.f32.mrf.mxu0 }
 0x5a9   :  { %18767 = vst [vmem:[#allocation135_spill] sm:$0xff] %v16313_v42  ;;  %v7290_v7 = vpop.f32.mrf.mxu1  ;;  %v7289_v46 = vadd.f32 %v7288_v13, %v6936_v32  ;;  %v6938_v54 = vadd.f32 %v6937_v33, %v15947_v37  ;;  %v8270_v13 = vmax.f32 %v7287_v48, 0.0 }
 0x5aa   :  { %v6941_v5 = vpop.f32.mrf.mxu0  ;;  %7566 = vmatmul.mubr.bf16.gmra.mxu0 %v18768_v1 }
 0x5ab   :  { %v7294_v6 = vpop.f32.mrf.mxu1  ;;  %7919 = vmatmul.mubr.bf16.gmra.mxu1 %v18769_v8  ;;  %v8273_v23 = vmax.f32 %v7289_v46, 0.0  ;;  %v7291_v31 = vadd.f32 %v7290_v7, %v6938_v54  ;;  %v6942_v44 = vadd.f32 %v6941_v5, %v15940_v47  ;;  %7575 = vmatprep.mubr.bf16.mxu0 %v18770_v35 }
 0x5ac   :  { %7928 = vmatprep.mubr.bf16.mxu1 %v18771_v55  ;;  %v6943_v32 = vpop.f32.mrf.mxu0 }
 0x5ad   :  { %v7296_v4 = vpop.f32.mrf.mxu1  ;;  %v16325_v33 = vpack.c.bf16 %v8273_v23, %v8269_v60  ;;  %v8274_v1 = vmax.f32 %v7291_v31, 0.0  ;;  %v7295_v28 = vadd.f32 %v7294_v6, %v6942_v44  ;;  %v6944_v40 = vadd.f32 %v6943_v32, %v15947_v37  ;;  %v18774_v6 = vld [vmem:[#allocation58_spill] sm:$0xff] }
 0x5ae   :  { %v6945_v7 = vpop.f32.mrf.mxu0 }
 0x5af   :  { %18772 = vst [vmem:[#allocation136_spill] sm:$0xff] %v16325_v33  ;;  %v7298_v46 = vpop.f32.mrf.mxu1  ;;  %v7297_v54 = vadd.f32 %v7296_v4, %v6944_v40  ;;  %v6946_v5 = vadd.f32 %v6945_v7, %v15940_v47  ;;  %v16330_v8 = vpack.c.bf16 %v8274_v1, %v8270_v13  ;;  %v8277_v31 = vmax.f32 %v7295_v28, 0.0  ;;  %v18775_v4 = vld [vmem:[#allocation18_spill] sm:$0xff]  ;;  %v18776_v13 = vld [vmem:[#allocation92_spill] sm:$0xff] }
 0x5b0   :  { %v6947_v48 = vpop.f32.mrf.mxu0 }
 0x5b1   :  { %18773 = vst [vmem:[#allocation137_spill] sm:$0xff] %v16330_v8  ;;  %v7300_v35 = vpop.f32.mrf.mxu1  ;;  %v7299_v39 = vadd.f32 %v7298_v46, %v6946_v5  ;;  %v6948_v55 = vadd.f32 %v6947_v48, %v15947_v37  ;;  %v8278_v1 = vmax.f32 %v7297_v54, 0.0 }
 0x5b2   :  { %v6951_v60 = vpop.f32.mrf.mxu0  ;;  %7576 = vmatmul.mubr.bf16.gmra.mxu0 %v18607_v27 }
 0x5b3   :  { %v7304_v23 = vpop.f32.mrf.mxu1  ;;  %7929 = vmatmul.mubr.bf16.gmra.mxu1 %v18774_v6  ;;  %v8281_v59 = vmax.f32 %v7299_v39, 0.0  ;;  %v7301_v44 = vadd.f32 %v7300_v35, %v6948_v55  ;;  %v6952_v32 = vadd.f32 %v6951_v60, %v15940_v47  ;;  %7585 = vmatprep.mubr.bf16.mxu0 %v18775_v4  ;;  %v11539_v39 = vld [vmem:[%s18055_s5 + $0x40] sm:$0xff]  }
 0x5b4   :  { %7938 = vmatprep.mubr.bf16.mxu1 %v18776_v13  ;;  %v6953_v40 = vpop.f32.mrf.mxu0  ;;  %8787 = vmatpush2.bf16.msra.mxu0 %v11539_v39 }
 0x5b5   :  { %v7306_v7 = vpop.f32.mrf.mxu1  ;;  %v16338_v46 = vpack.c.bf16 %v8281_v59, %v8277_v31  ;;  %v8282_v5 = vmax.f32 %v7301_v44, 0.0  ;;  %v7305_v48 = vadd.f32 %v7304_v23, %v6952_v32  ;;  %v6954_v27 = vadd.f32 %v6953_v40, %v15947_v37  ;;  %v11540_v23 = vld [vmem:[%s18055_s5 + $0xc0] sm:$0xff]  }
 0x5b6   :  { %v6955_v33 = vpop.f32.mrf.mxu0  ;;  %v18779_v32 = vld [vmem:[#allocation17_spill] sm:$0xff]  ;;  %9076 = vmatpush2.bf16.msra.mxu1 %v11540_v23 }
 0x5b7   :  { %18777 = vst [vmem:[#allocation138_spill] sm:$0xff] %v16338_v46  ;;  %v7308_v6 = vpop.f32.mrf.mxu1  ;;  %v7307_v28 = vadd.f32 %v7306_v7, %v6954_v27  ;;  %v6956_v35 = vadd.f32 %v6955_v33, %v15940_v47  ;;  %v16345_v55 = vpack.c.bf16 %v8282_v5, %v8278_v1  ;;  %v18780_v33 = vld [vmem:[#allocation60_spill] sm:$0xff]  ;;  %v8285_v13 = vmax.f32 %v7305_v48, 0.0  ;;  %v18782_v27 = vld [vmem:[#allocation95_spill] sm:$0xff] }
 0x5b8   :  { %v6957_v54 = vpop.f32.mrf.mxu0  ;;  %v18781_v5 = vld [vmem:[#allocation20_spill] sm:$0xff] }
 0x5b9   :  { %18778 = vst [vmem:[#allocation139_spill] sm:$0xff] %v16345_v55  ;;  %v7310_v60 = vpop.f32.mrf.mxu1  ;;  %v7309_v4 = vadd.f32 %v7308_v6, %v6956_v35  ;;  %v6958_v31 = vadd.f32 %v6957_v54, %v15947_v37  ;;  %v8286_v6 = vmax.f32 %v7307_v28, 0.0 }
 0x5ba   :  { %v6961_v59 = vpop.f32.mrf.mxu0  ;;  %7586 = vmatmul.mubr.bf16.gmra.mxu0 %v18779_v32 }
 0x5bb   :  { %v7314_v44 = vpop.f32.mrf.mxu1  ;;  %7939 = vmatmul.mubr.bf16.gmra.mxu1 %v18780_v33  ;;  %v8289_v40 = vmax.f32 %v7309_v4, 0.0  ;;  %v7311_v1 = vadd.f32 %v7310_v60, %v6958_v31  ;;  %v6962_v7 = vadd.f32 %v6961_v59, %v15940_v47  ;;  %7595 = vmatprep.mubr.bf16.mxu0 %v18781_v5 }
 0x5bc   :  { %7948 = vmatprep.mubr.bf16.mxu1 %v18782_v27  ;;  %v6963_v35 = vpop.f32.mrf.mxu0 }
 0x5bd   :  { %v7316_v39 = vpop.f32.mrf.mxu1  ;;  %v16356_v54 = vpack.c.bf16 %v8289_v40, %v8285_v13  ;;  %v8290_v46 = vmax.f32 %v7311_v1, 0.0  ;;  %v7315_v55 = vadd.f32 %v7314_v44, %v6962_v7  ;;  %v6964_v32 = vadd.f32 %v6963_v35, %v15947_v37  ;;  %v18785_v13 = vld [vmem:[#allocation19_spill] sm:$0xff]  ;;  %v18786_v40 = vld [vmem:[#allocation61_spill] sm:$0xff] }
 0x5be   :  { %v6965_v33 = vpop.f32.mrf.mxu0 }
 0x5bf   :  { %18783 = vst [vmem:[#allocation140_spill] sm:$0xff] %v16356_v54  ;;  %v7318_v48 = vpop.f32.mrf.mxu1  ;;  %v7317_v4 = vadd.f32 %v7316_v39, %v6964_v32  ;;  %v6966_v60 = vadd.f32 %v6965_v33, %v15940_v47  ;;  %v16360_v31 = vpack.c.bf16 %v8290_v46, %v8286_v6  ;;  %v8293_v44 = vmax.f32 %v7315_v55, 0.0  ;;  %v18787_v39 = vld [vmem:[#allocation22_spill] sm:$0xff]  ;;  %v18788_v46 = vld [vmem:[#allocation63_spill] sm:$0xff] }
 0x5c0   :  { %v6967_v59 = vpop.f32.mrf.mxu0 }
 0x5c1   :  { %18784 = vst [vmem:[#allocation141_spill] sm:$0xff] %v16360_v31  ;;  %v7320_v5 = vpop.f32.mrf.mxu1  ;;  %v7319_v27 = vadd.f32 %v7318_v48, %v6966_v60  ;;  %v6968_v28 = vadd.f32 %v6967_v59, %v15947_v37  ;;  %v8294_v6 = vmax.f32 %v7317_v4, 0.0 }
 0x5c2   :  { %v6971_v8 = vpop.f32.mrf.mxu0  ;;  %7596 = vmatmul.mubr.bf16.gmra.mxu0 %v18785_v13 }
 0x5c3   :  { %v7324_v23 = vpop.f32.mrf.mxu1  ;;  %7949 = vmatmul.mubr.bf16.gmra.mxu1 %v18786_v40  ;;  %v8297_v1 = vmax.f32 %v7319_v27, 0.0  ;;  %v7321_v7 = vadd.f32 %v7320_v5, %v6968_v28  ;;  %v6972_v35 = vadd.f32 %v6971_v8, %v15940_v47  ;;  %7605 = vmatprep.mubr.bf16.mxu0 %v18787_v39 }
 0x5c4   :  { %7958 = vmatprep.mubr.bf16.mxu1 %v18788_v46  ;;  %v6973_v32 = vpop.f32.mrf.mxu0 }
 0x5c5   :  { %v7326_v33 = vpop.f32.mrf.mxu1  ;;  %v16368_v48 = vpack.c.bf16 %v8297_v1, %v8293_v44  ;;  %v8298_v60 = vmax.f32 %v7321_v7, 0.0  ;;  %v7325_v59 = vadd.f32 %v7324_v23, %v6972_v35  ;;  %v6974_v13 = vadd.f32 %v6973_v32, %v15947_v37  ;;  %v18791_v44 = vld [vmem:[#allocation62_spill] sm:$0xff]  ;;  %v18792_v32 = vld [vmem:[#allocation24_spill] sm:$0xff] }
 0x5c6   :  { %v6975_v54 = vpop.f32.mrf.mxu0 }
 0x5c7   :  { %18789 = vst [vmem:[#allocation142_spill] sm:$0xff] %v16368_v48  ;;  %v7328_v40 = vpop.f32.mrf.mxu1  ;;  %v7327_v55 = vadd.f32 %v7326_v33, %v6974_v13  ;;  %v6976_v5 = vadd.f32 %v6975_v54, %v15940_v47  ;;  %v16372_v27 = vpack.c.bf16 %v8298_v60, %v8294_v6  ;;  %v8301_v23 = vmax.f32 %v7325_v59, 0.0  ;;  %v18793_v54 = vld [vmem:[#allocation94_spill] sm:$0xff] }
 0x5c8   :  { %v6977_v8 = vpop.f32.mrf.mxu0 }
 0x5c9   :  { %18790 = vst [vmem:[#allocation143_spill] sm:$0xff] %v16372_v27  ;;  %v7330_v28 = vpop.f32.mrf.mxu1  ;;  %v7329_v39 = vadd.f32 %v7328_v40, %v6976_v5  ;;  %v6978_v4 = vadd.f32 %v6977_v8, %v15947_v37  ;;  %v8302_v6 = vmax.f32 %v7327_v55, 0.0 }
 0x5ca   :  { %v6981_v46 = vpop.f32.mrf.mxu0  ;;  %7606 = vmatmul.mubr.bf16.gmra.mxu0 %v18630_v30 }
 0x5cb   :  { %v7334_v31 = vpop.f32.mrf.mxu1  ;;  %7959 = vmatmul.mubr.bf16.gmra.mxu1 %v18791_v44  ;;  %v8305_v1 = vmax.f32 %v7329_v39, 0.0  ;;  %v7331_v7 = vadd.f32 %v7330_v28, %v6978_v4  ;;  %v6982_v35 = vadd.f32 %v6981_v46, %v15940_v47  ;;  %7615 = vmatprep.mubr.bf16.mxu0 %v18792_v32 }
 0x5cc   :  { %7968 = vmatprep.mubr.bf16.mxu1 %v18793_v54  ;;  %v6983_v33 = vpop.f32.mrf.mxu0 }
 0x5cd   :  { %v7336_v60 = vpop.f32.mrf.mxu1  ;;  %v16380_v13 = vpack.c.bf16 %v8305_v1, %v8301_v23  ;;  %v8306_v40 = vmax.f32 %v7331_v7, 0.0  ;;  %v7335_v5 = vadd.f32 %v7334_v31, %v6982_v35  ;;  %v6984_v30 = vadd.f32 %v6983_v33, %v15947_v37  ;;  %v18796_v23 = vld [vmem:[#allocation23_spill] sm:$0xff]  ;;  %v18797_v1 = vld [vmem:[#allocation64_spill] sm:$0xff] }
 0x5ce   :  { %v6985_v8 = vpop.f32.mrf.mxu0 }
 0x5cf   :  { %18794 = vst [vmem:[#allocation144_spill] sm:$0xff] %v16380_v13  ;;  %v7338_v44 = vpop.f32.mrf.mxu1  ;;  %v7337_v59 = vadd.f32 %v7336_v60, %v6984_v30  ;;  %v6986_v28 = vadd.f32 %v6985_v8, %v15940_v47  ;;  %v16384_v39 = vpack.c.bf16 %v8306_v40, %v8302_v6  ;;  %v8309_v31 = vmax.f32 %v7335_v5, 0.0  ;;  %v18798_v60 = vld [vmem:[#allocation26_spill] sm:$0xff] }
 0x5d0   :  { %v6987_v4 = vpop.f32.mrf.mxu0  ;;  %v18799_v6 = vld [vmem:[#allocation66_spill] sm:$0xff] }
 0x5d1   :  { %18795 = vst [vmem:[#allocation145_spill] sm:$0xff] %v16384_v39  ;;  %v7340_v46 = vpop.f32.mrf.mxu1  ;;  %v7339_v32 = vadd.f32 %v7338_v44, %v6986_v28  ;;  %v6988_v55 = vadd.f32 %v6987_v4, %v15947_v37  ;;  %v8310_v40 = vmax.f32 %v7337_v59, 0.0 }
 0x5d2   :  { %v6991_v54 = vpop.f32.mrf.mxu0  ;;  %7616 = vmatmul.mubr.bf16.gmra.mxu0 %v18796_v23 }
 0x5d3   :  { %v7344_v48 = vpop.f32.mrf.mxu1  ;;  %7969 = vmatmul.mubr.bf16.gmra.mxu1 %v18797_v1  ;;  %v8313_v7 = vmax.f32 %v7339_v32, 0.0  ;;  %v7341_v35 = vadd.f32 %v7340_v46, %v6988_v55  ;;  %v6992_v33 = vadd.f32 %v6991_v54, %v15940_v47  ;;  %7625 = vmatprep.mubr.bf16.mxu0 %v18798_v60 }
 0x5d4   :  { %7978 = vmatprep.mubr.bf16.mxu1 %v18799_v6  ;;  %v6993_v30 = vpop.f32.mrf.mxu0 }
 0x5d5   :  { %v7346_v8 = vpop.f32.mrf.mxu1  ;;  %v16392_v44 = vpack.c.bf16 %v8313_v7, %v8309_v31  ;;  %v8314_v28 = vmax.f32 %v7341_v35, 0.0  ;;  %v7345_v4 = vadd.f32 %v7344_v48, %v6992_v33  ;;  %v6994_v23 = vadd.f32 %v6993_v30, %v15947_v37  ;;  %v18802_v31 = vld [vmem:[#allocation25_spill] sm:$0xff] }
 0x5d6   :  { %v6995_v13 = vpop.f32.mrf.mxu0  ;;  %v18803_v7 = vld [vmem:[#allocation65_spill] sm:$0xff] }
 0x5d7   :  { %18800 = vst [vmem:[#allocation146_spill] sm:$0xff] %v16392_v44  ;;  %v7348_v1 = vpop.f32.mrf.mxu1  ;;  %v7347_v5 = vadd.f32 %v7346_v8, %v6994_v23  ;;  %v6996_v46 = vadd.f32 %v6995_v13, %v15940_v47  ;;  %v16396_v32 = vpack.c.bf16 %v8314_v28, %v8310_v40  ;;  %v8317_v48 = vmax.f32 %v7345_v4, 0.0  ;;  %v18804_v8 = vld [vmem:[#allocation28_spill] sm:$0xff] }
 0x5d8   :  { %v6997_v55 = vpop.f32.mrf.mxu0  ;;  %v18805_v13 = vld [vmem:[#allocation68_spill] sm:$0xff] }
 0x5d9   :  { %18801 = vst [vmem:[#allocation147_spill] sm:$0xff] %v16396_v32  ;;  %v7350_v54 = vpop.f32.mrf.mxu1  ;;  %v7349_v60 = vadd.f32 %v7348_v1, %v6996_v46  ;;  %v6998_v59 = vadd.f32 %v6997_v55, %v15947_v37  ;;  %v8318_v40 = vmax.f32 %v7347_v5, 0.0 }
 0x5da   :  { %v7001_v6 = vpop.f32.mrf.mxu0  ;;  %7626 = vmatmul.mubr.bf16.gmra.mxu0 %v18802_v31 }
 0x5db   :  { %v7354_v39 = vpop.f32.mrf.mxu1  ;;  %7979 = vmatmul.mubr.bf16.gmra.mxu1 %v18803_v7  ;;  %v8321_v35 = vmax.f32 %v7349_v60, 0.0  ;;  %v7351_v33 = vadd.f32 %v7350_v54, %v6998_v59  ;;  %v7002_v30 = vadd.f32 %v7001_v6, %v15940_v47  ;;  %7635 = vmatprep.mubr.bf16.mxu0 %v18804_v8 }
 0x5dc   :  { %7988 = vmatprep.mubr.bf16.mxu1 %v18805_v13  ;;  %v7003_v28 = vpop.f32.mrf.mxu0 }
 0x5dd   :  { %v7356_v23 = vpop.f32.mrf.mxu1  ;;  %v16404_v1 = vpack.c.bf16 %v8321_v35, %v8317_v48  ;;  %v8322_v46 = vmax.f32 %v7351_v33, 0.0  ;;  %v7355_v55 = vadd.f32 %v7354_v39, %v7002_v30  ;;  %v7004_v31 = vadd.f32 %v7003_v28, %v15947_v37  ;;  %v18808_v48 = vld [vmem:[#allocation27_spill] sm:$0xff] }
 0x5de   :  { %v7005_v44 = vpop.f32.mrf.mxu0  ;;  %v18809_v35 = vld [vmem:[#allocation67_spill] sm:$0xff] }
 0x5df   :  { %18806 = vst [vmem:[#allocation148_spill] sm:$0xff] %v16404_v1  ;;  %v7358_v7 = vpop.f32.mrf.mxu1  ;;  %v7357_v4 = vadd.f32 %v7356_v23, %v7004_v31  ;;  %v7006_v54 = vadd.f32 %v7005_v44, %v15940_v47  ;;  %v16408_v60 = vpack.c.bf16 %v8322_v46, %v8318_v40  ;;  %v8325_v39 = vmax.f32 %v7355_v55, 0.0  ;;  %v18810_v23 = vld [vmem:[#allocation30_spill] sm:$0xff] }
 0x5e0   :  { %v7007_v59 = vpop.f32.mrf.mxu0  ;;  %v18811_v44 = vld [vmem:[#allocation70_spill] sm:$0xff] }
 0x5e1   :  { %18807 = vst [vmem:[#allocation149_spill] sm:$0xff] %v16408_v60  ;;  %v7360_v6 = vpop.f32.mrf.mxu1  ;;  %v7359_v8 = vadd.f32 %v7358_v7, %v7006_v54  ;;  %v7008_v5 = vadd.f32 %v7007_v59, %v15947_v37  ;;  %v8326_v40 = vmax.f32 %v7357_v4, 0.0 }
 0x5e2   :  { %v7011_v13 = vpop.f32.mrf.mxu0  ;;  %7636 = vmatmul.mubr.bf16.gmra.mxu0 %v18808_v48 }
 0x5e3   :  { %v7364_v32 = vpop.f32.mrf.mxu1  ;;  %7989 = vmatmul.mubr.bf16.gmra.mxu1 %v18809_v35  ;;  %v8329_v33 = vmax.f32 %v7359_v8, 0.0  ;;  %v7361_v30 = vadd.f32 %v7360_v6, %v7008_v5  ;;  %v7012_v28 = vadd.f32 %v7011_v13, %v15940_v47  ;;  %7645 = vmatprep.mubr.bf16.mxu0 %v18810_v23 }
 0x5e4   :  { %7998 = vmatprep.mubr.bf16.mxu1 %v18811_v44  ;;  %v7013_v46 = vpop.f32.mrf.mxu0 }
 0x5e5   :  { %v7366_v31 = vpop.f32.mrf.mxu1  ;;  %v16416_v7 = vpack.c.bf16 %v8329_v33, %v8325_v39  ;;  %v8330_v54 = vmax.f32 %v7361_v30, 0.0  ;;  %v7365_v59 = vadd.f32 %v7364_v32, %v7012_v28  ;;  %v7014_v48 = vadd.f32 %v7013_v46, %v15947_v37  ;;  %v18814_v39 = vld [vmem:[#allocation29_spill] sm:$0xff] }
 0x5e6   :  { %v7015_v1 = vpop.f32.mrf.mxu0  ;;  %v18815_v33 = vld [vmem:[#allocation69_spill] sm:$0xff] }
 0x5e7   :  { %18812 = vst [vmem:[#allocation150_spill] sm:$0xff] %v16416_v7  ;;  %v7368_v35 = vpop.f32.mrf.mxu1  ;;  %v7367_v55 = vadd.f32 %v7366_v31, %v7014_v48  ;;  %v7016_v6 = vadd.f32 %v7015_v1, %v15940_v47  ;;  %v16420_v8 = vpack.c.bf16 %v8330_v54, %v8326_v40  ;;  %v8333_v32 = vmax.f32 %v7365_v59, 0.0  ;;  %v18816_v31 = vld [vmem:[#allocation32_spill] sm:$0xff] }
 0x5e8   :  { %v7017_v5 = vpop.f32.mrf.mxu0  ;;  %v18817_v1 = vld [vmem:[#allocation72_spill] sm:$0xff] }
 0x5e9   :  { %18813 = vst [vmem:[#allocation151_spill] sm:$0xff] %v16420_v8  ;;  %v7370_v13 = vpop.f32.mrf.mxu1  ;;  %v7369_v23 = vadd.f32 %v7368_v35, %v7016_v6  ;;  %v7018_v4 = vadd.f32 %v7017_v5, %v15947_v37  ;;  %v8334_v40 = vmax.f32 %v7367_v55, 0.0 }
 0x5ea   :  { %v7021_v44 = vpop.f32.mrf.mxu0  ;;  %7646 = vmatmul.mubr.bf16.gmra.mxu0 %v18814_v39 }
 0x5eb   :  { %v7374_v60 = vpop.f32.mrf.mxu1  ;;  %7999 = vmatmul.mubr.bf16.gmra.mxu1 %v18815_v33  ;;  %v8337_v30 = vmax.f32 %v7369_v23, 0.0  ;;  %v7371_v28 = vadd.f32 %v7370_v13, %v7018_v4  ;;  %v7022_v46 = vadd.f32 %v7021_v44, %v15940_v47  ;;  %7655 = vmatprep.mubr.bf16.mxu0 %v18816_v31 }
 0x5ec   :  { %8008 = vmatprep.mubr.bf16.mxu1 %v18817_v1  ;;  %v7023_v54 = vpop.f32.mrf.mxu0 }
 0x5ed   :  { %v7376_v48 = vpop.f32.mrf.mxu1  ;;  %v16428_v35 = vpack.c.bf16 %v8337_v30, %v8333_v32  ;;  %v8338_v6 = vmax.f32 %v7371_v28, 0.0  ;;  %v7375_v5 = vadd.f32 %v7374_v60, %v7022_v46  ;;  %v7024_v39 = vadd.f32 %v7023_v54, %v15947_v37  ;;  %v18820_v32 = vld [vmem:[#allocation31_spill] sm:$0xff] }
 0x5ee   :  { %v7025_v7 = vpop.f32.mrf.mxu0  ;;  %v18821_v30 = vld [vmem:[#allocation71_spill] sm:$0xff] }
 0x5ef   :  { %18818 = vst [vmem:[#allocation152_spill] sm:$0xff] %v16428_v35  ;;  %v7378_v33 = vpop.f32.mrf.mxu1  ;;  %v7377_v59 = vadd.f32 %v7376_v48, %v7024_v39  ;;  %v7026_v13 = vadd.f32 %v7025_v7, %v15940_v47  ;;  %v16432_v23 = vpack.c.bf16 %v8338_v6, %v8334_v40  ;;  %v8341_v60 = vmax.f32 %v7375_v5, 0.0  ;;  %v18822_v48 = vld [vmem:[#allocation34_spill] sm:$0xff] }
 0x5f0   :  { %v7027_v4 = vpop.f32.mrf.mxu0  ;;  %v18823_v7 = vld [vmem:[#allocation74_spill] sm:$0xff] }
 0x5f1   :  { %18819 = vst [vmem:[#allocation35_spill] sm:$0xff] %v16432_v23  ;;  %v7380_v44 = vpop.f32.mrf.mxu1  ;;  %v7379_v31 = vadd.f32 %v7378_v33, %v7026_v13  ;;  %v7028_v55 = vadd.f32 %v7027_v4, %v15947_v37  ;;  %v8342_v40 = vmax.f32 %v7377_v59, 0.0 }
 0x5f2   :  { %v7031_v1 = vpop.f32.mrf.mxu0  ;;  %7656 = vmatmul.mubr.bf16.gmra.mxu0 %v18820_v32 }
 0x5f3   :  { %v7384_v8 = vpop.f32.mrf.mxu1  ;;  %8009 = vmatmul.mubr.bf16.gmra.mxu1 %v18821_v30  ;;  %v8345_v28 = vmax.f32 %v7379_v31, 0.0  ;;  %v7381_v46 = vadd.f32 %v7380_v44, %v7028_v55  ;;  %v7032_v54 = vadd.f32 %v7031_v1, %v15940_v47  ;;  %7665 = vmatprep.mubr.bf16.mxu0 %v18822_v48 }
 0x5f4   :  { %8018 = vmatprep.mubr.bf16.mxu1 %v18823_v7  ;;  %v7033_v6 = vpop.f32.mrf.mxu0 }
 0x5f5   :  { %v7386_v39 = vpop.f32.mrf.mxu1  ;;  %v16440_v33 = vpack.c.bf16 %v8345_v28, %v8341_v60  ;;  %v8346_v13 = vmax.f32 %v7381_v46, 0.0  ;;  %v7385_v4 = vadd.f32 %v7384_v8, %v7032_v54  ;;  %v7034_v32 = vadd.f32 %v7033_v6, %v15947_v37  ;;  %v18826_v60 = vld [vmem:[#allocation33_spill] sm:$0xff] }
 0x5f6   :  { %v7035_v35 = vpop.f32.mrf.mxu0  ;;  %v18827_v28 = vld [vmem:[#allocation73_spill] sm:$0xff] }
 0x5f7   :  { %18824 = vst [vmem:[#allocation39_spill] sm:$0xff] %v16440_v33  ;;  %v7388_v30 = vpop.f32.mrf.mxu1  ;;  %v7387_v5 = vadd.f32 %v7386_v39, %v7034_v32  ;;  %v7036_v44 = vadd.f32 %v7035_v35, %v15940_v47  ;;  %v16444_v31 = vpack.c.bf16 %v8346_v13, %v8342_v40  ;;  %v8349_v8 = vmax.f32 %v7385_v4, 0.0  ;;  %v18828_v39 = vld [vmem:[#allocation36_spill] sm:$0xff] }
 0x5f8   :  { %v7037_v55 = vpop.f32.mrf.mxu0  ;;  %v18829_v35 = vld [vmem:[#allocation76_spill] sm:$0xff] }
 0x5f9   :  { %18825 = vst [vmem:[#allocation41_spill] sm:$0xff] %v16444_v31  ;;  %v7390_v1 = vpop.f32.mrf.mxu1  ;;  %v7389_v48 = vadd.f32 %v7388_v30, %v7036_v44  ;;  %v7038_v59 = vadd.f32 %v7037_v55, %v15947_v37  ;;  %v8350_v40 = vmax.f32 %v7387_v5, 0.0 }
 0x5fa   :  { %v7041_v7 = vpop.f32.mrf.mxu0  ;;  %7666 = vmatmul.mubr.bf16.gmra.mxu0 %v18826_v60 }
 0x5fb   :  { %v7394_v23 = vpop.f32.mrf.mxu1  ;;  %8019 = vmatmul.mubr.bf16.gmra.mxu1 %v18827_v28  ;;  %v8353_v46 = vmax.f32 %v7389_v48, 0.0  ;;  %v7391_v54 = vadd.f32 %v7390_v1, %v7038_v59  ;;  %v7042_v6 = vadd.f32 %v7041_v7, %v15940_v47  ;;  %7675 = vmatprep.mubr.bf16.mxu0 %v18828_v39 }
 0x5fc   :  { %8028 = vmatprep.mubr.bf16.mxu1 %v18829_v35  ;;  %v7043_v13 = vpop.f32.mrf.mxu0 }
 0x5fd   :  { %v7396_v32 = vpop.f32.mrf.mxu1  ;;  %v16452_v30 = vpack.c.bf16 %v8353_v46, %v8349_v8  ;;  %v8354_v44 = vmax.f32 %v7391_v54, 0.0  ;;  %v7395_v55 = vadd.f32 %v7394_v23, %v7042_v6  ;;  %v7044_v60 = vadd.f32 %v7043_v13, %v15947_v37  ;;  %v18832_v23 = vld [vmem:[#allocation75_spill] sm:$0xff]  ;;  %v18833_v13 = vld [vmem:[#allocation38_spill] sm:$0xff] }
 0x5fe   :  { %v7045_v33 = vpop.f32.mrf.mxu0 }
 0x5ff   :  { %18830 = vst [vmem:[#allocation43_spill] sm:$0xff] %v16452_v30  ;;  %v7398_v28 = vpop.f32.mrf.mxu1  ;;  %v7397_v4 = vadd.f32 %v7396_v32, %v7044_v60  ;;  %v7046_v1 = vadd.f32 %v7045_v33, %v15940_v47  ;;  %v16456_v48 = vpack.c.bf16 %v8354_v44, %v8350_v40  ;;  %v8357_v46 = vmax.f32 %v7395_v55, 0.0  ;;  %v18834_v47 = vld [vmem:[#allocation78_spill] sm:$0xff] }
 0x600   :  { %v7047_v59 = vpop.f32.mrf.mxu0 }
 0x601   :  { %18831 = vst [vmem:[#allocation45_spill] sm:$0xff] %v16456_v48  ;;  %v7400_v7 = vpop.f32.mrf.mxu1  ;;  %v7399_v39 = vadd.f32 %v7398_v28, %v7046_v1  ;;  %v7048_v5 = vadd.f32 %v7047_v59, %v15947_v37  ;;  %v8358_v37 = vmax.f32 %v7397_v4, 0.0  ;;  %v18839_v4 = vld [vmem:[#allocation40_spill] sm:$0xff] }
 0x602   :  { %v16459_v35 = vpop.f32.mrf.mxu0  ;;  %7676 = vmatmul.mubr.bf16.gmra.mxu0 %v18683_v22 }
 0x603   :  { %v16462_v8 = vpop.f32.mrf.mxu1  ;;  %8029 = vmatmul.mubr.bf16.gmra.mxu1 %v18832_v23  ;;  %v8361_v54 = vmax.f32 %v7399_v39, 0.0  ;;  %v7401_v6 = vadd.f32 %v7400_v7, %v7048_v5  ;;  %7685 = vmatprep.mubr.bf16.mxu0 %v18833_v13  ;;  %v18837_v7 = vld [vmem:[#allocation37_spill] sm:$0xff]  ;;  %v18840_v23 = vld [vmem:[#allocation79_spill] sm:$0xff] }
 0x604   :  { %8038 = vmatprep.mubr.bf16.mxu1 %v18834_v47  ;;  %v16467_v33 = vpop.f32.mrf.mxu0  ;;  %v18838_v5 = vld [vmem:[#allocation77_spill] sm:$0xff] }
 0x605   :  { %v16469_v40 = vpop.f32.mrf.mxu1  ;;  %v16471_v32 = vpack.c.bf16 %v8361_v54, %v8357_v46  ;;  %v8362_v44 = vmax.f32 %v7401_v6, 0.0 }
 0x606   :  { %v16473_v22 = vpop.f32.mrf.mxu0 }
 0x607   :  { %18835 = vst [vmem:[#allocation47_spill] sm:$0xff] %v16471_v32  ;;  %v16475_v60 = vpop.f32.mrf.mxu1  ;;  %v16477_v28 = vpack.c.bf16 %v8362_v44, %v8358_v37 }
 0x608   :  { %v7443_v55 = vpop.f32.mrf.mxu0 }
 0x609   :  { %18836 = vst [vmem:[#allocation49_spill] sm:$0xff] %v16477_v28  ;;  %v16479_v1 = vpop.f32.mrf.mxu1 }
 0x60a   :  { %v16481_v59 = vpop.f32.mrf.mxu0  ;;  %7686 = vmatmul.mubr.bf16.gmra.mxu0 %v18837_v7 }
 0x60b   :  { %v16484_v39 = vpop.f32.mrf.mxu1  ;;  %8039 = vmatmul.mubr.bf16.gmra.mxu1 %v18838_v5  ;;  %7695 = vmatprep.mubr.bf16.mxu0 %v18839_v4  ;;  %v18841_v5 = vld [vmem:[#allocation42_spill] sm:$0xff]  ;;  %v18842_v4 = vld [vmem:[#allocation80_spill] sm:$0xff] }
 0x60c   :  { %8048 = vmatprep.mubr.bf16.mxu1 %v18840_v23  ;;  %v16489_v46 = vpop.f32.mrf.mxu0 }
 0x60d   :  { %v16491_v54 = vpop.f32.mrf.mxu1 }
 0x60e   :  { %v16493_v6 = vpop.f32.mrf.mxu0 }
 0x60f   :  { %v16495_v13 = vpop.f32.mrf.mxu1 }
 0x610   :  { %v16497_v47 = vpop.f32.mrf.mxu0 }
 0x611   :  { %v16499_v37 = vpop.f32.mrf.mxu1 }
 0x612   :  { %v16501_v44 = vpop.f32.mrf.mxu0  ;;  %7696 = vmatmul.mubr.bf16.gmra.mxu0 %v18690_v14 }
 0x613   :  { %v16504_v7 = vpop.f32.mrf.mxu1  ;;  %8049 = vmatmul.mubr.bf16.gmra.mxu1 %v15883_v0  ;;  %7705 = vmatprep.mubr.bf16.mxu0 %v18841_v5  ;;  %v18843_v5 = vld [vmem:[#allocation44_spill] sm:$0xff] }
 0x614   :  { %8058 = vmatprep.mubr.bf16.mxu1 %v18842_v4  ;;  %v16509_v23 = vpop.f32.mrf.mxu0  ;;  %v18844_v4 = vld [vmem:[#allocation81_spill] sm:$0xff] }
 0x615   :  { %v16511_v32 = vpop.f32.mrf.mxu1 }
 0x616   :  { %v16513_v28 = vpop.f32.mrf.mxu0 }
 0x617   :  { %v16515_v30 = vpop.f32.mrf.mxu1 }
 0x618   :  { %v16517_v48 = vpop.f32.mrf.mxu0 }
 0x619   :  { %v16519_v31 = vpop.f32.mrf.mxu1 }
 0x61a   :  { %v16521_v14 = vpop.f32.mrf.mxu0  ;;  %7706 = vmatmul.mubr.bf16.gmra.mxu0 %v18694_v41 }
 0x61b   :  { %v16524_v0 = vpop.f32.mrf.mxu1  ;;  %8059 = vmatmul.mubr.bf16.gmra.mxu1 %v15895_v51  ;;  %7715 = vmatprep.mubr.bf16.mxu0 %v18843_v5  ;;  %v18845_v5 = vld [vmem:[#allocation46_spill] sm:$0xff] }
 0x61c   :  { %8068 = vmatprep.mubr.bf16.mxu1 %v18844_v4  ;;  %v16529_v27 = vpop.f32.mrf.mxu0  ;;  %v18846_v4 = vld [vmem:[#allocation82_spill] sm:$0xff] }
 0x61d   :  { %v16531_v42 = vpop.f32.mrf.mxu1 }
 0x61e   :  { %v16533_v38 = vpop.f32.mrf.mxu0 }
 0x61f   :  { %v16535_v24 = vpop.f32.mrf.mxu1 }
 0x620   :  { %v16537_v57 = vpop.f32.mrf.mxu0 }
 0x621   :  { %v16539_v61 = vpop.f32.mrf.mxu1 }
 0x622   :  { %v16541_v41 = vpop.f32.mrf.mxu0  ;;  %7716 = vmatmul.mubr.bf16.gmra.mxu0 %v18698_v26 }
 0x623   :  { %v16544_v51 = vpop.f32.mrf.mxu1  ;;  %8069 = vmatmul.mubr.bf16.gmra.mxu1 %v15907_v21  ;;  %7725 = vmatprep.mubr.bf16.mxu0 %v18845_v5  ;;  %v12022_v5 = vld [vmem:[%s18054_s4] sm:$0xf] }
 0x624   :  { %8078 = vmatprep.mubr.bf16.mxu1 %v18846_v4  ;;  %v16549_v19 = vpop.f32.mrf.mxu0  ;;  %v18847_v4 = vld [vmem:[#allocation5_spill] sm:$0xff] }
 0x625   :  { %v16551_v56 = vpop.f32.mrf.mxu1  ;;  %v18848_v49 = vsub.s32 3, %v18847_v4 }
 0x626   :  { %v16553_v3 = vpop.f32.mrf.mxu0 }
 0x627   :  { %v16555_v2 = vpop.f32.mrf.mxu1  ;;  %v16572_v16 = vrot.slane %v12022_v5, %v18848_v49 }
 0x628   :  { %v16557_v43 = vpop.f32.mrf.mxu0 }
 0x629   :  { %v16559_v15 = vpop.f32.mrf.mxu1  ;;  %v7440_v36 = vadd.f32 %v16467_v33, %v16572_v16 }
 0x62a   :  { %v16561_v26 = vpop.f32.mrf.mxu0  ;;  %7726 = vmatmul.mubr.bf16.gmra.mxu0 %v18702_v17  ;;  %v7444_v17 = vadd.f32 %v7443_v55, %v16572_v16 }
 0x62b   :  { %v16564_v21 = vpop.f32.mrf.mxu1  ;;  %8079 = vmatmul.mubr.bf16.gmra.mxu1 %v15919_v53  ;;  %7735 = vmatprep.mubr.bf16.mxu0 %v18849_v29  ;;  %v7793_v33 = vadd.f32 %v16469_v40, %v7440_v36 }
 0x62c   :  { %8088 = vmatprep.mubr.bf16.mxu1 %v18850_v18  ;;  %v16576_v20 = vpop.f32.mrf.mxu0  ;;  %v7797_v29 = vadd.f32 %v16479_v1, %v7444_v17  ;;  %v18851_v18 = vsub.s32 2, %v18847_v4 }
 0x62d   :  { %v16578_v34 = vpop.f32.mrf.mxu1 }
 0x62e   :  { %v16581_v45 = vpop.f32.mrf.mxu0  ;;  %v16594_v11 = vrot.slane %v12022_v5, %v18851_v18  ;;  %v8116_v17 = vmax.f32 %v7797_v29, 0.0 }
 0x62f   :  { %v16583_v53 = vpop.f32.mrf.mxu1 }
 0x630   :  { %v16587_v52 = vpop.f32.mrf.mxu0  ;;  %v7442_v1 = vadd.f32 %v16473_v22, %v16594_v11 }
 0x631   :  { %v16589_v49 = vpop.f32.mrf.mxu1 }
 0x632   :  { %v16596_v50 = vpop.f32.mrf.mxu0  ;;  %7736 = vmatmul.mubr.bf16.gmra.mxu0 %v18706_v63  ;;  %v7454_v63 = vadd.f32 %v16497_v47, %v16572_v16  ;;  %v7795_v40 = vadd.f32 %v16475_v60, %v7442_v1  ;;  %v18858_v60 = vld [vmem:[#allocation86_spill] sm:$0xff] }
 0x633   :  { %18852 = vst [vmem:[#allocation97_spill] sm:$0xff] %v16596_v50  ;;  %v16599_v55 = vpop.f32.mrf.mxu1  ;;  %8089 = vmatmul.mubr.bf16.gmra.mxu1 %v15934_v12  ;;  %7745 = vmatprep.mubr.bf16.mxu0 %v18854_v62  ;;  %v7438_v12 = vadd.f32 %v16459_v35, %v16594_v11  ;;  %v8112_v62 = vmax.f32 %v7793_v33, 0.0 }
 0x634   :  { %18853 = vst [vmem:[#allocation154_spill] sm:$0xff] %v16599_v55  ;;  %8098 = vmatprep.mubr.bf16.mxu1 %v18855_v10  ;;  %v16607_v4 = vpop.f32.mrf.mxu0  ;;  %v7450_v10 = vadd.f32 %v16489_v46, %v16572_v16  ;;  %v7807_v29 = vadd.f32 %v16499_v37, %v7454_v63  ;;  %v8115_v33 = vmax.f32 %v7795_v40, 0.0  ;;  %v7452_v37 = vadd.f32 %v16493_v6, %v16594_v11 }
 0x635   :  { %v16609_v5 = vpop.f32.mrf.mxu1  ;;  %v8368_v47 = vpack.c.bf16 %v8116_v17, %v8112_v62  ;;  %v7791_v50 = vadd.f32 %v16462_v8, %v7438_v12  ;;  %v7460_v6 = vadd.f32 %v16509_v23, %v16572_v16 }
 0x636   :  { %v16615_v18 = vpop.f32.mrf.mxu0  ;;  %v7803_v46 = vadd.f32 %v16491_v54, %v7450_v10  ;;  %v8124_v17 = vmax.f32 %v7807_v29, 0.0  ;;  %v7805_v40 = vadd.f32 %v16495_v13, %v7452_v37  ;;  %v7462_v37 = vadd.f32 %v16513_v28, %v16594_v11 }
 0x637   :  { %v16617_v36 = vpop.f32.mrf.mxu1  ;;  %v8111_v63 = vmax.f32 %v7791_v50, 0.0  ;;  %v7813_v23 = vadd.f32 %v16511_v32, %v7460_v6  ;;  %v7470_v28 = vadd.f32 %v16529_v27, %v16572_v16 }
 0x638   :  { %18856 = vst [vmem:[#allocation96_spill] sm:$0xff] %v16617_v36  ;;  %v16622_v22 = vpop.f32.mrf.mxu0  ;;  %v8120_v62 = vmax.f32 %v7803_v46, 0.0  ;;  %v18859_v46 = vld [vmem:[#allocation85_spill] sm:$0xff]  ;;  %v8123_v13 = vmax.f32 %v7805_v40, 0.0  ;;  %v7815_v40 = vadd.f32 %v16515_v30, %v7462_v37  ;;  %v7472_v37 = vadd.f32 %v16533_v38, %v16594_v11 }
 0x639   :  { %v16624_v55 = vpop.f32.mrf.mxu1  ;;  %v8367_v10 = vpack.c.bf16 %v8115_v33, %v8111_v63  ;;  %v18860_v33 = vld [vmem:[#allocation88_spill] sm:$0xff]  ;;  %v8128_v6 = vmax.f32 %v7813_v23, 0.0  ;;  %v18861_v23 = vld [vmem:[#allocation87_spill] sm:$0xff]  ;;  %v7823_v27 = vadd.f32 %v16531_v42, %v7470_v28  ;;  %v7480_v38 = vadd.f32 %v16549_v19, %v16572_v16 }
 0x63a   :  { %v16628_v35 = vpop.f32.mrf.mxu0  ;;  %7746 = vmatmul.mubr.bf16.gmra.mxu0 %v18709_v25  ;;  %v7464_v25 = vadd.f32 %v16517_v48, %v16572_v16  ;;  %v8372_v48 = vpack.c.bf16 %v8124_v17, %v8120_v62  ;;  %v8131_v30 = vmax.f32 %v7815_v40, 0.0  ;;  %v7825_v40 = vadd.f32 %v16535_v24, %v7472_v37 }
 0x63b   :  { %v16631_v36 = vpop.f32.mrf.mxu1  ;;  %8099 = vmatmul.mubr.bf16.gmra.mxu1 %v15954_v9  ;;  %8788 = vmatprep.mubr.bf16.mxu0 %v18858_v60  ;;  %v7448_v9 = vadd.f32 %v16481_v59, %v16594_v11  ;;  %v8136_v28 = vmax.f32 %v7823_v27, 0.0  ;;  %v18863_v27 = vld [vmem:[#allocation103_spill] sm:$0xff]  ;;  %v7833_v19 = vadd.f32 %v16551_v56, %v7480_v38  ;;  %v7482_v37 = vadd.f32 %v16553_v3, %v16594_v11 }
 0x63c   :  { %18857 = vst [vmem:[#allocation153_spill] sm:$0xff] %v16631_v36  ;;  %9077 = vmatprep.mubr.bf16.mxu1 %v8368_v47  ;;  %v16638_v1 = vpop.f32.mrf.mxu0  ;;  %v7817_v50 = vadd.f32 %v16519_v31, %v7464_v25  ;;  %v7474_v25 = vadd.f32 %v16537_v57, %v16572_v16  ;;  %v8139_v24 = vmax.f32 %v7825_v40, 0.0  ;;  %v7490_v3 = vadd.f32 %v16576_v20, %v16572_v16 }
 0x63d   :  { %v16640_v8 = vpop.f32.mrf.mxu1  ;;  %v7801_v59 = vadd.f32 %v16484_v39, %v7448_v9  ;;  %v7458_v9 = vadd.f32 %v16501_v44, %v16594_v11  ;;  %v8144_v38 = vmax.f32 %v7833_v19, 0.0  ;;  %v7835_v40 = vadd.f32 %v16555_v2, %v7482_v37  ;;  %v18865_v19 = vld [vmem:[#allocation105_spill] sm:$0xff] }
 0x63e   :  { %v16646_v54 = vpop.f32.mrf.mxu0  ;;  %v8132_v39 = vmax.f32 %v7817_v50, 0.0  ;;  %v7827_v57 = vadd.f32 %v16539_v61, %v7474_v25  ;;  %v7484_v25 = vadd.f32 %v16557_v43, %v16572_v16  ;;  %v7843_v20 = vadd.f32 %v16578_v34, %v7490_v3 }
 0x63f   :  { %v16648_v12 = vpop.f32.mrf.mxu1  ;;  %v8119_v63 = vmax.f32 %v7801_v59, 0.0  ;;  %v7811_v44 = vadd.f32 %v16504_v7, %v7458_v9  ;;  %v7468_v9 = vadd.f32 %v16521_v14, %v16594_v11  ;;  %v8147_v2 = vmax.f32 %v7835_v40, 0.0 }
 0x640   :  { %v16653_v47 = vpop.f32.mrf.mxu0  ;;  %v8376_v59 = vpack.c.bf16 %v8132_v39, %v8128_v6  ;;  %v8140_v7 = vmax.f32 %v7827_v57, 0.0  ;;  %v7837_v43 = vadd.f32 %v16559_v15, %v7484_v25  ;;  %v7494_v25 = vadd.f32 %v16587_v52, %v16572_v16 }
 0x641   :  { %v16655_v29 = vpop.f32.mrf.mxu1  ;;  %v7821_v14 = vadd.f32 %v16524_v0, %v7468_v9  ;;  %v7478_v9 = vadd.f32 %v16541_v41, %v16594_v11  ;;  %v7492_v37 = vadd.f32 %v16581_v45, %v16594_v11  ;;  %v8152_v3 = vmax.f32 %v7843_v20, 0.0  ;;  %v18869_v20 = vld [vmem:[#allocation107_spill] sm:$0xff] }
 0x642   :  { %v16659_v60 = vpop.f32.mrf.mxu0  ;;  %8789 = vmatmul.mubr.bf16.vlgmr.msra.gmra.mxu0 %v18859_v46  ;;  %v8148_v0 = vmax.f32 %v7837_v43, 0.0  ;;  %v7847_v52 = vadd.f32 %v16589_v49, %v7494_v25  ;;  %v7504_v25 = vadd.f32 %v16622_v22, %v16572_v16  ;;  %v7500_v45 = vadd.f32 %v16607_v4, %v16572_v16 }
 0x643   :  { %v16661_v36 = vpop.f32.mrf.mxu1  ;;  %9078 = vmatmul.mubr.bf16.vlgmr.msra.gmra.mxu1 %v8367_v10  ;;  %8796 = vmatprep.mubr.bf16.mxu0 %v18860_v33  ;;  %v8371_v10 = vpack.c.bf16 %v8123_v13, %v8119_v63  ;;  %v18862_v13 = vld [vmem:[#allocation104_spill] sm:$0xff]  ;;  %v8127_v63 = vmax.f32 %v7811_v44, 0.0  ;;  %v8380_v44 = vpack.c.bf16 %v8140_v7, %v8136_v28  ;;  %v7831_v41 = vadd.f32 %v16544_v51, %v7478_v9 }
 0x644   :  { %9085 = vmatprep.mubr.bf16.mxu1 %v8372_v48  ;;  %v16668_v31 = vpop.f32.mrf.mxu0  ;;  %v8156_v51 = vmax.f32 %v7847_v52, 0.0  ;;  %v7488_v9 = vadd.f32 %v16561_v26, %v16594_v11  ;;  %v7845_v40 = vadd.f32 %v16583_v53, %v7492_v37  ;;  %v7857_v22 = vadd.f32 %v16624_v55, %v7504_v25 }
 0x645   :  { %v16670_v17 = vpop.f32.mrf.mxu1  ;;  %v7853_v4 = vadd.f32 %v16609_v5, %v7500_v45 }
 0x646   :  { %v16676_v32 = vpop.f32.mrf.mxu0  ;;  %v7841_v26 = vadd.f32 %v16564_v21, %v7488_v9  ;;  %v8155_v53 = vmax.f32 %v7845_v40, 0.0  ;;  %v8164_v21 = vmax.f32 %v7857_v22, 0.0 }
 0x647   :  { %v16678_v62 = vpop.f32.mrf.mxu1 }
 0x648   :  { %v16683_v48 = vpop.f32.mrf.mxu0  ;;  %v8151_v25 = vmax.f32 %v7841_v26, 0.0 }
 0x649   :  { %v16685_v50 = vpop.f32.mrf.mxu1 }
 0x64a   :  { %v16689_v46 = vpop.f32.mrf.mxu0  ;;  %8797 = vmatmul.mubr.bf16.gmra.mxu0 %v18861_v23  ;;  %v8387_v45 = vpack.c.bf16 %v8155_v53, %v8151_v25  ;;  %v18875_v53 = vld [vmem:[#allocation111_spill] sm:$0xff]  ;;  %v7512_v25 = vadd.f32 %v16646_v54, %v16594_v11  ;;  %v7520_v54 = vadd.f32 %v16668_v31, %v16572_v16 }
 0x64b   :  { %v16691_v33 = vpop.f32.mrf.mxu1  ;;  %9086 = vmatmul.mubr.bf16.gmra.mxu1 %v8371_v10  ;;  %8804 = vmatprep.mubr.bf16.mxu0 %v18862_v13  ;;  %v8375_v10 = vpack.c.bf16 %v8131_v30, %v8127_v63  ;;  %v18864_v30 = vld [vmem:[#allocation106_spill] sm:$0xff]  ;;  %v8135_v63 = vmax.f32 %v7821_v14, 0.0  ;;  %v8384_v14 = vpack.c.bf16 %v8148_v0, %v8144_v38 }
 0x64c   :  { %9093 = vmatprep.mubr.bf16.mxu1 %v8376_v59  ;;  %v16698_v61 = vpop.f32.mrf.mxu0  ;;  %v7873_v31 = vadd.f32 %v16670_v17, %v7520_v54 }
 0x64d   :  { %v16700_v39 = vpop.f32.mrf.mxu1 }
 0x64e   :  { %v16706_v42 = vpop.f32.mrf.mxu0 }
 0x64f   :  { %v16708_v6 = vpop.f32.mrf.mxu1 }
 0x650   :  { %v16713_v59 = vpop.f32.mrf.mxu0 }
 0x651   :  { %v16715_v57 = vpop.f32.mrf.mxu1 }
 0x652   :  { %v16719_v23 = vpop.f32.mrf.mxu0  ;;  %8805 = vmatmul.mubr.bf16.gmra.mxu0 %v18863_v27 }
 0x653   :  { %v16721_v13 = vpop.f32.mrf.mxu1  ;;  %9094 = vmatmul.mubr.bf16.gmra.mxu1 %v8375_v10  ;;  %8812 = vmatprep.mubr.bf16.mxu0 %v18864_v30  ;;  %v8379_v10 = vpack.c.bf16 %v8139_v24, %v8135_v63  ;;  %v18866_v24 = vld [vmem:[#allocation108_spill] sm:$0xff]  ;;  %v8143_v63 = vmax.f32 %v7831_v41, 0.0  ;;  %v8388_v41 = vpack.c.bf16 %v8156_v51, %v8152_v3  ;;  %v7514_v51 = vadd.f32 %v16653_v47, %v16572_v16 }
 0x654   :  { %9101 = vmatprep.mubr.bf16.mxu1 %v8380_v44  ;;  %v16728_v15 = vpop.f32.mrf.mxu0  ;;  %v8160_v3 = vmax.f32 %v7853_v4, 0.0  ;;  %v18874_v4 = vld [vmem:[#allocation109_spill] sm:$0xff] }
 0x655   :  { %v16730_v7 = vpop.f32.mrf.mxu1  ;;  %v7867_v47 = vadd.f32 %v16655_v29, %v7514_v51 }
 0x656   :  { %v16736_v56 = vpop.f32.mrf.mxu0  ;;  %v8392_v26 = vpack.c.bf16 %v8164_v21, %v8160_v3 }
 0x657   :  { %v16738_v28 = vpop.f32.mrf.mxu1  ;;  %v8172_v51 = vmax.f32 %v7867_v47, 0.0 }
 0x658   :  { %v16743_v44 = vpop.f32.mrf.mxu0 }
 0x659   :  { %v16745_v43 = vpop.f32.mrf.mxu1 }
 0x65a   :  { %v16749_v27 = vpop.f32.mrf.mxu0  ;;  %8813 = vmatmul.mubr.bf16.gmra.mxu0 %v18865_v19 }
 0x65b   :  { %v16751_v30 = vpop.f32.mrf.mxu1  ;;  %9102 = vmatmul.mubr.bf16.gmra.mxu1 %v8379_v10  ;;  %8820 = vmatprep.mubr.bf16.mxu0 %v18866_v24  ;;  %v8383_v10 = vpack.c.bf16 %v8147_v2, %v8143_v63  ;;  %v7502_v2 = vadd.f32 %v16615_v18, %v16594_v11  ;;  %v18870_v63 = vld [vmem:[#allocation97_spill] sm:$0xff]  ;;  %v7510_v18 = vadd.f32 %v16638_v1, %v16572_v16 }
 0x65c   :  { %9109 = vmatprep.mubr.bf16.mxu1 %v8384_v14  ;;  %v16758_v49 = vpop.f32.mrf.mxu0  ;;  %v7498_v9 = vadd.f32 %v18870_v63, %v16594_v11 }
 0x65d   :  { %v16760_v0 = vpop.f32.mrf.mxu1  ;;  %v7863_v1 = vadd.f32 %v16640_v8, %v7510_v18 }
 0x65e   :  { %v16766_v34 = vpop.f32.mrf.mxu0 }
 0x65f   :  { %v16768_v38 = vpop.f32.mrf.mxu1 }
 0x660   :  { %v16773_v14 = vpop.f32.mrf.mxu0 }
 0x661   :  { %v16775_v52 = vpop.f32.mrf.mxu1 }
 0x662   :  { %v16779_v19 = vpop.f32.mrf.mxu0  ;;  %8821 = vmatmul.mubr.bf16.gmra.mxu0 %v18869_v20  ;;  %v18872_v20 = vld [vmem:[#allocation154_spill] sm:$0xff] }
 0x663   :  { %18867 = vst [vmem:[#allocation99_spill] sm:$0xff] %v16779_v19  ;;  %v16781_v24 = vpop.f32.mrf.mxu1  ;;  %9110 = vmatmul.mubr.bf16.gmra.mxu1 %v8383_v10  ;;  %8828 = vmatprep.mubr.bf16.mxu0 %v16030_v58  ;;  %v18871_v10 = vld [vmem:[#allocation96_spill] sm:$0xff]  ;;  %v7851_v63 = vadd.f32 %v18872_v20, %v7498_v9  ;;  %v7524_v9 = vadd.f32 %v16683_v48, %v16572_v16 }
 0x664   :  { %18868 = vst [vmem:[#allocation156_spill] sm:$0xff] %v16781_v24  ;;  %9117 = vmatprep.mubr.bf16.mxu1 %v8388_v41  ;;  %v16788_v55 = vpop.f32.mrf.mxu0  ;;  %v7855_v40 = vadd.f32 %v18871_v10, %v7502_v2  ;;  %v8168_v10 = vmax.f32 %v7863_v1, 0.0  ;;  %v18877_v1 = vld [vmem:[#allocation110_spill] sm:$0xff] }
 0x665   :  { %v16790_v37 = vpop.f32.mrf.mxu1  ;;  %v8159_v3 = vmax.f32 %v7851_v63, 0.0  ;;  %v7877_v48 = vadd.f32 %v16685_v50, %v7524_v9 }
 0x666   :  { %v16796_v5 = vpop.f32.mrf.mxu0  ;;  %v8163_v2 = vmax.f32 %v7855_v40, 0.0  ;;  %v8396_v63 = vpack.c.bf16 %v8172_v51, %v8168_v10  ;;  %v7518_v10 = vadd.f32 %v16659_v60, %v16594_v11 }
 0x667   :  { %v16798_v58 = vpop.f32.mrf.mxu1  ;;  %v8180_v9 = vmax.f32 %v7877_v48, 0.0 }
 0x668   :  { %v16803_v41 = vpop.f32.mrf.mxu0  ;;  %v8391_v40 = vpack.c.bf16 %v8163_v2, %v8159_v3  ;;  %v18878_v2 = vld [vmem:[#allocation113_spill] sm:$0xff]  ;;  %v7534_v3 = vadd.f32 %v16713_v59, %v16572_v16  ;;  %v7871_v60 = vadd.f32 %v16661_v36, %v7518_v10  ;;  %v7528_v10 = vadd.f32 %v16689_v46, %v16594_v11 }
 0x669   :  { %v16805_v22 = vpop.f32.mrf.mxu1 }
 0x66a   :  { %v16809_v24 = vpop.f32.mrf.mxu0  ;;  %8829 = vmatmul.mubr.bf16.gmra.mxu0 %v18874_v4  ;;  %v18876_v4 = vld [vmem:[#allocation153_spill] sm:$0xff]  ;;  %v7887_v59 = vadd.f32 %v16715_v57, %v7534_v3  ;;  %v7544_v3 = vadd.f32 %v16743_v44, %v16572_v16  ;;  %v7881_v46 = vadd.f32 %v16691_v33, %v7528_v10  ;;  %v7538_v10 = vadd.f32 %v16719_v23, %v16594_v11 }
 0x66b   :  { %v16811_v19 = vpop.f32.mrf.mxu1  ;;  %9118 = vmatmul.mubr.bf16.gmra.mxu1 %v8387_v45  ;;  %8836 = vmatprep.mubr.bf16.mxu0 %v18875_v53  ;;  %v7508_v45 = vadd.f32 %v16628_v35, %v16594_v11 }
 0x66c   :  { %18873 = vst [vmem:[#allocation98_spill] sm:$0xff] %v16811_v19  ;;  %9125 = vmatprep.mubr.bf16.mxu1 %v8392_v26  ;;  %v16818_v29 = vpop.f32.mrf.mxu0  ;;  %v7865_v26 = vadd.f32 %v16648_v12, %v7512_v25  ;;  %v7522_v25 = vadd.f32 %v16676_v32, %v16594_v11  ;;  %v7530_v32 = vadd.f32 %v16698_v61, %v16572_v16  ;;  %v8188_v36 = vmax.f32 %v7887_v59, 0.0 }
 0x66d   :  { %v16820_v21 = vpop.f32.mrf.mxu1  ;;  %v7861_v35 = vadd.f32 %v18876_v4, %v7508_v45  ;;  %v7897_v44 = vadd.f32 %v16745_v43, %v7544_v3  ;;  %v7554_v3 = vadd.f32 %v16773_v14, %v16572_v16  ;;  %v7891_v23 = vadd.f32 %v16721_v13, %v7538_v10 }
 0x66e   :  { %v16826_v8 = vpop.f32.mrf.mxu0  ;;  %v8171_v12 = vmax.f32 %v7865_v26, 0.0  ;;  %v7883_v61 = vadd.f32 %v16700_v39, %v7530_v32  ;;  %v7548_v10 = vadd.f32 %v16749_v27, %v16594_v11 }
 0x66f   :  { %v16828_v18 = vpop.f32.mrf.mxu1  ;;  %v8167_v45 = vmax.f32 %v7861_v35, 0.0  ;;  %v8196_v33 = vmax.f32 %v7897_v44, 0.0  ;;  %v7907_v14 = vadd.f32 %v16775_v52, %v7554_v3  ;;  %v7564_v3 = vadd.f32 %v16803_v41, %v16572_v16 }
 0x670   :  { %v16833_v20 = vpop.f32.mrf.mxu0  ;;  %v8184_v32 = vmax.f32 %v7883_v61, 0.0  ;;  %v18881_v61 = vld [vmem:[#allocation114_spill] sm:$0xff]  ;;  %v7901_v27 = vadd.f32 %v16751_v30, %v7548_v10  ;;  %v18889_v10 = vld [vmem:[#allocation99_spill] sm:$0xff] }
 0x671   :  { %v16835_v47 = vpop.f32.mrf.mxu1  ;;  %v8395_v26 = vpack.c.bf16 %v8171_v12, %v8167_v45  ;;  %v18880_v12 = vld [vmem:[#allocation15_spill] sm:$0xff]  ;;  %v8175_v45 = vmax.f32 %v7871_v60, 0.0  ;;  %v8204_v13 = vmax.f32 %v7907_v14, 0.0  ;;  %v7917_v41 = vadd.f32 %v16805_v22, %v7564_v3 }
 0x672   :  { %v16839_v53 = vpop.f32.mrf.mxu0  ;;  %8837 = vmatmul.mubr.bf16.gmra.mxu0 %v18877_v1  ;;  %v8404_v60 = vpack.c.bf16 %v8188_v36, %v8184_v32  ;;  %v7574_v3 = vadd.f32 %v16833_v20, %v16572_v16 }
 0x673   :  { %v16841_v19 = vpop.f32.mrf.mxu1  ;;  %9126 = vmatmul.mubr.bf16.gmra.mxu1 %v8391_v40  ;;  %8844 = vmatprep.mubr.bf16.mxu0 %v18878_v2  ;;  %v8176_v40 = vmax.f32 %v7873_v31, 0.0  ;;  %v18879_v31 = vld [vmem:[#allocation112_spill] sm:$0xff]  ;;  %v8212_v30 = vmax.f32 %v7917_v41, 0.0 }
 0x674   :  { %9133 = vmatprep.mubr.bf16.mxu1 %v8396_v63  ;;  %v16848_v50 = vpop.f32.mrf.mxu0  ;;  %v7875_v63 = vadd.f32 %v16678_v62, %v7522_v25  ;;  %v7532_v25 = vadd.f32 %v16706_v42, %v16594_v11  ;;  %v7540_v42 = vadd.f32 %v16728_v15, %v16572_v16  ;;  %v7927_v20 = vadd.f32 %v16835_v47, %v7574_v3 }
 0x675   :  { %v16850_v51 = vpop.f32.mrf.mxu1  ;;  %v8400_v35 = vpack.c.bf16 %v8180_v9, %v8176_v40 }
 0x676   :  { %v16856_v17 = vpop.f32.mrf.mxu0  ;;  %v8179_v62 = vmax.f32 %v7875_v63, 0.0  ;;  %v7885_v63 = vadd.f32 %v16708_v6, %v7532_v25  ;;  %v7893_v15 = vadd.f32 %v16730_v7, %v7540_v42  ;;  %v7542_v25 = vadd.f32 %v16736_v56, %v16594_v11 }
 0x677   :  { %v16858_v54 = vpop.f32.mrf.mxu1  ;;  %v7550_v56 = vadd.f32 %v16758_v49, %v16572_v16  ;;  %v8220_v3 = vmax.f32 %v7927_v20, 0.0 }
 0x678   :  { %v16863_v4 = vpop.f32.mrf.mxu0  ;;  %v8187_v6 = vmax.f32 %v7885_v63, 0.0  ;;  %v8192_v42 = vmax.f32 %v7893_v15, 0.0  ;;  %v7895_v63 = vadd.f32 %v16738_v28, %v7542_v25  ;;  %v18883_v15 = vld [vmem:[#allocation115_spill] sm:$0xff]  ;;  %v7552_v25 = vadd.f32 %v16766_v34, %v16594_v11 }
 0x679   :  { %v16865_v48 = vpop.f32.mrf.mxu1  ;;  %v7903_v49 = vadd.f32 %v16760_v0, %v7550_v56  ;;  %v7560_v34 = vadd.f32 %v16788_v55, %v16572_v16 }
 0x67a   :  { %v16869_v1 = vpop.f32.mrf.mxu0  ;;  %8845 = vmatmul.mubr.bf16.gmra.mxu0 %v18879_v31  ;;  %v8195_v28 = vmax.f32 %v7895_v63, 0.0  ;;  %v7905_v63 = vadd.f32 %v16768_v38, %v7552_v25  ;;  %v7562_v25 = vadd.f32 %v16796_v5, %v16594_v11  ;;  %v7570_v5 = vadd.f32 %v16818_v29, %v16572_v16 }
 0x67b   :  { %v16871_v2 = vpop.f32.mrf.mxu1  ;;  %9134 = vmatmul.mubr.bf16.gmra.mxu1 %v8395_v26  ;;  %8852 = vmatprep.mubr.bf16.mxu0 %v18880_v12  ;;  %v8399_v26 = vpack.c.bf16 %v8179_v62, %v8175_v45  ;;  %v18882_v62 = vld [vmem:[#allocation116_spill] sm:$0xff]  ;;  %v8183_v45 = vmax.f32 %v7881_v46, 0.0  ;;  %v8408_v46 = vpack.c.bf16 %v8196_v33, %v8192_v42  ;;  %v8200_v56 = vmax.f32 %v7903_v49, 0.0  ;;  %v18887_v49 = vld [vmem:[#allocation117_spill] sm:$0xff] }
 0x67c   :  { %9141 = vmatprep.mubr.bf16.mxu1 %v8400_v35  ;;  %v16878_v57 = vpop.f32.mrf.mxu0  ;;  %v7913_v55 = vadd.f32 %v16790_v37, %v7560_v34  ;;  %v8203_v38 = vmax.f32 %v7905_v63, 0.0  ;;  %v7923_v29 = vadd.f32 %v16820_v21, %v7570_v5 }
 0x67d   :  { %v16880_v9 = vpop.f32.mrf.mxu1 }
 0x67e   :  { %v16886_v39 = vpop.f32.mrf.mxu0 }
 0x67f   :  { %v16888_v40 = vpop.f32.mrf.mxu1 }
 0x680   :  { %v16893_v35 = vpop.f32.mrf.mxu0 }
 0x681   :  { %v16895_v59 = vpop.f32.mrf.mxu1 }
 0x682   :  { %v16899_v31 = vpop.f32.mrf.mxu0  ;;  %8853 = vmatmul.mubr.bf16.gmra.mxu0 %v18881_v61 }
 0x683   :  { %v16901_v12 = vpop.f32.mrf.mxu1  ;;  %9142 = vmatmul.mubr.bf16.gmra.mxu1 %v8399_v26  ;;  %8860 = vmatprep.mubr.bf16.mxu0 %v18882_v62  ;;  %v8403_v26 = vpack.c.bf16 %v8187_v6, %v8183_v45  ;;  %v18884_v6 = vld [vmem:[#allocation118_spill] sm:$0xff]  ;;  %v8191_v45 = vmax.f32 %v7891_v23, 0.0  ;;  %v8412_v23 = vpack.c.bf16 %v8204_v13, %v8200_v56  ;;  %v7558_v56 = vadd.f32 %v18889_v10, %v16594_v11 }
 0x684   :  { %9149 = vmatprep.mubr.bf16.mxu1 %v8404_v60  ;;  %v16908_v43 = vpop.f32.mrf.mxu0 }
 0x685   :  { %v16910_v36 = vpop.f32.mrf.mxu1 }
 0x686   :  { %v16916_v7 = vpop.f32.mrf.mxu0 }
 0x687   :  { %v16918_v32 = vpop.f32.mrf.mxu1 }
 0x688   :  { %v16923_v60 = vpop.f32.mrf.mxu0 }
 0x689   :  { %v16925_v44 = vpop.f32.mrf.mxu1 }
 0x68a   :  { %v16929_v61 = vpop.f32.mrf.mxu0  ;;  %8861 = vmatmul.mubr.bf16.gmra.mxu0 %v18883_v15 }
 0x68b   :  { %v16931_v62 = vpop.f32.mrf.mxu1  ;;  %9150 = vmatmul.mubr.bf16.gmra.mxu1 %v8403_v26  ;;  %8868 = vmatprep.mubr.bf16.mxu0 %v18884_v6  ;;  %v8407_v26 = vpack.c.bf16 %v8195_v28, %v8191_v45  ;;  %v18888_v28 = vld [vmem:[#allocation120_spill] sm:$0xff]  ;;  %v8199_v45 = vmax.f32 %v7901_v27, 0.0 }
 0x68c   :  { %9157 = vmatprep.mubr.bf16.mxu1 %v8408_v46  ;;  %v16938_v52 = vpop.f32.mrf.mxu0 }
 0x68d   :  { %v16940_v33 = vpop.f32.mrf.mxu1  ;;  %v8411_v63 = vpack.c.bf16 %v8203_v38, %v8199_v45  ;;  %v18893_v38 = vld [vmem:[#allocation122_spill] sm:$0xff]  ;;  %v7584_v45 = vadd.f32 %v16863_v4, %v16572_v16 }
 0x68e   :  { %v16946_v0 = vpop.f32.mrf.mxu0 }
 0x68f   :  { %v16948_v42 = vpop.f32.mrf.mxu1  ;;  %v7937_v4 = vadd.f32 %v16865_v48, %v7584_v45 }
 0x690   :  { %v16953_v46 = vpop.f32.mrf.mxu0 }
 0x691   :  { %v16955_v14 = vpop.f32.mrf.mxu1  ;;  %v8228_v45 = vmax.f32 %v7937_v4, 0.0 }
 0x692   :  { %v16959_v15 = vpop.f32.mrf.mxu0  ;;  %8869 = vmatmul.mubr.bf16.gmra.mxu0 %v18887_v49 }
 0x693   :  { %18885 = vst [vmem:[#allocation155_spill] sm:$0xff] %v16959_v15  ;;  %v16961_v6 = vpop.f32.mrf.mxu1  ;;  %9158 = vmatmul.mubr.bf16.gmra.mxu1 %v8407_v26  ;;  %8876 = vmatprep.mubr.bf16.mxu0 %v18888_v28  ;;  %v8208_v26 = vmax.f32 %v7913_v55, 0.0  ;;  %v18890_v28 = vld [vmem:[#allocation156_spill] sm:$0xff]  ;;  %v18892_v55 = vld [vmem:[#allocation119_spill] sm:$0xff] }
 0x694   :  { %18886 = vst [vmem:[#allocation101_spill] sm:$0xff] %v16961_v6  ;;  %9165 = vmatprep.mubr.bf16.mxu1 %v8412_v23  ;;  %v16968_v22 = vpop.f32.mrf.mxu0  ;;  %v7915_v23 = vadd.f32 %v16798_v58, %v7562_v25  ;;  %v7911_v10 = vadd.f32 %v18890_v28, %v7558_v56  ;;  %v7572_v25 = vadd.f32 %v16826_v8, %v16594_v11 }
 0x695   :  { %v16970_v13 = vpop.f32.mrf.mxu1  ;;  %v8416_v27 = vpack.c.bf16 %v8212_v30, %v8208_v26  ;;  %v7568_v26 = vadd.f32 %v16809_v24, %v16594_v11  ;;  %v7580_v8 = vadd.f32 %v16848_v50, %v16572_v16 }
 0x696   :  { %v16976_v37 = vpop.f32.mrf.mxu0  ;;  %v8211_v58 = vmax.f32 %v7915_v23, 0.0  ;;  %v8207_v56 = vmax.f32 %v7911_v10, 0.0 }
 0x697   :  { %v16978_v34 = vpop.f32.mrf.mxu1  ;;  %v7933_v50 = vadd.f32 %v16850_v51, %v7580_v8 }
 0x698   :  { %v16983_v49 = vpop.f32.mrf.mxu0  ;;  %v8415_v23 = vpack.c.bf16 %v8211_v58, %v8207_v56  ;;  %v18896_v58 = vld [vmem:[#allocation124_spill] sm:$0xff]  ;;  %v7594_v56 = vadd.f32 %v16893_v35, %v16572_v16 }
 0x699   :  { %v16985_v41 = vpop.f32.mrf.mxu1 }
 0x69a   :  { %v16989_v6 = vpop.f32.mrf.mxu0  ;;  %8877 = vmatmul.mubr.bf16.gmra.mxu0 %v18892_v55  ;;  %v18894_v55 = vld [vmem:[#allocation98_spill] sm:$0xff]  ;;  %v7947_v35 = vadd.f32 %v16895_v59, %v7594_v56  ;;  %v7604_v56 = vadd.f32 %v16923_v60, %v16572_v16 }
 0x69b   :  { %v16991_v15 = vpop.f32.mrf.mxu1  ;;  %9166 = vmatmul.mubr.bf16.gmra.mxu1 %v8411_v63  ;;  %8884 = vmatprep.mubr.bf16.mxu0 %v18893_v38  ;;  %v8216_v63 = vmax.f32 %v7923_v29, 0.0  ;;  %v7921_v24 = vadd.f32 %v18894_v55, %v7568_v26  ;;  %v18895_v29 = vld [vmem:[#allocation121_spill] sm:$0xff] }
 0x69c   :  { %18891 = vst [vmem:[#allocation51_spill] sm:$0xff] %v16991_v15  ;;  %9173 = vmatprep.mubr.bf16.mxu1 %v8416_v27  ;;  %v16998_v47 = vpop.f32.mrf.mxu0  ;;  %v7925_v27 = vadd.f32 %v16828_v18, %v7572_v25  ;;  %v7582_v25 = vadd.f32 %v16856_v17, %v16594_v11  ;;  %v7590_v17 = vadd.f32 %v16878_v57, %v16572_v16 }
 0x69d   :  { %v17000_v30 = vpop.f32.mrf.mxu1  ;;  %v8420_v10 = vpack.c.bf16 %v8220_v3, %v8216_v63  ;;  %v8215_v26 = vmax.f32 %v7921_v24, 0.0  ;;  %v7578_v63 = vadd.f32 %v16839_v53, %v16594_v11  ;;  %v7957_v60 = vadd.f32 %v16925_v44, %v7604_v56 }
 0x69e   :  { %v17006_v21 = vpop.f32.mrf.mxu0  ;;  %v8219_v18 = vmax.f32 %v7925_v27, 0.0  ;;  %v7943_v57 = vadd.f32 %v16880_v9, %v7590_v17  ;;  %v7614_v56 = vadd.f32 %v16953_v46, %v16572_v16 }
 0x69f   :  { %v17008_v5 = vpop.f32.mrf.mxu1  ;;  %v7931_v53 = vadd.f32 %v16841_v19, %v7578_v63  ;;  %v8236_v19 = vmax.f32 %v7947_v35, 0.0  ;;  %v7588_v63 = vadd.f32 %v16869_v1, %v16594_v11 }
 0x6a0   :  { %v17013_v28 = vpop.f32.mrf.mxu0  ;;  %v8419_v27 = vpack.c.bf16 %v8219_v18, %v8215_v26  ;;  %v18898_v18 = vld [vmem:[#allocation21_spill] sm:$0xff]  ;;  %v8232_v17 = vmax.f32 %v7943_v57, 0.0  ;;  %v7967_v46 = vadd.f32 %v16955_v14, %v7614_v56  ;;  %v7624_v56 = vadd.f32 %v16983_v49, %v16572_v16 }
 0x6a1   :  { %v17015_v20 = vpop.f32.mrf.mxu1  ;;  %v8223_v26 = vmax.f32 %v7931_v53, 0.0  ;;  %v7941_v1 = vadd.f32 %v16871_v2, %v7588_v63  ;;  %v18899_v57 = vld [vmem:[#allocation125_spill] sm:$0xff]  ;;  %v8244_v2 = vmax.f32 %v7957_v60, 0.0  ;;  %v7598_v63 = vadd.f32 %v16899_v31, %v16594_v11 }
 0x6a2   :  { %v17019_v38 = vpop.f32.mrf.mxu0  ;;  %8885 = vmatmul.mubr.bf16.gmra.mxu0 %v18895_v29  ;;  %v8428_v53 = vpack.c.bf16 %v8236_v19, %v8232_v17  ;;  %v7977_v49 = vadd.f32 %v16985_v41, %v7624_v56  ;;  %v7634_v56 = vadd.f32 %v17013_v28, %v16572_v16 }
 0x6a3   :  { %v17021_v15 = vpop.f32.mrf.mxu1  ;;  %9174 = vmatmul.mubr.bf16.gmra.mxu1 %v8415_v23  ;;  %8892 = vmatprep.mubr.bf16.mxu0 %v18896_v58  ;;  %v8224_v23 = vmax.f32 %v7933_v50, 0.0  ;;  %v18897_v50 = vld [vmem:[#allocation123_spill] sm:$0xff]  ;;  %v7951_v31 = vadd.f32 %v16901_v12, %v7598_v63  ;;  %v8252_v12 = vmax.f32 %v7967_v46, 0.0  ;;  %v7608_v63 = vadd.f32 %v16929_v61, %v16594_v11 }
 0x6a4   :  { %9181 = vmatprep.mubr.bf16.mxu1 %v8420_v10  ;;  %v17028_v48 = vpop.f32.mrf.mxu0  ;;  %v7935_v10 = vadd.f32 %v16858_v54, %v7582_v25  ;;  %v7592_v25 = vadd.f32 %v16886_v39, %v16594_v11  ;;  %v7600_v39 = vadd.f32 %v16908_v43, %v16572_v16  ;;  %v7987_v28 = vadd.f32 %v17015_v20, %v7634_v56 }
 0x6a5   :  { %v17030_v3 = vpop.f32.mrf.mxu1  ;;  %v8424_v24 = vpack.c.bf16 %v8228_v45, %v8224_v23  ;;  %v7961_v61 = vadd.f32 %v16931_v62, %v7608_v63  ;;  %v8260_v62 = vmax.f32 %v7977_v49, 0.0  ;;  %v18907_v63 = vld [vmem:[#allocation155_spill] sm:$0xff] }
 0x6a6   :  { %v17036_v51 = vpop.f32.mrf.mxu0  ;;  %v8227_v54 = vmax.f32 %v7935_v10, 0.0  ;;  %v7945_v10 = vadd.f32 %v16888_v40, %v7592_v25  ;;  %v7953_v43 = vadd.f32 %v16910_v36, %v7600_v39  ;;  %v7602_v25 = vadd.f32 %v16916_v7, %v16594_v11 }
 0x6a7   :  { %v17038_v8 = vpop.f32.mrf.mxu1  ;;  %v7610_v7 = vadd.f32 %v16938_v52, %v16572_v16  ;;  %v8268_v56 = vmax.f32 %v7987_v28, 0.0 }
 0x6a8   :  { %v17043_v55 = vpop.f32.mrf.mxu0  ;;  %v8235_v40 = vmax.f32 %v7945_v10, 0.0  ;;  %v8240_v39 = vmax.f32 %v7953_v43, 0.0  ;;  %v7955_v10 = vadd.f32 %v16918_v32, %v7602_v25  ;;  %v18901_v43 = vld [vmem:[#allocation126_spill] sm:$0xff]  ;;  %v7612_v25 = vadd.f32 %v16946_v0, %v16594_v11 }
 0x6a9   :  { %v17045_v4 = vpop.f32.mrf.mxu1  ;;  %v7963_v52 = vadd.f32 %v16940_v33, %v7610_v7  ;;  %v7620_v0 = vadd.f32 %v16968_v22, %v16572_v16 }
 0x6aa   :  { %v17049_v29 = vpop.f32.mrf.mxu0  ;;  %8893 = vmatmul.mubr.bf16.gmra.mxu0 %v18897_v50  ;;  %v8243_v32 = vmax.f32 %v7955_v10, 0.0  ;;  %v7965_v10 = vadd.f32 %v16948_v42, %v7612_v25  ;;  %v7622_v25 = vadd.f32 %v16976_v37, %v16594_v11  ;;  %v7630_v37 = vadd.f32 %v16998_v47, %v16572_v16 }
 0x6ab   :  { %v17051_v58 = vpop.f32.mrf.mxu1  ;;  %9182 = vmatmul.mubr.bf16.gmra.mxu1 %v8419_v27  ;;  %8900 = vmatprep.mubr.bf16.mxu0 %v18898_v18  ;;  %v8423_v27 = vpack.c.bf16 %v8227_v54, %v8223_v26  ;;  %v18900_v54 = vld [vmem:[#allocation127_spill] sm:$0xff]  ;;  %v8231_v26 = vmax.f32 %v7941_v1, 0.0  ;;  %v8432_v1 = vpack.c.bf16 %v8244_v2, %v8240_v39  ;;  %v8248_v7 = vmax.f32 %v7963_v52, 0.0  ;;  %v18905_v52 = vld [vmem:[#allocation128_spill] sm:$0xff] }
 0x6ac   :  { %9189 = vmatprep.mubr.bf16.mxu1 %v8424_v24  ;;  %v17058_v59 = vpop.f32.mrf.mxu0  ;;  %v7973_v22 = vadd.f32 %v16970_v13, %v7620_v0  ;;  %v8251_v42 = vmax.f32 %v7965_v10, 0.0  ;;  %v7983_v47 = vadd.f32 %v17000_v30, %v7630_v37 }
 0x6ad   :  { %v17060_v45 = vpop.f32.mrf.mxu1 }
 0x6ae   :  { %v17066_v9 = vpop.f32.mrf.mxu0 }
 0x6af   :  { %v17068_v23 = vpop.f32.mrf.mxu1 }
 0x6b0   :  { %v17073_v24 = vpop.f32.mrf.mxu0 }
 0x6b1   :  { %v17075_v35 = vpop.f32.mrf.mxu1 }
 0x6b2   :  { %v17079_v50 = vpop.f32.mrf.mxu0  ;;  %8901 = vmatmul.mubr.bf16.gmra.mxu0 %v18899_v57 }
 0x6b3   :  { %v17081_v18 = vpop.f32.mrf.mxu1  ;;  %9190 = vmatmul.mubr.bf16.gmra.mxu1 %v8423_v27  ;;  %8908 = vmatprep.mubr.bf16.mxu0 %v18900_v54  ;;  %v8427_v27 = vpack.c.bf16 %v8235_v40, %v8231_v26  ;;  %v18902_v40 = vld [vmem:[#allocation129_spill] sm:$0xff]  ;;  %v8239_v26 = vmax.f32 %v7951_v31, 0.0  ;;  %v8436_v31 = vpack.c.bf16 %v8252_v12, %v8248_v7  ;;  %v7618_v7 = vadd.f32 %v18907_v63, %v16594_v11 }
 0x6b4   :  { %9197 = vmatprep.mubr.bf16.mxu1 %v8428_v53  ;;  %v17088_v44 = vpop.f32.mrf.mxu0 }
 0x6b5   :  { %v17090_v19 = vpop.f32.mrf.mxu1 }
 0x6b6   :  { %v17096_v36 = vpop.f32.mrf.mxu0 }
 0x6b7   :  { %v17098_v17 = vpop.f32.mrf.mxu1 }
 0x6b8   :  { %v17103_v53 = vpop.f32.mrf.mxu0 }
 0x6b9   :  { %v17105_v60 = vpop.f32.mrf.mxu1 }
 0x6ba   :  { %v17109_v57 = vpop.f32.mrf.mxu0  ;;  %8909 = vmatmul.mubr.bf16.gmra.mxu0 %v18901_v43 }
 0x6bb   :  { %v17111_v54 = vpop.f32.mrf.mxu1  ;;  %9198 = vmatmul.mubr.bf16.gmra.mxu1 %v8427_v27  ;;  %8916 = vmatprep.mubr.bf16.mxu0 %v18902_v40  ;;  %v8431_v27 = vpack.c.bf16 %v8243_v32, %v8239_v26  ;;  %v18906_v32 = vld [vmem:[#allocation131_spill] sm:$0xff]  ;;  %v8247_v26 = vmax.f32 %v7961_v61, 0.0 }
 0x6bc   :  { %9205 = vmatprep.mubr.bf16.mxu1 %v8432_v1  ;;  %v17118_v14 = vpop.f32.mrf.mxu0 }
 0x6bd   :  { %v17120_v2 = vpop.f32.mrf.mxu1  ;;  %v8435_v10 = vpack.c.bf16 %v8251_v42, %v8247_v26  ;;  %v18911_v42 = vld [vmem:[#allocation133_spill] sm:$0xff]  ;;  %v7644_v26 = vadd.f32 %v17043_v55, %v16572_v16 }
 0x6be   :  { %v17126_v33 = vpop.f32.mrf.mxu0 }
 0x6bf   :  { %v17128_v39 = vpop.f32.mrf.mxu1  ;;  %v7997_v55 = vadd.f32 %v17045_v4, %v7644_v26 }
 0x6c0   :  { %v17133_v1 = vpop.f32.mrf.mxu0 }
 0x6c1   :  { %v17135_v46 = vpop.f32.mrf.mxu1  ;;  %v8276_v26 = vmax.f32 %v7997_v55, 0.0 }
 0x6c2   :  { %v17139_v43 = vpop.f32.mrf.mxu0  ;;  %8917 = vmatmul.mubr.bf16.gmra.mxu0 %v18905_v52 }
 0x6c3   :  { %18903 = vst [vmem:[#allocation100_spill] sm:$0xff] %v17139_v43  ;;  %v17141_v40 = vpop.f32.mrf.mxu1  ;;  %9206 = vmatmul.mubr.bf16.gmra.mxu1 %v8431_v27  ;;  %8924 = vmatprep.mubr.bf16.mxu0 %v18906_v32  ;;  %v8256_v27 = vmax.f32 %v7973_v22, 0.0  ;;  %v18908_v32 = vld [vmem:[#allocation101_spill] sm:$0xff]  ;;  %v18910_v22 = vld [vmem:[#allocation130_spill] sm:$0xff] }
 0x6c4   :  { %18904 = vst [vmem:[#allocation157_spill] sm:$0xff] %v17141_v40  ;;  %9213 = vmatprep.mubr.bf16.mxu1 %v8436_v31  ;;  %v17148_v41 = vpop.f32.mrf.mxu0  ;;  %v7975_v31 = vadd.f32 %v16978_v34, %v7622_v25  ;;  %v7971_v63 = vadd.f32 %v18908_v32, %v7618_v7  ;;  %v7632_v25 = vadd.f32 %v17006_v21, %v16594_v11 }
 0x6c5   :  { %v17150_v12 = vpop.f32.mrf.mxu1  ;;  %v8440_v61 = vpack.c.bf16 %v8260_v62, %v8256_v27  ;;  %v7628_v27 = vadd.f32 %v16989_v6, %v16594_v11  ;;  %v7640_v21 = vadd.f32 %v17028_v48, %v16572_v16 }
 0x6c6   :  { %v17156_v13 = vpop.f32.mrf.mxu0  ;;  %v8259_v34 = vmax.f32 %v7975_v31, 0.0  ;;  %v8255_v7 = vmax.f32 %v7971_v63, 0.0 }
 0x6c7   :  { %v17158_v0 = vpop.f32.mrf.mxu1  ;;  %v7993_v48 = vadd.f32 %v17030_v3, %v7640_v21 }
 0x6c8   :  { %v17163_v52 = vpop.f32.mrf.mxu0  ;;  %v8439_v31 = vpack.c.bf16 %v8259_v34, %v8255_v7  ;;  %v18914_v34 = vld [vmem:[#allocation135_spill] sm:$0xff]  ;;  %v7654_v7 = vadd.f32 %v17073_v24, %v16572_v16 }
 0x6c9   :  { %v17165_v49 = vpop.f32.mrf.mxu1 }
 0x6ca   :  { %v17169_v40 = vpop.f32.mrf.mxu0  ;;  %8925 = vmatmul.mubr.bf16.gmra.mxu0 %v18910_v22  ;;  %v18912_v22 = vld [vmem:[#allocation51_spill] sm:$0xff]  ;;  %v8007_v24 = vadd.f32 %v17075_v35, %v7654_v7  ;;  %v7664_v7 = vadd.f32 %v17103_v53, %v16572_v16 }
 0x6cb   :  { %v17171_v43 = vpop.f32.mrf.mxu1  ;;  %9214 = vmatmul.mubr.bf16.gmra.mxu1 %v8435_v10  ;;  %8932 = vmatprep.mubr.bf16.mxu0 %v18911_v42  ;;  %v8264_v10 = vmax.f32 %v7983_v47, 0.0  ;;  %v7981_v6 = vadd.f32 %v18912_v22, %v7628_v27  ;;  %v18913_v47 = vld [vmem:[#allocation132_spill] sm:$0xff] }
 0x6cc   :  { %18909 = vst [vmem:[#allocation6_spill] sm:$0xff] %v17171_v43  ;;  %9221 = vmatprep.mubr.bf16.mxu1 %v8440_v61  ;;  %v17178_v20 = vpop.f32.mrf.mxu0  ;;  %v7985_v61 = vadd.f32 %v17008_v5, %v7632_v25  ;;  %v7642_v25 = vadd.f32 %v17036_v51, %v16594_v11  ;;  %v7650_v51 = vadd.f32 %v17058_v59, %v16572_v16 }
 0x6cd   :  { %v17180_v62 = vpop.f32.mrf.mxu1  ;;  %v8444_v63 = vpack.c.bf16 %v8268_v56, %v8264_v10  ;;  %v8263_v27 = vmax.f32 %v7981_v6, 0.0  ;;  %v7638_v10 = vadd.f32 %v17019_v38, %v16594_v11  ;;  %v8017_v53 = vadd.f32 %v17105_v60, %v7664_v7 }
 0x6ce   :  { %v17186_v30 = vpop.f32.mrf.mxu0  ;;  %v8267_v5 = vmax.f32 %v7985_v61, 0.0  ;;  %v8003_v59 = vadd.f32 %v17060_v45, %v7650_v51  ;;  %v7674_v7 = vadd.f32 %v17133_v1, %v16572_v16 }
 0x6cf   :  { %v17188_v37 = vpop.f32.mrf.mxu1  ;;  %v7991_v38 = vadd.f32 %v17021_v15, %v7638_v10  ;;  %v8284_v15 = vmax.f32 %v8007_v24, 0.0  ;;  %v7648_v10 = vadd.f32 %v17049_v29, %v16594_v11 }
 0x6d0   :  { %v17193_v32 = vpop.f32.mrf.mxu0  ;;  %v8443_v61 = vpack.c.bf16 %v8267_v5, %v8263_v27  ;;  %v18916_v5 = vld [vmem:[#allocation137_spill] sm:$0xff]  ;;  %v8280_v51 = vmax.f32 %v8003_v59, 0.0  ;;  %v18917_v59 = vld [vmem:[#allocation136_spill] sm:$0xff]  ;;  %v8027_v1 = vadd.f32 %v17135_v46, %v7674_v7  ;;  %v7684_v7 = vadd.f32 %v17163_v52, %v16572_v16 }
 0x6d1   :  { %v17195_v28 = vpop.f32.mrf.mxu1  ;;  %v8271_v27 = vmax.f32 %v7991_v38, 0.0  ;;  %v8001_v29 = vadd.f32 %v17051_v58, %v7648_v10  ;;  %v8292_v58 = vmax.f32 %v8017_v53, 0.0  ;;  %v7658_v10 = vadd.f32 %v17079_v50, %v16594_v11 }
 0x6d2   :  { %v17199_v42 = vpop.f32.mrf.mxu0  ;;  %8933 = vmatmul.mubr.bf16.gmra.mxu0 %v18913_v47  ;;  %v8452_v38 = vpack.c.bf16 %v8284_v15, %v8280_v51  ;;  %v8037_v52 = vadd.f32 %v17165_v49, %v7684_v7  ;;  %v7694_v7 = vadd.f32 %v17193_v32, %v16572_v16 }
 0x6d3   :  { %v17201_v43 = vpop.f32.mrf.mxu1  ;;  %9222 = vmatmul.mubr.bf16.gmra.mxu1 %v8439_v31  ;;  %8940 = vmatprep.mubr.bf16.mxu0 %v18914_v34  ;;  %v8272_v31 = vmax.f32 %v7993_v48, 0.0  ;;  %v18915_v48 = vld [vmem:[#allocation134_spill] sm:$0xff]  ;;  %v8011_v50 = vadd.f32 %v17081_v18, %v7658_v10  ;;  %v8300_v18 = vmax.f32 %v8027_v1, 0.0  ;;  %v7668_v10 = vadd.f32 %v17109_v57, %v16594_v11 }
 0x6d4   :  { %9229 = vmatprep.mubr.bf16.mxu1 %v8444_v63  ;;  %v17208_v4 = vpop.f32.mrf.mxu0  ;;  %v7995_v63 = vadd.f32 %v17038_v8, %v7642_v25  ;;  %v7652_v25 = vadd.f32 %v17066_v9, %v16594_v11  ;;  %v7660_v9 = vadd.f32 %v17088_v44, %v16572_v16  ;;  %v8047_v32 = vadd.f32 %v17195_v28, %v7694_v7 }
 0x6d5   :  { %v17210_v56 = vpop.f32.mrf.mxu1  ;;  %v8448_v6 = vpack.c.bf16 %v8276_v26, %v8272_v31  ;;  %v8021_v57 = vadd.f32 %v17111_v54, %v7668_v10  ;;  %v8308_v54 = vmax.f32 %v8037_v52, 0.0  ;;  %v18925_v10 = vld [vmem:[#allocation100_spill] sm:$0xff] }
 0x6d6   :  { %v17216_v3 = vpop.f32.mrf.mxu0  ;;  %v8275_v8 = vmax.f32 %v7995_v63, 0.0  ;;  %v8005_v63 = vadd.f32 %v17068_v23, %v7652_v25  ;;  %v8013_v44 = vadd.f32 %v17090_v19, %v7660_v9  ;;  %v7662_v25 = vadd.f32 %v17096_v36, %v16594_v11 }
 0x6d7   :  { %v17218_v21 = vpop.f32.mrf.mxu1  ;;  %v7670_v36 = vadd.f32 %v17118_v14, %v16572_v16  ;;  %v8316_v7 = vmax.f32 %v8047_v32, 0.0 }
 0x6d8   :  { %v17223_v22 = vpop.f32.mrf.mxu0  ;;  %v8283_v23 = vmax.f32 %v8005_v63, 0.0  ;;  %v8288_v9 = vmax.f32 %v8013_v44, 0.0  ;;  %v8015_v63 = vadd.f32 %v17098_v17, %v7662_v25  ;;  %v18919_v44 = vld [vmem:[#allocation138_spill] sm:$0xff]  ;;  %v7672_v25 = vadd.f32 %v17126_v33, %v16594_v11 }
 0x6d9   :  { %v17225_v55 = vpop.f32.mrf.mxu1  ;;  %v8023_v14 = vadd.f32 %v17120_v2, %v7670_v36  ;;  %v7680_v33 = vadd.f32 %v17148_v41, %v16572_v16 }
 0x6da   :  { %v17229_v47 = vpop.f32.mrf.mxu0  ;;  %8941 = vmatmul.mubr.bf16.gmra.mxu0 %v18915_v48  ;;  %v8291_v17 = vmax.f32 %v8015_v63, 0.0  ;;  %v8025_v63 = vadd.f32 %v17128_v39, %v7672_v25  ;;  %v7682_v25 = vadd.f32 %v17156_v13, %v16594_v11  ;;  %v7690_v13 = vadd.f32 %v17178_v20, %v16572_v16 }
 0x6db   :  { %v17231_v34 = vpop.f32.mrf.mxu1  ;;  %9230 = vmatmul.mubr.bf16.gmra.mxu1 %v8443_v61  ;;  %8948 = vmatprep.mubr.bf16.mxu0 %v18916_v5  ;;  %v8447_v61 = vpack.c.bf16 %v8275_v8, %v8271_v27  ;;  %v18918_v8 = vld [vmem:[#allocation139_spill] sm:$0xff]  ;;  %v8279_v27 = vmax.f32 %v8001_v29, 0.0  ;;  %v8456_v29 = vpack.c.bf16 %v8292_v58, %v8288_v9  ;;  %v8296_v36 = vmax.f32 %v8023_v14, 0.0  ;;  %v18923_v14 = vld [vmem:[#allocation140_spill] sm:$0xff] }
 0x6dc   :  { %9237 = vmatprep.mubr.bf16.mxu1 %v8448_v6  ;;  %v17238_v35 = vpop.f32.mrf.mxu0  ;;  %v8033_v41 = vadd.f32 %v17150_v12, %v7680_v33  ;;  %v8299_v39 = vmax.f32 %v8025_v63, 0.0  ;;  %v8043_v20 = vadd.f32 %v17180_v62, %v7690_v13 }
 0x6dd   :  { %v17240_v26 = vpop.f32.mrf.mxu1 }
 0x6de   :  { %v17246_v45 = vpop.f32.mrf.mxu0 }
 0x6df   :  { %v17248_v31 = vpop.f32.mrf.mxu1 }
 0x6e0   :  { %v17253_v6 = vpop.f32.mrf.mxu0 }
 0x6e1   :  { %v17255_v24 = vpop.f32.mrf.mxu1 }
 0x6e2   :  { %v17259_v48 = vpop.f32.mrf.mxu0  ;;  %8949 = vmatmul.mubr.bf16.gmra.mxu0 %v18917_v59 }
 0x6e3   :  { %v17261_v5 = vpop.f32.mrf.mxu1  ;;  %9238 = vmatmul.mubr.bf16.gmra.mxu1 %v8447_v61  ;;  %8956 = vmatprep.mubr.bf16.mxu0 %v18918_v8  ;;  %v8451_v61 = vpack.c.bf16 %v8283_v23, %v8279_v27  ;;  %v18920_v23 = vld [vmem:[#allocation141_spill] sm:$0xff]  ;;  %v8287_v27 = vmax.f32 %v8011_v50, 0.0  ;;  %v8460_v50 = vpack.c.bf16 %v8300_v18, %v8296_v36  ;;  %v7678_v36 = vadd.f32 %v18925_v10, %v16594_v11 }
 0x6e4   :  { %9245 = vmatprep.mubr.bf16.mxu1 %v8452_v38  ;;  %v17268_v60 = vpop.f32.mrf.mxu0 }
 0x6e5   :  { %v17270_v15 = vpop.f32.mrf.mxu1 }
 0x6e6   :  { %v17276_v19 = vpop.f32.mrf.mxu0 }
 0x6e7   :  { %v17278_v51 = vpop.f32.mrf.mxu1 }
 0x6e8   :  { %v17283_v38 = vpop.f32.mrf.mxu0 }
 0x6e9   :  { %v17285_v53 = vpop.f32.mrf.mxu1 }
 0x6ea   :  { %v17289_v59 = vpop.f32.mrf.mxu0  ;;  %8957 = vmatmul.mubr.bf16.gmra.mxu0 %v18919_v44 }
 0x6eb   :  { %v17291_v8 = vpop.f32.mrf.mxu1  ;;  %9246 = vmatmul.mubr.bf16.gmra.mxu1 %v8451_v61  ;;  %8964 = vmatprep.mubr.bf16.mxu0 %v18920_v23  ;;  %v8455_v61 = vpack.c.bf16 %v8291_v17, %v8287_v27  ;;  %v18924_v17 = vld [vmem:[#allocation143_spill] sm:$0xff]  ;;  %v8295_v27 = vmax.f32 %v8021_v57, 0.0 }
 0x6ec   :  { %9253 = vmatprep.mubr.bf16.mxu1 %v8456_v29  ;;  %v17298_v46 = vpop.f32.mrf.mxu0 }
 0x6ed   :  { %v17300_v58 = vpop.f32.mrf.mxu1  ;;  %v8459_v63 = vpack.c.bf16 %v8299_v39, %v8295_v27  ;;  %v18929_v39 = vld [vmem:[#allocation145_spill] sm:$0xff]  ;;  %v7704_v27 = vadd.f32 %v17223_v22, %v16572_v16 }
 0x6ee   :  { %v17306_v2 = vpop.f32.mrf.mxu0  ;;  %v17380_v22 = vld [vmem:[%s18056_s6] ss:$0 sm:$0xff] }
 0x6ef   :  { %v17308_v9 = vpop.f32.mrf.mxu1 }
 0x6f0   :  { %v17313_v29 = vpop.f32.mrf.mxu0 }
 0x6f1   :  { %v17315_v1 = vpop.f32.mrf.mxu1 }
 0x6f2   :  { %v17319_v44 = vpop.f32.mrf.mxu0  ;;  %8965 = vmatmul.mubr.bf16.gmra.mxu0 %v18923_v14 }
 0x6f3   :  { %18921 = vst [vmem:[#allocation89_spill] sm:$0xff] %v17319_v44  ;;  %v17321_v23 = vpop.f32.mrf.mxu1  ;;  %9254 = vmatmul.mubr.bf16.gmra.mxu1 %v8455_v61  ;;  %8972 = vmatprep.mubr.bf16.mxu0 %v18924_v17  ;;  %v8304_v61 = vmax.f32 %v8033_v41, 0.0  ;;  %v18926_v17 = vld [vmem:[#allocation157_spill] sm:$0xff]  ;;  %v18928_v41 = vld [vmem:[#allocation142_spill] sm:$0xff] }
 0x6f4   :  { %18922 = vst [vmem:[#allocation102_spill] sm:$0xff] %v17321_v23  ;;  %9261 = vmatprep.mubr.bf16.mxu1 %v8460_v50  ;;  %v17328_v49 = vpop.f32.mrf.mxu0  ;;  %v8035_v50 = vadd.f32 %v17158_v0, %v7682_v25  ;;  %v8031_v10 = vadd.f32 %v18926_v17, %v7678_v36  ;;  %v7692_v25 = vadd.f32 %v17186_v30, %v16594_v11 }
 0x6f5   :  { %v17330_v18 = vpop.f32.mrf.mxu1  ;;  %v8464_v57 = vpack.c.bf16 %v8308_v54, %v8304_v61  ;;  %v7688_v61 = vadd.f32 %v17169_v40, %v16594_v11  ;;  %v7700_v30 = vadd.f32 %v17208_v4, %v16572_v16  ;;  %v8057_v40 = vadd.f32 %v17225_v55, %v7704_v27 }
 0x6f6   :  { %v17336_v12 = vpop.f32.mrf.mxu0  ;;  %v8307_v0 = vmax.f32 %v8035_v50, 0.0  ;;  %v8303_v36 = vmax.f32 %v8031_v10, 0.0 }
 0x6f7   :  { %v17338_v33 = vpop.f32.mrf.mxu1  ;;  %v8324_v27 = vmax.f32 %v8057_v40, 0.0 }
 0x6f8   :  { %v17343_v14 = vpop.f32.mrf.mxu0  ;;  %v8463_v50 = vpack.c.bf16 %v8307_v0, %v8303_v36 }
 0x6f9   :  { %v17345_v52 = vpop.f32.mrf.mxu1 }
 0x6fa   :  { %v17349_v23 = vpop.f32.mrf.mxu0  ;;  %8973 = vmatmul.mubr.bf16.gmra.mxu0 %v18928_v41  ;;  %v18931_v41 = vld [vmem:[#allocation6_spill] sm:$0xff] }
 0x6fb   :  { %v17351_v44 = vpop.f32.mrf.mxu1  ;;  %9262 = vmatmul.mubr.bf16.gmra.mxu1 %v8459_v63  ;;  %8980 = vmatprep.mubr.bf16.mxu0 %v18929_v39  ;;  %v8312_v63 = vmax.f32 %v8043_v20, 0.0  ;;  %v8041_v20 = vadd.f32 %v18931_v41, %v7688_v61  ;;  %v7714_v61 = vadd.f32 %v17253_v6, %v16572_v16 }
 0x6fc   :  { %18927 = vst [vmem:[#allocation52_spill] sm:$0xff] %v17351_v44  ;;  %9269 = vmatprep.mubr.bf16.mxu1 %v8464_v57  ;;  %v17358_v28 = vpop.f32.mrf.mxu0  ;;  %v8045_v57 = vadd.f32 %v17188_v37, %v7692_v25  ;;  %v18932_v44 = vld [vmem:[#allocation144_spill] sm:$0xff]  ;;  %v8053_v37 = vadd.f32 %v17210_v56, %v7700_v30  ;;  %v18933_v25 = vld [vmem:[#allocation147_spill] sm:$0xff]  ;;  %v7698_v56 = vadd.f32 %v17199_v42, %v16594_v11 }
 0x6fd   :  { %v17360_v54 = vpop.f32.mrf.mxu1  ;;  %v8468_v10 = vpack.c.bf16 %v8316_v7, %v8312_v63  ;;  %v8311_v63 = vmax.f32 %v8041_v20, 0.0  ;;  %v8067_v20 = vadd.f32 %v17255_v24, %v7714_v61  ;;  %v7712_v24 = vadd.f32 %v17246_v45, %v16594_v11 }
 0x6fe   :  { %v17366_v62 = vpop.f32.mrf.mxu0  ;;  %v8315_v36 = vmax.f32 %v8045_v57, 0.0  ;;  %v8320_v41 = vmax.f32 %v8053_v37, 0.0  ;;  %v7710_v57 = vadd.f32 %v17238_v35, %v16572_v16  ;;  %v7724_v61 = vadd.f32 %v17283_v38, %v16572_v16 }
 0x6ff   :  { %v17368_v13 = vpop.f32.mrf.mxu1  ;;  %v7720_v45 = vadd.f32 %v17268_v60, %v16572_v16 }
 0x700   :  { %18930 = vst [vmem:[#allocation8_spill] sm:$0xff] %v17368_v13  ;;  %v17373_v17 = vpop.f32.mrf.mxu0  ;;  %v7702_v13 = vadd.f32 %v17216_v3, %v16594_v11  ;;  %v8467_v40 = vpack.c.bf16 %v8315_v36, %v8311_v63  ;;  %v8472_v42 = vpack.c.bf16 %v8324_v27, %v8320_v41  ;;  %v8332_v27 = vmax.f32 %v8067_v20, 0.0 }
 0x701   :  { %v17375_v32 = vpop.f32.mrf.mxu1 }
 0x702   :  { %v8790_v39 = vpop.f32.mrf.mxu0  ;;  %8981 = vmatmul.mubr.bf16.gmra.mxu0 %v18932_v44 }
 0x703   :  { %v9079_v4 = vpop.f32.mrf.mxu1  ;;  %9270 = vmatmul.mubr.bf16.gmra.mxu1 %v8463_v50  ;;  %v8791_v0 = vadd.f32 %v17380_v22, %v8790_v39  ;;  %8988 = vmatprep.mubr.bf16.mxu0 %v18933_v25  ;;  %v18934_v25 = vld [vmem:[#allocation146_spill] sm:$0xff] }
 0x704   :  { %9277 = vmatprep.mubr.bf16.mxu1 %v8468_v10  ;;  %v8792_v55 = vpop.f32.mrf.mxu0  ;;  %v8055_v10 = vadd.f32 %v17218_v21, %v7702_v13 }
 0x705   :  { %v9081_v7 = vpop.f32.mrf.mxu1  ;;  %v17392_v44 = vadd.f32 %v9079_v4, %v8791_v0  ;;  %v8051_v0 = vadd.f32 %v17201_v43, %v7698_v56  ;;  %v8063_v55 = vadd.f32 %v17240_v26, %v7710_v57  ;;  %v7708_v56 = vadd.f32 %v17229_v47, %v16594_v11 }
 0x706   :  { %v8793_v30 = vpop.f32.mrf.mxu0  ;;  %v18935_v7 = vld [vmem:[#allocation149_spill] sm:$0xff]  ;;  %v8323_v21 = vmax.f32 %v8055_v10, 0.0 }
 0x707   :  { %v9082_v50 = vpop.f32.mrf.mxu1  ;;  %v8794_v3 = vadd.f32 %v17380_v22, %v8793_v30  ;;  %9334 = vmax.xlane.f32.xlu0 %v17392_v44  ;;  %v8319_v26 = vmax.f32 %v8051_v0, 0.0  ;;  %v8328_v41 = vmax.f32 %v8063_v55, 0.0  ;;  %v8061_v20 = vadd.f32 %v17231_v34, %v7708_v56  ;;  %v18936_v0 = vld [vmem:[#allocation148_spill] sm:$0xff] }
 0x708   :  { %v8795_v6 = vpop.f32.mrf.mxu0 }
 0x709   :  { %v9084_v39 = vpop.f32.mrf.mxu1  ;;  %v17402_v4 = vadd.f32 %v9082_v50, %v8794_v3  ;;  %v8471_v3 = vpack.c.bf16 %v8323_v21, %v8319_v26  ;;  %v8077_v6 = vadd.f32 %v17285_v53, %v7724_v61  ;;  %v8476_v47 = vpack.c.bf16 %v8332_v27, %v8328_v41 }
 0x70a   :  { %v8798_v37 = vpop.f32.mrf.mxu0  ;;  %8989 = vmatmul.mubr.bf16.gmra.mxu0 %v18934_v25  ;;  %v7722_v53 = vadd.f32 %v17276_v19, %v16594_v11  ;;  %v7730_v19 = vadd.f32 %v17298_v46, %v16572_v16 }
 0x70b   :  { %v9087_v35 = vpop.f32.mrf.mxu1  ;;  %9278 = vmatmul.mubr.bf16.gmra.mxu1 %v8467_v40  ;;  %v8799_v36 = vadd.f32 %v17380_v22, %v8798_v37  ;;  %8996 = vmatprep.mubr.bf16.mxu0 %v18935_v7  ;;  %v8065_v40 = vadd.f32 %v17248_v31, %v7712_v24  ;;  %v8073_v37 = vadd.f32 %v17270_v15, %v7720_v45  ;;  %v8327_v15 = vmax.f32 %v8061_v20, 0.0 }
 0x70c   :  { %9285 = vmatprep.mubr.bf16.mxu1 %v8472_v42  ;;  %9336 = vmax.xlane.f32.xlu0 %v17402_v4  ;;  %v8800_v13 = vpop.f32.mrf.mxu0  ;;  %v7734_v7 = vadd.f32 %v17313_v29, %v16572_v16  ;;  %v7718_v24 = vadd.f32 %v17259_v48, %v16594_v11  ;;  %v8075_v56 = vadd.f32 %v17278_v51, %v7722_v53 }
 0x70d   :  { %v9089_v43 = vpop.f32.mrf.mxu1  ;;  %v17414_v63 = vadd.f32 %v9087_v35, %v8799_v36  ;;  %v18937_v35 = vld [vmem:[#allocation151_spill] sm:$0xff]  ;;  %v8331_v31 = vmax.f32 %v8065_v40, 0.0  ;;  %v8340_v36 = vmax.f32 %v8077_v6, 0.0  ;;  %v8336_v27 = vmax.f32 %v8073_v37, 0.0 }
 0x70e   :  { %v8801_v30 = vpop.f32.mrf.mxu0  ;;  %v8071_v45 = vadd.f32 %v17261_v5, %v7718_v24  ;;  %v8083_v40 = vadd.f32 %v17300_v58, %v7730_v19  ;;  %v8339_v51 = vmax.f32 %v8075_v56, 0.0  ;;  %v7744_v20 = vadd.f32 %v17343_v14, %v16572_v16  ;;  %v18940_v24 = vld [vmem:[#allocation152_spill] sm:$0xff] }
 0x70f   :  { %v9090_v50 = vpop.f32.mrf.mxu1  ;;  %v8802_v57 = vadd.f32 %v17380_v22, %v8801_v30  ;;  %9338 = vmax.xlane.f32.xlu1 %v17414_v63  ;;  %v8475_v26 = vpack.c.bf16 %v8331_v31, %v8327_v15  ;;  %v8480_v48 = vpack.c.bf16 %v8340_v36, %v8336_v27  ;;  %v18941_v27 = vld [vmem:[#allocation41_spill] sm:$0xff] }
 0x710   :  { %v8803_v38 = vpop.f32.mrf.mxu0  ;;  %v8335_v58 = vmax.f32 %v8071_v45, 0.0 }
 0x711   :  { %v9092_v10 = vpop.f32.mrf.mxu1  ;;  %v17424_v39 = vadd.f32 %v9090_v50, %v8802_v57  ;;  %v8087_v50 = vadd.f32 %v17315_v1, %v7734_v7  ;;  %v7732_v1 = vadd.f32 %v17306_v2, %v16594_v11  ;;  %v7740_v2 = vadd.f32 %v17328_v49, %v16572_v16 }
 0x712   :  { %v8806_v42 = vpop.f32.mrf.mxu0  ;;  %8997 = vmatmul.mubr.bf16.gmra.mxu0 %v18936_v0  ;;  %v18939_v10 = vld [vmem:[#allocation35_spill] sm:$0xff]  ;;  %v7728_v0 = vadd.f32 %v17289_v59, %v16594_v11  ;;  %v8479_v31 = vpack.c.bf16 %v8339_v51, %v8335_v58  ;;  %v18945_v58 = vld [vmem:[#allocation45_spill] sm:$0xff] }
 0x713   :  { %v9095_v60 = vpop.f32.mrf.mxu1  ;;  %9286 = vmatmul.mubr.bf16.gmra.mxu1 %v8471_v3  ;;  %v8807_v25 = vadd.f32 %v17380_v22, %v8806_v42  ;;  %9004 = vmatprep.mubr.bf16.mxu0 %v18937_v35  ;;  %v18938_v3 = vld [vmem:[#allocation150_spill] sm:$0xff]  ;;  %v8085_v53 = vadd.f32 %v17308_v9, %v7732_v1 }
 0x714   :  { %9293 = vmatprep.mubr.bf16.mxu1 %v8476_v47  ;;  %9340 = vmax.xlane.f32.xlu1 %v17424_v39  ;;  %v8808_v55 = vpop.f32.mrf.mxu0  ;;  %v8348_v47 = vmax.f32 %v8087_v50, 0.0  ;;  %v8081_v7 = vadd.f32 %v17291_v8, %v7728_v0  ;;  %v18943_v1 = vld [vmem:[#allocation102_spill] sm:$0xff] }
 0x715   :  { %v9097_v34 = vpop.f32.mrf.mxu1  ;;  %v17436_v21 = vadd.f32 %v9095_v60, %v8807_v25  ;;  %v8344_v25 = vmax.f32 %v8083_v40, 0.0  ;;  %v8347_v9 = vmax.f32 %v8085_v53, 0.0 }
 0x716   :  { %v8809_v13 = vpop.f32.mrf.mxu0  ;;  %v8097_v34 = vadd.f32 %v17345_v52, %v7744_v20  ;;  %v7742_v52 = vadd.f32 %v17336_v12, %v16594_v11  ;;  %v7750_v12 = vadd.f32 %v17358_v28, %v16572_v16 }
 0x717   :  { %v9098_v43 = vpop.f32.mrf.mxu1  ;;  %v8810_v61 = vadd.f32 %v17380_v22, %v8809_v13  ;;  %9342 = vmax.xlane.f32.xlu0 %v17436_v21  ;;  %v8484_v59 = vpack.c.bf16 %v8348_v47, %v8344_v25  ;;  %v8093_v13 = vadd.f32 %v17330_v18, %v7740_v2  ;;  %v8343_v18 = vmax.f32 %v8081_v7, 0.0  ;;  %v18944_v47 = vld [vmem:[#allocation39_spill] sm:$0xff] }
 0x718   :  { %v8811_v29 = vpop.f32.mrf.mxu0  ;;  %v8103_v28 = vadd.f32 %v17360_v54, %v7750_v12  ;;  %v7748_v54 = vadd.f32 %v17349_v23, %v16594_v11 }
 0x719   :  { %v9100_v30 = vpop.f32.mrf.mxu1  ;;  %v17446_v41 = vadd.f32 %v9098_v43, %v8810_v61  ;;  %v8356_v61 = vmax.f32 %v8097_v34, 0.0  ;;  %v18942_v29 = vld [vmem:[#allocation89_spill] sm:$0xff]  ;;  %v8352_v45 = vmax.f32 %v8093_v13, 0.0 }
 0x71a   :  { %v8814_v57 = vpop.f32.mrf.mxu0  ;;  %9005 = vmatmul.mubr.bf16.gmra.mxu0 %v18938_v3  ;;  %v7738_v30 = vadd.f32 %v18942_v29, %v16594_v11  ;;  %v8483_v3 = vpack.c.bf16 %v8347_v9, %v8343_v18  ;;  %v8360_v53 = vmax.f32 %v8103_v28, 0.0  ;;  %v18949_v9 = vld [vmem:[#allocation49_spill] sm:$0xff] }
 0x71b   :  { %v9103_v46 = vpop.f32.mrf.mxu1  ;;  %9294 = vmatmul.mubr.bf16.gmra.mxu1 %v8475_v26  ;;  %v8815_v38 = vadd.f32 %v17380_v22, %v8814_v57  ;;  %9012 = vmatprep.mubr.bf16.mxu0 %v18939_v10  ;;  %v7754_v26 = vadd.f32 %v17373_v17, %v16572_v16  ;;  %v8488_v51 = vpack.c.bf16 %v8356_v61, %v8352_v45 }
 0x71c   :  { %9301 = vmatprep.mubr.bf16.mxu1 %v8480_v48  ;;  %9344 = vmax.xlane.f32.xlu1 %v17446_v41  ;;  %v8816_v6 = vpop.f32.mrf.mxu0 }
 0x71d   :  { %v9105_v5 = vpop.f32.mrf.mxu1  ;;  %v17458_v42 = vadd.f32 %v9103_v46, %v8815_v38  ;;  %v8095_v46 = vadd.f32 %v17338_v33, %v7742_v52  ;;  %v8107_v38 = vadd.f32 %v17375_v32, %v7754_v26  ;;  %v8091_v6 = vadd.f32 %v18943_v1, %v7738_v30 }
 0x71e   :  { %v8817_v60 = vpop.f32.mrf.mxu0  ;;  %v7752_v32 = vadd.f32 %v17366_v62, %v16594_v11  ;;  %v18946_v62 = vld [vmem:[#allocation8_spill] sm:$0xff] }
 0x71f   :  { %v9106_v37 = vpop.f32.mrf.mxu1  ;;  %v8818_v35 = vadd.f32 %v17380_v22, %v8817_v60  ;;  %9346 = vmax.xlane.f32.xlu0 %v17458_v42  ;;  %v8355_v33 = vmax.f32 %v8095_v46, 0.0  ;;  %v8351_v2 = vmax.f32 %v8091_v6, 0.0 }
 0x720   :  { %v8819_v14 = vpop.f32.mrf.mxu0  ;;  %v8105_v34 = vadd.f32 %v18946_v62, %v7752_v32 }
 0x721   :  { %v9108_v55 = vpop.f32.mrf.mxu1  ;;  %v17468_v36 = vadd.f32 %v9106_v37, %v8818_v35  ;;  %v8364_v37 = vmax.f32 %v8107_v38, 0.0 }
 0x722   :  { %v8822_v15 = vpop.f32.mrf.mxu0  ;;  %9013 = vmatmul.mubr.bf16.gmra.mxu0 %v18940_v24  ;;  %v8487_v55 = vpack.c.bf16 %v8355_v33, %v8351_v2  ;;  %v8363_v52 = vmax.f32 %v8105_v34, 0.0 }
 0x723   :  { %v9111_v49 = vpop.f32.mrf.mxu1  ;;  %9302 = vmatmul.mubr.bf16.gmra.mxu1 %v8479_v31  ;;  %v8823_v43 = vadd.f32 %v17380_v22, %v8822_v15  ;;  %9020 = vmatprep.mubr.bf16.mxu0 %v18941_v27  ;;  %v8492_v24 = vpack.c.bf16 %v8364_v37, %v8360_v53  ;;  %v18948_v27 = vld [vmem:[#allocation43_spill] sm:$0xff] }
 0x724   :  { %9309 = vmatprep.mubr.bf16.mxu1 %v8484_v59  ;;  %9348 = vmax.xlane.f32.xlu1 %v17468_v36  ;;  %v8824_v19 = vpop.f32.mrf.mxu0 }
 0x725   :  { %v9113_v8 = vpop.f32.mrf.mxu1  ;;  %v17480_v56 = vadd.f32 %v9111_v49, %v8823_v43  ;;  %v18947_v49 = vld [vmem:[#allocation52_spill] sm:$0xff] }
 0x726   :  { %v8825_v50 = vpop.f32.mrf.mxu0  ;;  %v8101_v13 = vadd.f32 %v18947_v49, %v7748_v54 }
 0x727   :  { %v9114_v48 = vpop.f32.mrf.mxu1  ;;  %v8826_v57 = vadd.f32 %v17380_v22, %v8825_v50  ;;  %9350 = vmax.xlane.f32.xlu0 %v17480_v56 }
 0x728   :  { %v8827_v17 = vpop.f32.mrf.mxu0  ;;  %v8359_v26 = vmax.f32 %v8101_v13, 0.0 }
 0x729   :  { %v9116_v40 = vpop.f32.mrf.mxu1  ;;  %v17490_v10 = vadd.f32 %v9114_v48, %v8826_v57 }
 0x72a   :  { %v8830_v5 = vpop.f32.mrf.mxu0  ;;  %9021 = vmatmul.mubr.bf16.gmra.mxu0 %v18944_v47  ;;  %v8491_v50 = vpack.c.bf16 %v8363_v52, %v8359_v26 }
 0x72b   :  { %v9119_v16 = vpop.f32.mrf.mxu1  ;;  %9310 = vmatmul.mubr.bf16.gmra.mxu1 %v8483_v3  ;;  %v8831_v20 = vadd.f32 %v17380_v22, %v8830_v5  ;;  %9028 = vmatprep.mubr.bf16.mxu0 %v18945_v58  ;;  %v18950_v3 = vld [vmem:[#allocation47_spill] sm:$0xff] }
 0x72c   :  { %9317 = vmatprep.mubr.bf16.mxu1 %v8488_v51  ;;  %9352 = vmax.xlane.f32.xlu1 %v17490_v10  ;;  %v8832_v0 = vpop.f32.mrf.mxu0 }
 0x72d   :  { %v9121_v60 = vpop.f32.mrf.mxu1  ;;  %v17500_v25 = vadd.f32 %v9119_v16, %v8831_v20 }
 0x72e   :  { %v8833_v35 = vpop.f32.mrf.mxu0 }
 0x72f   :  { %v9122_v31 = vpop.f32.mrf.mxu1  ;;  %v8834_v14 = vadd.f32 %v17380_v22, %v8833_v35  ;;  %9354 = vmax.xlane.f32.xlu0 %v17500_v25 }
 0x730   :  { %v8835_v59 = vpop.f32.mrf.mxu0 }
 0x731   :  { %v9124_v7 = vpop.f32.mrf.mxu1  ;;  %v17507_v15 = vadd.f32 %v9122_v31, %v8834_v14 }
 0x732   :  { %v8838_v43 = vpop.f32.mrf.mxu0  ;;  %9029 = vmatmul.mubr.bf16.gmra.mxu0 %v18948_v27 }
 0x733   :  { %v9127_v11 = vpop.f32.mrf.mxu1  ;;  %9318 = vmatmul.mubr.bf16.gmra.mxu1 %v8487_v55  ;;  %v8839_v23 = vadd.f32 %v17380_v22, %v8838_v43  ;;  %9036 = vmatprep.mubr.bf16.mxu0 %v18949_v9 }
 0x734   :  { %9325 = vmatprep.mubr.bf16.mxu1 %v8492_v24  ;;  %9356 = vmax.xlane.f32.xlu1 %v17507_v15  ;;  %v8840_v19 = vpop.f32.mrf.mxu0 }
 0x735   :  { %v9129_v8 = vpop.f32.mrf.mxu1  ;;  %v17514_v61 = vadd.f32 %v9127_v11, %v8839_v23 }
 0x736   :  { %v8841_v18 = vpop.f32.mrf.mxu0 }
 0x737   :  { %v9130_v29 = vpop.f32.mrf.mxu1  ;;  %v8842_v30 = vadd.f32 %v17380_v22, %v8841_v18  ;;  %9358 = vmax.xlane.f32.xlu0 %v17514_v61 }
 0x738   :  { %v8843_v48 = vpop.f32.mrf.mxu0 }
 0x739   :  { %v9132_v45 = vpop.f32.mrf.mxu1  ;;  %v17518_v12 = vadd.f32 %v9130_v29, %v8842_v30 }
 0x73a   :  { %v8846_v57 = vpop.f32.mrf.mxu0  ;;  %9037 = vmatmul.mubr.bf16.gmra.mxu0 %v18950_v3 }
 0x73b   :  { %v9135_v46 = vpop.f32.mrf.mxu1  ;;  %9326 = vmatmul.mubr.bf16.gmra.mxu1 %v8491_v50  ;;  %v8847_v17 = vadd.f32 %v17380_v22, %v8846_v57  ;;  %9360 = vmax.xlane.f32.xlu1 %v17518_v12 }
 0x73c   :  { %v8848_v40 = vpop.f32.mrf.mxu0 }
 0x73d   :  { %v9137_v38 = vpop.f32.mrf.mxu1  ;;  %v17523_v51 = vadd.f32 %v9135_v46, %v8847_v17 }
 0x73e   :  { %v8849_v1 = vpop.f32.mrf.mxu0 }
 0x73f   :  { %v9138_v6 = vpop.f32.mrf.mxu1  ;;  %v8850_v5 = vadd.f32 %v17380_v22, %v8849_v1  ;;  %9362 = vmax.xlane.f32.xlu0 %v17523_v51 }
 0x740   :  { %v8851_v47 = vpop.f32.mrf.mxu0 }
 0x741   :  { %v9140_v16 = vpop.f32.mrf.mxu1  ;;  %v17527_v28 = vadd.f32 %v9138_v6, %v8850_v5 }
 0x742   :  { %v8854_v20 = vpop.f32.mrf.mxu0 }
 0x743   :  { %v9143_v58 = vpop.f32.mrf.mxu1  ;;  %v8855_v33 = vadd.f32 %v17380_v22, %v8854_v20  ;;  %9364 = vmax.xlane.f32.xlu1 %v17527_v28 }
 0x744   :  { %v8856_v32 = vpop.f32.mrf.mxu0 }
 0x745   :  { %v9145_v0 = vpop.f32.mrf.mxu1  ;;  %v17531_v60 = vadd.f32 %v9143_v58, %v8855_v33 }
 0x746   :  { %v8857_v37 = vpop.f32.mrf.mxu0 }
 0x747   :  { %v9146_v2 = vpop.f32.mrf.mxu1  ;;  %v8858_v54 = vadd.f32 %v17380_v22, %v8857_v37  ;;  %9366 = vmax.xlane.f32.xlu0 %v17531_v60 }
 0x748   :  { %v8859_v35 = vpop.f32.mrf.mxu0 }
 0x749   :  { %v9148_v31 = vpop.f32.mrf.mxu1  ;;  %v17535_v53 = vadd.f32 %v9146_v2, %v8858_v54 }
 0x74a   :  { %v8862_v14 = vpop.f32.mrf.mxu0 }
 0x74b   :  { %v9151_v55 = vpop.f32.mrf.mxu1  ;;  %v8863_v62 = vadd.f32 %v17380_v22, %v8862_v14  ;;  %9368 = vmax.xlane.f32.xlu1 %v17535_v53 }
 0x74c   :  { %v8864_v34 = vpop.f32.mrf.mxu0 }
 0x74d   :  { %v9153_v59 = vpop.f32.mrf.mxu1  ;;  %v17539_v7 = vadd.f32 %v9151_v55, %v8863_v62 }
 0x74e   :  { %v8865_v24 = vpop.f32.mrf.mxu0 }
 0x74f   :  { %v9154_v49 = vpop.f32.mrf.mxu1  ;;  %v8866_v13 = vadd.f32 %v17380_v22, %v8865_v24  ;;  %9370 = vmax.xlane.f32.xlu0 %v17539_v7 }
 0x750   :  { %v8867_v43 = vpop.f32.mrf.mxu0 }
 0x751   :  { %v9156_v27 = vpop.f32.mrf.mxu1  ;;  %v17543_v11 = vadd.f32 %v9154_v49, %v8866_v13 }
 0x752   :  { %v8870_v23 = vpop.f32.mrf.mxu0 }
 0x753   :  { %v9159_v9 = vpop.f32.mrf.mxu1  ;;  %v8871_v52 = vadd.f32 %v17380_v22, %v8870_v23  ;;  %9372 = vmax.xlane.f32.xlu1 %v17543_v11 }
 0x754   :  { %v8872_v19 = vpop.f32.mrf.mxu0 }
 0x755   :  { %v9161_v8 = vpop.f32.mrf.mxu1  ;;  %v17547_v26 = vadd.f32 %v9159_v9, %v8871_v52 }
 0x756   :  { %v8873_v18 = vpop.f32.mrf.mxu0 }
 0x757   :  { %v9162_v29 = vpop.f32.mrf.mxu1  ;;  %v8874_v30 = vadd.f32 %v17380_v22, %v8873_v18  ;;  %9374 = vmax.xlane.f32.xlu0 %v17547_v26 }
 0x758   :  { %v8875_v50 = vpop.f32.mrf.mxu0 }
 0x759   :  { %v9164_v48 = vpop.f32.mrf.mxu1  ;;  %v17551_v45 = vadd.f32 %v9162_v29, %v8874_v30 }
 0x75a   :  { %v8878_v57 = vpop.f32.mrf.mxu0 }
 0x75b   :  { %v9167_v3 = vpop.f32.mrf.mxu1  ;;  %v8879_v46 = vadd.f32 %v17380_v22, %v8878_v57  ;;  %9376 = vmax.xlane.f32.xlu1 %v17551_v45 }
 0x75c   :  { %v8880_v17 = vpop.f32.mrf.mxu0 }
 0x75d   :  { %v9169_v40 = vpop.f32.mrf.mxu1  ;;  %v17555_v38 = vadd.f32 %v9167_v3, %v8879_v46 }
 0x75e   :  { %v8881_v1 = vpop.f32.mrf.mxu0 }
 0x75f   :  { %v9170_v6 = vpop.f32.mrf.mxu1  ;;  %v8882_v5 = vadd.f32 %v17380_v22, %v8881_v1  ;;  %9378 = vmax.xlane.f32.xlu0 %v17555_v38 }
 0x760   :  { %v8883_v47 = vpop.f32.mrf.mxu0 }
 0x761   :  { %v9172_v16 = vpop.f32.mrf.mxu1  ;;  %v17559_v20 = vadd.f32 %v9170_v6, %v8882_v5 }
 0x762   :  { %v8886_v58 = vpop.f32.mrf.mxu0 }
 0x763   :  { %v9175_v33 = vpop.f32.mrf.mxu1  ;;  %v8887_v32 = vadd.f32 %v17380_v22, %v8886_v58  ;;  %9380 = vmax.xlane.f32.xlu1 %v17559_v20 }
 0x764   :  { %v8888_v0 = vpop.f32.mrf.mxu0 }
 0x765   :  { %v9177_v37 = vpop.f32.mrf.mxu1  ;;  %v17563_v2 = vadd.f32 %v9175_v33, %v8887_v32 }
 0x766   :  { %v8889_v54 = vpop.f32.mrf.mxu0 }
 0x767   :  { %v9178_v35 = vpop.f32.mrf.mxu1  ;;  %v8890_v31 = vadd.f32 %v17380_v22, %v8889_v54  ;;  %9382 = vmax.xlane.f32.xlu0 %v17563_v2 }
 0x768   :  { %v8891_v14 = vpop.f32.mrf.mxu0 }
 0x769   :  { %v9180_v55 = vpop.f32.mrf.mxu1  ;;  %v17567_v62 = vadd.f32 %v9178_v35, %v8890_v31 }
 0x76a   :  { %v8894_v34 = vpop.f32.mrf.mxu0 }
 0x76b   :  { %v9183_v59 = vpop.f32.mrf.mxu1  ;;  %v8895_v24 = vadd.f32 %v17380_v22, %v8894_v34  ;;  %9384 = vmax.xlane.f32.xlu1 %v17567_v62 }
 0x76c   :  { %v8896_v49 = vpop.f32.mrf.mxu0 }
 0x76d   :  { %v9185_v13 = vpop.f32.mrf.mxu1  ;;  %v17571_v43 = vadd.f32 %v9183_v59, %v8895_v24 }
 0x76e   :  { %v8897_v27 = vpop.f32.mrf.mxu0 }
 0x76f   :  { %v9186_v23 = vpop.f32.mrf.mxu1  ;;  %v8898_v9 = vadd.f32 %v17380_v22, %v8897_v27  ;;  %9386 = vmax.xlane.f32.xlu0 %v17571_v43 }
 0x770   :  { %v8899_v52 = vpop.f32.mrf.mxu0 }
 0x771   :  { %v9188_v19 = vpop.f32.mrf.mxu1  ;;  %v17575_v8 = vadd.f32 %v9186_v23, %v8898_v9 }
 0x772   :  { %v8902_v18 = vpop.f32.mrf.mxu0 }
 0x773   :  { %v9191_v29 = vpop.f32.mrf.mxu1  ;;  %v8903_v30 = vadd.f32 %v17380_v22, %v8902_v18  ;;  %9388 = vmax.xlane.f32.xlu1 %v17575_v8 }
 0x774   :  { %v8904_v50 = vpop.f32.mrf.mxu0 }
 0x775   :  { %v9193_v48 = vpop.f32.mrf.mxu1  ;;  %v17579_v57 = vadd.f32 %v9191_v29, %v8903_v30 }
 0x776   :  { %v8905_v3 = vpop.f32.mrf.mxu0 }
 0x777   :  { %v9194_v46 = vpop.f32.mrf.mxu1  ;;  %v8906_v17 = vadd.f32 %v17380_v22, %v8905_v3  ;;  %9390 = vmax.xlane.f32.xlu0 %v17579_v57 }
 0x778   :  { %v8907_v40 = vpop.f32.mrf.mxu0 }
 0x779   :  { %v9196_v1 = vpop.f32.mrf.mxu1  ;;  %v17583_v6 = vadd.f32 %v9194_v46, %v8906_v17 }
 0x77a   :  { %v8910_v5 = vpop.f32.mrf.mxu0 }
 0x77b   :  { %v9199_v47 = vpop.f32.mrf.mxu1  ;;  %v8911_v16 = vadd.f32 %v17380_v22, %v8910_v5  ;;  %9392 = vmax.xlane.f32.xlu1 %v17583_v6 }
 0x77c   :  { %v8912_v58 = vpop.f32.mrf.mxu0 }
 0x77d   :  { %v9201_v33 = vpop.f32.mrf.mxu1  ;;  %v17587_v32 = vadd.f32 %v9199_v47, %v8911_v16 }
 0x77e   :  { %v8913_v0 = vpop.f32.mrf.mxu0 }
 0x77f   :  { %v9202_v37 = vpop.f32.mrf.mxu1  ;;  %v8914_v54 = vadd.f32 %v17380_v22, %v8913_v0  ;;  %9394 = vmax.xlane.f32.xlu0 %v17587_v32 }
 0x780   :  { %v8915_v35 = vpop.f32.mrf.mxu0 }
 0x781   :  { %v9204_v31 = vpop.f32.mrf.mxu1  ;;  %v17591_v14 = vadd.f32 %v9202_v37, %v8914_v54 }
 0x782   :  { %v8918_v55 = vpop.f32.mrf.mxu0 }
 0x783   :  { %v9207_v34 = vpop.f32.mrf.mxu1  ;;  %v8919_v59 = vadd.f32 %v17380_v22, %v8918_v55  ;;  %9396 = vmax.xlane.f32.xlu1 %v17591_v14 }
 0x784   :  { %v8920_v24 = vpop.f32.mrf.mxu0 }
 0x785   :  { %v9209_v49 = vpop.f32.mrf.mxu1  ;;  %v17595_v13 = vadd.f32 %v9207_v34, %v8919_v59 }
 0x786   :  { %v8921_v27 = vpop.f32.mrf.mxu0 }
 0x787   :  { %v9210_v23 = vpop.f32.mrf.mxu1  ;;  %v8922_v9 = vadd.f32 %v17380_v22, %v8921_v27  ;;  %9398 = vmax.xlane.f32.xlu0 %v17595_v13 }
 0x788   :  { %v8923_v52 = vpop.f32.mrf.mxu0 }
 0x789   :  { %v9212_v19 = vpop.f32.mrf.mxu1  ;;  %v17599_v18 = vadd.f32 %v9210_v23, %v8922_v9 }
 0x78a   :  { %v8926_v29 = vpop.f32.mrf.mxu0 }
 0x78b   :  { %v9215_v30 = vpop.f32.mrf.mxu1  ;;  %v8927_v50 = vadd.f32 %v17380_v22, %v8926_v29  ;;  %9400 = vmax.xlane.f32.xlu1 %v17599_v18 }
 0x78c   :  { %v8928_v48 = vpop.f32.mrf.mxu0 }
 0x78d   :  { %v9217_v3 = vpop.f32.mrf.mxu1  ;;  %v17603_v46 = vadd.f32 %v9215_v30, %v8927_v50 }
 0x78e   :  { %v8929_v17 = vpop.f32.mrf.mxu0 }
 0x78f   :  { %v9218_v40 = vpop.f32.mrf.mxu1  ;;  %v8930_v1 = vadd.f32 %v17380_v22, %v8929_v17  ;;  %9402 = vmax.xlane.f32.xlu0 %v17603_v46 }
 0x790   :  { %v8931_v5 = vpop.f32.mrf.mxu0  ;;  %v9335_v58 = vpop.xlane.xlu0 %9334 }
 0x791   :  { %v9220_v47 = vpop.f32.mrf.mxu1  ;;  %v17607_v16 = vadd.f32 %v9218_v40, %v8930_v1  ;;  %v17610_v33 = vsub.f32 %v17392_v44, %v9335_v58 }
 0x792   :  { %v8934_v0 = vpop.f32.mrf.mxu0 }
 0x793   :  { %v9223_v37 = vpop.f32.mrf.mxu1  ;;  %v8935_v54 = vadd.f32 %v17380_v22, %v8934_v0  ;;  %9404 = vmax.xlane.f32.xlu1 %v17607_v16  ;;  %v9526_v35 = vmul.f32 1.442695, %v17610_v33 }
 0x794   :  { %v8936_v31 = vpop.f32.mrf.mxu0 }
 0x795   :  { %v9225_v55 = vpop.f32.mrf.mxu1  ;;  %v17615_v34 = vadd.f32 %v9223_v37, %v8935_v54  ;;  %v9337_v59 = vpop.xlane.xlu0 %9336  ;;  %11541 = vpow2.f32 %v9526_v35 }
 0x796   :  { %v17618_v24 = vsub.f32 %v17402_v4, %v9337_v59  ;;  %v8937_v49 = vpop.f32.mrf.mxu0 }
 0x797   :  { %v9226_v44 = vpop.f32.mrf.mxu1  ;;  %v8938_v27 = vadd.f32 %v17380_v22, %v8937_v49  ;;  %9406 = vmax.xlane.f32.xlu0 %v17615_v34 }
 0x798   :  { %v9528_v23 = vmul.f32 1.442695, %v17618_v24  ;;  %v8939_v9 = vpop.f32.mrf.mxu0  ;;  %v9339_v29 = vpop.xlane.xlu1 %9338 }
 0x799   :  { %v9228_v52 = vpop.f32.mrf.mxu1  ;;  %v17623_v19 = vadd.f32 %v9226_v44, %v8938_v27  ;;  %v17626_v30 = vsub.f32 %v17414_v63, %v9339_v29 }
 0x79a   :  { %11543 = vpow2.f32 %v9528_v23  ;;  %v8942_v50 = vpop.f32.mrf.mxu0 }
 0x79b   :  { %v9231_v4 = vpop.f32.mrf.mxu1  ;;  %v8943_v48 = vadd.f32 %v17380_v22, %v8942_v50  ;;  %9408 = vmax.xlane.f32.xlu1 %v17623_v19  ;;  %v9530_v3 = vmul.f32 1.442695, %v17626_v30 }
 0x79c   :  { %v8944_v17 = vpop.f32.mrf.mxu0 }
 0x79d   :  { %v9233_v40 = vpop.f32.mrf.mxu1  ;;  %v17631_v1 = vadd.f32 %v9231_v4, %v8943_v48  ;;  %v9341_v5 = vpop.xlane.xlu1 %9340  ;;  %11545 = vpow2.f32 %v9530_v3 }
 0x79e   :  { %v17634_v47 = vsub.f32 %v17424_v39, %v9341_v5  ;;  %v8945_v58 = vpop.f32.mrf.mxu0 }
 0x79f   :  { %v9234_v63 = vpop.f32.mrf.mxu1  ;;  %v8946_v0 = vadd.f32 %v17380_v22, %v8945_v58  ;;  %9410 = vmax.xlane.f32.xlu0 %v17631_v1 }
 0x7a0   :  { %v9532_v37 = vmul.f32 1.442695, %v17634_v47  ;;  %v8947_v54 = vpop.f32.mrf.mxu0  ;;  %v9343_v55 = vpop.xlane.xlu0 %9342 }
 0x7a1   :  { %v9236_v35 = vpop.f32.mrf.mxu1  ;;  %v17639_v31 = vadd.f32 %v9234_v63, %v8946_v0  ;;  %v17642_v59 = vsub.f32 %v17436_v21, %v9343_v55 }
 0x7a2   :  { %11547 = vpow2.f32 %v9532_v37  ;;  %v8950_v49 = vpop.f32.mrf.mxu0  ;;  %v11542_v44 = vpop.eup %11541 }
 0x7a3   :  { %v9239_v39 = vpop.f32.mrf.mxu1  ;;  %v8951_v27 = vadd.f32 %v17380_v22, %v8950_v49  ;;  %9412 = vmax.xlane.f32.xlu1 %v17639_v31  ;;  %v9534_v23 = vmul.f32 1.442695, %v17642_v59  ;;  %9654 = vadd.xlane.f32.xlu0 %v11542_v44 }
 0x7a4   :  { %v8952_v9 = vpop.f32.mrf.mxu0 }
 0x7a5   :  { %v9241_v52 = vpop.f32.mrf.mxu1  ;;  %v17647_v29 = vadd.f32 %v9239_v39, %v8951_v27  ;;  %v9345_v50 = vpop.xlane.xlu1 %9344  ;;  %11549 = vpow2.f32 %v9534_v23 }
 0x7a6   :  { %v17650_v4 = vsub.f32 %v17446_v41, %v9345_v50  ;;  %v8953_v21 = vpop.f32.mrf.mxu0 }
 0x7a7   :  { %v9242_v48 = vpop.f32.mrf.mxu1  ;;  %v11544_v3 = vpop.eup %11543  ;;  %v8954_v17 = vadd.f32 %v17380_v22, %v8953_v21  ;;  %9414 = vmax.xlane.f32.xlu0 %v17647_v29 }
 0x7a8   :  { %v9536_v40 = vmul.f32 1.442695, %v17650_v4  ;;  %9656 = vadd.xlane.f32.xlu1 %v11544_v3  ;;  %v8955_v5 = vpop.f32.mrf.mxu0  ;;  %v9347_v0 = vpop.xlane.xlu0 %9346 }
 0x7a9   :  { %v9244_v58 = vpop.f32.mrf.mxu1  ;;  %v17655_v63 = vadd.f32 %v9242_v48, %v8954_v17  ;;  %v17658_v37 = vsub.f32 %v17458_v42, %v9347_v0 }
 0x7aa   :  { %11551 = vpow2.f32 %v9536_v40  ;;  %v8958_v41 = vpop.f32.mrf.mxu0  ;;  %v11546_v35 = vpop.eup %11545 }
 0x7ab   :  { %v9247_v54 = vpop.f32.mrf.mxu1  ;;  %v8959_v55 = vadd.f32 %v17380_v22, %v8958_v41  ;;  %v9538_v49 = vmul.f32 1.442695, %v17658_v37  ;;  %9658 = vadd.xlane.f32.xlu0 %v11546_v35 }
 0x7ac   :  { %9416 = vmax.xlane.f32.xlu1 %v17655_v63  ;;  %v8960_v39 = vpop.f32.mrf.mxu0 }
 0x7ad   :  { %v9249_v44 = vpop.f32.mrf.mxu1  ;;  %v17663_v27 = vadd.f32 %v9247_v54, %v8959_v55  ;;  %v9349_v23 = vpop.xlane.xlu1 %9348  ;;  %11553 = vpow2.f32 %v9538_v49 }
 0x7ae   :  { %v17666_v9 = vsub.f32 %v17468_v36, %v9349_v23  ;;  %v8961_v42 = vpop.f32.mrf.mxu0 }
 0x7af   :  { %v9250_v52 = vpop.f32.mrf.mxu1  ;;  %v11548_v50 = vpop.eup %11547  ;;  %v8962_v21 = vadd.f32 %v17380_v22, %v8961_v42  ;;  %9418 = vmax.xlane.f32.xlu0 %v17663_v27 }
 0x7b0   :  { %v9540_v48 = vmul.f32 1.442695, %v17666_v9  ;;  %9660 = vadd.xlane.f32.xlu1 %v11548_v50  ;;  %v8963_v3 = vpop.f32.mrf.mxu0  ;;  %v9351_v5 = vpop.xlane.xlu0 %9350 }
 0x7b1   :  { %v9252_v17 = vpop.f32.mrf.mxu1  ;;  %v17671_v40 = vadd.f32 %v9250_v52, %v8962_v21  ;;  %v17674_v58 = vsub.f32 %v17480_v56, %v9351_v5 }
 0x7b2   :  { %11555 = vpow2.f32 %v9540_v48  ;;  %v8966_v36 = vpop.f32.mrf.mxu0  ;;  %v11550_v41 = vpop.eup %11549 }
 0x7b3   :  { %v9255_v0 = vpop.f32.mrf.mxu1  ;;  %v8967_v54 = vadd.f32 %v17380_v22, %v8966_v36  ;;  %v9542_v35 = vmul.f32 1.442695, %v17674_v58  ;;  %9662 = vadd.xlane.f32.xlu0 %v11550_v41 }
 0x7b4   :  { %9420 = vmax.xlane.f32.xlu1 %v17671_v40  ;;  %v8968_v55 = vpop.f32.mrf.mxu0 }
 0x7b5   :  { %v9257_v49 = vpop.f32.mrf.mxu1  ;;  %v17679_v39 = vadd.f32 %v9255_v0, %v8967_v54  ;;  %v9353_v44 = vpop.xlane.xlu1 %9352  ;;  %11557 = vpow2.f32 %v9542_v35 }
 0x7b6   :  { %v17682_v23 = vsub.f32 %v17490_v10, %v9353_v44  ;;  %v8969_v56 = vpop.f32.mrf.mxu0 }
 0x7b7   :  { %v9258_v42 = vpop.f32.mrf.mxu1  ;;  %v11552_v52 = vpop.eup %11551  ;;  %v8970_v50 = vadd.f32 %v17380_v22, %v8969_v56  ;;  %9422 = vmax.xlane.f32.xlu0 %v17679_v39 }
 0x7b8   :  { %v9544_v21 = vmul.f32 1.442695, %v17682_v23  ;;  %9664 = vadd.xlane.f32.xlu1 %v11552_v52  ;;  %v8971_v48 = vpop.f32.mrf.mxu0  ;;  %v9355_v5 = vpop.xlane.xlu0 %9354 }
 0x7b9   :  { %v9260_v3 = vpop.f32.mrf.mxu1  ;;  %v17687_v17 = vadd.f32 %v9258_v42, %v8970_v50  ;;  %v17690_v36 = vsub.f32 %v17500_v25, %v9355_v5 }
 0x7ba   :  { %11559 = vpow2.f32 %v9544_v21  ;;  %v8974_v10 = vpop.f32.mrf.mxu0  ;;  %v11554_v41 = vpop.eup %11553 }
 0x7bb   :  { %v9263_v0 = vpop.f32.mrf.mxu1  ;;  %v8975_v54 = vadd.f32 %v17380_v22, %v8974_v10  ;;  %v9546_v35 = vmul.f32 1.442695, %v17690_v36  ;;  %9666 = vadd.xlane.f32.xlu0 %v11554_v41 }
 0x7bc   :  { %9424 = vmax.xlane.f32.xlu1 %v17687_v17  ;;  %v8976_v55 = vpop.f32.mrf.mxu0 }
 0x7bd   :  { %v9265_v49 = vpop.f32.mrf.mxu1  ;;  %v17695_v44 = vadd.f32 %v9263_v0, %v8975_v54  ;;  %v9357_v56 = vpop.xlane.xlu1 %9356  ;;  %11561 = vpow2.f32 %v9546_v35 }
 0x7be   :  { %v17698_v42 = vsub.f32 %v17507_v15, %v9357_v56  ;;  %v8977_v25 = vpop.f32.mrf.mxu0 }
 0x7bf   :  { %v9266_v52 = vpop.f32.mrf.mxu1  ;;  %v11556_v50 = vpop.eup %11555  ;;  %v8978_v21 = vadd.f32 %v17380_v22, %v8977_v25  ;;  %9426 = vmax.xlane.f32.xlu0 %v17695_v44  ;;  %v17711_v22 = vld [vmem:[%s18056_s6] ss:$0 sm:$0xff]  ;;  %s12047_s6 = smov [#allocation2]  }
 0x7c0   :  { %18951 = vst [vmem:[#allocation91_spill] sm:$0xff] %v17698_v42  ;;  %v9548_v48 = vmul.f32 1.442695, %v17698_v42  ;;  %9668 = vadd.xlane.f32.xlu1 %v11556_v50  ;;  %v8979_v3 = vpop.f32.mrf.mxu0  ;;  %v9359_v0 = vpop.xlane.xlu0 %9358  ;;  %s10043_s18 = sshll.u32 %s12047_s6, 4  ;;  %s10044_s18 = int_to_ptr.vmem [resolvable:$true] %s10043_s18 }
 0x7c1   :  { %v9268_v5 = vpop.f32.mrf.mxu1  ;;  %v17703_v10 = vadd.f32 %v9266_v52, %v8978_v21  ;;  %v17706_v41 = vsub.f32 %v17514_v61, %v9359_v0  ;;  %s12024_s19 = scalar_lea.vmem %s10044_s18, 8192  ;;  %p12029_p1 = scmp.lt.s32.totalorder %s10044_s18, %s10044_s18 }
 0x7c2   :  { %11563 = vpow2.f32 %v9548_v48  ;;  %v8982_v15 = vpop.f32.mrf.mxu0  ;;  %v11558_v35 = vpop.eup %11557  ;;  %p12025_p0 = scmp.ne.s32.totalorder %s10044_s18, %s12024_s19  ;;  %p12030_p2 = scmp.lt.s32.totalorder %s12024_s19, %s12024_s19 }
 0x7c3   :  { %18952 = vst [vmem:[#allocation7_spill] sm:$0xff] %v17706_v41  ;;  %v9271_v54 = vpop.f32.mrf.mxu1  ;;  %v8983_v55 = vadd.f32 %v17711_v22, %v8982_v15  ;;  %v9550_v49 = vmul.f32 1.442695, %v17706_v41  ;;  %9670 = vadd.xlane.f32.xlu0 %v11558_v35 }
 0x7c4   :  { %9428 = vmax.xlane.f32.xlu1 %v17703_v10  ;;  %v8984_v56 = vpop.f32.mrf.mxu0  ;;  %v9361_v61 = vpop.xlane.xlu1 %9360  ;;  %p12031_p3 = por %p12030_p2, %p12029_p1 }
 0x7c5   :  { %v9273_v25 = vpop.f32.mrf.mxu1  ;;  %v17716_v52 = vadd.f32 %v9271_v54, %v8983_v55  ;;  %11565 = vpow2.f32 %v9550_v49  ;;  %v17719_v50 = vsub.f32 %v17518_v12, %v9361_v61 }
 0x7c6   :  { %v8985_v21 = vpop.f32.mrf.mxu0  ;;  %p12032_p4 = pnand %p12031_p3, %p12025_p0 }
 0x7c7   :  { %18953 = vst [vmem:[#allocation53_spill] sm:$0xff] %v17719_v50  ;;  %v9274_v48 = vpop.f32.mrf.mxu1  ;;  %v11560_v3 = vpop.eup %11559  ;;  %v8986_v5 = vadd.f32 %v17711_v22, %v8985_v21  ;;  %v9552_v0 = vmul.f32 1.442695, %v17719_v50  ;;  %9430 = vmax.xlane.f32.xlu0 %v17716_v52 }
 0x7c8   :  { %9672 = vadd.xlane.f32.xlu1 %v11560_v3  ;;  %v8987_v15 = vpop.f32.mrf.mxu0  ;;  %v9363_v54 = vpop.xlane.xlu0 %9362 }
 0x7c9   :  { %v9276_v35 = vpop.f32.mrf.mxu1  ;;  %v17724_v56 = vadd.f32 %v9274_v48, %v8986_v5  ;;  %11567 = vpow2.f32 %v9552_v0  ;;  %v17727_v55 = vsub.f32 %v17523_v51, %v9363_v54 }
 0x7ca   :  { %v8990_v12 = vpop.f32.mrf.mxu0  ;;  %v11562_v25 = vpop.eup %11561 }
 0x7cb   :  { %18954 = vst [vmem:[#allocation10_spill] sm:$0xff] %v17727_v55  ;;  %v9279_v49 = vpop.f32.mrf.mxu1  ;;  %v8991_v61 = vadd.f32 %v17711_v22, %v8990_v12  ;;  %v9554_v21 = vmul.f32 1.442695, %v17727_v55  ;;  %9674 = vadd.xlane.f32.xlu0 %v11562_v25 }
 0x7cc   :  { %9432 = vmax.xlane.f32.xlu1 %v17724_v56  ;;  %v8992_v3 = vpop.f32.mrf.mxu0  ;;  %v9365_v48 = vpop.xlane.xlu1 %9364 }
 0x7cd   :  { %v9281_v15 = vpop.f32.mrf.mxu1  ;;  %v17732_v35 = vadd.f32 %v9279_v49, %v8991_v61  ;;  %11569 = vpow2.f32 %v9554_v21  ;;  %v17735_v5 = vsub.f32 %v17527_v28, %v9365_v48 }
 0x7ce   :  { %v8993_v51 = vpop.f32.mrf.mxu0 }
 0x7cf   :  { %18955 = vst [vmem:[#allocation55_spill] sm:$0xff] %v17735_v5  ;;  %v9282_v0 = vpop.f32.mrf.mxu1  ;;  %v11564_v54 = vpop.eup %11563  ;;  %v8994_v50 = vadd.f32 %v17711_v22, %v8993_v51  ;;  %v9556_v12 = vmul.f32 1.442695, %v17735_v5  ;;  %9434 = vmax.xlane.f32.xlu0 %v17732_v35 }
 0x7d0   :  { %9676 = vadd.xlane.f32.xlu1 %v11564_v54  ;;  %v8995_v25 = vpop.f32.mrf.mxu0  ;;  %v9367_v49 = vpop.xlane.xlu0 %9366 }
 0x7d1   :  { %v9284_v3 = vpop.f32.mrf.mxu1  ;;  %v17740_v15 = vadd.f32 %v9282_v0, %v8994_v50  ;;  %11571 = vpow2.f32 %v9556_v12  ;;  %v17743_v61 = vsub.f32 %v17531_v60, %v9367_v49 }
 0x7d2   :  { %v8998_v28 = vpop.f32.mrf.mxu0  ;;  %v11566_v48 = vpop.eup %11565 }
 0x7d3   :  { %18956 = vst [vmem:[#allocation9_spill] sm:$0xff] %v17743_v61  ;;  %v9287_v21 = vpop.f32.mrf.mxu1  ;;  %v8999_v55 = vadd.f32 %v17711_v22, %v8998_v28  ;;  %v9558_v51 = vmul.f32 1.442695, %v17743_v61  ;;  %9678 = vadd.xlane.f32.xlu0 %v11566_v48 }
 0x7d4   :  { %9436 = vmax.xlane.f32.xlu1 %v17740_v15  ;;  %v9000_v54 = vpop.f32.mrf.mxu0  ;;  %v9369_v50 = vpop.xlane.xlu1 %9368 }
 0x7d5   :  { %v9289_v25 = vpop.f32.mrf.mxu1  ;;  %v17748_v3 = vadd.f32 %v9287_v21, %v8999_v55  ;;  %11573 = vpow2.f32 %v9558_v51  ;;  %v17751_v0 = vsub.f32 %v17535_v53, %v9369_v50 }
 0x7d6   :  { %v9001_v60 = vpop.f32.mrf.mxu0  ;;  %v11568_v49 = vpop.eup %11567 }
 0x7d7   :  { %18957 = vst [vmem:[#allocation54_spill] sm:$0xff] %v17751_v0  ;;  %v9290_v12 = vpop.f32.mrf.mxu1  ;;  %v9002_v5 = vadd.f32 %v17711_v22, %v9001_v60  ;;  %v9560_v28 = vmul.f32 1.442695, %v17751_v0  ;;  %9438 = vmax.xlane.f32.xlu0 %v17748_v3 }
 0x7d8   :  { %9680 = vadd.xlane.f32.xlu1 %v11568_v49  ;;  %v9003_v48 = vpop.f32.mrf.mxu0  ;;  %v9371_v55 = vpop.xlane.xlu0 %9370 }
 0x7d9   :  { %v9292_v54 = vpop.f32.mrf.mxu1  ;;  %v17756_v25 = vadd.f32 %v9290_v12, %v9002_v5  ;;  %11575 = vpow2.f32 %v9560_v28  ;;  %v17759_v21 = vsub.f32 %v17539_v7, %v9371_v55 }
 0x7da   :  { %v9006_v53 = vpop.f32.mrf.mxu0  ;;  %v11570_v50 = vpop.eup %11569 }
 0x7db   :  { %18958 = vst [vmem:[#allocation12_spill] sm:$0xff] %v17759_v21  ;;  %v9295_v51 = vpop.f32.mrf.mxu1  ;;  %v9007_v61 = vadd.f32 %v17711_v22, %v9006_v53  ;;  %v9562_v60 = vmul.f32 1.442695, %v17759_v21  ;;  %9682 = vadd.xlane.f32.xlu0 %v11570_v50 }
 0x7dc   :  { %9440 = vmax.xlane.f32.xlu1 %v17756_v25  ;;  %v9008_v49 = vpop.f32.mrf.mxu0  ;;  %v9373_v5 = vpop.xlane.xlu1 %9372 }
 0x7dd   :  { %v9297_v48 = vpop.f32.mrf.mxu1  ;;  %v17764_v54 = vadd.f32 %v9295_v51, %v9007_v61  ;;  %11577 = vpow2.f32 %v9562_v60  ;;  %v17767_v12 = vsub.f32 %v17543_v11, %v9373_v5 }
 0x7de   :  { %v9009_v7 = vpop.f32.mrf.mxu0  ;;  %v11572_v55 = vpop.eup %11571 }
 0x7df   :  { %18959 = vst [vmem:[#allocation90_spill] sm:$0xff] %v17767_v12  ;;  %v9298_v28 = vpop.f32.mrf.mxu1  ;;  %v9010_v0 = vadd.f32 %v17711_v22, %v9009_v7  ;;  %v9564_v53 = vmul.f32 1.442695, %v17767_v12  ;;  %9442 = vmax.xlane.f32.xlu0 %v17764_v54 }
 0x7e0   :  { %9684 = vadd.xlane.f32.xlu1 %v11572_v55  ;;  %v9011_v50 = vpop.f32.mrf.mxu0 }
 0x7e1   :  { %v9300_v49 = vpop.f32.mrf.mxu1  ;;  %v17772_v48 = vadd.f32 %v9298_v28, %v9010_v0  ;;  %11579 = vpow2.f32 %v9564_v53  ;;  %v9375_v53 = vpop.xlane.xlu0 %9374 }
 0x7e2   :  { %v9014_v61 = vpop.f32.mrf.mxu0  ;;  %v11574_v60 = vpop.eup %11573 }
 0x7e3   :  { %18960 = vst [vmem:[#allocation11_spill] sm:$0xff] %v17772_v48  ;;  %v9303_v51 = vpop.f32.mrf.mxu1  ;;  %v9015_v11 = vadd.f32 %v17711_v22, %v9014_v61  ;;  %9686 = vadd.xlane.f32.xlu0 %v11574_v60 }
 0x7e4   :  { %9444 = vmax.xlane.f32.xlu1 %v17772_v48  ;;  %v9016_v5 = vpop.f32.mrf.mxu0 }
 0x7e5   :  { %v9305_v7 = vpop.f32.mrf.mxu1  ;;  %v17776_v21 = vadd.f32 %v9303_v51, %v9015_v11 }
 0x7e6   :  { %v9017_v55 = vpop.f32.mrf.mxu0  ;;  %v11576_v41 = vpop.eup %11575  ;;  %v17785_v7 = vsub.f32 %v17547_v26, %v9375_v53 }
 0x7e7   :  { %18961 = vst [vmem:[#allocation56_spill] sm:$0xff] %v17776_v21  ;;  %v9306_v12 = vpop.f32.mrf.mxu1  ;;  %v9018_v50 = vadd.f32 %v17711_v22, %v9017_v55  ;;  %9446 = vmax.xlane.f32.xlu0 %v17776_v21 }
 0x7e8   :  { %9688 = vadd.xlane.f32.xlu1 %v11576_v41  ;;  %v9019_v0 = vpop.f32.mrf.mxu0  ;;  %v9377_v41 = vpop.xlane.xlu1 %9376  ;;  %v9566_v26 = vmul.f32 1.442695, %v17785_v7 }
 0x7e9   :  { %v9308_v28 = vpop.f32.mrf.mxu1  ;;  %v17780_v49 = vadd.f32 %v9306_v12, %v9018_v50  ;;  %v9379_v55 = vpop.xlane.xlu0 %9378  ;;  %v17791_v42 = vsub.f32 %v17551_v45, %v9377_v41 }
 0x7ea   :  { %v9022_v61 = vpop.f32.mrf.mxu0  ;;  %v11578_v60 = vpop.eup %11577  ;;  %v17796_v53 = vsub.f32 %v17555_v38, %v9379_v55  ;;  %11581 = vpow2.f32 %v9566_v26 }
 0x7eb   :  { %18962 = vst [vmem:[#allocation14_spill] sm:$0xff] %v17780_v49  ;;  %v9311_v48 = vpop.f32.mrf.mxu1  ;;  %v9023_v5 = vadd.f32 %v17711_v22, %v9022_v61  ;;  %9690 = vadd.xlane.f32.xlu0 %v11578_v60  ;;  %18963 = vst [vmem:[#allocation93_spill] sm:$0xff] %v17791_v42  ;;  %v9568_v45 = vmul.f32 1.442695, %v17791_v42 }
 0x7ec   :  { %9448 = vmax.xlane.f32.xlu1 %v17780_v49  ;;  %v9024_v51 = vpop.f32.mrf.mxu0  ;;  %v9570_v38 = vmul.f32 1.442695, %v17796_v53 }
 0x7ed   :  { %v9313_v11 = vpop.f32.mrf.mxu1  ;;  %v17787_v0 = vadd.f32 %v9311_v48, %v9023_v5  ;;  %v9381_v48 = vpop.xlane.xlu1 %9380  ;;  %11583 = vpow2.f32 %v9568_v45 }
 0x7ee   :  { %v9025_v28 = vpop.f32.mrf.mxu0  ;;  %v11580_v50 = vpop.eup %11579  ;;  %v17803_v41 = vsub.f32 %v17559_v20, %v9381_v48  ;;  %11585 = vpow2.f32 %v9570_v38 }
 0x7ef   :  { %v9314_v12 = vpop.f32.mrf.mxu1  ;;  %v9026_v21 = vadd.f32 %v17711_v22, %v9025_v28  ;;  %9450 = vmax.xlane.f32.xlu0 %v17787_v0 }
 0x7f0   :  { %9692 = vadd.xlane.f32.xlu1 %v11580_v50  ;;  %v9027_v61 = vpop.f32.mrf.mxu0  ;;  %v9383_v51 = vpop.xlane.xlu0 %9382  ;;  %v9572_v20 = vmul.f32 1.442695, %v17803_v41 }
 0x7f1   :  { %v9316_v60 = vpop.f32.mrf.mxu1  ;;  %v17798_v5 = vadd.f32 %v9314_v12, %v9026_v21  ;;  %v17808_v21 = vsub.f32 %v17563_v2, %v9383_v51 }
 0x7f2   :  { %v9030_v11 = vpop.f32.mrf.mxu0  ;;  %11587 = vpow2.f32 %v9572_v20 }
 0x7f3   :  { %v9319_v49 = vpop.f32.mrf.mxu1  ;;  %v9031_v28 = vadd.f32 %v17711_v22, %v9030_v11  ;;  %v9574_v2 = vmul.f32 1.442695, %v17808_v21 }
 0x7f4   :  { %9452 = vmax.xlane.f32.xlu1 %v17798_v5  ;;  %v9032_v50 = vpop.f32.mrf.mxu0  ;;  %v9385_v12 = vpop.xlane.xlu1 %9384 }
 0x7f5   :  { %v9321_v61 = vpop.f32.mrf.mxu1  ;;  %v17810_v55 = vadd.f32 %v9319_v49, %v9031_v28  ;;  %v17816_v48 = vsub.f32 %v17567_v62, %v9385_v12  ;;  %11589 = vpow2.f32 %v9574_v2 }
 0x7f6   :  { %v9033_v60 = vpop.f32.mrf.mxu0 }
 0x7f7   :  { %v9322_v11 = vpop.f32.mrf.mxu1  ;;  %v9034_v42 = vadd.f32 %v17711_v22, %v9033_v60  ;;  %9454 = vmax.xlane.f32.xlu0 %v17810_v55  ;;  %18964 = vst [vmem:[#allocation13_spill] sm:$0xff] %v17816_v48  ;;  %v9576_v62 = vmul.f32 1.442695, %v17816_v48 }
 0x7f8   :  { %v9035_v26 = vpop.f32.mrf.mxu0  ;;  %v9387_v51 = vpop.xlane.xlu0 %9386 }
 0x7f9   :  { %v9324_v50 = vpop.f32.mrf.mxu1  ;;  %v17819_v49 = vadd.f32 %v9322_v11, %v9034_v42  ;;  %v17822_v28 = vsub.f32 %v17571_v43, %v9387_v51  ;;  %11591 = vpow2.f32 %v9576_v62 }
 0x7fa   :  { %v9038_v61 = vpop.f32.mrf.mxu0 }
 0x7fb   :  { %v9327_v60 = vpop.f32.mrf.mxu1  ;;  %v9039_v45 = vadd.f32 %v17711_v22, %v9038_v61  ;;  %9456 = vmax.xlane.f32.xlu1 %v17819_v49  ;;  %v9578_v38 = vmul.f32 1.442695, %v17822_v28 }
 0x7fc   :  { %v9040_v12 = vpop.f32.mrf.mxu0  ;;  %v9389_v11 = vpop.xlane.xlu1 %9388 }
 0x7fd   :  { %v9329_v26 = vpop.f32.mrf.mxu1  ;;  %v17828_v42 = vadd.f32 %v9327_v60, %v9039_v45  ;;  %v17831_v43 = vsub.f32 %v17575_v8, %v9389_v11  ;;  %11593 = vpow2.f32 %v9578_v38  ;;  %v11582_v45 = vpop.eup %11581 }
 0x7fe   :  { %v9041_v50 = vpop.f32.mrf.mxu0  ;;  %v11584_v11 = vpop.eup %11583 }
 0x7ff   :  { %v9330_v51 = vpop.f32.mrf.mxu1  ;;  %v9042_v61 = vadd.f32 %v17711_v22, %v9041_v50  ;;  %9458 = vmax.xlane.f32.xlu0 %v17828_v42  ;;  %v9580_v2 = vmul.f32 1.442695, %v17831_v43  ;;  %v11586_v62 = vpop.eup %11585 }
 0x800   :  { %v9043_v20 = vpop.f32.mrf.mxu0  ;;  %v9391_v60 = vpop.xlane.xlu0 %9390 }
 0x801   :  { %v9332_v48 = vpop.f32.mrf.mxu1  ;;  %v17836_v12 = vadd.f32 %v9330_v51, %v9042_v61  ;;  %v17839_v26 = vsub.f32 %v17579_v57, %v9391_v60  ;;  %11595 = vpow2.f32 %v9580_v2  ;;  %v11588_v57 = vpop.eup %11587 }
 0x802   :  { %v11590_v61 = vpop.eup %11589 }
 0x803   :  { %9460 = vmax.xlane.f32.xlu1 %v17836_v12  ;;  %9694 = vadd.xlane.f32.xlu0 %v11582_v45  ;;  %v9582_v8 = vmul.f32 1.442695, %v17839_v26 }
 0x804   :  { %v9393_v22 = vpop.xlane.xlu1 %9392 }
 0x805   :  { %v17844_v48 = vsub.f32 %v17583_v6, %v9393_v22  ;;  %11597 = vpow2.f32 %v9582_v8 }
 0x806   :  { %v11592_v6 = vpop.eup %11591 }
 0x807   :  { %v9584_v38 = vmul.f32 1.442695, %v17844_v48  ;;  %9696 = vadd.xlane.f32.xlu1 %v11584_v11  ;;  %9698 = vadd.xlane.f32.xlu0 %v11586_v62 }
 0x808   :  { %v9395_v50 = vpop.xlane.xlu0 %9394 }
 0x809   :  { %11599 = vpow2.f32 %v9584_v38  ;;  %v17848_v51 = vsub.f32 %v17587_v32, %v9395_v50 }
 0x80a   :  { %v11594_v45 = vpop.eup %11593 }
 0x80b   :  { %v9586_v20 = vmul.f32 1.442695, %v17848_v51  ;;  %9700 = vadd.xlane.f32.xlu1 %v11588_v57  ;;  %9702 = vadd.xlane.f32.xlu0 %v11590_v61 }
 0x80c   :  { %v9397_v2 = vpop.xlane.xlu1 %9396 }
 0x80d   :  { %11601 = vpow2.f32 %v9586_v20  ;;  %v17852_v60 = vsub.f32 %v17591_v14, %v9397_v2 }
 0x80e   :  { %v11596_v11 = vpop.eup %11595 }
 0x80f   :  { %v9588_v8 = vmul.f32 1.442695, %v17852_v60  ;;  %9704 = vadd.xlane.f32.xlu1 %v11592_v6  ;;  %9706 = vadd.xlane.f32.xlu0 %v11594_v45 }
 0x810   :  { %v9399_v22 = vpop.xlane.xlu0 %9398 }
 0x811   :  { %11603 = vpow2.f32 %v9588_v8  ;;  %v17856_v32 = vsub.f32 %v17595_v13, %v9399_v22 }
 0x812   :  { %v11598_v62 = vpop.eup %11597 }
 0x813   :  { %v9590_v38 = vmul.f32 1.442695, %v17856_v32  ;;  %9708 = vadd.xlane.f32.xlu1 %v11596_v11  ;;  %9710 = vadd.xlane.f32.xlu0 %v11598_v62 }
 0x814   :  { %v9401_v50 = vpop.xlane.xlu1 %9400 }
 0x815   :  { %11605 = vpow2.f32 %v9590_v38  ;;  %v17860_v14 = vsub.f32 %v17599_v18, %v9401_v50 }
 0x816   :  { %v11600_v57 = vpop.eup %11599 }
 0x817   :  { %v9592_v61 = vmul.f32 1.442695, %v17860_v14  ;;  %9712 = vadd.xlane.f32.xlu1 %v11600_v57 }
 0x818   :  { %v9403_v20 = vpop.xlane.xlu0 %9402 }
 0x819   :  { %11607 = vpow2.f32 %v9592_v61  ;;  %v17864_v13 = vsub.f32 %v17603_v46, %v9403_v20 }
 0x81a   :  { %v11602_v2 = vpop.eup %11601 }
 0x81b   :  { %v9594_v6 = vmul.f32 1.442695, %v17864_v13  ;;  %9714 = vadd.xlane.f32.xlu0 %v11602_v2 }
 0x81c   :  { %v9405_v45 = vpop.xlane.xlu1 %9404 }
 0x81d   :  { %11609 = vpow2.f32 %v9594_v6  ;;  %v17868_v8 = vsub.f32 %v17607_v16, %v9405_v45 }
 0x81e   :  { %v11604_v18 = vpop.eup %11603 }
 0x81f   :  { %v9596_v22 = vmul.f32 1.442695, %v17868_v8  ;;  %9716 = vadd.xlane.f32.xlu1 %v11604_v18 }
 0x820   :  { %v9407_v11 = vpop.xlane.xlu0 %9406 }
 0x821   :  { %11611 = vpow2.f32 %v9596_v22  ;;  %v17872_v62 = vsub.f32 %v17615_v34, %v9407_v11 }
 0x822   :  { %v11606_v46 = vpop.eup %11605 }
 0x823   :  { %v9598_v38 = vmul.f32 1.442695, %v17872_v62  ;;  %9718 = vadd.xlane.f32.xlu0 %v11606_v46 }
 0x824   :  { %v9409_v50 = vpop.xlane.xlu1 %9408 }
 0x825   :  { %11613 = vpow2.f32 %v9598_v38  ;;  %v17876_v57 = vsub.f32 %v17623_v19, %v9409_v50 }
 0x826   :  { %v11608_v16 = vpop.eup %11607 }
 0x827   :  { %v9600_v61 = vmul.f32 1.442695, %v17876_v57  ;;  %9720 = vadd.xlane.f32.xlu1 %v11608_v16 }
 0x828   :  { %v9411_v20 = vpop.xlane.xlu0 %9410 }
 0x829   :  { %11615 = vpow2.f32 %v9600_v61  ;;  %v17880_v2 = vsub.f32 %v17631_v1, %v9411_v20 }
 0x82a   :  { %v11610_v34 = vpop.eup %11609 }
 0x82b   :  { %v9602_v6 = vmul.f32 1.442695, %v17880_v2  ;;  %9722 = vadd.xlane.f32.xlu0 %v11610_v34 }
 0x82c   :  { %v9413_v45 = vpop.xlane.xlu1 %9412  ;;  %v9655_v19 = vpop.xlane.xlu0 %9654 }
 0x82d   :  { %11617 = vpow2.f32 %v9602_v6  ;;  %v17884_v18 = vsub.f32 %v17639_v31, %v9413_v45 }
 0x82e   :  { %v11612_v22 = vpop.eup %11611  ;;  %11619 = vlog2.f32 %v9655_v19 }
 0x82f   :  { %v9604_v11 = vmul.f32 1.442695, %v17884_v18  ;;  %9724 = vadd.xlane.f32.xlu1 %v11612_v22 }
 0x830   :  { %v9415_v38 = vpop.xlane.xlu0 %9414 }
 0x831   :  { %11621 = vpow2.f32 %v9604_v11  ;;  %v9657_v46 = vpop.xlane.xlu1 %9656  ;;  %v17888_v50 = vsub.f32 %v17647_v29, %v9415_v38 }
 0x832   :  { %v11614_v1 = vpop.eup %11613  ;;  %11623 = vlog2.f32 %v9657_v46 }
 0x833   :  { %9726 = vadd.xlane.f32.xlu0 %v11614_v1  ;;  %v9606_v16 = vmul.f32 1.442695, %v17888_v50 }
 0x834   :  { %v9659_v31 = vpop.xlane.xlu0 %9658 }
 0x835   :  { %v9417_v61 = vpop.xlane.xlu1 %9416  ;;  %11625 = vpow2.f32 %v9606_v16 }
 0x836   :  { %v11616_v20 = vpop.eup %11615  ;;  %v17892_v34 = vsub.f32 %v17655_v63, %v9417_v61  ;;  %11627 = vlog2.f32 %v9659_v31 }
 0x837   :  { %9728 = vadd.xlane.f32.xlu1 %v11616_v20 }
 0x838   :  { %v9608_v6 = vmul.f32 1.442695, %v17892_v34  ;;  %v9419_v19 = vpop.xlane.xlu0 %9418 }
 0x839   :  { %v9661_v45 = vpop.xlane.xlu1 %9660  ;;  %v17896_v29 = vsub.f32 %v17663_v27, %v9419_v19 }
 0x83a   :  { %v11618_v22 = vpop.eup %11617  ;;  %11629 = vpow2.f32 %v9608_v6 }
 0x83b   :  { %v11620_v11 = vpop.eup %11619  ;;  %11631 = vlog2.f32 %v9661_v45  ;;  %9730 = vadd.xlane.f32.xlu0 %v11618_v22  ;;  %v9610_v38 = vmul.f32 1.442695, %v17896_v29 }
 0x83c   :  { %v9783_v46 = vmul.f32 0.6931472, %v11620_v11  ;;  %v9663_v63 = vpop.xlane.xlu0 %9662 }
 0x83d   :  { %v9421_v1 = vpop.xlane.xlu1 %9420  ;;  %11633 = vpow2.f32 %v9610_v38 }
 0x83e   :  { %v11622_v16 = vpop.eup %11621  ;;  %v9910_v61 = vsub.f32 %v17610_v33, %v9783_v46  ;;  %v17901_v31 = vsub.f32 %v17671_v40, %v9421_v1  ;;  %11635 = vlog2.f32 %v9663_v63 }
 0x83f   :  { %v11624_v20 = vpop.eup %11623  ;;  %9732 = vadd.xlane.f32.xlu1 %v11622_v16 }
 0x840   :  { %9974 = vst [vmem:[#allocation2] sm:$0xff] %v9910_v61  ;;  %v9785_v27 = vmul.f32 0.6931472, %v11624_v20  ;;  %v9612_v6 = vmul.f32 1.442695, %v17901_v31  ;;  %v9423_v19 = vpop.xlane.xlu0 %9422 }
 0x841   :  { %v9665_v45 = vpop.xlane.xlu1 %9664  ;;  %v17906_v11 = vsub.f32 %v17679_v39, %v9423_v19 }
 0x842   :  { %v9911_v22 = vsub.f32 %v17618_v24, %v9785_v27  ;;  %11637 = vpow2.f32 %v9612_v6  ;;  %v11626_v33 = vpop.eup %11625 }
 0x843   :  { %11639 = vlog2.f32 %v9665_v45  ;;  %v11628_v46 = vpop.eup %11627  ;;  %v9614_v40 = vmul.f32 1.442695, %v17906_v11  ;;  %9734 = vadd.xlane.f32.xlu0 %v11626_v33 }
 0x844   :  { %9975 = vst [vmem:[#allocation2 + $0x8] sm:$0xff] %v9911_v22  ;;  %v9787_v38 = vmul.f32 0.6931472, %v11628_v46  ;;  %v9667_v63 = vpop.xlane.xlu0 %9666 }
 0x845   :  { %v9425_v1 = vpop.xlane.xlu1 %9424  ;;  %11641 = vpow2.f32 %v9614_v40 }
 0x846   :  { %v17910_v16 = vsub.f32 %v17687_v17, %v9425_v1  ;;  %v9912_v24 = vsub.f32 %v17626_v30, %v9787_v38  ;;  %11643 = vlog2.f32 %v9667_v63 }
 0x847   :  { %v11630_v61 = vpop.eup %11629 }
 0x848   :  { %v11632_v39 = vpop.eup %11631  ;;  %v9616_v20 = vmul.f32 1.442695, %v17910_v16  ;;  %9736 = vadd.xlane.f32.xlu1 %v11630_v61  ;;  %9976 = vst [vmem:[#allocation2 + $0x10] sm:$0xff] %v9912_v24  ;;  %v9427_v45 = vpop.xlane.xlu0 %9426 }
 0x849   :  { %v9789_v27 = vmul.f32 0.6931472, %v11632_v39  ;;  %v9669_v6 = vpop.xlane.xlu1 %9668  ;;  %v17915_v19 = vsub.f32 %v17695_v44, %v9427_v45 }
 0x84a   :  { %11645 = vpow2.f32 %v9616_v20  ;;  %v11634_v22 = vpop.eup %11633 }
 0x84b   :  { %v9913_v17 = vsub.f32 %v17634_v47, %v9789_v27  ;;  %11647 = vlog2.f32 %v9669_v6  ;;  %v11636_v33 = vpop.eup %11635  ;;  %v9618_v30 = vmul.f32 1.442695, %v17915_v19  ;;  %9738 = vadd.xlane.f32.xlu0 %v11634_v22 }
 0x84c   :  { %v9791_v46 = vmul.f32 0.6931472, %v11636_v33  ;;  %v9671_v38 = vpop.xlane.xlu0 %9670 }
 0x84d   :  { %9977 = vst [vmem:[#allocation2 + $0x18] sm:$0xff] %v9913_v17  ;;  %v9429_v40 = vpop.xlane.xlu1 %9428  ;;  %11649 = vpow2.f32 %v9618_v30 }
 0x84e   :  { %v17920_v1 = vsub.f32 %v17703_v10, %v9429_v40  ;;  %v9914_v44 = vsub.f32 %v17642_v59, %v9791_v46  ;;  %11651 = vlog2.f32 %v9671_v38 }
 0x84f   :  { %v11638_v63 = vpop.eup %11637 }
 0x850   :  { %v11640_v61 = vpop.eup %11639  ;;  %v9620_v47 = vmul.f32 1.442695, %v17920_v1  ;;  %9740 = vadd.xlane.f32.xlu1 %v11638_v63  ;;  %9978 = vst [vmem:[#allocation2 + $0x20] sm:$0xff] %v9914_v44  ;;  %v9431_v20 = vpop.xlane.xlu0 %9430 }
 0x851   :  { %v9793_v24 = vmul.f32 0.6931472, %v11640_v61  ;;  %v9673_v39 = vpop.xlane.xlu1 %9672  ;;  %v17925_v27 = vsub.f32 %v17716_v52, %v9431_v20 }
 0x852   :  { %11653 = vpow2.f32 %v9620_v47  ;;  %v11642_v6 = vpop.eup %11641 }
 0x853   :  { %v9915_v10 = vsub.f32 %v17650_v4, %v9793_v24  ;;  %11655 = vlog2.f32 %v9673_v39  ;;  %v11644_v45 = vpop.eup %11643  ;;  %v9622_v59 = vmul.f32 1.442695, %v17925_v27  ;;  %9742 = vadd.xlane.f32.xlu0 %v11642_v6 }
 0x854   :  { %v9795_v22 = vmul.f32 0.6931472, %v11644_v45  ;;  %v9675_v33 = vpop.xlane.xlu0 %9674 }
 0x855   :  { %9979 = vst [vmem:[#allocation2 + $0x28] sm:$0xff] %v9915_v10  ;;  %v9433_v17 = vpop.xlane.xlu1 %9432  ;;  %11657 = vpow2.f32 %v9622_v59 }
 0x856   :  { %v17930_v30 = vsub.f32 %v17724_v56, %v9433_v17  ;;  %v9916_v52 = vsub.f32 %v17658_v37, %v9795_v22  ;;  %11659 = vlog2.f32 %v9675_v33 }
 0x857   :  { %v11646_v46 = vpop.eup %11645 }
 0x858   :  { %v11648_v40 = vpop.eup %11647  ;;  %v9624_v4 = vmul.f32 1.442695, %v17930_v30  ;;  %9744 = vadd.xlane.f32.xlu1 %v11646_v46  ;;  %9980 = vst [vmem:[#allocation2 + $0x30] sm:$0xff] %v9916_v52  ;;  %v9435_v44 = vpop.xlane.xlu0 %9434 }
 0x859   :  { %v9797_v38 = vmul.f32 0.6931472, %v11648_v40  ;;  %v9677_v63 = vpop.xlane.xlu1 %9676  ;;  %v17935_v61 = vsub.f32 %v17732_v35, %v9435_v44 }
 0x85a   :  { %11661 = vpow2.f32 %v9624_v4  ;;  %v11650_v47 = vpop.eup %11649 }
 0x85b   :  { %v9917_v56 = vsub.f32 %v17666_v9, %v9797_v38  ;;  %11663 = vlog2.f32 %v9677_v63  ;;  %v11652_v24 = vpop.eup %11651  ;;  %v9626_v37 = vmul.f32 1.442695, %v17935_v61  ;;  %9746 = vadd.xlane.f32.xlu0 %v11650_v47 }
 0x85c   :  { %v9799_v39 = vmul.f32 0.6931472, %v11652_v24  ;;  %v9679_v6 = vpop.xlane.xlu0 %9678 }
 0x85d   :  { %9981 = vst [vmem:[#allocation2 + $0x38] sm:$0xff] %v9917_v56  ;;  %v9437_v20 = vpop.xlane.xlu1 %9436  ;;  %11665 = vpow2.f32 %v9626_v37 }
 0x85e   :  { %v17940_v10 = vsub.f32 %v17740_v15, %v9437_v20  ;;  %v9918_v35 = vsub.f32 %v17674_v58, %v9799_v39  ;;  %11667 = vlog2.f32 %v9679_v6 }
 0x85f   :  { %v11654_v45 = vpop.eup %11653 }
 0x860   :  { %v11656_v59 = vpop.eup %11655  ;;  %v9628_v9 = vmul.f32 1.442695, %v17940_v10  ;;  %9748 = vadd.xlane.f32.xlu1 %v11654_v45  ;;  %9982 = vst [vmem:[#allocation2 + $0x40] sm:$0xff] %v9918_v35  ;;  %v9439_v33 = vpop.xlane.xlu0 %9438  ;;  %v18965_v45 = vld [vmem:[#allocation91_spill] sm:$0xff] }
 0x861   :  { %v9801_v22 = vmul.f32 0.6931472, %v11656_v59  ;;  %v9681_v17 = vpop.xlane.xlu1 %9680  ;;  %v17945_v46 = vsub.f32 %v17748_v3, %v9439_v33 }
 0x862   :  { %11669 = vpow2.f32 %v9628_v9  ;;  %v11658_v52 = vpop.eup %11657 }
 0x863   :  { %v9919_v15 = vsub.f32 %v17682_v23, %v9801_v22  ;;  %11671 = vlog2.f32 %v9681_v17  ;;  %v11660_v40 = vpop.eup %11659  ;;  %v9630_v58 = vmul.f32 1.442695, %v17945_v46  ;;  %9750 = vadd.xlane.f32.xlu0 %v11658_v52  ;;  %v18966_v17 = vld [vmem:[#allocation11_spill] sm:$0xff] }
 0x864   :  { %v9803_v4 = vmul.f32 0.6931472, %v11660_v40  ;;  %v9683_v63 = vpop.xlane.xlu0 %9682 }
 0x865   :  { %9983 = vst [vmem:[#allocation2 + $0x48] sm:$0xff] %v9919_v15  ;;  %v9441_v38 = vpop.xlane.xlu1 %9440  ;;  %11673 = vpow2.f32 %v9630_v58  ;;  %v18967_v15 = vld [vmem:[#allocation7_spill] sm:$0xff] }
 0x866   :  { %v17950_v44 = vsub.f32 %v17756_v25, %v9441_v38  ;;  %v9920_v3 = vsub.f32 %v17690_v36, %v9803_v4  ;;  %11675 = vlog2.f32 %v9683_v63 }
 0x867   :  { %v11662_v47 = vpop.eup %11661 }
 0x868   :  { %v11664_v56 = vpop.eup %11663  ;;  %v9632_v23 = vmul.f32 1.442695, %v17950_v44  ;;  %9752 = vadd.xlane.f32.xlu1 %v11662_v47  ;;  %9984 = vst [vmem:[#allocation2 + $0x50] sm:$0xff] %v9920_v3  ;;  %v9443_v39 = vpop.xlane.xlu0 %9442  ;;  %v18968_v47 = vld [vmem:[#allocation56_spill] sm:$0xff] }
 0x869   :  { %v9805_v24 = vmul.f32 0.6931472, %v11664_v56  ;;  %v9685_v37 = vpop.xlane.xlu1 %9684  ;;  %v17955_v20 = vsub.f32 %v17764_v54, %v9443_v39 }
 0x86a   :  { %11677 = vpow2.f32 %v9632_v23  ;;  %v11666_v6 = vpop.eup %11665  ;;  %v18969_v23 = vld [vmem:[#allocation53_spill] sm:$0xff] }
 0x86b   :  { %v9921_v25 = vsub.f32 %v18965_v45, %v9805_v24  ;;  %11679 = vlog2.f32 %v9685_v37  ;;  %v11668_v35 = vpop.eup %11667  ;;  %v9634_v36 = vmul.f32 1.442695, %v17955_v20  ;;  %9754 = vadd.xlane.f32.xlu0 %v11666_v6 }
 0x86c   :  { %v9807_v59 = vmul.f32 0.6931472, %v11668_v35  ;;  %v9687_v22 = vpop.xlane.xlu0 %9686  ;;  %v18970_v35 = vld [vmem:[#allocation14_spill] sm:$0xff] }
 0x86d   :  { %9985 = vst [vmem:[#allocation2 + $0x58] sm:$0xff] %v9921_v25  ;;  %v9445_v9 = vpop.xlane.xlu1 %9444  ;;  %11681 = vpow2.f32 %v9634_v36 }
 0x86e   :  { %v17960_v33 = vsub.f32 %v18966_v17, %v9445_v9  ;;  %v9922_v54 = vsub.f32 %v18967_v15, %v9807_v59  ;;  %11683 = vlog2.f32 %v9687_v22  ;;  %v18971_v9 = vld [vmem:[#allocation10_spill] sm:$0xff] }
 0x86f   :  { %v11670_v52 = vpop.eup %11669 }
 0x870   :  { %v11672_v40 = vpop.eup %11671  ;;  %v9636_v58 = vmul.f32 1.442695, %v17960_v33  ;;  %9756 = vadd.xlane.f32.xlu1 %v11670_v52  ;;  %9986 = vst [vmem:[#allocation2 + $0x60] sm:$0xff] %v9922_v54  ;;  %v9447_v63 = vpop.xlane.xlu0 %9446 }
 0x871   :  { %v9809_v4 = vmul.f32 0.6931472, %v11672_v40  ;;  %v9689_v38 = vpop.xlane.xlu1 %9688  ;;  %v17965_v3 = vsub.f32 %v18968_v47, %v9447_v63 }
 0x872   :  { %11685 = vpow2.f32 %v9636_v58  ;;  %v11674_v56 = vpop.eup %11673 }
 0x873   :  { %v9923_v24 = vsub.f32 %v18969_v23, %v9809_v4  ;;  %11687 = vlog2.f32 %v9689_v38  ;;  %v11676_v37 = vpop.eup %11675  ;;  %v9638_v39 = vmul.f32 1.442695, %v17965_v3  ;;  %9758 = vadd.xlane.f32.xlu0 %v11674_v56  ;;  %v18972_v38 = vld [vmem:[#allocation55_spill] sm:$0xff] }
 0x874   :  { %v9811_v6 = vmul.f32 0.6931472, %v11676_v37  ;;  %v9691_v25 = vpop.xlane.xlu0 %9690 }
 0x875   :  { %9987 = vst [vmem:[#allocation2 + $0x68] sm:$0xff] %v9923_v24  ;;  %v9449_v45 = vpop.xlane.xlu1 %9448  ;;  %11689 = vpow2.f32 %v9638_v39 }
 0x876   :  { %v17970_v36 = vsub.f32 %v18970_v35, %v9449_v45  ;;  %v9924_v22 = vsub.f32 %v18971_v9, %v9811_v6  ;;  %11691 = vlog2.f32 %v9691_v25  ;;  %v18973_v6 = vld [vmem:[#allocation9_spill] sm:$0xff] }
 0x877   :  { %v11678_v59 = vpop.eup %11677 }
 0x878   :  { %v11680_v17 = vpop.eup %11679  ;;  %v9640_v52 = vmul.f32 1.442695, %v17970_v36  ;;  %9760 = vadd.xlane.f32.xlu1 %v11678_v59  ;;  %9988 = vst [vmem:[#allocation2 + $0x70] sm:$0xff] %v9924_v22  ;;  %v9451_v40 = vpop.xlane.xlu0 %9450 }
 0x879   :  { %v9813_v15 = vmul.f32 0.6931472, %v11680_v17  ;;  %v9693_v54 = vpop.xlane.xlu1 %9692  ;;  %v17975_v58 = vsub.f32 %v17787_v0, %v9451_v40  ;;  %v18974_v17 = vld [vmem:[#allocation54_spill] sm:$0xff] }
 0x87a   :  { %11693 = vpow2.f32 %v9640_v52  ;;  %v11682_v4 = vpop.eup %11681 }
 0x87b   :  { %v9925_v63 = vsub.f32 %v18972_v38, %v9813_v15  ;;  %11695 = vlog2.f32 %v9693_v54  ;;  %v11684_v47 = vpop.eup %11683  ;;  %v9642_v56 = vmul.f32 1.442695, %v17975_v58  ;;  %9762 = vadd.xlane.f32.xlu0 %v11682_v4 }
 0x87c   :  { %v9815_v23 = vmul.f32 0.6931472, %v11684_v47 }
 0x87d   :  { %9989 = vst [vmem:[#allocation2 + $0x78] sm:$0xff] %v9925_v63  ;;  %v9453_v24 = vpop.xlane.xlu1 %9452  ;;  %11697 = vpow2.f32 %v9642_v56  ;;  %v18975_v63 = vld [vmem:[#allocation12_spill] sm:$0xff] }
 0x87e   :  { %v17980_v37 = vsub.f32 %v17798_v5, %v9453_v24  ;;  %v9926_v45 = vsub.f32 %v18973_v6, %v9815_v23 }
 0x87f   :  { %v11686_v39 = vpop.eup %11685 }
 0x880   :  { %v11688_v0 = vpop.eup %11687  ;;  %v9644_v25 = vmul.f32 1.442695, %v17980_v37  ;;  %9764 = vadd.xlane.f32.xlu1 %v11686_v39  ;;  %v9455_v35 = vpop.xlane.xlu0 %9454  ;;  %9990 = vst [vmem:[#allocation2 + $0x80] sm:$0xff] %v9926_v45  ;;  %v18976_v45 = vld [vmem:[#allocation90_spill] sm:$0xff] }
 0x881   :  { %v9817_v59 = vmul.f32 0.6931472, %v11688_v0  ;;  %v17985_v9 = vsub.f32 %v17810_v55, %v9455_v35 }
 0x882   :  { %11699 = vpow2.f32 %v9644_v25  ;;  %v11690_v22 = vpop.eup %11689 }
 0x883   :  { %v9927_v52 = vsub.f32 %v18974_v17, %v9817_v59  ;;  %v9646_v5 = vmul.f32 1.442695, %v17985_v9  ;;  %v11692_v15 = vpop.eup %11691  ;;  %9766 = vadd.xlane.f32.xlu0 %v11690_v22 }
 0x884   :  { %v9457_v54 = vpop.xlane.xlu1 %9456  ;;  %v9819_v40 = vmul.f32 0.6931472, %v11692_v15 }
 0x885   :  { %9991 = vst [vmem:[#allocation2 + $0x88] sm:$0xff] %v9927_v52  ;;  %11701 = vpow2.f32 %v9646_v5  ;;  %v17990_v4 = vsub.f32 %v17819_v49, %v9457_v54 }
 0x886   :  { %v9928_v47 = vsub.f32 %v18975_v63, %v9819_v40 }
 0x887   :  { %v11694_v38 = vpop.eup %11693  ;;  %v9648_v55 = vmul.f32 1.442695, %v17990_v4 }
 0x888   :  { %v11696_v56 = vpop.eup %11695  ;;  %9768 = vadd.xlane.f32.xlu1 %v11694_v38  ;;  %v9459_v23 = vpop.xlane.xlu0 %9458  ;;  %9992 = vst [vmem:[#allocation2 + $0x90] sm:$0xff] %v9928_v47 }
 0x889   :  { %v9821_v24 = vmul.f32 0.6931472, %v11696_v56  ;;  %11703 = vpow2.f32 %v9648_v55  ;;  %v17995_v39 = vsub.f32 %v17828_v42, %v9459_v23 }
 0x88a   :  { %v11698_v6 = vpop.eup %11697 }
 0x88b   :  { %v9929_v0 = vsub.f32 %v18976_v45, %v9821_v24  ;;  %v9650_v49 = vmul.f32 1.442695, %v17995_v39  ;;  %9770 = vadd.xlane.f32.xlu0 %v11698_v6 }
 0x88c   :  { %v9461_v25 = vpop.xlane.xlu1 %9460  ;;  %v9695_v35 = vpop.xlane.xlu0 %9694 }
 0x88d   :  { %9993 = vst [vmem:[#allocation2 + $0x98] sm:$0xff] %v9929_v0  ;;  %11705 = vpow2.f32 %v9650_v49  ;;  %v18000_v59 = vsub.f32 %v17836_v12, %v9461_v25 }
 0x88e   :  { %11707 = vlog2.f32 %v9695_v35 }
 0x88f   :  { %v11700_v22 = vpop.eup %11699  ;;  %v9652_v17 = vmul.f32 1.442695, %v18000_v59 }
 0x890   :  { %9772 = vadd.xlane.f32.xlu1 %v11700_v22  ;;  %v9697_v42 = vpop.xlane.xlu1 %9696  ;;  %v9699_v52 = vpop.xlane.xlu0 %9698 }
 0x891   :  { %11709 = vpow2.f32 %v9652_v17  ;;  %v18977_v17 = vld [vmem:[#allocation93_spill] sm:$0xff] }
 0x892   :  { %v11702_v5 = vpop.eup %11701  ;;  %11711 = vlog2.f32 %v9697_v42 }
 0x893   :  { %11713 = vlog2.f32 %v9699_v52  ;;  %9774 = vadd.xlane.f32.xlu0 %v11702_v5 }
 0x894   :  { %v9701_v15 = vpop.xlane.xlu1 %9700  ;;  %v9703_v54 = vpop.xlane.xlu0 %9702 }
 0x895   :  { %11715 = vlog2.f32 %v9701_v15 }
 0x896   :  { %v11704_v40 = vpop.eup %11703  ;;  %11717 = vlog2.f32 %v9703_v54 }
 0x897   :  { %9776 = vadd.xlane.f32.xlu1 %v11704_v40 }
 0x898   :  { %v9705_v12 = vpop.xlane.xlu1 %9704  ;;  %v9707_v38 = vpop.xlane.xlu0 %9706 }
 0x899   :  { %11719 = vlog2.f32 %v9705_v12 }
 0x89a   :  { %v11706_v63 = vpop.eup %11705  ;;  %11721 = vlog2.f32 %v9707_v38 }
 0x89b   :  { %v11708_v47 = vpop.eup %11707  ;;  %9778 = vadd.xlane.f32.xlu0 %v11706_v63 }
 0x89c   :  { %v9823_v55 = vmul.f32 0.6931472, %v11708_v47  ;;  %v9709_v56 = vpop.xlane.xlu1 %9708  ;;  %v9711_v23 = vpop.xlane.xlu0 %9710 }
 0x89d   :  { %11723 = vlog2.f32 %v9709_v56 }
 0x89e   :  { %v11710_v24 = vpop.eup %11709  ;;  %v9930_v6 = vsub.f32 %v17785_v7, %v9823_v55  ;;  %11725 = vlog2.f32 %v9711_v23  ;;  %v18978_v23 = vld [vmem:[#allocation13_spill] sm:$0xff] }
 0x89f   :  { %v11712_v45 = vpop.eup %11711  ;;  %9780 = vadd.xlane.f32.xlu1 %v11710_v24 }
 0x8a0   :  { %v11714_v0 = vpop.eup %11713  ;;  %9994 = vst [vmem:[#allocation2 + $0xa0] sm:$0xff] %v9930_v6  ;;  %v9825_v49 = vmul.f32 0.6931472, %v11712_v45  ;;  %v9713_v25 = vpop.xlane.xlu1 %9712 }
 0x8a1   :  { %v9827_v35 = vmul.f32 0.6931472, %v11714_v0  ;;  %11727 = vlog2.f32 %v9713_v25 }
 0x8a2   :  { %v11716_v22 = vpop.eup %11715  ;;  %v9931_v42 = vsub.f32 %v18977_v17, %v9825_v49 }
 0x8a3   :  { %v11718_v52 = vpop.eup %11717  ;;  %v9932_v5 = vsub.f32 %v17796_v53, %v9827_v35  ;;  %v9829_v15 = vmul.f32 0.6931472, %v11716_v22 }
 0x8a4   :  { %9995 = vst [vmem:[#allocation2 + $0xa8] sm:$0xff] %v9931_v42  ;;  %v9831_v54 = vmul.f32 0.6931472, %v11718_v52  ;;  %v9715_v40 = vpop.xlane.xlu0 %9714 }
 0x8a5   :  { %9996 = vst [vmem:[#allocation2 + $0xb0] sm:$0xff] %v9932_v5  ;;  %v9933_v7 = vsub.f32 %v17803_v41, %v9829_v15  ;;  %11729 = vlog2.f32 %v9715_v40 }
 0x8a6   :  { %v11720_v12 = vpop.eup %11719  ;;  %v9934_v38 = vsub.f32 %v17808_v21, %v9831_v54 }
 0x8a7   :  { %v11722_v63 = vpop.eup %11721  ;;  %9997 = vst [vmem:[#allocation2 + $0xb8] sm:$0xff] %v9933_v7  ;;  %v9833_v47 = vmul.f32 0.6931472, %v11720_v12 }
 0x8a8   :  { %9998 = vst [vmem:[#allocation2 + $0xc0] sm:$0xff] %v9934_v38  ;;  %v9835_v55 = vmul.f32 0.6931472, %v11722_v63  ;;  %v9717_v56 = vpop.xlane.xlu1 %9716 }
 0x8a9   :  { %v9935_v24 = vsub.f32 %v18978_v23, %v9833_v47  ;;  %11731 = vlog2.f32 %v9717_v56 }
 0x8aa   :  { %v11724_v53 = vpop.eup %11723  ;;  %v9936_v6 = vsub.f32 %v17822_v28, %v9835_v55 }
 0x8ab   :  { %v11726_v45 = vpop.eup %11725  ;;  %9999 = vst [vmem:[#allocation2 + $0xc8] sm:$0xff] %v9935_v24  ;;  %v9837_v0 = vmul.f32 0.6931472, %v11724_v53 }
 0x8ac   :  { %10000 = vst [vmem:[#allocation2 + $0xd0] sm:$0xff] %v9936_v6  ;;  %v9839_v41 = vmul.f32 0.6931472, %v11726_v45  ;;  %v9719_v49 = vpop.xlane.xlu0 %9718 }
 0x8ad   :  { %v9937_v21 = vsub.f32 %v17831_v43, %v9837_v0  ;;  %11733 = vlog2.f32 %v9719_v49 }
 0x8ae   :  { %v11728_v25 = vpop.eup %11727  ;;  %v9938_v35 = vsub.f32 %v17839_v26, %v9839_v41 }
 0x8af   :  { %10001 = vst [vmem:[#allocation2 + $0xd8] sm:$0xff] %v9937_v21  ;;  %v9841_v22 = vmul.f32 0.6931472, %v11728_v25 }
 0x8b0   :  { %10002 = vst [vmem:[#allocation2 + $0xe0] sm:$0xff] %v9938_v35  ;;  %v9721_v17 = vpop.xlane.xlu1 %9720 }
 0x8b1   :  { %v9939_v42 = vsub.f32 %v17844_v48, %v9841_v22  ;;  %11735 = vlog2.f32 %v9721_v17 }
 0x8b2   :  { %v11730_v28 = vpop.eup %11729 }
 0x8b3   :  { %10003 = vst [vmem:[#allocation2 + $0xe8] sm:$0xff] %v9939_v42  ;;  %v9843_v52 = vmul.f32 0.6931472, %v11730_v28 }
 0x8b4   :  { %v9723_v5 = vpop.xlane.xlu0 %9722 }
 0x8b5   :  { %v9940_v15 = vsub.f32 %v17848_v51, %v9843_v52  ;;  %11737 = vlog2.f32 %v9723_v5 }
 0x8b6   :  { %v11732_v54 = vpop.eup %11731 }
 0x8b7   :  { %10004 = vst [vmem:[#allocation2 + $0xf0] sm:$0xff] %v9940_v15  ;;  %v9845_v43 = vmul.f32 0.6931472, %v11732_v54 }
 0x8b8   :  { %v9725_v40 = vpop.xlane.xlu1 %9724 }
 0x8b9   :  { %v9941_v26 = vsub.f32 %v17852_v60, %v9845_v43  ;;  %11739 = vlog2.f32 %v9725_v40 }
 0x8ba   :  { %v11734_v7 = vpop.eup %11733 }
 0x8bb   :  { %10005 = vst [vmem:[#allocation2 + $0xf8] sm:$0xff] %v9941_v26  ;;  %v9847_v12 = vmul.f32 0.6931472, %v11734_v7 }
 0x8bc   :  { %v9727_v38 = vpop.xlane.xlu0 %9726 }
 0x8bd   :  { %v9942_v48 = vsub.f32 %v17856_v32, %v9847_v12  ;;  %11741 = vlog2.f32 %v9727_v38 }
 0x8be   :  { %v11736_v63 = vpop.eup %11735 }
 0x8bf   :  { %10006 = vst [vmem:[#allocation2 + $0x100] sm:$0xff] %v9942_v48  ;;  %v9849_v47 = vmul.f32 0.6931472, %v11736_v63 }
 0x8c0   :  { %v9729_v55 = vpop.xlane.xlu1 %9728 }
 0x8c1   :  { %v9943_v51 = vsub.f32 %v17860_v14, %v9849_v47  ;;  %11743 = vlog2.f32 %v9729_v55 }
 0x8c2   :  { %v11738_v56 = vpop.eup %11737 }
 0x8c3   :  { %10007 = vst [vmem:[#allocation2 + $0x108] sm:$0xff] %v9943_v51  ;;  %v9851_v23 = vmul.f32 0.6931472, %v11738_v56 }
 0x8c4   :  { %v9731_v24 = vpop.xlane.xlu0 %9730 }
 0x8c5   :  { %v9944_v60 = vsub.f32 %v17864_v13, %v9851_v23  ;;  %11745 = vlog2.f32 %v9731_v24 }
 0x8c6   :  { %v11740_v53 = vpop.eup %11739 }
 0x8c7   :  { %10008 = vst [vmem:[#allocation2 + $0x110] sm:$0xff] %v9944_v60  ;;  %v9853_v6 = vmul.f32 0.6931472, %v11740_v53 }
 0x8c8   :  { %v9733_v45 = vpop.xlane.xlu1 %9732 }
 0x8c9   :  { %v9945_v32 = vsub.f32 %v17868_v8, %v9853_v6  ;;  %11747 = vlog2.f32 %v9733_v45 }
 0x8ca   :  { %v11742_v0 = vpop.eup %11741 }
 0x8cb   :  { %10009 = vst [vmem:[#allocation2 + $0x118] sm:$0xff] %v9945_v32  ;;  %v9855_v41 = vmul.f32 0.6931472, %v11742_v0 }
 0x8cc   :  { %v9735_v49 = vpop.xlane.xlu0 %9734 }
 0x8cd   :  { %v9946_v14 = vsub.f32 %v17872_v62, %v9855_v41  ;;  %11749 = vlog2.f32 %v9735_v49 }
 0x8ce   :  { %v11744_v21 = vpop.eup %11743 }
 0x8cf   :  { %10010 = vst [vmem:[#allocation2 + $0x120] sm:$0xff] %v9946_v14  ;;  %v9857_v25 = vmul.f32 0.6931472, %v11744_v21 }
 0x8d1   :  { %v9947_v13 = vsub.f32 %v17876_v57, %v9857_v25  ;;  %v9737_v35 = vpop.xlane.xlu1 %9736 }
 0x8d2   :  { %v11746_v22 = vpop.eup %11745  ;;  %11751 = vlog2.f32 %v9737_v35 }
 0x8d3   :  { %10011 = vst [vmem:[#allocation2 + $0x128] sm:$0xff] %v9947_v13  ;;  %v9859_v17 = vmul.f32 0.6931472, %v11746_v22 }
 0x8d4   :  { %v9739_v42 = vpop.xlane.xlu0 %9738 }
 0x8d5   :  { %v9948_v8 = vsub.f32 %v17880_v2, %v9859_v17  ;;  %11753 = vlog2.f32 %v9739_v42 }
 0x8d6   :  { %v11748_v28 = vpop.eup %11747 }
 0x8d7   :  { %10012 = vst [vmem:[#allocation2 + $0x130] sm:$0xff] %v9948_v8  ;;  %v9861_v52 = vmul.f32 0.6931472, %v11748_v28 }
 0x8d9   :  { %v9949_v62 = vsub.f32 %v17884_v18, %v9861_v52  ;;  %v9741_v5 = vpop.xlane.xlu1 %9740 }
 0x8da   :  { %11755 = vlog2.f32 %v9741_v5  ;;  %v11750_v15 = vpop.eup %11749 }
 0x8db   :  { %10013 = vst [vmem:[#allocation2 + $0x138] sm:$0xff] %v9949_v62  ;;  %v9863_v54 = vmul.f32 0.6931472, %v11750_v15 }
 0x8dc   :  { %v9743_v57 = vpop.xlane.xlu0 %9742 }
 0x8dd   :  { %v9950_v43 = vsub.f32 %v17888_v50, %v9863_v54  ;;  %11757 = vlog2.f32 %v9743_v57 }
 0x8df   :  { %v11752_v40 = vpop.eup %11751  ;;  %10014 = vst [vmem:[#allocation2 + $0x140] sm:$0xff] %v9950_v43 }
 0x8e0   :  { %v9865_v26 = vmul.f32 0.6931472, %v11752_v40 }
 0x8e1   :  { %v9745_v2 = vpop.xlane.xlu1 %9744 }
 0x8e2   :  { %v9951_v7 = vsub.f32 %v17892_v34, %v9865_v26  ;;  %11759 = vlog2.f32 %v9745_v2  ;;  %v11754_v12 = vpop.eup %11753 }
 0x8e3   :  { %v9867_v38 = vmul.f32 0.6931472, %v11754_v12 }
 0x8e4   :  { %10015 = vst [vmem:[#allocation2 + $0x148] sm:$0xff] %v9951_v7  ;;  %v9747_v18 = vpop.xlane.xlu0 %9746 }
 0x8e5   :  { %v9952_v48 = vsub.f32 %v17896_v29, %v9867_v38  ;;  %11761 = vlog2.f32 %v9747_v18 }
 0x8e7   :  { %v11756_v63 = vpop.eup %11755  ;;  %10016 = vst [vmem:[#allocation2 + $0x150] sm:$0xff] %v9952_v48 }
 0x8e8   :  { %v9869_v47 = vmul.f32 0.6931472, %v11756_v63 }
 0x8e9   :  { %v9749_v55 = vpop.xlane.xlu1 %9748 }
 0x8ea   :  { %v9953_v50 = vsub.f32 %v17901_v31, %v9869_v47  ;;  %11763 = vlog2.f32 %v9749_v55  ;;  %v11758_v51 = vpop.eup %11757 }
 0x8eb   :  { %v9871_v56 = vmul.f32 0.6931472, %v11758_v51 }
 0x8ec   :  { %10017 = vst [vmem:[#allocation2 + $0x158] sm:$0xff] %v9953_v50  ;;  %v9751_v23 = vpop.xlane.xlu0 %9750 }
 0x8ed   :  { %v9954_v34 = vsub.f32 %v17906_v11, %v9871_v56  ;;  %11765 = vlog2.f32 %v9751_v23 }
 0x8ef   :  { %v11760_v24 = vpop.eup %11759  ;;  %10018 = vst [vmem:[#allocation2 + $0x160] sm:$0xff] %v9954_v34 }
 0x8f0   :  { %v9873_v60 = vmul.f32 0.6931472, %v11760_v24 }
 0x8f1   :  { %v9753_v53 = vpop.xlane.xlu1 %9752 }
 0x8f2   :  { %v9955_v29 = vsub.f32 %v17910_v16, %v9873_v60  ;;  %11767 = vlog2.f32 %v9753_v53  ;;  %v11762_v6 = vpop.eup %11761 }
 0x8f3   :  { %v9875_v45 = vmul.f32 0.6931472, %v11762_v6 }
 0x8f4   :  { %10019 = vst [vmem:[#allocation2 + $0x168] sm:$0xff] %v9955_v29  ;;  %v9755_v32 = vpop.xlane.xlu0 %9754 }
 0x8f5   :  { %v9956_v31 = vsub.f32 %v17915_v19, %v9875_v45  ;;  %11769 = vlog2.f32 %v9755_v32 }
 0x8f7   :  { %v11764_v0 = vpop.eup %11763  ;;  %10020 = vst [vmem:[#allocation2 + $0x170] sm:$0xff] %v9956_v31 }
 0x8f8   :  { %v9877_v41 = vmul.f32 0.6931472, %v11764_v0 }
 0x8f9   :  { %v9757_v14 = vpop.xlane.xlu1 %9756 }
 0x8fa   :  { %v9957_v11 = vsub.f32 %v17920_v1, %v9877_v41  ;;  %11771 = vlog2.f32 %v9757_v14  ;;  %v11766_v49 = vpop.eup %11765 }
 0x8fb   :  { %v9879_v21 = vmul.f32 0.6931472, %v11766_v49 }
 0x8fc   :  { %10021 = vst [vmem:[#allocation2 + $0x178] sm:$0xff] %v9957_v11  ;;  %v9759_v25 = vpop.xlane.xlu0 %9758 }
 0x8fd   :  { %v9958_v16 = vsub.f32 %v17925_v27, %v9879_v21  ;;  %11773 = vlog2.f32 %v9759_v25 }
 0x8ff   :  { %v11768_v13 = vpop.eup %11767  ;;  %10022 = vst [vmem:[#allocation2 + $0x180] sm:$0xff] %v9958_v16 }
 0x900   :  { %v9881_v35 = vmul.f32 0.6931472, %v11768_v13 }
 0x901   :  { %v9761_v22 = vpop.xlane.xlu1 %9760 }
 0x902   :  { %v9959_v19 = vsub.f32 %v17930_v30, %v9881_v35  ;;  %11775 = vlog2.f32 %v9761_v22  ;;  %v11770_v17 = vpop.eup %11769 }
 0x903   :  { %v9883_v8 = vmul.f32 0.6931472, %v11770_v17 }
 0x904   :  { %10023 = vst [vmem:[#allocation2 + $0x188] sm:$0xff] %v9959_v19  ;;  %v9763_v42 = vpop.xlane.xlu0 %9762 }
 0x905   :  { %v9960_v1 = vsub.f32 %v17935_v61, %v9883_v8  ;;  %11777 = vlog2.f32 %v9763_v42 }
 0x907   :  { %v11772_v28 = vpop.eup %11771  ;;  %10024 = vst [vmem:[#allocation2 + $0x190] sm:$0xff] %v9960_v1 }
 0x908   :  { %v9885_v52 = vmul.f32 0.6931472, %v11772_v28 }
 0x909   :  { %v9765_v62 = vpop.xlane.xlu1 %9764 }
 0x90a   :  { %v9961_v27 = vsub.f32 %v17940_v10, %v9885_v52  ;;  %11779 = vlog2.f32 %v9765_v62  ;;  %v11774_v5 = vpop.eup %11773 }
 0x90b   :  { %v9887_v15 = vmul.f32 0.6931472, %v11774_v5 }
 0x90c   :  { %10025 = vst [vmem:[#allocation2 + $0x198] sm:$0xff] %v9961_v27  ;;  %v9767_v54 = vpop.xlane.xlu0 %9766 }
 0x90d   :  { %v9962_v30 = vsub.f32 %v17945_v46, %v9887_v15  ;;  %11781 = vlog2.f32 %v9767_v54 }
 0x90f   :  { %v11776_v57 = vpop.eup %11775  ;;  %10026 = vst [vmem:[#allocation2 + $0x1a0] sm:$0xff] %v9962_v30 }
 0x910   :  { %v9889_v43 = vmul.f32 0.6931472, %v11776_v57 }
 0x911   :  { %v9769_v40 = vpop.xlane.xlu1 %9768 }
 0x912   :  { %v9963_v61 = vsub.f32 %v17950_v44, %v9889_v43  ;;  %11783 = vlog2.f32 %v9769_v40  ;;  %v11778_v26 = vpop.eup %11777 }
 0x913   :  { %v9891_v2 = vmul.f32 0.6931472, %v11778_v26 }
 0x914   :  { %10027 = vst [vmem:[#allocation2 + $0x1a8] sm:$0xff] %v9963_v61  ;;  %v9771_v7 = vpop.xlane.xlu0 %9770 }
 0x915   :  { %v9964_v10 = vsub.f32 %v17955_v20, %v9891_v2  ;;  %11785 = vlog2.f32 %v9771_v7 }
 0x917   :  { %v11780_v12 = vpop.eup %11779  ;;  %10028 = vst [vmem:[#allocation2 + $0x1b0] sm:$0xff] %v9964_v10 }
 0x918   :  { %v9893_v38 = vmul.f32 0.6931472, %v11780_v12 }
 0x919   :  { %v9773_v18 = vpop.xlane.xlu1 %9772 }
 0x91a   :  { %v9965_v46 = vsub.f32 %v17960_v33, %v9893_v38  ;;  %11787 = vlog2.f32 %v9773_v18  ;;  %v11782_v48 = vpop.eup %11781 }
 0x91b   :  { %v9895_v63 = vmul.f32 0.6931472, %v11782_v48 }
 0x91c   :  { %10029 = vst [vmem:[#allocation2 + $0x1b8] sm:$0xff] %v9965_v46  ;;  %v9775_v47 = vpop.xlane.xlu0 %9774 }
 0x91d   :  { %11789 = vlog2.f32 %v9775_v47  ;;  %v9966_v44 = vsub.f32 %v17965_v3, %v9895_v63 }
 0x91f   :  { %v11784_v55 = vpop.eup %11783  ;;  %10030 = vst [vmem:[#allocation2 + $0x1c0] sm:$0xff] %v9966_v44 }
 0x920   :  { %v9897_v50 = vmul.f32 0.6931472, %v11784_v55  ;;  %v9777_v51 = vpop.xlane.xlu1 %9776 }
 0x921   :  { %11791 = vlog2.f32 %v9777_v51 }
 0x922   :  { %v9967_v20 = vsub.f32 %v17970_v36, %v9897_v50  ;;  %v11786_v56 = vpop.eup %11785 }
 0x923   :  { %v9899_v23 = vmul.f32 0.6931472, %v11786_v56 }
 0x924   :  { %10031 = vst [vmem:[#allocation2 + $0x1c8] sm:$0xff] %v9967_v20  ;;  %v9779_v34 = vpop.xlane.xlu0 %9778 }
 0x925   :  { %11793 = vlog2.f32 %v9779_v34  ;;  %v9968_v33 = vsub.f32 %v17975_v58, %v9899_v23 }
 0x927   :  { %v11788_v24 = vpop.eup %11787  ;;  %10032 = vst [vmem:[#allocation2 + $0x1d0] sm:$0xff] %v9968_v33 }
 0x928   :  { %v9901_v60 = vmul.f32 0.6931472, %v11788_v24  ;;  %v9781_v53 = vpop.xlane.xlu1 %9780 }
 0x929   :  { %11795 = vlog2.f32 %v9781_v53 }
 0x92a   :  { %v11790_v3 = vpop.eup %11789  ;;  %v9969_v29 = vsub.f32 %v17980_v37, %v9901_v60 }
 0x92b   :  { %v9903_v6 = vmul.f32 0.6931472, %v11790_v3 }
 0x92c   :  { %10033 = vst [vmem:[#allocation2 + $0x1d8] sm:$0xff] %v9969_v29 }
 0x92d   :  { %v9970_v45 = vsub.f32 %v17985_v9, %v9903_v6 }
 0x92e   :  { %v11792_v36 = vpop.eup %11791 }
 0x92f   :  { %10034 = vst [vmem:[#allocation2 + $0x1e0] sm:$0xff] %v9970_v45  ;;  %v9905_v32 = vmul.f32 0.6931472, %v11792_v36 }
 0x931   :  { %v9971_v31 = vsub.f32 %v17990_v4, %v9905_v32 }
 0x932   :  { %v11794_v0 = vpop.eup %11793 }
 0x933   :  { %10035 = vst [vmem:[#allocation2 + $0x1e8] sm:$0xff] %v9971_v31  ;;  %v9907_v58 = vmul.f32 0.6931472, %v11794_v0 }
 0x935   :  { %v9972_v41 = vsub.f32 %v17995_v39, %v9907_v58 }
 0x936   :  { %v11796_v14 = vpop.eup %11795 }
 0x937   :  { %10036 = vst [vmem:[#allocation2 + $0x1f0] sm:$0xff] %v9972_v41  ;;  %v9909_v11 = vmul.f32 0.6931472, %v11796_v14 }
 0x939   :  { %v9973_v37 = vsub.f32 %v18000_v59, %v9909_v11 }
 0x93b   :  { %10037 = vst [vmem:[#allocation2 + $0x1f8] sm:$0xff] %v9973_v37 }
 0x93c   :  { %12035 = shalt.err (!%p12032_p4)
}
 0x93d   :  { %s12048_s20 = smov 128   ;;  %s12049_s21 = smov 8  }
 0x93e   :  { %10049 = dma.vmem_to_hbm [thread:$0]  %s10044_s18, 8192, %s18057_s7, [#allocation3], %s12048_s20, %s12048_s20, %s12049_s21  }
 0x93f   :  { %12044 = dma.done.wait [#allocation3], 8192  }
 0x940   :  { %12045 = vsyncadd [#allocation3], 4294959104 }
 0x941   :  { %10053 = vsyncpa [#allocation3], 1 }

</bundles_post_ra>
